<compile_context>
chip_gen: v5e
topology: v5e:2x2
jax: 0.10.0
libtpu: 0.0.40
codegen_flags: <defaults>
</compile_context>

<pallas_src>
import functools

import jax
import jax.numpy as jnp
from jax.experimental import pallas as pl
from jax.experimental.pallas import tpu as pltpu

VMEM_SPEC = pl.BlockSpec(memory_space=pltpu.MemorySpace.VMEM)


# ----------------------------------------------------------------- kernel ---

def _mpnn_fused_kernel(node_ref, edge_ref, s_ref, a_ref,
                       pw_ref, pb_ref, e1w_ref, e1b_ref, e2w_ref, e2b_ref,
                       cb_ref, gw_ref, gb_ref,
                       out_ref, ew3_ref, *, num_steps, d):
    f32, bf16 = jnp.float32, jnp.bfloat16

    # ---- project_node_feats: ReLU(x @ Wp + bp); bf16 MXU operands, f32 acc --
    h = jnp.maximum(
        jnp.dot(node_ref[...], pw_ref[...], preferred_element_type=f32)
        + pb_ref[...], 0.0)                                          # (V, D) f32

    # ---- edge network (loop-invariant): Linear -> ReLU -> Linear ------------
    # Written into the (D_in, E, D_out) scratch ew3 so the hot loop reads each
    # W_e row with a cheap leading-axis index.  Computed in column chunks so
    # no (E, D*D) value is ever live.
    eh = jnp.maximum(
        jnp.dot(edge_ref[...], e1w_ref[...], preferred_element_type=f32)
        + e1b_ref[...], 0.0).astype(bf16)                            # (E, H) bf16
    chunk_rows = 8                               # D_in rows of W_e per matmul
    cols = chunk_rows * d
    for c in range(d // chunk_rows):
        lo = c * cols
        chunk = (jnp.dot(eh, e2w_ref[:, lo:lo + cols],
                         preferred_element_type=f32)
                 + e2b_ref[:, lo:lo + cols])                         # (E, 8*D) f32
        for t in range(chunk_rows):
            ew3_ref[c * chunk_rows + t] = chunk[:, t * d:(t + 1) * d]

    # ---- message passing: fori_loop carries only h; every big loop-invariant
    #      is re-read from its VMEM ref at point of use (bounded live ranges).
    def step(_, h):
        # -- NNConv (sum aggregation): gather sources (one-hot matmul, exact
        #    in bf16), then the true per-edge contraction on the VPU.
        h_src = jnp.dot(s_ref[...], h.astype(bf16),
                        preferred_element_type=f32)                  # (E, D) f32
        accs = [jnp.zeros_like(h_src) for _ in range(4)]
        for i in range(d):
            accs[i % 4] = accs[i % 4] + h_src[:, i:i + 1] * ew3_ref[i]
        m = (accs[0] + accs[1]) + (accs[2] + accs[3])                # (E, D) f32
        # scatter-add to destinations (one-hot matmul) + bias + ReLU
        x = jnp.maximum(
            jnp.dot(a_ref[...], m.astype(bf16), preferred_element_type=f32)
            + cb_ref[...], 0.0)                                      # (V, D) f32

        # -- single-step GRU, all 6 gate matmuls fused into ONE
        #    (V, 2D) @ (2D, 4D) MXU push (full 128-lane contraction).
        #    cols [0:D)=r, [D:2D)=z, [2D:3D)=x-part of n, [3D:4D)=h-part of n.
        xh = jnp.concatenate([x, h], axis=1).astype(bf16)            # (V, 2D)
        g = (jnp.dot(xh, gw_ref[...], preferred_element_type=f32)
             + gb_ref[...])                                          # (V, 4D)
        rz = jax.nn.sigmoid(g[:, 0:2 * d])
        r, z = rz[:, 0:d], rz[:, d:2 * d]
        n = jnp.tanh(g[:, 2 * d:3 * d] + r * g[:, 3 * d:4 * d])
        return (1.0 - z) * n + z * h         # new node feats == new hidden

    out_ref[...] = jax.lax.fori_loop(0, num_steps, step, h)


# ---------------------------------------------------------------- wrapper ---

def mpnn_forward(params, node_feats, edge_feats, S, A, num_steps, D):
    V, node_in = node_feats.shape
    E, edge_in = edge_feats.shape
    H = params['e1_w_t'].shape[1]
    bf16 = jnp.bfloat16

    flops = int(2 * V * node_in * D + 2 * E * edge_in * H + 2 * E * H * D * D
                + num_steps * (2 * E * V * D      # gather
                               + 2 * E * D * D    # per-edge contraction
                               + 2 * V * E * D    # scatter-add
                               + 2 * V * (2 * D) * (4 * D)))  # fused GRU
    transcendentals = int(num_steps * V * 3 * D)
    bytes_accessed = int(
        (V * node_in + E * edge_in + E * V + V * E) * 2              # bf16 inputs
        + (node_in * D + edge_in * H + H * D * D + 2 * D * 4 * D) * 2  # bf16 weights
        + (D + H + D * D + D + 4 * D) * 4                            # f32 biases
        + V * D * 4)                                                 # f32 output

    kernel = functools.partial(_mpnn_fused_kernel, num_steps=num_steps, d=D)
    return pl.pallas_call(
        kernel,
        out_shape=jax.ShapeDtypeStruct((V, D), jnp.float32),
        in_specs=[VMEM_SPEC] * 13,
        out_specs=VMEM_SPEC,
        scratch_shapes=[pltpu.VMEM((D, E, D), jnp.float32)],   # per-edge W_e rows
        compiler_params=pltpu.CompilerParams(
            vmem_limit_bytes=32 * 1024 * 1024),
        cost_estimate=pl.CostEstimate(flops=flops,
                                      transcendentals=transcendentals,
                                      bytes_accessed=bytes_accessed),
    )(node_feats.astype(bf16), edge_feats.astype(bf16),
      S.astype(bf16), A.astype(bf16),
      params['proj_w_t'], params['proj_b'],
      params['e1_w_t'], params['e1_b'],
      params['e2_w_t'], params['e2_b'],
      params['conv_b'],
      params['gru_w_all'], params['gru_b_all'])


# ----------------------------------------------------------------- params ---

def init_params(key, node_in, edge_in, D, H):
    """Deterministic synthetic parameters (PyTorch-style uniform fan-in init)."""
    def lin(k, fan_in, fan_out):
        k1, k2 = jax.random.split(k)
        bound = 1.0 / jnp.sqrt(jnp.float32(fan_in))
        w = jax.random.uniform(k1, (fan_out, fan_in), jnp.float32, -bound, bound)
        b = jax.random.uniform(k2, (fan_out,), jnp.float32, -bound, bound)
        return w, b

    bf16, f32 = jnp.bfloat16, jnp.float32
    keys = jax.random.split(key, 5)
    p = {}
    w, b = lin(keys[0], node_in, D)                  # project_node_feats Linear
    p['proj_w_t'], p['proj_b'] = w.T.astype(bf16), b[None, :]
    w, b = lin(keys[1], edge_in, H)                  # edge_network Linear 1
    p['e1_w_t'], p['e1_b'] = w.T.astype(bf16), b[None, :]
    w, b = lin(keys[2], H, D * D)                    # edge_network Linear 2
    p['e2_w_t'], p['e2_b'] = w.T.astype(bf16), b[None, :]
    p['conv_b'] = jnp.zeros((1, D), f32)             # NNConv bias (zeros in DGL)

    # GRU (PyTorch gate order r, z, n).  Fused single-matmul layout (2D, 4D):
    #   rows [0:D)=x, [D:2D)=h;  cols [0:D)=r, [D:2D)=z, [2D:3D)=n(x), [3D:4D)=n(h)
    wih, bih = lin(keys[3], D, 3 * D)                # weight_ih / bias_ih
    whh, bhh = lin(keys[4], D, 3 * D)                # weight_hh / bias_hh
    zero = jnp.zeros((D, D), f32)
    wir, wiz, win = wih[0:D].T, wih[D:2 * D].T, wih[2 * D:3 * D].T
    whr, whz, whn = whh[0:D].T, whh[D:2 * D].T, whh[2 * D:3 * D].T
    top = jnp.concatenate([wir, wiz, win, zero], axis=1)
    bot = jnp.concatenate([whr, whz, zero, whn], axis=1)
    p['gru_w_all'] = jnp.concatenate([top, bot], axis=0).astype(bf16)   # (2D, 4D)
    p['gru_b_all'] = jnp.concatenate(
        [bih[0:D] + bhh[0:D], bih[D:2 * D] + bhh[D:2 * D],
         bih[2 * D:3 * D], bhh[2 * D:3 * D]])[None, :]                  # (1, 4D) f32
    return p


# ------------------------------------------------------------------- main ---

if __name__ == "__main__":
    V, E = 16, 32                 # small batch-of-graphs: 16 nodes, 32 edges
    node_in, edge_in = 32, 32
    D, H, steps = 64, 128, 6      # node_out_feats, edge_hidden_feats, steps

    key = jax.random.PRNGKey(0)
    k_nf, k_ef, k_p = jax.random.split(key, 3)
    node_feats = jax.random.normal(k_nf, (V, node_in), jnp.float32)
    edge_feats = jax.random.normal(k_ef, (E, edge_in), jnp.float32)
    params = init_params(k_p, node_in, edge_in, D, H)

    # deterministic graph: two directed rings (i -> i+1, i -> i+3 mod V)
    src = jnp.concatenate([jnp.arange(V), jnp.arange(V)])
    dst = jnp.concatenate([(jnp.arange(V) + 1) % V, (jnp.arange(V) + 3) % V])
    S = jax.nn.one_hot(src, V, dtype=jnp.float32)       # (E, V) gather of src
    A = jax.nn.one_hot(dst, V, dtype=jnp.float32).T     # (V, E) scatter to dst

    out = mpnn_forward(params, node_feats, edge_feats, S, A, steps, D)
    out = jax.block_until_ready(out)
    assert out.shape == (V, D) and out.dtype == jnp.float32
    print("KERNEL_OK")
</pallas_src>

<mosaic_0001>
module attributes {stable_mosaic.version = 11 : i64} {
  func.func @_mpnn_fused_kernel(%arg0: memref<16x32xbf16, #tpu.memory_space<vmem>>, %arg1: memref<32x32xbf16, #tpu.memory_space<vmem>>, %arg2: memref<32x16xbf16, #tpu.memory_space<vmem>>, %arg3: memref<16x32xbf16, #tpu.memory_space<vmem>>, %arg4: memref<32x64xbf16, #tpu.memory_space<vmem>>, %arg5: memref<1x64xf32, #tpu.memory_space<vmem>>, %arg6: memref<32x128xbf16, #tpu.memory_space<vmem>>, %arg7: memref<1x128xf32, #tpu.memory_space<vmem>>, %arg8: memref<128x4096xbf16, #tpu.memory_space<vmem>>, %arg9: memref<1x4096xf32, #tpu.memory_space<vmem>>, %arg10: memref<1x64xf32, #tpu.memory_space<vmem>>, %arg11: memref<128x256xbf16, #tpu.memory_space<vmem>>, %arg12: memref<1x256xf32, #tpu.memory_space<vmem>>, %arg13: memref<16x64xf32, #tpu.memory_space<vmem>>, %arg14: memref<64x32x64xf32, #tpu.memory_space<vmem>>) attributes {dimension_semantics = [], scalar_prefetch = 0 : i64, scratch_operands = 1 : i64, tpu.core_type = #tpu.core_type<tc>} {
    %c0 = arith.constant 0 : index
    %c0_0 = arith.constant 0 : index
    %0 = vector.load %arg0[%c0, %c0_0] : memref<16x32xbf16, #tpu.memory_space<vmem>>, vector<16x32xbf16>
    %c0_1 = arith.constant 0 : index
    %c0_2 = arith.constant 0 : index
    %1 = vector.load %arg4[%c0_1, %c0_2] : memref<32x64xbf16, #tpu.memory_space<vmem>>, vector<32x64xbf16>
    %cst = arith.constant dense<0.000000e+00> : vector<16x64xf32>
    %2 = tpu.matmul %0, %1, %cst {dimension_numbers = #tpu.dot_dimension_numbers<[1], [0], [0], [1], [0, 0, 1, 1], [], []>} : vector<16x32xbf16>, vector<32x64xbf16>, vector<16x64xf32> -> vector<16x64xf32>
    %c0_3 = arith.constant 0 : index
    %c0_4 = arith.constant 0 : index
    %3 = vector.load %arg5[%c0_3, %c0_4] : memref<1x64xf32, #tpu.memory_space<vmem>>, vector<1x64xf32>
    %4 = vector.broadcast %3 : vector<1x64xf32> to vector<16x64xf32>
    %5 = arith.addf %2, %4 : vector<16x64xf32>
    %cst_5 = arith.constant 0.000000e+00 : f32
    %6 = vector.broadcast %cst_5 : f32 to vector<16x64xf32>
    %7 = arith.maximumf %5, %6 : vector<16x64xf32>
    %c0_6 = arith.constant 0 : index
    %c0_7 = arith.constant 0 : index
    %8 = vector.load %arg1[%c0_6, %c0_7] : memref<32x32xbf16, #tpu.memory_space<vmem>>, vector<32x32xbf16>
    %c0_8 = arith.constant 0 : index
    %c0_9 = arith.constant 0 : index
    %9 = vector.load %arg6[%c0_8, %c0_9] : memref<32x128xbf16, #tpu.memory_space<vmem>>, vector<32x128xbf16>
    %cst_10 = arith.constant dense<0.000000e+00> : vector<32x128xf32>
    %10 = tpu.matmul %8, %9, %cst_10 {dimension_numbers = #tpu.dot_dimension_numbers<[1], [0], [0], [1], [0, 0, 1, 1], [], []>} : vector<32x32xbf16>, vector<32x128xbf16>, vector<32x128xf32> -> vector<32x128xf32>
    %c0_11 = arith.constant 0 : index
    %c0_12 = arith.constant 0 : index
    %11 = vector.load %arg7[%c0_11, %c0_12] : memref<1x128xf32, #tpu.memory_space<vmem>>, vector<1x128xf32>
    %12 = vector.broadcast %11 : vector<1x128xf32> to vector<32x128xf32>
    %13 = arith.addf %10, %12 : vector<32x128xf32>
    %cst_13 = arith.constant 0.000000e+00 : f32
    %14 = vector.broadcast %cst_13 : f32 to vector<32x128xf32>
    %15 = arith.maximumf %13, %14 : vector<32x128xf32>
    %16 = arith.truncf %15 : vector<32x128xf32> to vector<32x128xbf16>
    %c0_14 = arith.constant 0 : index
    %c0_15 = arith.constant 0 : index
    %17 = vector.load %arg8[%c0_14, %c0_15] : memref<128x4096xbf16, #tpu.memory_space<vmem>>, vector<128x512xbf16>
    %cst_16 = arith.constant dense<0.000000e+00> : vector<32x512xf32>
    %18 = tpu.matmul %16, %17, %cst_16 {dimension_numbers = #tpu.dot_dimension_numbers<[1], [0], [0], [1], [0, 0, 1, 1], [], []>} : vector<32x128xbf16>, vector<128x512xbf16>, vector<32x512xf32> -> vector<32x512xf32>
    %c0_17 = arith.constant 0 : index
    %c0_18 = arith.constant 0 : index
    %19 = vector.load %arg9[%c0_17, %c0_18] : memref<1x4096xf32, #tpu.memory_space<vmem>>, vector<1x512xf32>
    %20 = vector.broadcast %19 : vector<1x512xf32> to vector<32x512xf32>
    %21 = arith.addf %18, %20 : vector<32x512xf32>
    %22 = vector.extract_strided_slice %21 {offsets = [0, 0], sizes = [32, 64], strides = [1, 1]} : vector<32x512xf32> to vector<32x64xf32>
    %c0_19 = arith.constant 0 : index
    %c0_20 = arith.constant 0 : index
    %c0_21 = arith.constant 0 : index
    %23 = vector.load %arg14[%c0_19, %c0_20, %c0_21] : memref<64x32x64xf32, #tpu.memory_space<vmem>>, vector<1x32x64xf32>
    %24 = vector.shape_cast %23 : vector<1x32x64xf32> to vector<32x64xf32>
    %25 = vector.shape_cast %22 : vector<32x64xf32> to vector<1x32x64xf32>
    tpu.vector_store %arg14[%c0_19, %c0_20, %c0_21], %25 {strides = array<i32>} : memref<64x32x64xf32, #tpu.memory_space<vmem>>, vector<1x32x64xf32>,
    %26 = vector.extract_strided_slice %21 {offsets = [0, 64], sizes = [32, 64], strides = [1, 1]} : vector<32x512xf32> to vector<32x64xf32>
    %c1 = arith.constant 1 : index
    %c0_22 = arith.constant 0 : index
    %c0_23 = arith.constant 0 : index
    %27 = vector.load %arg14[%c1, %c0_22, %c0_23] : memref<64x32x64xf32, #tpu.memory_space<vmem>>, vector<1x32x64xf32>
    %28 = vector.shape_cast %27 : vector<1x32x64xf32> to vector<32x64xf32>
    %29 = vector.shape_cast %26 : vector<32x64xf32> to vector<1x32x64xf32>
    tpu.vector_store %arg14[%c1, %c0_22, %c0_23], %29 {strides = array<i32>} : memref<64x32x64xf32, #tpu.memory_space<vmem>>, vector<1x32x64xf32>,
    %30 = vector.extract_strided_slice %21 {offsets = [0, 128], sizes = [32, 64], strides = [1, 1]} : vector<32x512xf32> to vector<32x64xf32>
    %c2 = arith.constant 2 : index
    %c0_24 = arith.constant 0 : index
    %c0_25 = arith.constant 0 : index
    %31 = vector.load %arg14[%c2, %c0_24, %c0_25] : memref<64x32x64xf32, #tpu.memory_space<vmem>>, vector<1x32x64xf32>
    %32 = vector.shape_cast %31 : vector<1x32x64xf32> to vector<32x64xf32>
    %33 = vector.shape_cast %30 : vector<32x64xf32> to vector<1x32x64xf32>
    tpu.vector_store %arg14[%c2, %c0_24, %c0_25], %33 {strides = array<i32>} : memref<64x32x64xf32, #tpu.memory_space<vmem>>, vector<1x32x64xf32>,
    %34 = vector.extract_strided_slice %21 {offsets = [0, 192], sizes = [32, 64], strides = [1, 1]} : vector<32x512xf32> to vector<32x64xf32>
    %c3 = arith.constant 3 : index
    %c0_26 = arith.constant 0 : index
    %c0_27 = arith.constant 0 : index
    %35 = vector.load %arg14[%c3, %c0_26, %c0_27] : memref<64x32x64xf32, #tpu.memory_space<vmem>>, vector<1x32x64xf32>
    %36 = vector.shape_cast %35 : vector<1x32x64xf32> to vector<32x64xf32>
    %37 = vector.shape_cast %34 : vector<32x64xf32> to vector<1x32x64xf32>
    tpu.vector_store %arg14[%c3, %c0_26, %c0_27], %37 {strides = array<i32>} : memref<64x32x64xf32, #tpu.memory_space<vmem>>, vector<1x32x64xf32>,
    %38 = vector.extract_strided_slice %21 {offsets = [0, 256], sizes = [32, 64], strides = [1, 1]} : vector<32x512xf32> to vector<32x64xf32>
    %c4 = arith.constant 4 : index
    %c0_28 = arith.constant 0 : index
    %c0_29 = arith.constant 0 : index
    %39 = vector.load %arg14[%c4, %c0_28, %c0_29] : memref<64x32x64xf32, #tpu.memory_space<vmem>>, vector<1x32x64xf32>
    %40 = vector.shape_cast %39 : vector<1x32x64xf32> to vector<32x64xf32>
    %41 = vector.shape_cast %38 : vector<32x64xf32> to vector<1x32x64xf32>
    tpu.vector_store %arg14[%c4, %c0_28, %c0_29], %41 {strides = array<i32>} : memref<64x32x64xf32, #tpu.memory_space<vmem>>, vector<1x32x64xf32>,
    %42 = vector.extract_strided_slice %21 {offsets = [0, 320], sizes = [32, 64], strides = [1, 1]} : vector<32x512xf32> to vector<32x64xf32>
    %c5 = arith.constant 5 : index
    %c0_30 = arith.constant 0 : index
    %c0_31 = arith.constant 0 : index
    %43 = vector.load %arg14[%c5, %c0_30, %c0_31] : memref<64x32x64xf32, #tpu.memory_space<vmem>>, vector<1x32x64xf32>
    %44 = vector.shape_cast %43 : vector<1x32x64xf32> to vector<32x64xf32>
    %45 = vector.shape_cast %42 : vector<32x64xf32> to vector<1x32x64xf32>
    tpu.vector_store %arg14[%c5, %c0_30, %c0_31], %45 {strides = array<i32>} : memref<64x32x64xf32, #tpu.memory_space<vmem>>, vector<1x32x64xf32>,
    %46 = vector.extract_strided_slice %21 {offsets = [0, 384], sizes = [32, 64], strides = [1, 1]} : vector<32x512xf32> to vector<32x64xf32>
    %c6 = arith.constant 6 : index
    %c0_32 = arith.constant 0 : index
    %c0_33 = arith.constant 0 : index
    %47 = vector.load %arg14[%c6, %c0_32, %c0_33] : memref<64x32x64xf32, #tpu.memory_space<vmem>>, vector<1x32x64xf32>
    %48 = vector.shape_cast %47 : vector<1x32x64xf32> to vector<32x64xf32>
    %49 = vector.shape_cast %46 : vector<32x64xf32> to vector<1x32x64xf32>
    tpu.vector_store %arg14[%c6, %c0_32, %c0_33], %49 {strides = array<i32>} : memref<64x32x64xf32, #tpu.memory_space<vmem>>, vector<1x32x64xf32>,
    %50 = vector.extract_strided_slice %21 {offsets = [0, 448], sizes = [32, 64], strides = [1, 1]} : vector<32x512xf32> to vector<32x64xf32>
    %c7 = arith.constant 7 : index
    %c0_34 = arith.constant 0 : index
    %c0_35 = arith.constant 0 : index
    %51 = vector.load %arg14[%c7, %c0_34, %c0_35] : memref<64x32x64xf32, #tpu.memory_space<vmem>>, vector<1x32x64xf32>
    %52 = vector.shape_cast %51 : vector<1x32x64xf32> to vector<32x64xf32>
    %53 = vector.shape_cast %50 : vector<32x64xf32> to vector<1x32x64xf32>
    tpu.vector_store %arg14[%c7, %c0_34, %c0_35], %53 {strides = array<i32>} : memref<64x32x64xf32, #tpu.memory_space<vmem>>, vector<1x32x64xf32>,
    %c0_36 = arith.constant 0 : index
    %c512 = arith.constant 512 : index
    %54 = vector.load %arg8[%c0_36, %c512] : memref<128x4096xbf16, #tpu.memory_space<vmem>>, vector<128x512xbf16>
    %cst_37 = arith.constant dense<0.000000e+00> : vector<32x512xf32>
    %55 = tpu.matmul %16, %54, %cst_37 {dimension_numbers = #tpu.dot_dimension_numbers<[1], [0], [0], [1], [0, 0, 1, 1], [], []>} : vector<32x128xbf16>, vector<128x512xbf16>, vector<32x512xf32> -> vector<32x512xf32>
    %c0_38 = arith.constant 0 : index
    %c512_39 = arith.constant 512 : index
    %56 = vector.load %arg9[%c0_38, %c512_39] : memref<1x4096xf32, #tpu.memory_space<vmem>>, vector<1x512xf32>
    %57 = vector.broadcast %56 : vector<1x512xf32> to vector<32x512xf32>
    %58 = arith.addf %55, %57 : vector<32x512xf32>
    %59 = vector.extract_strided_slice %58 {offsets = [0, 0], sizes = [32, 64], strides = [1, 1]} : vector<32x512xf32> to vector<32x64xf32>
    %c8 = arith.constant 8 : index
    %c0_40 = arith.constant 0 : index
    %c0_41 = arith.constant 0 : index
    %60 = vector.load %arg14[%c8, %c0_40, %c0_41] : memref<64x32x64xf32, #tpu.memory_space<vmem>>, vector<1x32x64xf32>
    %61 = vector.shape_cast %60 : vector<1x32x64xf32> to vector<32x64xf32>
    %62 = vector.shape_cast %59 : vector<32x64xf32> to vector<1x32x64xf32>
    tpu.vector_store %arg14[%c8, %c0_40, %c0_41], %62 {strides = array<i32>} : memref<64x32x64xf32, #tpu.memory_space<vmem>>, vector<1x32x64xf32>,
    %63 = vector.extract_strided_slice %58 {offsets = [0, 64], sizes = [32, 64], strides = [1, 1]} : vector<32x512xf32> to vector<32x64xf32>
    %c9 = arith.constant 9 : index
    %c0_42 = arith.constant 0 : index
    %c0_43 = arith.constant 0 : index
    %64 = vector.load %arg14[%c9, %c0_42, %c0_43] : memref<64x32x64xf32, #tpu.memory_space<vmem>>, vector<1x32x64xf32>
    %65 = vector.shape_cast %64 : vector<1x32x64xf32> to vector<32x64xf32>
    %66 = vector.shape_cast %63 : vector<32x64xf32> to vector<1x32x64xf32>
    tpu.vector_store %arg14[%c9, %c0_42, %c0_43], %66 {strides = array<i32>} : memref<64x32x64xf32, #tpu.memory_space<vmem>>, vector<1x32x64xf32>,
    %67 = vector.extract_strided_slice %58 {offsets = [0, 128], sizes = [32, 64], strides = [1, 1]} : vector<32x512xf32> to vector<32x64xf32>
    %c10 = arith.constant 10 : index
    %c0_44 = arith.constant 0 : index
    %c0_45 = arith.constant 0 : index
    %68 = vector.load %arg14[%c10, %c0_44, %c0_45] : memref<64x32x64xf32, #tpu.memory_space<vmem>>, vector<1x32x64xf32>
    %69 = vector.shape_cast %68 : vector<1x32x64xf32> to vector<32x64xf32>
    %70 = vector.shape_cast %67 : vector<32x64xf32> to vector<1x32x64xf32>
    tpu.vector_store %arg14[%c10, %c0_44, %c0_45], %70 {strides = array<i32>} : memref<64x32x64xf32, #tpu.memory_space<vmem>>, vector<1x32x64xf32>,
    %71 = vector.extract_strided_slice %58 {offsets = [0, 192], sizes = [32, 64], strides = [1, 1]} : vector<32x512xf32> to vector<32x64xf32>
    %c11 = arith.constant 11 : index
    %c0_46 = arith.constant 0 : index
    %c0_47 = arith.constant 0 : index
    %72 = vector.load %arg14[%c11, %c0_46, %c0_47] : memref<64x32x64xf32, #tpu.memory_space<vmem>>, vector<1x32x64xf32>
    %73 = vector.shape_cast %72 : vector<1x32x64xf32> to vector<32x64xf32>
    %74 = vector.shape_cast %71 : vector<32x64xf32> to vector<1x32x64xf32>
    tpu.vector_store %arg14[%c11, %c0_46, %c0_47], %74 {strides = array<i32>} : memref<64x32x64xf32, #tpu.memory_space<vmem>>, vector<1x32x64xf32>,
    %75 = vector.extract_strided_slice %58 {offsets = [0, 256], sizes = [32, 64], strides = [1, 1]} : vector<32x512xf32> to vector<32x64xf32>
    %c12 = arith.constant 12 : index
    %c0_48 = arith.constant 0 : index
    %c0_49 = arith.constant 0 : index
    %76 = vector.load %arg14[%c12, %c0_48, %c0_49] : memref<64x32x64xf32, #tpu.memory_space<vmem>>, vector<1x32x64xf32>
    %77 = vector.shape_cast %76 : vector<1x32x64xf32> to vector<32x64xf32>
    %78 = vector.shape_cast %75 : vector<32x64xf32> to vector<1x32x64xf32>
    tpu.vector_store %arg14[%c12, %c0_48, %c0_49], %78 {strides = array<i32>} : memref<64x32x64xf32, #tpu.memory_space<vmem>>, vector<1x32x64xf32>,
    %79 = vector.extract_strided_slice %58 {offsets = [0, 320], sizes = [32, 64], strides = [1, 1]} : vector<32x512xf32> to vector<32x64xf32>
    %c13 = arith.constant 13 : index
    %c0_50 = arith.constant 0 : index
    %c0_51 = arith.constant 0 : index
    %80 = vector.load %arg14[%c13, %c0_50, %c0_51] : memref<64x32x64xf32, #tpu.memory_space<vmem>>, vector<1x32x64xf32>
    %81 = vector.shape_cast %80 : vector<1x32x64xf32> to vector<32x64xf32>
    %82 = vector.shape_cast %79 : vector<32x64xf32> to vector<1x32x64xf32>
    tpu.vector_store %arg14[%c13, %c0_50, %c0_51], %82 {strides = array<i32>} : memref<64x32x64xf32, #tpu.memory_space<vmem>>, vector<1x32x64xf32>,
    %83 = vector.extract_strided_slice %58 {offsets = [0, 384], sizes = [32, 64], strides = [1, 1]} : vector<32x512xf32> to vector<32x64xf32>
    %c14 = arith.constant 14 : index
    %c0_52 = arith.constant 0 : index
    %c0_53 = arith.constant 0 : index
    %84 = vector.load %arg14[%c14, %c0_52, %c0_53] : memref<64x32x64xf32, #tpu.memory_space<vmem>>, vector<1x32x64xf32>
    %85 = vector.shape_cast %84 : vector<1x32x64xf32> to vector<32x64xf32>
    %86 = vector.shape_cast %83 : vector<32x64xf32> to vector<1x32x64xf32>
    tpu.vector_store %arg14[%c14, %c0_52, %c0_53], %86 {strides = array<i32>} : memref<64x32x64xf32, #tpu.memory_space<vmem>>, vector<1x32x64xf32>,
    %87 = vector.extract_strided_slice %58 {offsets = [0, 448], sizes = [32, 64], strides = [1, 1]} : vector<32x512xf32> to vector<32x64xf32>
    %c15 = arith.constant 15 : index
    %c0_54 = arith.constant 0 : index
    %c0_55 = arith.constant 0 : index
    %88 = vector.load %arg14[%c15, %c0_54, %c0_55] : memref<64x32x64xf32, #tpu.memory_space<vmem>>, vector<1x32x64xf32>
    %89 = vector.shape_cast %88 : vector<1x32x64xf32> to vector<32x64xf32>
    %90 = vector.shape_cast %87 : vector<32x64xf32> to vector<1x32x64xf32>
    tpu.vector_store %arg14[%c15, %c0_54, %c0_55], %90 {strides = array<i32>} : memref<64x32x64xf32, #tpu.memory_space<vmem>>, vector<1x32x64xf32>,
    %c0_56 = arith.constant 0 : index
    %c1024 = arith.constant 1024 : index
    %91 = vector.load %arg8[%c0_56, %c1024] : memref<128x4096xbf16, #tpu.memory_space<vmem>>, vector<128x512xbf16>
    %cst_57 = arith.constant dense<0.000000e+00> : vector<32x512xf32>
    %92 = tpu.matmul %16, %91, %cst_57 {dimension_numbers = #tpu.dot_dimension_numbers<[1], [0], [0], [1], [0, 0, 1, 1], [], []>} : vector<32x128xbf16>, vector<128x512xbf16>, vector<32x512xf32> -> vector<32x512xf32>
    %c0_58 = arith.constant 0 : index
    %c1024_59 = arith.constant 1024 : index
    %93 = vector.load %arg9[%c0_58, %c1024_59] : memref<1x4096xf32, #tpu.memory_space<vmem>>, vector<1x512xf32>
    %94 = vector.broadcast %93 : vector<1x512xf32> to vector<32x512xf32>
    %95 = arith.addf %92, %94 : vector<32x512xf32>
    %96 = vector.extract_strided_slice %95 {offsets = [0, 0], sizes = [32, 64], strides = [1, 1]} : vector<32x512xf32> to vector<32x64xf32>
    %c16 = arith.constant 16 : index
    %c0_60 = arith.constant 0 : index
    %c0_61 = arith.constant 0 : index
    %97 = vector.load %arg14[%c16, %c0_60, %c0_61] : memref<64x32x64xf32, #tpu.memory_space<vmem>>, vector<1x32x64xf32>
    %98 = vector.shape_cast %97 : vector<1x32x64xf32> to vector<32x64xf32>
    %99 = vector.shape_cast %96 : vector<32x64xf32> to vector<1x32x64xf32>
    tpu.vector_store %arg14[%c16, %c0_60, %c0_61], %99 {strides = array<i32>} : memref<64x32x64xf32, #tpu.memory_space<vmem>>, vector<1x32x64xf32>,
    %100 = vector.extract_strided_slice %95 {offsets = [0, 64], sizes = [32, 64], strides = [1, 1]} : vector<32x512xf32> to vector<32x64xf32>
    %c17 = arith.constant 17 : index
    %c0_62 = arith.constant 0 : index
    %c0_63 = arith.constant 0 : index
    %101 = vector.load %arg14[%c17, %c0_62, %c0_63] : memref<64x32x64xf32, #tpu.memory_space<vmem>>, vector<1x32x64xf32>
    %102 = vector.shape_cast %101 : vector<1x32x64xf32> to vector<32x64xf32>
    %103 = vector.shape_cast %100 : vector<32x64xf32> to vector<1x32x64xf32>
    tpu.vector_store %arg14[%c17, %c0_62, %c0_63], %103 {strides = array<i32>} : memref<64x32x64xf32, #tpu.memory_space<vmem>>, vector<1x32x64xf32>,
    %104 = vector.extract_strided_slice %95 {offsets = [0, 128], sizes = [32, 64], strides = [1, 1]} : vector<32x512xf32> to vector<32x64xf32>
    %c18 = arith.constant 18 : index
    %c0_64 = arith.constant 0 : index
    %c0_65 = arith.constant 0 : index
    %105 = vector.load %arg14[%c18, %c0_64, %c0_65] : memref<64x32x64xf32, #tpu.memory_space<vmem>>, vector<1x32x64xf32>
    %106 = vector.shape_cast %105 : vector<1x32x64xf32> to vector<32x64xf32>
    %107 = vector.shape_cast %104 : vector<32x64xf32> to vector<1x32x64xf32>
    tpu.vector_store %arg14[%c18, %c0_64, %c0_65], %107 {strides = array<i32>} : memref<64x32x64xf32, #tpu.memory_space<vmem>>, vector<1x32x64xf32>,
    %108 = vector.extract_strided_slice %95 {offsets = [0, 192], sizes = [32, 64], strides = [1, 1]} : vector<32x512xf32> to vector<32x64xf32>
    %c19 = arith.constant 19 : index
    %c0_66 = arith.constant 0 : index
    %c0_67 = arith.constant 0 : index
    %109 = vector.load %arg14[%c19, %c0_66, %c0_67] : memref<64x32x64xf32, #tpu.memory_space<vmem>>, vector<1x32x64xf32>
    %110 = vector.shape_cast %109 : vector<1x32x64xf32> to vector<32x64xf32>
    %111 = vector.shape_cast %108 : vector<32x64xf32> to vector<1x32x64xf32>
    tpu.vector_store %arg14[%c19, %c0_66, %c0_67], %111 {strides = array<i32>} : memref<64x32x64xf32, #tpu.memory_space<vmem>>, vector<1x32x64xf32>,
    %112 = vector.extract_strided_slice %95 {offsets = [0, 256], sizes = [32, 64], strides = [1, 1]} : vector<32x512xf32> to vector<32x64xf32>
    %c20 = arith.constant 20 : index
    %c0_68 = arith.constant 0 : index
    %c0_69 = arith.constant 0 : index
    %113 = vector.load %arg14[%c20, %c0_68, %c0_69] : memref<64x32x64xf32, #tpu.memory_space<vmem>>, vector<1x32x64xf32>
    %114 = vector.shape_cast %113 : vector<1x32x64xf32> to vector<32x64xf32>
    %115 = vector.shape_cast %112 : vector<32x64xf32> to vector<1x32x64xf32>
    tpu.vector_store %arg14[%c20, %c0_68, %c0_69], %115 {strides = array<i32>} : memref<64x32x64xf32, #tpu.memory_space<vmem>>, vector<1x32x64xf32>,
    %116 = vector.extract_strided_slice %95 {offsets = [0, 320], sizes = [32, 64], strides = [1, 1]} : vector<32x512xf32> to vector<32x64xf32>
    %c21 = arith.constant 21 : index
    %c0_70 = arith.constant 0 : index
    %c0_71 = arith.constant 0 : index
    %117 = vector.load %arg14[%c21, %c0_70, %c0_71] : memref<64x32x64xf32, #tpu.memory_space<vmem>>, vector<1x32x64xf32>
    %118 = vector.shape_cast %117 : vector<1x32x64xf32> to vector<32x64xf32>
    %119 = vector.shape_cast %116 : vector<32x64xf32> to vector<1x32x64xf32>
    tpu.vector_store %arg14[%c21, %c0_70, %c0_71], %119 {strides = array<i32>} : memref<64x32x64xf32, #tpu.memory_space<vmem>>, vector<1x32x64xf32>,
    %120 = vector.extract_strided_slice %95 {offsets = [0, 384], sizes = [32, 64], strides = [1, 1]} : vector<32x512xf32> to vector<32x64xf32>
    %c22 = arith.constant 22 : index
    %c0_72 = arith.constant 0 : index
    %c0_73 = arith.constant 0 : index
    %121 = vector.load %arg14[%c22, %c0_72, %c0_73] : memref<64x32x64xf32, #tpu.memory_space<vmem>>, vector<1x32x64xf32>
    %122 = vector.shape_cast %121 : vector<1x32x64xf32> to vector<32x64xf32>
    %123 = vector.shape_cast %120 : vector<32x64xf32> to vector<1x32x64xf32>
    tpu.vector_store %arg14[%c22, %c0_72, %c0_73], %123 {strides = array<i32>} : memref<64x32x64xf32, #tpu.memory_space<vmem>>, vector<1x32x64xf32>,
    %124 = vector.extract_strided_slice %95 {offsets = [0, 448], sizes = [32, 64], strides = [1, 1]} : vector<32x512xf32> to vector<32x64xf32>
    %c23 = arith.constant 23 : index
    %c0_74 = arith.constant 0 : index
    %c0_75 = arith.constant 0 : index
    %125 = vector.load %arg14[%c23, %c0_74, %c0_75] : memref<64x32x64xf32, #tpu.memory_space<vmem>>, vector<1x32x64xf32>
    %126 = vector.shape_cast %125 : vector<1x32x64xf32> to vector<32x64xf32>
    %127 = vector.shape_cast %124 : vector<32x64xf32> to vector<1x32x64xf32>
    tpu.vector_store %arg14[%c23, %c0_74, %c0_75], %127 {strides = array<i32>} : memref<64x32x64xf32, #tpu.memory_space<vmem>>, vector<1x32x64xf32>,
    %c0_76 = arith.constant 0 : index
    %c1536 = arith.constant 1536 : index
    %128 = vector.load %arg8[%c0_76, %c1536] : memref<128x4096xbf16, #tpu.memory_space<vmem>>, vector<128x512xbf16>
    %cst_77 = arith.constant dense<0.000000e+00> : vector<32x512xf32>
    %129 = tpu.matmul %16, %128, %cst_77 {dimension_numbers = #tpu.dot_dimension_numbers<[1], [0], [0], [1], [0, 0, 1, 1], [], []>} : vector<32x128xbf16>, vector<128x512xbf16>, vector<32x512xf32> -> vector<32x512xf32>
    %c0_78 = arith.constant 0 : index
    %c1536_79 = arith.constant 1536 : index
    %130 = vector.load %arg9[%c0_78, %c1536_79] : memref<1x4096xf32, #tpu.memory_space<vmem>>, vector<1x512xf32>
    %131 = vector.broadcast %130 : vector<1x512xf32> to vector<32x512xf32>
    %132 = arith.addf %129, %131 : vector<32x512xf32>
    %133 = vector.extract_strided_slice %132 {offsets = [0, 0], sizes = [32, 64], strides = [1, 1]} : vector<32x512xf32> to vector<32x64xf32>
    %c24 = arith.constant 24 : index
    %c0_80 = arith.constant 0 : index
    %c0_81 = arith.constant 0 : index
    %134 = vector.load %arg14[%c24, %c0_80, %c0_81] : memref<64x32x64xf32, #tpu.memory_space<vmem>>, vector<1x32x64xf32>
    %135 = vector.shape_cast %134 : vector<1x32x64xf32> to vector<32x64xf32>
    %136 = vector.shape_cast %133 : vector<32x64xf32> to vector<1x32x64xf32>
    tpu.vector_store %arg14[%c24, %c0_80, %c0_81], %136 {strides = array<i32>} : memref<64x32x64xf32, #tpu.memory_space<vmem>>, vector<1x32x64xf32>,
    %137 = vector.extract_strided_slice %132 {offsets = [0, 64], sizes = [32, 64], strides = [1, 1]} : vector<32x512xf32> to vector<32x64xf32>
    %c25 = arith.constant 25 : index
    %c0_82 = arith.constant 0 : index
    %c0_83 = arith.constant 0 : index
    %138 = vector.load %arg14[%c25, %c0_82, %c0_83] : memref<64x32x64xf32, #tpu.memory_space<vmem>>, vector<1x32x64xf32>
    %139 = vector.shape_cast %138 : vector<1x32x64xf32> to vector<32x64xf32>
    %140 = vector.shape_cast %137 : vector<32x64xf32> to vector<1x32x64xf32>
    tpu.vector_store %arg14[%c25, %c0_82, %c0_83], %140 {strides = array<i32>} : memref<64x32x64xf32, #tpu.memory_space<vmem>>, vector<1x32x64xf32>,
    %141 = vector.extract_strided_slice %132 {offsets = [0, 128], sizes = [32, 64], strides = [1, 1]} : vector<32x512xf32> to vector<32x64xf32>
    %c26 = arith.constant 26 : index
    %c0_84 = arith.constant 0 : index
    %c0_85 = arith.constant 0 : index
    %142 = vector.load %arg14[%c26, %c0_84, %c0_85] : memref<64x32x64xf32, #tpu.memory_space<vmem>>, vector<1x32x64xf32>
    %143 = vector.shape_cast %142 : vector<1x32x64xf32> to vector<32x64xf32>
    %144 = vector.shape_cast %141 : vector<32x64xf32> to vector<1x32x64xf32>
    tpu.vector_store %arg14[%c26, %c0_84, %c0_85], %144 {strides = array<i32>} : memref<64x32x64xf32, #tpu.memory_space<vmem>>, vector<1x32x64xf32>,
    %145 = vector.extract_strided_slice %132 {offsets = [0, 192], sizes = [32, 64], strides = [1, 1]} : vector<32x512xf32> to vector<32x64xf32>
    %c27 = arith.constant 27 : index
    %c0_86 = arith.constant 0 : index
    %c0_87 = arith.constant 0 : index
    %146 = vector.load %arg14[%c27, %c0_86, %c0_87] : memref<64x32x64xf32, #tpu.memory_space<vmem>>, vector<1x32x64xf32>
    %147 = vector.shape_cast %146 : vector<1x32x64xf32> to vector<32x64xf32>
    %148 = vector.shape_cast %145 : vector<32x64xf32> to vector<1x32x64xf32>
    tpu.vector_store %arg14[%c27, %c0_86, %c0_87], %148 {strides = array<i32>} : memref<64x32x64xf32, #tpu.memory_space<vmem>>, vector<1x32x64xf32>,
    %149 = vector.extract_strided_slice %132 {offsets = [0, 256], sizes = [32, 64], strides = [1, 1]} : vector<32x512xf32> to vector<32x64xf32>
    %c28 = arith.constant 28 : index
    %c0_88 = arith.constant 0 : index
    %c0_89 = arith.constant 0 : index
    %150 = vector.load %arg14[%c28, %c0_88, %c0_89] : memref<64x32x64xf32, #tpu.memory_space<vmem>>, vector<1x32x64xf32>
    %151 = vector.shape_cast %150 : vector<1x32x64xf32> to vector<32x64xf32>
    %152 = vector.shape_cast %149 : vector<32x64xf32> to vector<1x32x64xf32>
    tpu.vector_store %arg14[%c28, %c0_88, %c0_89], %152 {strides = array<i32>} : memref<64x32x64xf32, #tpu.memory_space<vmem>>, vector<1x32x64xf32>,
    %153 = vector.extract_strided_slice %132 {offsets = [0, 320], sizes = [32, 64], strides = [1, 1]} : vector<32x512xf32> to vector<32x64xf32>
    %c29 = arith.constant 29 : index
    %c0_90 = arith.constant 0 : index
    %c0_91 = arith.constant 0 : index
    %154 = vector.load %arg14[%c29, %c0_90, %c0_91] : memref<64x32x64xf32, #tpu.memory_space<vmem>>, vector<1x32x64xf32>
    %155 = vector.shape_cast %154 : vector<1x32x64xf32> to vector<32x64xf32>
    %156 = vector.shape_cast %153 : vector<32x64xf32> to vector<1x32x64xf32>
    tpu.vector_store %arg14[%c29, %c0_90, %c0_91], %156 {strides = array<i32>} : memref<64x32x64xf32, #tpu.memory_space<vmem>>, vector<1x32x64xf32>,
    %157 = vector.extract_strided_slice %132 {offsets = [0, 384], sizes = [32, 64], strides = [1, 1]} : vector<32x512xf32> to vector<32x64xf32>
    %c30 = arith.constant 30 : index
    %c0_92 = arith.constant 0 : index
    %c0_93 = arith.constant 0 : index
    %158 = vector.load %arg14[%c30, %c0_92, %c0_93] : memref<64x32x64xf32, #tpu.memory_space<vmem>>, vector<1x32x64xf32>
    %159 = vector.shape_cast %158 : vector<1x32x64xf32> to vector<32x64xf32>
    %160 = vector.shape_cast %157 : vector<32x64xf32> to vector<1x32x64xf32>
    tpu.vector_store %arg14[%c30, %c0_92, %c0_93], %160 {strides = array<i32>} : memref<64x32x64xf32, #tpu.memory_space<vmem>>, vector<1x32x64xf32>,
    %161 = vector.extract_strided_slice %132 {offsets = [0, 448], sizes = [32, 64], strides = [1, 1]} : vector<32x512xf32> to vector<32x64xf32>
    %c31 = arith.constant 31 : index
    %c0_94 = arith.constant 0 : index
    %c0_95 = arith.constant 0 : index
    %162 = vector.load %arg14[%c31, %c0_94, %c0_95] : memref<64x32x64xf32, #tpu.memory_space<vmem>>, vector<1x32x64xf32>
    %163 = vector.shape_cast %162 : vector<1x32x64xf32> to vector<32x64xf32>
    %164 = vector.shape_cast %161 : vector<32x64xf32> to vector<1x32x64xf32>
    tpu.vector_store %arg14[%c31, %c0_94, %c0_95], %164 {strides = array<i32>} : memref<64x32x64xf32, #tpu.memory_space<vmem>>, vector<1x32x64xf32>,
    %c0_96 = arith.constant 0 : index
    %c2048 = arith.constant 2048 : index
    %165 = vector.load %arg8[%c0_96, %c2048] : memref<128x4096xbf16, #tpu.memory_space<vmem>>, vector<128x512xbf16>
    %cst_97 = arith.constant dense<0.000000e+00> : vector<32x512xf32>
    %166 = tpu.matmul %16, %165, %cst_97 {dimension_numbers = #tpu.dot_dimension_numbers<[1], [0], [0], [1], [0, 0, 1, 1], [], []>} : vector<32x128xbf16>, vector<128x512xbf16>, vector<32x512xf32> -> vector<32x512xf32>
    %c0_98 = arith.constant 0 : index
    %c2048_99 = arith.constant 2048 : index
    %167 = vector.load %arg9[%c0_98, %c2048_99] : memref<1x4096xf32, #tpu.memory_space<vmem>>, vector<1x512xf32>
    %168 = vector.broadcast %167 : vector<1x512xf32> to vector<32x512xf32>
    %169 = arith.addf %166, %168 : vector<32x512xf32>
    %170 = vector.extract_strided_slice %169 {offsets = [0, 0], sizes = [32, 64], strides = [1, 1]} : vector<32x512xf32> to vector<32x64xf32>
    %c32 = arith.constant 32 : index
    %c0_100 = arith.constant 0 : index
    %c0_101 = arith.constant 0 : index
    %171 = vector.load %arg14[%c32, %c0_100, %c0_101] : memref<64x32x64xf32, #tpu.memory_space<vmem>>, vector<1x32x64xf32>
    %172 = vector.shape_cast %171 : vector<1x32x64xf32> to vector<32x64xf32>
    %173 = vector.shape_cast %170 : vector<32x64xf32> to vector<1x32x64xf32>
    tpu.vector_store %arg14[%c32, %c0_100, %c0_101], %173 {strides = array<i32>} : memref<64x32x64xf32, #tpu.memory_space<vmem>>, vector<1x32x64xf32>,
    %174 = vector.extract_strided_slice %169 {offsets = [0, 64], sizes = [32, 64], strides = [1, 1]} : vector<32x512xf32> to vector<32x64xf32>
    %c33 = arith.constant 33 : index
    %c0_102 = arith.constant 0 : index
    %c0_103 = arith.constant 0 : index
    %175 = vector.load %arg14[%c33, %c0_102, %c0_103] : memref<64x32x64xf32, #tpu.memory_space<vmem>>, vector<1x32x64xf32>
    %176 = vector.shape_cast %175 : vector<1x32x64xf32> to vector<32x64xf32>
    %177 = vector.shape_cast %174 : vector<32x64xf32> to vector<1x32x64xf32>
    tpu.vector_store %arg14[%c33, %c0_102, %c0_103], %177 {strides = array<i32>} : memref<64x32x64xf32, #tpu.memory_space<vmem>>, vector<1x32x64xf32>,
    %178 = vector.extract_strided_slice %169 {offsets = [0, 128], sizes = [32, 64], strides = [1, 1]} : vector<32x512xf32> to vector<32x64xf32>
    %c34 = arith.constant 34 : index
    %c0_104 = arith.constant 0 : index
    %c0_105 = arith.constant 0 : index
    %179 = vector.load %arg14[%c34, %c0_104, %c0_105] : memref<64x32x64xf32, #tpu.memory_space<vmem>>, vector<1x32x64xf32>
    %180 = vector.shape_cast %179 : vector<1x32x64xf32> to vector<32x64xf32>
    %181 = vector.shape_cast %178 : vector<32x64xf32> to vector<1x32x64xf32>
    tpu.vector_store %arg14[%c34, %c0_104, %c0_105], %181 {strides = array<i32>} : memref<64x32x64xf32, #tpu.memory_space<vmem>>, vector<1x32x64xf32>,
    %182 = vector.extract_strided_slice %169 {offsets = [0, 192], sizes = [32, 64], strides = [1, 1]} : vector<32x512xf32> to vector<32x64xf32>
    %c35 = arith.constant 35 : index
    %c0_106 = arith.constant 0 : index
    %c0_107 = arith.constant 0 : index
    %183 = vector.load %arg14[%c35, %c0_106, %c0_107] : memref<64x32x64xf32, #tpu.memory_space<vmem>>, vector<1x32x64xf32>
    %184 = vector.shape_cast %183 : vector<1x32x64xf32> to vector<32x64xf32>
    %185 = vector.shape_cast %182 : vector<32x64xf32> to vector<1x32x64xf32>
    tpu.vector_store %arg14[%c35, %c0_106, %c0_107], %185 {strides = array<i32>} : memref<64x32x64xf32, #tpu.memory_space<vmem>>, vector<1x32x64xf32>,
    %186 = vector.extract_strided_slice %169 {offsets = [0, 256], sizes = [32, 64], strides = [1, 1]} : vector<32x512xf32> to vector<32x64xf32>
    %c36 = arith.constant 36 : index
    %c0_108 = arith.constant 0 : index
    %c0_109 = arith.constant 0 : index
    %187 = vector.load %arg14[%c36, %c0_108, %c0_109] : memref<64x32x64xf32, #tpu.memory_space<vmem>>, vector<1x32x64xf32>
    %188 = vector.shape_cast %187 : vector<1x32x64xf32> to vector<32x64xf32>
    %189 = vector.shape_cast %186 : vector<32x64xf32> to vector<1x32x64xf32>
    tpu.vector_store %arg14[%c36, %c0_108, %c0_109], %189 {strides = array<i32>} : memref<64x32x64xf32, #tpu.memory_space<vmem>>, vector<1x32x64xf32>,
    %190 = vector.extract_strided_slice %169 {offsets = [0, 320], sizes = [32, 64], strides = [1, 1]} : vector<32x512xf32> to vector<32x64xf32>
    %c37 = arith.constant 37 : index
    %c0_110 = arith.constant 0 : index
    %c0_111 = arith.constant 0 : index
    %191 = vector.load %arg14[%c37, %c0_110, %c0_111] : memref<64x32x64xf32, #tpu.memory_space<vmem>>, vector<1x32x64xf32>
    %192 = vector.shape_cast %191 : vector<1x32x64xf32> to vector<32x64xf32>
    %193 = vector.shape_cast %190 : vector<32x64xf32> to vector<1x32x64xf32>
    tpu.vector_store %arg14[%c37, %c0_110, %c0_111], %193 {strides = array<i32>} : memref<64x32x64xf32, #tpu.memory_space<vmem>>, vector<1x32x64xf32>,
    %194 = vector.extract_strided_slice %169 {offsets = [0, 384], sizes = [32, 64], strides = [1, 1]} : vector<32x512xf32> to vector<32x64xf32>
    %c38 = arith.constant 38 : index
    %c0_112 = arith.constant 0 : index
    %c0_113 = arith.constant 0 : index
    %195 = vector.load %arg14[%c38, %c0_112, %c0_113] : memref<64x32x64xf32, #tpu.memory_space<vmem>>, vector<1x32x64xf32>
    %196 = vector.shape_cast %195 : vector<1x32x64xf32> to vector<32x64xf32>
    %197 = vector.shape_cast %194 : vector<32x64xf32> to vector<1x32x64xf32>
    tpu.vector_store %arg14[%c38, %c0_112, %c0_113], %197 {strides = array<i32>} : memref<64x32x64xf32, #tpu.memory_space<vmem>>, vector<1x32x64xf32>,
    %198 = vector.extract_strided_slice %169 {offsets = [0, 448], sizes = [32, 64], strides = [1, 1]} : vector<32x512xf32> to vector<32x64xf32>
    %c39 = arith.constant 39 : index
    %c0_114 = arith.constant 0 : index
    %c0_115 = arith.constant 0 : index
    %199 = vector.load %arg14[%c39, %c0_114, %c0_115] : memref<64x32x64xf32, #tpu.memory_space<vmem>>, vector<1x32x64xf32>
    %200 = vector.shape_cast %199 : vector<1x32x64xf32> to vector<32x64xf32>
    %201 = vector.shape_cast %198 : vector<32x64xf32> to vector<1x32x64xf32>
    tpu.vector_store %arg14[%c39, %c0_114, %c0_115], %201 {strides = array<i32>} : memref<64x32x64xf32, #tpu.memory_space<vmem>>, vector<1x32x64xf32>,
    %c0_116 = arith.constant 0 : index
    %c2560 = arith.constant 2560 : index
    %202 = vector.load %arg8[%c0_116, %c2560] : memref<128x4096xbf16, #tpu.memory_space<vmem>>, vector<128x512xbf16>
    %cst_117 = arith.constant dense<0.000000e+00> : vector<32x512xf32>
    %203 = tpu.matmul %16, %202, %cst_117 {dimension_numbers = #tpu.dot_dimension_numbers<[1], [0], [0], [1], [0, 0, 1, 1], [], []>} : vector<32x128xbf16>, vector<128x512xbf16>, vector<32x512xf32> -> vector<32x512xf32>
    %c0_118 = arith.constant 0 : index
    %c2560_119 = arith.constant 2560 : index
    %204 = vector.load %arg9[%c0_118, %c2560_119] : memref<1x4096xf32, #tpu.memory_space<vmem>>, vector<1x512xf32>
    %205 = vector.broadcast %204 : vector<1x512xf32> to vector<32x512xf32>
    %206 = arith.addf %203, %205 : vector<32x512xf32>
    %207 = vector.extract_strided_slice %206 {offsets = [0, 0], sizes = [32, 64], strides = [1, 1]} : vector<32x512xf32> to vector<32x64xf32>
    %c40 = arith.constant 40 : index
    %c0_120 = arith.constant 0 : index
    %c0_121 = arith.constant 0 : index
    %208 = vector.load %arg14[%c40, %c0_120, %c0_121] : memref<64x32x64xf32, #tpu.memory_space<vmem>>, vector<1x32x64xf32>
    %209 = vector.shape_cast %208 : vector<1x32x64xf32> to vector<32x64xf32>
    %210 = vector.shape_cast %207 : vector<32x64xf32> to vector<1x32x64xf32>
    tpu.vector_store %arg14[%c40, %c0_120, %c0_121], %210 {strides = array<i32>} : memref<64x32x64xf32, #tpu.memory_space<vmem>>, vector<1x32x64xf32>,
    %211 = vector.extract_strided_slice %206 {offsets = [0, 64], sizes = [32, 64], strides = [1, 1]} : vector<32x512xf32> to vector<32x64xf32>
    %c41 = arith.constant 41 : index
    %c0_122 = arith.constant 0 : index
    %c0_123 = arith.constant 0 : index
    %212 = vector.load %arg14[%c41, %c0_122, %c0_123] : memref<64x32x64xf32, #tpu.memory_space<vmem>>, vector<1x32x64xf32>
    %213 = vector.shape_cast %212 : vector<1x32x64xf32> to vector<32x64xf32>
    %214 = vector.shape_cast %211 : vector<32x64xf32> to vector<1x32x64xf32>
    tpu.vector_store %arg14[%c41, %c0_122, %c0_123], %214 {strides = array<i32>} : memref<64x32x64xf32, #tpu.memory_space<vmem>>, vector<1x32x64xf32>,
    %215 = vector.extract_strided_slice %206 {offsets = [0, 128], sizes = [32, 64], strides = [1, 1]} : vector<32x512xf32> to vector<32x64xf32>
    %c42 = arith.constant 42 : index
    %c0_124 = arith.constant 0 : index
    %c0_125 = arith.constant 0 : index
    %216 = vector.load %arg14[%c42, %c0_124, %c0_125] : memref<64x32x64xf32, #tpu.memory_space<vmem>>, vector<1x32x64xf32>
    %217 = vector.shape_cast %216 : vector<1x32x64xf32> to vector<32x64xf32>
    %218 = vector.shape_cast %215 : vector<32x64xf32> to vector<1x32x64xf32>
    tpu.vector_store %arg14[%c42, %c0_124, %c0_125], %218 {strides = array<i32>} : memref<64x32x64xf32, #tpu.memory_space<vmem>>, vector<1x32x64xf32>,
    %219 = vector.extract_strided_slice %206 {offsets = [0, 192], sizes = [32, 64], strides = [1, 1]} : vector<32x512xf32> to vector<32x64xf32>
    %c43 = arith.constant 43 : index
    %c0_126 = arith.constant 0 : index
    %c0_127 = arith.constant 0 : index
    %220 = vector.load %arg14[%c43, %c0_126, %c0_127] : memref<64x32x64xf32, #tpu.memory_space<vmem>>, vector<1x32x64xf32>
    %221 = vector.shape_cast %220 : vector<1x32x64xf32> to vector<32x64xf32>
    %222 = vector.shape_cast %219 : vector<32x64xf32> to vector<1x32x64xf32>
    tpu.vector_store %arg14[%c43, %c0_126, %c0_127], %222 {strides = array<i32>} : memref<64x32x64xf32, #tpu.memory_space<vmem>>, vector<1x32x64xf32>,
    %223 = vector.extract_strided_slice %206 {offsets = [0, 256], sizes = [32, 64], strides = [1, 1]} : vector<32x512xf32> to vector<32x64xf32>
    %c44 = arith.constant 44 : index
    %c0_128 = arith.constant 0 : index
    %c0_129 = arith.constant 0 : index
    %224 = vector.load %arg14[%c44, %c0_128, %c0_129] : memref<64x32x64xf32, #tpu.memory_space<vmem>>, vector<1x32x64xf32>
    %225 = vector.shape_cast %224 : vector<1x32x64xf32> to vector<32x64xf32>
    %226 = vector.shape_cast %223 : vector<32x64xf32> to vector<1x32x64xf32>
    tpu.vector_store %arg14[%c44, %c0_128, %c0_129], %226 {strides = array<i32>} : memref<64x32x64xf32, #tpu.memory_space<vmem>>, vector<1x32x64xf32>,
    %227 = vector.extract_strided_slice %206 {offsets = [0, 320], sizes = [32, 64], strides = [1, 1]} : vector<32x512xf32> to vector<32x64xf32>
    %c45 = arith.constant 45 : index
    %c0_130 = arith.constant 0 : index
    %c0_131 = arith.constant 0 : index
    %228 = vector.load %arg14[%c45, %c0_130, %c0_131] : memref<64x32x64xf32, #tpu.memory_space<vmem>>, vector<1x32x64xf32>
    %229 = vector.shape_cast %228 : vector<1x32x64xf32> to vector<32x64xf32>
    %230 = vector.shape_cast %227 : vector<32x64xf32> to vector<1x32x64xf32>
    tpu.vector_store %arg14[%c45, %c0_130, %c0_131], %230 {strides = array<i32>} : memref<64x32x64xf32, #tpu.memory_space<vmem>>, vector<1x32x64xf32>,
    %231 = vector.extract_strided_slice %206 {offsets = [0, 384], sizes = [32, 64], strides = [1, 1]} : vector<32x512xf32> to vector<32x64xf32>
    %c46 = arith.constant 46 : index
    %c0_132 = arith.constant 0 : index
    %c0_133 = arith.constant 0 : index
    %232 = vector.load %arg14[%c46, %c0_132, %c0_133] : memref<64x32x64xf32, #tpu.memory_space<vmem>>, vector<1x32x64xf32>
    %233 = vector.shape_cast %232 : vector<1x32x64xf32> to vector<32x64xf32>
    %234 = vector.shape_cast %231 : vector<32x64xf32> to vector<1x32x64xf32>
    tpu.vector_store %arg14[%c46, %c0_132, %c0_133], %234 {strides = array<i32>} : memref<64x32x64xf32, #tpu.memory_space<vmem>>, vector<1x32x64xf32>,
    %235 = vector.extract_strided_slice %206 {offsets = [0, 448], sizes = [32, 64], strides = [1, 1]} : vector<32x512xf32> to vector<32x64xf32>
    %c47 = arith.constant 47 : index
    %c0_134 = arith.constant 0 : index
    %c0_135 = arith.constant 0 : index
    %236 = vector.load %arg14[%c47, %c0_134, %c0_135] : memref<64x32x64xf32, #tpu.memory_space<vmem>>, vector<1x32x64xf32>
    %237 = vector.shape_cast %236 : vector<1x32x64xf32> to vector<32x64xf32>
    %238 = vector.shape_cast %235 : vector<32x64xf32> to vector<1x32x64xf32>
    tpu.vector_store %arg14[%c47, %c0_134, %c0_135], %238 {strides = array<i32>} : memref<64x32x64xf32, #tpu.memory_space<vmem>>, vector<1x32x64xf32>,
    %c0_136 = arith.constant 0 : index
    %c3072 = arith.constant 3072 : index
    %239 = vector.load %arg8[%c0_136, %c3072] : memref<128x4096xbf16, #tpu.memory_space<vmem>>, vector<128x512xbf16>
    %cst_137 = arith.constant dense<0.000000e+00> : vector<32x512xf32>
    %240 = tpu.matmul %16, %239, %cst_137 {dimension_numbers = #tpu.dot_dimension_numbers<[1], [0], [0], [1], [0, 0, 1, 1], [], []>} : vector<32x128xbf16>, vector<128x512xbf16>, vector<32x512xf32> -> vector<32x512xf32>
    %c0_138 = arith.constant 0 : index
    %c3072_139 = arith.constant 3072 : index
    %241 = vector.load %arg9[%c0_138, %c3072_139] : memref<1x4096xf32, #tpu.memory_space<vmem>>, vector<1x512xf32>
    %242 = vector.broadcast %241 : vector<1x512xf32> to vector<32x512xf32>
    %243 = arith.addf %240, %242 : vector<32x512xf32>
    %244 = vector.extract_strided_slice %243 {offsets = [0, 0], sizes = [32, 64], strides = [1, 1]} : vector<32x512xf32> to vector<32x64xf32>
    %c48 = arith.constant 48 : index
    %c0_140 = arith.constant 0 : index
    %c0_141 = arith.constant 0 : index
    %245 = vector.load %arg14[%c48, %c0_140, %c0_141] : memref<64x32x64xf32, #tpu.memory_space<vmem>>, vector<1x32x64xf32>
    %246 = vector.shape_cast %245 : vector<1x32x64xf32> to vector<32x64xf32>
    %247 = vector.shape_cast %244 : vector<32x64xf32> to vector<1x32x64xf32>
    tpu.vector_store %arg14[%c48, %c0_140, %c0_141], %247 {strides = array<i32>} : memref<64x32x64xf32, #tpu.memory_space<vmem>>, vector<1x32x64xf32>,
    %248 = vector.extract_strided_slice %243 {offsets = [0, 64], sizes = [32, 64], strides = [1, 1]} : vector<32x512xf32> to vector<32x64xf32>
    %c49 = arith.constant 49 : index
    %c0_142 = arith.constant 0 : index
    %c0_143 = arith.constant 0 : index
    %249 = vector.load %arg14[%c49, %c0_142, %c0_143] : memref<64x32x64xf32, #tpu.memory_space<vmem>>, vector<1x32x64xf32>
    %250 = vector.shape_cast %249 : vector<1x32x64xf32> to vector<32x64xf32>
    %251 = vector.shape_cast %248 : vector<32x64xf32> to vector<1x32x64xf32>
    tpu.vector_store %arg14[%c49, %c0_142, %c0_143], %251 {strides = array<i32>} : memref<64x32x64xf32, #tpu.memory_space<vmem>>, vector<1x32x64xf32>,
    %252 = vector.extract_strided_slice %243 {offsets = [0, 128], sizes = [32, 64], strides = [1, 1]} : vector<32x512xf32> to vector<32x64xf32>
    %c50 = arith.constant 50 : index
    %c0_144 = arith.constant 0 : index
    %c0_145 = arith.constant 0 : index
    %253 = vector.load %arg14[%c50, %c0_144, %c0_145] : memref<64x32x64xf32, #tpu.memory_space<vmem>>, vector<1x32x64xf32>
    %254 = vector.shape_cast %253 : vector<1x32x64xf32> to vector<32x64xf32>
    %255 = vector.shape_cast %252 : vector<32x64xf32> to vector<1x32x64xf32>
    tpu.vector_store %arg14[%c50, %c0_144, %c0_145], %255 {strides = array<i32>} : memref<64x32x64xf32, #tpu.memory_space<vmem>>, vector<1x32x64xf32>,
    %256 = vector.extract_strided_slice %243 {offsets = [0, 192], sizes = [32, 64], strides = [1, 1]} : vector<32x512xf32> to vector<32x64xf32>
    %c51 = arith.constant 51 : index
    %c0_146 = arith.constant 0 : index
    %c0_147 = arith.constant 0 : index
    %257 = vector.load %arg14[%c51, %c0_146, %c0_147] : memref<64x32x64xf32, #tpu.memory_space<vmem>>, vector<1x32x64xf32>
    %258 = vector.shape_cast %257 : vector<1x32x64xf32> to vector<32x64xf32>
    %259 = vector.shape_cast %256 : vector<32x64xf32> to vector<1x32x64xf32>
    tpu.vector_store %arg14[%c51, %c0_146, %c0_147], %259 {strides = array<i32>} : memref<64x32x64xf32, #tpu.memory_space<vmem>>, vector<1x32x64xf32>,
    %260 = vector.extract_strided_slice %243 {offsets = [0, 256], sizes = [32, 64], strides = [1, 1]} : vector<32x512xf32> to vector<32x64xf32>
    %c52 = arith.constant 52 : index
    %c0_148 = arith.constant 0 : index
    %c0_149 = arith.constant 0 : index
    %261 = vector.load %arg14[%c52, %c0_148, %c0_149] : memref<64x32x64xf32, #tpu.memory_space<vmem>>, vector<1x32x64xf32>
    %262 = vector.shape_cast %261 : vector<1x32x64xf32> to vector<32x64xf32>
    %263 = vector.shape_cast %260 : vector<32x64xf32> to vector<1x32x64xf32>
    tpu.vector_store %arg14[%c52, %c0_148, %c0_149], %263 {strides = array<i32>} : memref<64x32x64xf32, #tpu.memory_space<vmem>>, vector<1x32x64xf32>,
    %264 = vector.extract_strided_slice %243 {offsets = [0, 320], sizes = [32, 64], strides = [1, 1]} : vector<32x512xf32> to vector<32x64xf32>
    %c53 = arith.constant 53 : index
    %c0_150 = arith.constant 0 : index
    %c0_151 = arith.constant 0 : index
    %265 = vector.load %arg14[%c53, %c0_150, %c0_151] : memref<64x32x64xf32, #tpu.memory_space<vmem>>, vector<1x32x64xf32>
    %266 = vector.shape_cast %265 : vector<1x32x64xf32> to vector<32x64xf32>
    %267 = vector.shape_cast %264 : vector<32x64xf32> to vector<1x32x64xf32>
    tpu.vector_store %arg14[%c53, %c0_150, %c0_151], %267 {strides = array<i32>} : memref<64x32x64xf32, #tpu.memory_space<vmem>>, vector<1x32x64xf32>,
    %268 = vector.extract_strided_slice %243 {offsets = [0, 384], sizes = [32, 64], strides = [1, 1]} : vector<32x512xf32> to vector<32x64xf32>
    %c54 = arith.constant 54 : index
    %c0_152 = arith.constant 0 : index
    %c0_153 = arith.constant 0 : index
    %269 = vector.load %arg14[%c54, %c0_152, %c0_153] : memref<64x32x64xf32, #tpu.memory_space<vmem>>, vector<1x32x64xf32>
    %270 = vector.shape_cast %269 : vector<1x32x64xf32> to vector<32x64xf32>
    %271 = vector.shape_cast %268 : vector<32x64xf32> to vector<1x32x64xf32>
    tpu.vector_store %arg14[%c54, %c0_152, %c0_153], %271 {strides = array<i32>} : memref<64x32x64xf32, #tpu.memory_space<vmem>>, vector<1x32x64xf32>,
    %272 = vector.extract_strided_slice %243 {offsets = [0, 448], sizes = [32, 64], strides = [1, 1]} : vector<32x512xf32> to vector<32x64xf32>
    %c55 = arith.constant 55 : index
    %c0_154 = arith.constant 0 : index
    %c0_155 = arith.constant 0 : index
    %273 = vector.load %arg14[%c55, %c0_154, %c0_155] : memref<64x32x64xf32, #tpu.memory_space<vmem>>, vector<1x32x64xf32>
    %274 = vector.shape_cast %273 : vector<1x32x64xf32> to vector<32x64xf32>
    %275 = vector.shape_cast %272 : vector<32x64xf32> to vector<1x32x64xf32>
    tpu.vector_store %arg14[%c55, %c0_154, %c0_155], %275 {strides = array<i32>} : memref<64x32x64xf32, #tpu.memory_space<vmem>>, vector<1x32x64xf32>,
    %c0_156 = arith.constant 0 : index
    %c3584 = arith.constant 3584 : index
    %276 = vector.load %arg8[%c0_156, %c3584] : memref<128x4096xbf16, #tpu.memory_space<vmem>>, vector<128x512xbf16>
    %cst_157 = arith.constant dense<0.000000e+00> : vector<32x512xf32>
    %277 = tpu.matmul %16, %276, %cst_157 {dimension_numbers = #tpu.dot_dimension_numbers<[1], [0], [0], [1], [0, 0, 1, 1], [], []>} : vector<32x128xbf16>, vector<128x512xbf16>, vector<32x512xf32> -> vector<32x512xf32>
    %c0_158 = arith.constant 0 : index
    %c3584_159 = arith.constant 3584 : index
    %278 = vector.load %arg9[%c0_158, %c3584_159] : memref<1x4096xf32, #tpu.memory_space<vmem>>, vector<1x512xf32>
    %279 = vector.broadcast %278 : vector<1x512xf32> to vector<32x512xf32>
    %280 = arith.addf %277, %279 : vector<32x512xf32>
    %281 = vector.extract_strided_slice %280 {offsets = [0, 0], sizes = [32, 64], strides = [1, 1]} : vector<32x512xf32> to vector<32x64xf32>
    %c56 = arith.constant 56 : index
    %c0_160 = arith.constant 0 : index
    %c0_161 = arith.constant 0 : index
    %282 = vector.load %arg14[%c56, %c0_160, %c0_161] : memref<64x32x64xf32, #tpu.memory_space<vmem>>, vector<1x32x64xf32>
    %283 = vector.shape_cast %282 : vector<1x32x64xf32> to vector<32x64xf32>
    %284 = vector.shape_cast %281 : vector<32x64xf32> to vector<1x32x64xf32>
    tpu.vector_store %arg14[%c56, %c0_160, %c0_161], %284 {strides = array<i32>} : memref<64x32x64xf32, #tpu.memory_space<vmem>>, vector<1x32x64xf32>,
    %285 = vector.extract_strided_slice %280 {offsets = [0, 64], sizes = [32, 64], strides = [1, 1]} : vector<32x512xf32> to vector<32x64xf32>
    %c57 = arith.constant 57 : index
    %c0_162 = arith.constant 0 : index
    %c0_163 = arith.constant 0 : index
    %286 = vector.load %arg14[%c57, %c0_162, %c0_163] : memref<64x32x64xf32, #tpu.memory_space<vmem>>, vector<1x32x64xf32>
    %287 = vector.shape_cast %286 : vector<1x32x64xf32> to vector<32x64xf32>
    %288 = vector.shape_cast %285 : vector<32x64xf32> to vector<1x32x64xf32>
    tpu.vector_store %arg14[%c57, %c0_162, %c0_163], %288 {strides = array<i32>} : memref<64x32x64xf32, #tpu.memory_space<vmem>>, vector<1x32x64xf32>,
    %289 = vector.extract_strided_slice %280 {offsets = [0, 128], sizes = [32, 64], strides = [1, 1]} : vector<32x512xf32> to vector<32x64xf32>
    %c58 = arith.constant 58 : index
    %c0_164 = arith.constant 0 : index
    %c0_165 = arith.constant 0 : index
    %290 = vector.load %arg14[%c58, %c0_164, %c0_165] : memref<64x32x64xf32, #tpu.memory_space<vmem>>, vector<1x32x64xf32>
    %291 = vector.shape_cast %290 : vector<1x32x64xf32> to vector<32x64xf32>
    %292 = vector.shape_cast %289 : vector<32x64xf32> to vector<1x32x64xf32>
    tpu.vector_store %arg14[%c58, %c0_164, %c0_165], %292 {strides = array<i32>} : memref<64x32x64xf32, #tpu.memory_space<vmem>>, vector<1x32x64xf32>,
    %293 = vector.extract_strided_slice %280 {offsets = [0, 192], sizes = [32, 64], strides = [1, 1]} : vector<32x512xf32> to vector<32x64xf32>
    %c59 = arith.constant 59 : index
    %c0_166 = arith.constant 0 : index
    %c0_167 = arith.constant 0 : index
    %294 = vector.load %arg14[%c59, %c0_166, %c0_167] : memref<64x32x64xf32, #tpu.memory_space<vmem>>, vector<1x32x64xf32>
    %295 = vector.shape_cast %294 : vector<1x32x64xf32> to vector<32x64xf32>
    %296 = vector.shape_cast %293 : vector<32x64xf32> to vector<1x32x64xf32>
    tpu.vector_store %arg14[%c59, %c0_166, %c0_167], %296 {strides = array<i32>} : memref<64x32x64xf32, #tpu.memory_space<vmem>>, vector<1x32x64xf32>,
    %297 = vector.extract_strided_slice %280 {offsets = [0, 256], sizes = [32, 64], strides = [1, 1]} : vector<32x512xf32> to vector<32x64xf32>
    %c60 = arith.constant 60 : index
    %c0_168 = arith.constant 0 : index
    %c0_169 = arith.constant 0 : index
    %298 = vector.load %arg14[%c60, %c0_168, %c0_169] : memref<64x32x64xf32, #tpu.memory_space<vmem>>, vector<1x32x64xf32>
    %299 = vector.shape_cast %298 : vector<1x32x64xf32> to vector<32x64xf32>
    %300 = vector.shape_cast %297 : vector<32x64xf32> to vector<1x32x64xf32>
    tpu.vector_store %arg14[%c60, %c0_168, %c0_169], %300 {strides = array<i32>} : memref<64x32x64xf32, #tpu.memory_space<vmem>>, vector<1x32x64xf32>,
    %301 = vector.extract_strided_slice %280 {offsets = [0, 320], sizes = [32, 64], strides = [1, 1]} : vector<32x512xf32> to vector<32x64xf32>
    %c61 = arith.constant 61 : index
    %c0_170 = arith.constant 0 : index
    %c0_171 = arith.constant 0 : index
    %302 = vector.load %arg14[%c61, %c0_170, %c0_171] : memref<64x32x64xf32, #tpu.memory_space<vmem>>, vector<1x32x64xf32>
    %303 = vector.shape_cast %302 : vector<1x32x64xf32> to vector<32x64xf32>
    %304 = vector.shape_cast %301 : vector<32x64xf32> to vector<1x32x64xf32>
    tpu.vector_store %arg14[%c61, %c0_170, %c0_171], %304 {strides = array<i32>} : memref<64x32x64xf32, #tpu.memory_space<vmem>>, vector<1x32x64xf32>,
    %305 = vector.extract_strided_slice %280 {offsets = [0, 384], sizes = [32, 64], strides = [1, 1]} : vector<32x512xf32> to vector<32x64xf32>
    %c62 = arith.constant 62 : index
    %c0_172 = arith.constant 0 : index
    %c0_173 = arith.constant 0 : index
    %306 = vector.load %arg14[%c62, %c0_172, %c0_173] : memref<64x32x64xf32, #tpu.memory_space<vmem>>, vector<1x32x64xf32>
    %307 = vector.shape_cast %306 : vector<1x32x64xf32> to vector<32x64xf32>
    %308 = vector.shape_cast %305 : vector<32x64xf32> to vector<1x32x64xf32>
    tpu.vector_store %arg14[%c62, %c0_172, %c0_173], %308 {strides = array<i32>} : memref<64x32x64xf32, #tpu.memory_space<vmem>>, vector<1x32x64xf32>,
    %309 = vector.extract_strided_slice %280 {offsets = [0, 448], sizes = [32, 64], strides = [1, 1]} : vector<32x512xf32> to vector<32x64xf32>
    %c63 = arith.constant 63 : index
    %c0_174 = arith.constant 0 : index
    %c0_175 = arith.constant 0 : index
    %310 = vector.load %arg14[%c63, %c0_174, %c0_175] : memref<64x32x64xf32, #tpu.memory_space<vmem>>, vector<1x32x64xf32>
    %311 = vector.shape_cast %310 : vector<1x32x64xf32> to vector<32x64xf32>
    %312 = vector.shape_cast %309 : vector<32x64xf32> to vector<1x32x64xf32>
    tpu.vector_store %arg14[%c63, %c0_174, %c0_175], %312 {strides = array<i32>} : memref<64x32x64xf32, #tpu.memory_space<vmem>>, vector<1x32x64xf32>,
    %c0_i32 = arith.constant 0 : i32
    %c6_i32 = arith.constant 6 : i32
    %313 = arith.addi %c0_i32, %c6_i32 : i32
    %c1_i32 = arith.constant 1 : i32
    %314 = scf.for %arg15 = %c0_i32 to %313 step %c1_i32 iter_args(%arg16 = %7) -> (vector<16x64xf32>)  : i32 {
      %c0_178 = arith.constant 0 : index
      %c0_179 = arith.constant 0 : index
      %316 = vector.load %arg2[%c0_178, %c0_179] : memref<32x16xbf16, #tpu.memory_space<vmem>>, vector<32x16xbf16>
      %317 = arith.truncf %arg16 : vector<16x64xf32> to vector<16x64xbf16>
      %cst_180 = arith.constant dense<0.000000e+00> : vector<32x64xf32>
      %318 = tpu.matmul %316, %317, %cst_180 {dimension_numbers = #tpu.dot_dimension_numbers<[1], [0], [0], [1], [0, 0, 1, 1], [], []>} : vector<32x16xbf16>, vector<16x64xbf16>, vector<32x64xf32> -> vector<32x64xf32>
      %cst_181 = arith.constant 0.000000e+00 : f32
      %319 = vector.broadcast %cst_181 : f32 to vector<32x64xf32>
      %cst_182 = arith.constant 0.000000e+00 : f32
      %320 = vector.broadcast %cst_182 : f32 to vector<32x64xf32>
      %cst_183 = arith.constant 0.000000e+00 : f32
      %321 = vector.broadcast %cst_183 : f32 to vector<32x64xf32>
      %cst_184 = arith.constant 0.000000e+00 : f32
      %322 = vector.broadcast %cst_184 : f32 to vector<32x64xf32>
      %323 = vector.extract_strided_slice %318 {offsets = [0, 0], sizes = [32, 1], strides = [1, 1]} : vector<32x64xf32> to vector<32x1xf32>
      %c0_185 = arith.constant 0 : index
      %c0_186 = arith.constant 0 : index
      %c0_187 = arith.constant 0 : index
      %324 = vector.load %arg14[%c0_185, %c0_186, %c0_187] : memref<64x32x64xf32, #tpu.memory_space<vmem>>, vector<1x32x64xf32>
      %325 = vector.shape_cast %324 : vector<1x32x64xf32> to vector<32x64xf32>
      %326 = vector.broadcast %323 : vector<32x1xf32> to vector<32x64xf32>
      %327 = arith.mulf %326, %325 : vector<32x64xf32>
      %328 = arith.addf %319, %327 : vector<32x64xf32>
      %329 = vector.extract_strided_slice %318 {offsets = [0, 1], sizes = [32, 1], strides = [1, 1]} : vector<32x64xf32> to vector<32x1xf32>
      %c1_188 = arith.constant 1 : index
      %c0_189 = arith.constant 0 : index
      %c0_190 = arith.constant 0 : index
      %330 = vector.load %arg14[%c1_188, %c0_189, %c0_190] : memref<64x32x64xf32, #tpu.memory_space<vmem>>, vector<1x32x64xf32>
      %331 = vector.shape_cast %330 : vector<1x32x64xf32> to vector<32x64xf32>
      %332 = vector.broadcast %329 : vector<32x1xf32> to vector<32x64xf32>
      %333 = arith.mulf %332, %331 : vector<32x64xf32>
      %334 = arith.addf %320, %333 : vector<32x64xf32>
      %335 = vector.extract_strided_slice %318 {offsets = [0, 2], sizes = [32, 1], strides = [1, 1]} : vector<32x64xf32> to vector<32x1xf32>
      %c2_191 = arith.constant 2 : index
      %c0_192 = arith.constant 0 : index
      %c0_193 = arith.constant 0 : index
      %336 = vector.load %arg14[%c2_191, %c0_192, %c0_193] : memref<64x32x64xf32, #tpu.memory_space<vmem>>, vector<1x32x64xf32>
      %337 = vector.shape_cast %336 : vector<1x32x64xf32> to vector<32x64xf32>
      %338 = vector.broadcast %335 : vector<32x1xf32> to vector<32x64xf32>
      %339 = arith.mulf %338, %337 : vector<32x64xf32>
      %340 = arith.addf %321, %339 : vector<32x64xf32>
      %341 = vector.extract_strided_slice %318 {offsets = [0, 3], sizes = [32, 1], strides = [1, 1]} : vector<32x64xf32> to vector<32x1xf32>
      %c3_194 = arith.constant 3 : index
      %c0_195 = arith.constant 0 : index
      %c0_196 = arith.constant 0 : index
      %342 = vector.load %arg14[%c3_194, %c0_195, %c0_196] : memref<64x32x64xf32, #tpu.memory_space<vmem>>, vector<1x32x64xf32>
      %343 = vector.shape_cast %342 : vector<1x32x64xf32> to vector<32x64xf32>
      %344 = vector.broadcast %341 : vector<32x1xf32> to vector<32x64xf32>
      %345 = arith.mulf %344, %343 : vector<32x64xf32>
      %346 = arith.addf %322, %345 : vector<32x64xf32>
      %347 = vector.extract_strided_slice %318 {offsets = [0, 4], sizes = [32, 1], strides = [1, 1]} : vector<32x64xf32> to vector<32x1xf32>
      %c4_197 = arith.constant 4 : index
      %c0_198 = arith.constant 0 : index
      %c0_199 = arith.constant 0 : index
      %348 = vector.load %arg14[%c4_197, %c0_198, %c0_199] : memref<64x32x64xf32, #tpu.memory_space<vmem>>, vector<1x32x64xf32>
      %349 = vector.shape_cast %348 : vector<1x32x64xf32> to vector<32x64xf32>
      %350 = vector.broadcast %347 : vector<32x1xf32> to vector<32x64xf32>
      %351 = arith.mulf %350, %349 : vector<32x64xf32>
      %352 = arith.addf %328, %351 : vector<32x64xf32>
      %353 = vector.extract_strided_slice %318 {offsets = [0, 5], sizes = [32, 1], strides = [1, 1]} : vector<32x64xf32> to vector<32x1xf32>
      %c5_200 = arith.constant 5 : index
      %c0_201 = arith.constant 0 : index
      %c0_202 = arith.constant 0 : index
      %354 = vector.load %arg14[%c5_200, %c0_201, %c0_202] : memref<64x32x64xf32, #tpu.memory_space<vmem>>, vector<1x32x64xf32>
      %355 = vector.shape_cast %354 : vector<1x32x64xf32> to vector<32x64xf32>
      %356 = vector.broadcast %353 : vector<32x1xf32> to vector<32x64xf32>
      %357 = arith.mulf %356, %355 : vector<32x64xf32>
      %358 = arith.addf %334, %357 : vector<32x64xf32>
      %359 = vector.extract_strided_slice %318 {offsets = [0, 6], sizes = [32, 1], strides = [1, 1]} : vector<32x64xf32> to vector<32x1xf32>
      %c6_203 = arith.constant 6 : index
      %c0_204 = arith.constant 0 : index
      %c0_205 = arith.constant 0 : index
      %360 = vector.load %arg14[%c6_203, %c0_204, %c0_205] : memref<64x32x64xf32, #tpu.memory_space<vmem>>, vector<1x32x64xf32>
      %361 = vector.shape_cast %360 : vector<1x32x64xf32> to vector<32x64xf32>
      %362 = vector.broadcast %359 : vector<32x1xf32> to vector<32x64xf32>
      %363 = arith.mulf %362, %361 : vector<32x64xf32>
      %364 = arith.addf %340, %363 : vector<32x64xf32>
      %365 = vector.extract_strided_slice %318 {offsets = [0, 7], sizes = [32, 1], strides = [1, 1]} : vector<32x64xf32> to vector<32x1xf32>
      %c7_206 = arith.constant 7 : index
      %c0_207 = arith.constant 0 : index
      %c0_208 = arith.constant 0 : index
      %366 = vector.load %arg14[%c7_206, %c0_207, %c0_208] : memref<64x32x64xf32, #tpu.memory_space<vmem>>, vector<1x32x64xf32>
      %367 = vector.shape_cast %366 : vector<1x32x64xf32> to vector<32x64xf32>
      %368 = vector.broadcast %365 : vector<32x1xf32> to vector<32x64xf32>
      %369 = arith.mulf %368, %367 : vector<32x64xf32>
      %370 = arith.addf %346, %369 : vector<32x64xf32>
      %371 = vector.extract_strided_slice %318 {offsets = [0, 8], sizes = [32, 1], strides = [1, 1]} : vector<32x64xf32> to vector<32x1xf32>
      %c8_209 = arith.constant 8 : index
      %c0_210 = arith.constant 0 : index
      %c0_211 = arith.constant 0 : index
      %372 = vector.load %arg14[%c8_209, %c0_210, %c0_211] : memref<64x32x64xf32, #tpu.memory_space<vmem>>, vector<1x32x64xf32>
      %373 = vector.shape_cast %372 : vector<1x32x64xf32> to vector<32x64xf32>
      %374 = vector.broadcast %371 : vector<32x1xf32> to vector<32x64xf32>
      %375 = arith.mulf %374, %373 : vector<32x64xf32>
      %376 = arith.addf %352, %375 : vector<32x64xf32>
      %377 = vector.extract_strided_slice %318 {offsets = [0, 9], sizes = [32, 1], strides = [1, 1]} : vector<32x64xf32> to vector<32x1xf32>
      %c9_212 = arith.constant 9 : index
      %c0_213 = arith.constant 0 : index
      %c0_214 = arith.constant 0 : index
      %378 = vector.load %arg14[%c9_212, %c0_213, %c0_214] : memref<64x32x64xf32, #tpu.memory_space<vmem>>, vector<1x32x64xf32>
      %379 = vector.shape_cast %378 : vector<1x32x64xf32> to vector<32x64xf32>
      %380 = vector.broadcast %377 : vector<32x1xf32> to vector<32x64xf32>
      %381 = arith.mulf %380, %379 : vector<32x64xf32>
      %382 = arith.addf %358, %381 : vector<32x64xf32>
      %383 = vector.extract_strided_slice %318 {offsets = [0, 10], sizes = [32, 1], strides = [1, 1]} : vector<32x64xf32> to vector<32x1xf32>
      %c10_215 = arith.constant 10 : index
      %c0_216 = arith.constant 0 : index
      %c0_217 = arith.constant 0 : index
      %384 = vector.load %arg14[%c10_215, %c0_216, %c0_217] : memref<64x32x64xf32, #tpu.memory_space<vmem>>, vector<1x32x64xf32>
      %385 = vector.shape_cast %384 : vector<1x32x64xf32> to vector<32x64xf32>
      %386 = vector.broadcast %383 : vector<32x1xf32> to vector<32x64xf32>
      %387 = arith.mulf %386, %385 : vector<32x64xf32>
      %388 = arith.addf %364, %387 : vector<32x64xf32>
      %389 = vector.extract_strided_slice %318 {offsets = [0, 11], sizes = [32, 1], strides = [1, 1]} : vector<32x64xf32> to vector<32x1xf32>
      %c11_218 = arith.constant 11 : index
      %c0_219 = arith.constant 0 : index
      %c0_220 = arith.constant 0 : index
      %390 = vector.load %arg14[%c11_218, %c0_219, %c0_220] : memref<64x32x64xf32, #tpu.memory_space<vmem>>, vector<1x32x64xf32>
      %391 = vector.shape_cast %390 : vector<1x32x64xf32> to vector<32x64xf32>
      %392 = vector.broadcast %389 : vector<32x1xf32> to vector<32x64xf32>
      %393 = arith.mulf %392, %391 : vector<32x64xf32>
      %394 = arith.addf %370, %393 : vector<32x64xf32>
      %395 = vector.extract_strided_slice %318 {offsets = [0, 12], sizes = [32, 1], strides = [1, 1]} : vector<32x64xf32> to vector<32x1xf32>
      %c12_221 = arith.constant 12 : index
      %c0_222 = arith.constant 0 : index
      %c0_223 = arith.constant 0 : index
      %396 = vector.load %arg14[%c12_221, %c0_222, %c0_223] : memref<64x32x64xf32, #tpu.memory_space<vmem>>, vector<1x32x64xf32>
      %397 = vector.shape_cast %396 : vector<1x32x64xf32> to vector<32x64xf32>
      %398 = vector.broadcast %395 : vector<32x1xf32> to vector<32x64xf32>
      %399 = arith.mulf %398, %397 : vector<32x64xf32>
      %400 = arith.addf %376, %399 : vector<32x64xf32>
      %401 = vector.extract_strided_slice %318 {offsets = [0, 13], sizes = [32, 1], strides = [1, 1]} : vector<32x64xf32> to vector<32x1xf32>
      %c13_224 = arith.constant 13 : index
      %c0_225 = arith.constant 0 : index
      %c0_226 = arith.constant 0 : index
      %402 = vector.load %arg14[%c13_224, %c0_225, %c0_226] : memref<64x32x64xf32, #tpu.memory_space<vmem>>, vector<1x32x64xf32>
      %403 = vector.shape_cast %402 : vector<1x32x64xf32> to vector<32x64xf32>
      %404 = vector.broadcast %401 : vector<32x1xf32> to vector<32x64xf32>
      %405 = arith.mulf %404, %403 : vector<32x64xf32>
      %406 = arith.addf %382, %405 : vector<32x64xf32>
      %407 = vector.extract_strided_slice %318 {offsets = [0, 14], sizes = [32, 1], strides = [1, 1]} : vector<32x64xf32> to vector<32x1xf32>
      %c14_227 = arith.constant 14 : index
      %c0_228 = arith.constant 0 : index
      %c0_229 = arith.constant 0 : index
      %408 = vector.load %arg14[%c14_227, %c0_228, %c0_229] : memref<64x32x64xf32, #tpu.memory_space<vmem>>, vector<1x32x64xf32>
      %409 = vector.shape_cast %408 : vector<1x32x64xf32> to vector<32x64xf32>
      %410 = vector.broadcast %407 : vector<32x1xf32> to vector<32x64xf32>
      %411 = arith.mulf %410, %409 : vector<32x64xf32>
      %412 = arith.addf %388, %411 : vector<32x64xf32>
      %413 = vector.extract_strided_slice %318 {offsets = [0, 15], sizes = [32, 1], strides = [1, 1]} : vector<32x64xf32> to vector<32x1xf32>
      %c15_230 = arith.constant 15 : index
      %c0_231 = arith.constant 0 : index
      %c0_232 = arith.constant 0 : index
      %414 = vector.load %arg14[%c15_230, %c0_231, %c0_232] : memref<64x32x64xf32, #tpu.memory_space<vmem>>, vector<1x32x64xf32>
      %415 = vector.shape_cast %414 : vector<1x32x64xf32> to vector<32x64xf32>
      %416 = vector.broadcast %413 : vector<32x1xf32> to vector<32x64xf32>
      %417 = arith.mulf %416, %415 : vector<32x64xf32>
      %418 = arith.addf %394, %417 : vector<32x64xf32>
      %419 = vector.extract_strided_slice %318 {offsets = [0, 16], sizes = [32, 1], strides = [1, 1]} : vector<32x64xf32> to vector<32x1xf32>
      %c16_233 = arith.constant 16 : index
      %c0_234 = arith.constant 0 : index
      %c0_235 = arith.constant 0 : index
      %420 = vector.load %arg14[%c16_233, %c0_234, %c0_235] : memref<64x32x64xf32, #tpu.memory_space<vmem>>, vector<1x32x64xf32>
      %421 = vector.shape_cast %420 : vector<1x32x64xf32> to vector<32x64xf32>
      %422 = vector.broadcast %419 : vector<32x1xf32> to vector<32x64xf32>
      %423 = arith.mulf %422, %421 : vector<32x64xf32>
      %424 = arith.addf %400, %423 : vector<32x64xf32>
      %425 = vector.extract_strided_slice %318 {offsets = [0, 17], sizes = [32, 1], strides = [1, 1]} : vector<32x64xf32> to vector<32x1xf32>
      %c17_236 = arith.constant 17 : index
      %c0_237 = arith.constant 0 : index
      %c0_238 = arith.constant 0 : index
      %426 = vector.load %arg14[%c17_236, %c0_237, %c0_238] : memref<64x32x64xf32, #tpu.memory_space<vmem>>, vector<1x32x64xf32>
      %427 = vector.shape_cast %426 : vector<1x32x64xf32> to vector<32x64xf32>
      %428 = vector.broadcast %425 : vector<32x1xf32> to vector<32x64xf32>
      %429 = arith.mulf %428, %427 : vector<32x64xf32>
      %430 = arith.addf %406, %429 : vector<32x64xf32>
      %431 = vector.extract_strided_slice %318 {offsets = [0, 18], sizes = [32, 1], strides = [1, 1]} : vector<32x64xf32> to vector<32x1xf32>
      %c18_239 = arith.constant 18 : index
      %c0_240 = arith.constant 0 : index
      %c0_241 = arith.constant 0 : index
      %432 = vector.load %arg14[%c18_239, %c0_240, %c0_241] : memref<64x32x64xf32, #tpu.memory_space<vmem>>, vector<1x32x64xf32>
      %433 = vector.shape_cast %432 : vector<1x32x64xf32> to vector<32x64xf32>
      %434 = vector.broadcast %431 : vector<32x1xf32> to vector<32x64xf32>
      %435 = arith.mulf %434, %433 : vector<32x64xf32>
      %436 = arith.addf %412, %435 : vector<32x64xf32>
      %437 = vector.extract_strided_slice %318 {offsets = [0, 19], sizes = [32, 1], strides = [1, 1]} : vector<32x64xf32> to vector<32x1xf32>
      %c19_242 = arith.constant 19 : index
      %c0_243 = arith.constant 0 : index
      %c0_244 = arith.constant 0 : index
      %438 = vector.load %arg14[%c19_242, %c0_243, %c0_244] : memref<64x32x64xf32, #tpu.memory_space<vmem>>, vector<1x32x64xf32>
      %439 = vector.shape_cast %438 : vector<1x32x64xf32> to vector<32x64xf32>
      %440 = vector.broadcast %437 : vector<32x1xf32> to vector<32x64xf32>
      %441 = arith.mulf %440, %439 : vector<32x64xf32>
      %442 = arith.addf %418, %441 : vector<32x64xf32>
      %443 = vector.extract_strided_slice %318 {offsets = [0, 20], sizes = [32, 1], strides = [1, 1]} : vector<32x64xf32> to vector<32x1xf32>
      %c20_245 = arith.constant 20 : index
      %c0_246 = arith.constant 0 : index
      %c0_247 = arith.constant 0 : index
      %444 = vector.load %arg14[%c20_245, %c0_246, %c0_247] : memref<64x32x64xf32, #tpu.memory_space<vmem>>, vector<1x32x64xf32>
      %445 = vector.shape_cast %444 : vector<1x32x64xf32> to vector<32x64xf32>
      %446 = vector.broadcast %443 : vector<32x1xf32> to vector<32x64xf32>
      %447 = arith.mulf %446, %445 : vector<32x64xf32>
      %448 = arith.addf %424, %447 : vector<32x64xf32>
      %449 = vector.extract_strided_slice %318 {offsets = [0, 21], sizes = [32, 1], strides = [1, 1]} : vector<32x64xf32> to vector<32x1xf32>
      %c21_248 = arith.constant 21 : index
      %c0_249 = arith.constant 0 : index
      %c0_250 = arith.constant 0 : index
      %450 = vector.load %arg14[%c21_248, %c0_249, %c0_250] : memref<64x32x64xf32, #tpu.memory_space<vmem>>, vector<1x32x64xf32>
      %451 = vector.shape_cast %450 : vector<1x32x64xf32> to vector<32x64xf32>
      %452 = vector.broadcast %449 : vector<32x1xf32> to vector<32x64xf32>
      %453 = arith.mulf %452, %451 : vector<32x64xf32>
      %454 = arith.addf %430, %453 : vector<32x64xf32>
      %455 = vector.extract_strided_slice %318 {offsets = [0, 22], sizes = [32, 1], strides = [1, 1]} : vector<32x64xf32> to vector<32x1xf32>
      %c22_251 = arith.constant 22 : index
      %c0_252 = arith.constant 0 : index
      %c0_253 = arith.constant 0 : index
      %456 = vector.load %arg14[%c22_251, %c0_252, %c0_253] : memref<64x32x64xf32, #tpu.memory_space<vmem>>, vector<1x32x64xf32>
      %457 = vector.shape_cast %456 : vector<1x32x64xf32> to vector<32x64xf32>
      %458 = vector.broadcast %455 : vector<32x1xf32> to vector<32x64xf32>
      %459 = arith.mulf %458, %457 : vector<32x64xf32>
      %460 = arith.addf %436, %459 : vector<32x64xf32>
      %461 = vector.extract_strided_slice %318 {offsets = [0, 23], sizes = [32, 1], strides = [1, 1]} : vector<32x64xf32> to vector<32x1xf32>
      %c23_254 = arith.constant 23 : index
      %c0_255 = arith.constant 0 : index
      %c0_256 = arith.constant 0 : index
      %462 = vector.load %arg14[%c23_254, %c0_255, %c0_256] : memref<64x32x64xf32, #tpu.memory_space<vmem>>, vector<1x32x64xf32>
      %463 = vector.shape_cast %462 : vector<1x32x64xf32> to vector<32x64xf32>
      %464 = vector.broadcast %461 : vector<32x1xf32> to vector<32x64xf32>
      %465 = arith.mulf %464, %463 : vector<32x64xf32>
      %466 = arith.addf %442, %465 : vector<32x64xf32>
      %467 = vector.extract_strided_slice %318 {offsets = [0, 24], sizes = [32, 1], strides = [1, 1]} : vector<32x64xf32> to vector<32x1xf32>
      %c24_257 = arith.constant 24 : index
      %c0_258 = arith.constant 0 : index
      %c0_259 = arith.constant 0 : index
      %468 = vector.load %arg14[%c24_257, %c0_258, %c0_259] : memref<64x32x64xf32, #tpu.memory_space<vmem>>, vector<1x32x64xf32>
      %469 = vector.shape_cast %468 : vector<1x32x64xf32> to vector<32x64xf32>
      %470 = vector.broadcast %467 : vector<32x1xf32> to vector<32x64xf32>
      %471 = arith.mulf %470, %469 : vector<32x64xf32>
      %472 = arith.addf %448, %471 : vector<32x64xf32>
      %473 = vector.extract_strided_slice %318 {offsets = [0, 25], sizes = [32, 1], strides = [1, 1]} : vector<32x64xf32> to vector<32x1xf32>
      %c25_260 = arith.constant 25 : index
      %c0_261 = arith.constant 0 : index
      %c0_262 = arith.constant 0 : index
      %474 = vector.load %arg14[%c25_260, %c0_261, %c0_262] : memref<64x32x64xf32, #tpu.memory_space<vmem>>, vector<1x32x64xf32>
      %475 = vector.shape_cast %474 : vector<1x32x64xf32> to vector<32x64xf32>
      %476 = vector.broadcast %473 : vector<32x1xf32> to vector<32x64xf32>
      %477 = arith.mulf %476, %475 : vector<32x64xf32>
      %478 = arith.addf %454, %477 : vector<32x64xf32>
      %479 = vector.extract_strided_slice %318 {offsets = [0, 26], sizes = [32, 1], strides = [1, 1]} : vector<32x64xf32> to vector<32x1xf32>
      %c26_263 = arith.constant 26 : index
      %c0_264 = arith.constant 0 : index
      %c0_265 = arith.constant 0 : index
      %480 = vector.load %arg14[%c26_263, %c0_264, %c0_265] : memref<64x32x64xf32, #tpu.memory_space<vmem>>, vector<1x32x64xf32>
      %481 = vector.shape_cast %480 : vector<1x32x64xf32> to vector<32x64xf32>
      %482 = vector.broadcast %479 : vector<32x1xf32> to vector<32x64xf32>
      %483 = arith.mulf %482, %481 : vector<32x64xf32>
      %484 = arith.addf %460, %483 : vector<32x64xf32>
      %485 = vector.extract_strided_slice %318 {offsets = [0, 27], sizes = [32, 1], strides = [1, 1]} : vector<32x64xf32> to vector<32x1xf32>
      %c27_266 = arith.constant 27 : index
      %c0_267 = arith.constant 0 : index
      %c0_268 = arith.constant 0 : index
      %486 = vector.load %arg14[%c27_266, %c0_267, %c0_268] : memref<64x32x64xf32, #tpu.memory_space<vmem>>, vector<1x32x64xf32>
      %487 = vector.shape_cast %486 : vector<1x32x64xf32> to vector<32x64xf32>
      %488 = vector.broadcast %485 : vector<32x1xf32> to vector<32x64xf32>
      %489 = arith.mulf %488, %487 : vector<32x64xf32>
      %490 = arith.addf %466, %489 : vector<32x64xf32>
      %491 = vector.extract_strided_slice %318 {offsets = [0, 28], sizes = [32, 1], strides = [1, 1]} : vector<32x64xf32> to vector<32x1xf32>
      %c28_269 = arith.constant 28 : index
      %c0_270 = arith.constant 0 : index
      %c0_271 = arith.constant 0 : index
      %492 = vector.load %arg14[%c28_269, %c0_270, %c0_271] : memref<64x32x64xf32, #tpu.memory_space<vmem>>, vector<1x32x64xf32>
      %493 = vector.shape_cast %492 : vector<1x32x64xf32> to vector<32x64xf32>
      %494 = vector.broadcast %491 : vector<32x1xf32> to vector<32x64xf32>
      %495 = arith.mulf %494, %493 : vector<32x64xf32>
      %496 = arith.addf %472, %495 : vector<32x64xf32>
      %497 = vector.extract_strided_slice %318 {offsets = [0, 29], sizes = [32, 1], strides = [1, 1]} : vector<32x64xf32> to vector<32x1xf32>
      %c29_272 = arith.constant 29 : index
      %c0_273 = arith.constant 0 : index
      %c0_274 = arith.constant 0 : index
      %498 = vector.load %arg14[%c29_272, %c0_273, %c0_274] : memref<64x32x64xf32, #tpu.memory_space<vmem>>, vector<1x32x64xf32>
      %499 = vector.shape_cast %498 : vector<1x32x64xf32> to vector<32x64xf32>
      %500 = vector.broadcast %497 : vector<32x1xf32> to vector<32x64xf32>
      %501 = arith.mulf %500, %499 : vector<32x64xf32>
      %502 = arith.addf %478, %501 : vector<32x64xf32>
      %503 = vector.extract_strided_slice %318 {offsets = [0, 30], sizes = [32, 1], strides = [1, 1]} : vector<32x64xf32> to vector<32x1xf32>
      %c30_275 = arith.constant 30 : index
      %c0_276 = arith.constant 0 : index
      %c0_277 = arith.constant 0 : index
      %504 = vector.load %arg14[%c30_275, %c0_276, %c0_277] : memref<64x32x64xf32, #tpu.memory_space<vmem>>, vector<1x32x64xf32>
      %505 = vector.shape_cast %504 : vector<1x32x64xf32> to vector<32x64xf32>
      %506 = vector.broadcast %503 : vector<32x1xf32> to vector<32x64xf32>
      %507 = arith.mulf %506, %505 : vector<32x64xf32>
      %508 = arith.addf %484, %507 : vector<32x64xf32>
      %509 = vector.extract_strided_slice %318 {offsets = [0, 31], sizes = [32, 1], strides = [1, 1]} : vector<32x64xf32> to vector<32x1xf32>
      %c31_278 = arith.constant 31 : index
      %c0_279 = arith.constant 0 : index
      %c0_280 = arith.constant 0 : index
      %510 = vector.load %arg14[%c31_278, %c0_279, %c0_280] : memref<64x32x64xf32, #tpu.memory_space<vmem>>, vector<1x32x64xf32>
      %511 = vector.shape_cast %510 : vector<1x32x64xf32> to vector<32x64xf32>
      %512 = vector.broadcast %509 : vector<32x1xf32> to vector<32x64xf32>
      %513 = arith.mulf %512, %511 : vector<32x64xf32>
      %514 = arith.addf %490, %513 : vector<32x64xf32>
      %515 = vector.extract_strided_slice %318 {offsets = [0, 32], sizes = [32, 1], strides = [1, 1]} : vector<32x64xf32> to vector<32x1xf32>
      %c32_281 = arith.constant 32 : index
      %c0_282 = arith.constant 0 : index
      %c0_283 = arith.constant 0 : index
      %516 = vector.load %arg14[%c32_281, %c0_282, %c0_283] : memref<64x32x64xf32, #tpu.memory_space<vmem>>, vector<1x32x64xf32>
      %517 = vector.shape_cast %516 : vector<1x32x64xf32> to vector<32x64xf32>
      %518 = vector.broadcast %515 : vector<32x1xf32> to vector<32x64xf32>
      %519 = arith.mulf %518, %517 : vector<32x64xf32>
      %520 = arith.addf %496, %519 : vector<32x64xf32>
      %521 = vector.extract_strided_slice %318 {offsets = [0, 33], sizes = [32, 1], strides = [1, 1]} : vector<32x64xf32> to vector<32x1xf32>
      %c33_284 = arith.constant 33 : index
      %c0_285 = arith.constant 0 : index
      %c0_286 = arith.constant 0 : index
      %522 = vector.load %arg14[%c33_284, %c0_285, %c0_286] : memref<64x32x64xf32, #tpu.memory_space<vmem>>, vector<1x32x64xf32>
      %523 = vector.shape_cast %522 : vector<1x32x64xf32> to vector<32x64xf32>
      %524 = vector.broadcast %521 : vector<32x1xf32> to vector<32x64xf32>
      %525 = arith.mulf %524, %523 : vector<32x64xf32>
      %526 = arith.addf %502, %525 : vector<32x64xf32>
      %527 = vector.extract_strided_slice %318 {offsets = [0, 34], sizes = [32, 1], strides = [1, 1]} : vector<32x64xf32> to vector<32x1xf32>
      %c34_287 = arith.constant 34 : index
      %c0_288 = arith.constant 0 : index
      %c0_289 = arith.constant 0 : index
      %528 = vector.load %arg14[%c34_287, %c0_288, %c0_289] : memref<64x32x64xf32, #tpu.memory_space<vmem>>, vector<1x32x64xf32>
      %529 = vector.shape_cast %528 : vector<1x32x64xf32> to vector<32x64xf32>
      %530 = vector.broadcast %527 : vector<32x1xf32> to vector<32x64xf32>
      %531 = arith.mulf %530, %529 : vector<32x64xf32>
      %532 = arith.addf %508, %531 : vector<32x64xf32>
      %533 = vector.extract_strided_slice %318 {offsets = [0, 35], sizes = [32, 1], strides = [1, 1]} : vector<32x64xf32> to vector<32x1xf32>
      %c35_290 = arith.constant 35 : index
      %c0_291 = arith.constant 0 : index
      %c0_292 = arith.constant 0 : index
      %534 = vector.load %arg14[%c35_290, %c0_291, %c0_292] : memref<64x32x64xf32, #tpu.memory_space<vmem>>, vector<1x32x64xf32>
      %535 = vector.shape_cast %534 : vector<1x32x64xf32> to vector<32x64xf32>
      %536 = vector.broadcast %533 : vector<32x1xf32> to vector<32x64xf32>
      %537 = arith.mulf %536, %535 : vector<32x64xf32>
      %538 = arith.addf %514, %537 : vector<32x64xf32>
      %539 = vector.extract_strided_slice %318 {offsets = [0, 36], sizes = [32, 1], strides = [1, 1]} : vector<32x64xf32> to vector<32x1xf32>
      %c36_293 = arith.constant 36 : index
      %c0_294 = arith.constant 0 : index
      %c0_295 = arith.constant 0 : index
      %540 = vector.load %arg14[%c36_293, %c0_294, %c0_295] : memref<64x32x64xf32, #tpu.memory_space<vmem>>, vector<1x32x64xf32>
      %541 = vector.shape_cast %540 : vector<1x32x64xf32> to vector<32x64xf32>
      %542 = vector.broadcast %539 : vector<32x1xf32> to vector<32x64xf32>
      %543 = arith.mulf %542, %541 : vector<32x64xf32>
      %544 = arith.addf %520, %543 : vector<32x64xf32>
      %545 = vector.extract_strided_slice %318 {offsets = [0, 37], sizes = [32, 1], strides = [1, 1]} : vector<32x64xf32> to vector<32x1xf32>
      %c37_296 = arith.constant 37 : index
      %c0_297 = arith.constant 0 : index
      %c0_298 = arith.constant 0 : index
      %546 = vector.load %arg14[%c37_296, %c0_297, %c0_298] : memref<64x32x64xf32, #tpu.memory_space<vmem>>, vector<1x32x64xf32>
      %547 = vector.shape_cast %546 : vector<1x32x64xf32> to vector<32x64xf32>
      %548 = vector.broadcast %545 : vector<32x1xf32> to vector<32x64xf32>
      %549 = arith.mulf %548, %547 : vector<32x64xf32>
      %550 = arith.addf %526, %549 : vector<32x64xf32>
      %551 = vector.extract_strided_slice %318 {offsets = [0, 38], sizes = [32, 1], strides = [1, 1]} : vector<32x64xf32> to vector<32x1xf32>
      %c38_299 = arith.constant 38 : index
      %c0_300 = arith.constant 0 : index
      %c0_301 = arith.constant 0 : index
      %552 = vector.load %arg14[%c38_299, %c0_300, %c0_301] : memref<64x32x64xf32, #tpu.memory_space<vmem>>, vector<1x32x64xf32>
      %553 = vector.shape_cast %552 : vector<1x32x64xf32> to vector<32x64xf32>
      %554 = vector.broadcast %551 : vector<32x1xf32> to vector<32x64xf32>
      %555 = arith.mulf %554, %553 : vector<32x64xf32>
      %556 = arith.addf %532, %555 : vector<32x64xf32>
      %557 = vector.extract_strided_slice %318 {offsets = [0, 39], sizes = [32, 1], strides = [1, 1]} : vector<32x64xf32> to vector<32x1xf32>
      %c39_302 = arith.constant 39 : index
      %c0_303 = arith.constant 0 : index
      %c0_304 = arith.constant 0 : index
      %558 = vector.load %arg14[%c39_302, %c0_303, %c0_304] : memref<64x32x64xf32, #tpu.memory_space<vmem>>, vector<1x32x64xf32>
      %559 = vector.shape_cast %558 : vector<1x32x64xf32> to vector<32x64xf32>
      %560 = vector.broadcast %557 : vector<32x1xf32> to vector<32x64xf32>
      %561 = arith.mulf %560, %559 : vector<32x64xf32>
      %562 = arith.addf %538, %561 : vector<32x64xf32>
      %563 = vector.extract_strided_slice %318 {offsets = [0, 40], sizes = [32, 1], strides = [1, 1]} : vector<32x64xf32> to vector<32x1xf32>
      %c40_305 = arith.constant 40 : index
      %c0_306 = arith.constant 0 : index
      %c0_307 = arith.constant 0 : index
      %564 = vector.load %arg14[%c40_305, %c0_306, %c0_307] : memref<64x32x64xf32, #tpu.memory_space<vmem>>, vector<1x32x64xf32>
      %565 = vector.shape_cast %564 : vector<1x32x64xf32> to vector<32x64xf32>
      %566 = vector.broadcast %563 : vector<32x1xf32> to vector<32x64xf32>
      %567 = arith.mulf %566, %565 : vector<32x64xf32>
      %568 = arith.addf %544, %567 : vector<32x64xf32>
      %569 = vector.extract_strided_slice %318 {offsets = [0, 41], sizes = [32, 1], strides = [1, 1]} : vector<32x64xf32> to vector<32x1xf32>
      %c41_308 = arith.constant 41 : index
      %c0_309 = arith.constant 0 : index
      %c0_310 = arith.constant 0 : index
      %570 = vector.load %arg14[%c41_308, %c0_309, %c0_310] : memref<64x32x64xf32, #tpu.memory_space<vmem>>, vector<1x32x64xf32>
      %571 = vector.shape_cast %570 : vector<1x32x64xf32> to vector<32x64xf32>
      %572 = vector.broadcast %569 : vector<32x1xf32> to vector<32x64xf32>
      %573 = arith.mulf %572, %571 : vector<32x64xf32>
      %574 = arith.addf %550, %573 : vector<32x64xf32>
      %575 = vector.extract_strided_slice %318 {offsets = [0, 42], sizes = [32, 1], strides = [1, 1]} : vector<32x64xf32> to vector<32x1xf32>
      %c42_311 = arith.constant 42 : index
      %c0_312 = arith.constant 0 : index
      %c0_313 = arith.constant 0 : index
      %576 = vector.load %arg14[%c42_311, %c0_312, %c0_313] : memref<64x32x64xf32, #tpu.memory_space<vmem>>, vector<1x32x64xf32>
      %577 = vector.shape_cast %576 : vector<1x32x64xf32> to vector<32x64xf32>
      %578 = vector.broadcast %575 : vector<32x1xf32> to vector<32x64xf32>
      %579 = arith.mulf %578, %577 : vector<32x64xf32>
      %580 = arith.addf %556, %579 : vector<32x64xf32>
      %581 = vector.extract_strided_slice %318 {offsets = [0, 43], sizes = [32, 1], strides = [1, 1]} : vector<32x64xf32> to vector<32x1xf32>
      %c43_314 = arith.constant 43 : index
      %c0_315 = arith.constant 0 : index
      %c0_316 = arith.constant 0 : index
      %582 = vector.load %arg14[%c43_314, %c0_315, %c0_316] : memref<64x32x64xf32, #tpu.memory_space<vmem>>, vector<1x32x64xf32>
      %583 = vector.shape_cast %582 : vector<1x32x64xf32> to vector<32x64xf32>
      %584 = vector.broadcast %581 : vector<32x1xf32> to vector<32x64xf32>
      %585 = arith.mulf %584, %583 : vector<32x64xf32>
      %586 = arith.addf %562, %585 : vector<32x64xf32>
      %587 = vector.extract_strided_slice %318 {offsets = [0, 44], sizes = [32, 1], strides = [1, 1]} : vector<32x64xf32> to vector<32x1xf32>
      %c44_317 = arith.constant 44 : index
      %c0_318 = arith.constant 0 : index
      %c0_319 = arith.constant 0 : index
      %588 = vector.load %arg14[%c44_317, %c0_318, %c0_319] : memref<64x32x64xf32, #tpu.memory_space<vmem>>, vector<1x32x64xf32>
      %589 = vector.shape_cast %588 : vector<1x32x64xf32> to vector<32x64xf32>
      %590 = vector.broadcast %587 : vector<32x1xf32> to vector<32x64xf32>
      %591 = arith.mulf %590, %589 : vector<32x64xf32>
      %592 = arith.addf %568, %591 : vector<32x64xf32>
      %593 = vector.extract_strided_slice %318 {offsets = [0, 45], sizes = [32, 1], strides = [1, 1]} : vector<32x64xf32> to vector<32x1xf32>
      %c45_320 = arith.constant 45 : index
      %c0_321 = arith.constant 0 : index
      %c0_322 = arith.constant 0 : index
      %594 = vector.load %arg14[%c45_320, %c0_321, %c0_322] : memref<64x32x64xf32, #tpu.memory_space<vmem>>, vector<1x32x64xf32>
      %595 = vector.shape_cast %594 : vector<1x32x64xf32> to vector<32x64xf32>
      %596 = vector.broadcast %593 : vector<32x1xf32> to vector<32x64xf32>
      %597 = arith.mulf %596, %595 : vector<32x64xf32>
      %598 = arith.addf %574, %597 : vector<32x64xf32>
      %599 = vector.extract_strided_slice %318 {offsets = [0, 46], sizes = [32, 1], strides = [1, 1]} : vector<32x64xf32> to vector<32x1xf32>
      %c46_323 = arith.constant 46 : index
      %c0_324 = arith.constant 0 : index
      %c0_325 = arith.constant 0 : index
      %600 = vector.load %arg14[%c46_323, %c0_324, %c0_325] : memref<64x32x64xf32, #tpu.memory_space<vmem>>, vector<1x32x64xf32>
      %601 = vector.shape_cast %600 : vector<1x32x64xf32> to vector<32x64xf32>
      %602 = vector.broadcast %599 : vector<32x1xf32> to vector<32x64xf32>
      %603 = arith.mulf %602, %601 : vector<32x64xf32>
      %604 = arith.addf %580, %603 : vector<32x64xf32>
      %605 = vector.extract_strided_slice %318 {offsets = [0, 47], sizes = [32, 1], strides = [1, 1]} : vector<32x64xf32> to vector<32x1xf32>
      %c47_326 = arith.constant 47 : index
      %c0_327 = arith.constant 0 : index
      %c0_328 = arith.constant 0 : index
      %606 = vector.load %arg14[%c47_326, %c0_327, %c0_328] : memref<64x32x64xf32, #tpu.memory_space<vmem>>, vector<1x32x64xf32>
      %607 = vector.shape_cast %606 : vector<1x32x64xf32> to vector<32x64xf32>
      %608 = vector.broadcast %605 : vector<32x1xf32> to vector<32x64xf32>
      %609 = arith.mulf %608, %607 : vector<32x64xf32>
      %610 = arith.addf %586, %609 : vector<32x64xf32>
      %611 = vector.extract_strided_slice %318 {offsets = [0, 48], sizes = [32, 1], strides = [1, 1]} : vector<32x64xf32> to vector<32x1xf32>
      %c48_329 = arith.constant 48 : index
      %c0_330 = arith.constant 0 : index
      %c0_331 = arith.constant 0 : index
      %612 = vector.load %arg14[%c48_329, %c0_330, %c0_331] : memref<64x32x64xf32, #tpu.memory_space<vmem>>, vector<1x32x64xf32>
      %613 = vector.shape_cast %612 : vector<1x32x64xf32> to vector<32x64xf32>
      %614 = vector.broadcast %611 : vector<32x1xf32> to vector<32x64xf32>
      %615 = arith.mulf %614, %613 : vector<32x64xf32>
      %616 = arith.addf %592, %615 : vector<32x64xf32>
      %617 = vector.extract_strided_slice %318 {offsets = [0, 49], sizes = [32, 1], strides = [1, 1]} : vector<32x64xf32> to vector<32x1xf32>
      %c49_332 = arith.constant 49 : index
      %c0_333 = arith.constant 0 : index
      %c0_334 = arith.constant 0 : index
      %618 = vector.load %arg14[%c49_332, %c0_333, %c0_334] : memref<64x32x64xf32, #tpu.memory_space<vmem>>, vector<1x32x64xf32>
      %619 = vector.shape_cast %618 : vector<1x32x64xf32> to vector<32x64xf32>
      %620 = vector.broadcast %617 : vector<32x1xf32> to vector<32x64xf32>
      %621 = arith.mulf %620, %619 : vector<32x64xf32>
      %622 = arith.addf %598, %621 : vector<32x64xf32>
      %623 = vector.extract_strided_slice %318 {offsets = [0, 50], sizes = [32, 1], strides = [1, 1]} : vector<32x64xf32> to vector<32x1xf32>
      %c50_335 = arith.constant 50 : index
      %c0_336 = arith.constant 0 : index
      %c0_337 = arith.constant 0 : index
      %624 = vector.load %arg14[%c50_335, %c0_336, %c0_337] : memref<64x32x64xf32, #tpu.memory_space<vmem>>, vector<1x32x64xf32>
      %625 = vector.shape_cast %624 : vector<1x32x64xf32> to vector<32x64xf32>
      %626 = vector.broadcast %623 : vector<32x1xf32> to vector<32x64xf32>
      %627 = arith.mulf %626, %625 : vector<32x64xf32>
      %628 = arith.addf %604, %627 : vector<32x64xf32>
      %629 = vector.extract_strided_slice %318 {offsets = [0, 51], sizes = [32, 1], strides = [1, 1]} : vector<32x64xf32> to vector<32x1xf32>
      %c51_338 = arith.constant 51 : index
      %c0_339 = arith.constant 0 : index
      %c0_340 = arith.constant 0 : index
      %630 = vector.load %arg14[%c51_338, %c0_339, %c0_340] : memref<64x32x64xf32, #tpu.memory_space<vmem>>, vector<1x32x64xf32>
      %631 = vector.shape_cast %630 : vector<1x32x64xf32> to vector<32x64xf32>
      %632 = vector.broadcast %629 : vector<32x1xf32> to vector<32x64xf32>
      %633 = arith.mulf %632, %631 : vector<32x64xf32>
      %634 = arith.addf %610, %633 : vector<32x64xf32>
      %635 = vector.extract_strided_slice %318 {offsets = [0, 52], sizes = [32, 1], strides = [1, 1]} : vector<32x64xf32> to vector<32x1xf32>
      %c52_341 = arith.constant 52 : index
      %c0_342 = arith.constant 0 : index
      %c0_343 = arith.constant 0 : index
      %636 = vector.load %arg14[%c52_341, %c0_342, %c0_343] : memref<64x32x64xf32, #tpu.memory_space<vmem>>, vector<1x32x64xf32>
      %637 = vector.shape_cast %636 : vector<1x32x64xf32> to vector<32x64xf32>
      %638 = vector.broadcast %635 : vector<32x1xf32> to vector<32x64xf32>
      %639 = arith.mulf %638, %637 : vector<32x64xf32>
      %640 = arith.addf %616, %639 : vector<32x64xf32>
      %641 = vector.extract_strided_slice %318 {offsets = [0, 53], sizes = [32, 1], strides = [1, 1]} : vector<32x64xf32> to vector<32x1xf32>
      %c53_344 = arith.constant 53 : index
      %c0_345 = arith.constant 0 : index
      %c0_346 = arith.constant 0 : index
      %642 = vector.load %arg14[%c53_344, %c0_345, %c0_346] : memref<64x32x64xf32, #tpu.memory_space<vmem>>, vector<1x32x64xf32>
      %643 = vector.shape_cast %642 : vector<1x32x64xf32> to vector<32x64xf32>
      %644 = vector.broadcast %641 : vector<32x1xf32> to vector<32x64xf32>
      %645 = arith.mulf %644, %643 : vector<32x64xf32>
      %646 = arith.addf %622, %645 : vector<32x64xf32>
      %647 = vector.extract_strided_slice %318 {offsets = [0, 54], sizes = [32, 1], strides = [1, 1]} : vector<32x64xf32> to vector<32x1xf32>
      %c54_347 = arith.constant 54 : index
      %c0_348 = arith.constant 0 : index
      %c0_349 = arith.constant 0 : index
      %648 = vector.load %arg14[%c54_347, %c0_348, %c0_349] : memref<64x32x64xf32, #tpu.memory_space<vmem>>, vector<1x32x64xf32>
      %649 = vector.shape_cast %648 : vector<1x32x64xf32> to vector<32x64xf32>
      %650 = vector.broadcast %647 : vector<32x1xf32> to vector<32x64xf32>
      %651 = arith.mulf %650, %649 : vector<32x64xf32>
      %652 = arith.addf %628, %651 : vector<32x64xf32>
      %653 = vector.extract_strided_slice %318 {offsets = [0, 55], sizes = [32, 1], strides = [1, 1]} : vector<32x64xf32> to vector<32x1xf32>
      %c55_350 = arith.constant 55 : index
      %c0_351 = arith.constant 0 : index
      %c0_352 = arith.constant 0 : index
      %654 = vector.load %arg14[%c55_350, %c0_351, %c0_352] : memref<64x32x64xf32, #tpu.memory_space<vmem>>, vector<1x32x64xf32>
      %655 = vector.shape_cast %654 : vector<1x32x64xf32> to vector<32x64xf32>
      %656 = vector.broadcast %653 : vector<32x1xf32> to vector<32x64xf32>
      %657 = arith.mulf %656, %655 : vector<32x64xf32>
      %658 = arith.addf %634, %657 : vector<32x64xf32>
      %659 = vector.extract_strided_slice %318 {offsets = [0, 56], sizes = [32, 1], strides = [1, 1]} : vector<32x64xf32> to vector<32x1xf32>
      %c56_353 = arith.constant 56 : index
      %c0_354 = arith.constant 0 : index
      %c0_355 = arith.constant 0 : index
      %660 = vector.load %arg14[%c56_353, %c0_354, %c0_355] : memref<64x32x64xf32, #tpu.memory_space<vmem>>, vector<1x32x64xf32>
      %661 = vector.shape_cast %660 : vector<1x32x64xf32> to vector<32x64xf32>
      %662 = vector.broadcast %659 : vector<32x1xf32> to vector<32x64xf32>
      %663 = arith.mulf %662, %661 : vector<32x64xf32>
      %664 = arith.addf %640, %663 : vector<32x64xf32>
      %665 = vector.extract_strided_slice %318 {offsets = [0, 57], sizes = [32, 1], strides = [1, 1]} : vector<32x64xf32> to vector<32x1xf32>
      %c57_356 = arith.constant 57 : index
      %c0_357 = arith.constant 0 : index
      %c0_358 = arith.constant 0 : index
      %666 = vector.load %arg14[%c57_356, %c0_357, %c0_358] : memref<64x32x64xf32, #tpu.memory_space<vmem>>, vector<1x32x64xf32>
      %667 = vector.shape_cast %666 : vector<1x32x64xf32> to vector<32x64xf32>
      %668 = vector.broadcast %665 : vector<32x1xf32> to vector<32x64xf32>
      %669 = arith.mulf %668, %667 : vector<32x64xf32>
      %670 = arith.addf %646, %669 : vector<32x64xf32>
      %671 = vector.extract_strided_slice %318 {offsets = [0, 58], sizes = [32, 1], strides = [1, 1]} : vector<32x64xf32> to vector<32x1xf32>
      %c58_359 = arith.constant 58 : index
      %c0_360 = arith.constant 0 : index
      %c0_361 = arith.constant 0 : index
      %672 = vector.load %arg14[%c58_359, %c0_360, %c0_361] : memref<64x32x64xf32, #tpu.memory_space<vmem>>, vector<1x32x64xf32>
      %673 = vector.shape_cast %672 : vector<1x32x64xf32> to vector<32x64xf32>
      %674 = vector.broadcast %671 : vector<32x1xf32> to vector<32x64xf32>
      %675 = arith.mulf %674, %673 : vector<32x64xf32>
      %676 = arith.addf %652, %675 : vector<32x64xf32>
      %677 = vector.extract_strided_slice %318 {offsets = [0, 59], sizes = [32, 1], strides = [1, 1]} : vector<32x64xf32> to vector<32x1xf32>
      %c59_362 = arith.constant 59 : index
      %c0_363 = arith.constant 0 : index
      %c0_364 = arith.constant 0 : index
      %678 = vector.load %arg14[%c59_362, %c0_363, %c0_364] : memref<64x32x64xf32, #tpu.memory_space<vmem>>, vector<1x32x64xf32>
      %679 = vector.shape_cast %678 : vector<1x32x64xf32> to vector<32x64xf32>
      %680 = vector.broadcast %677 : vector<32x1xf32> to vector<32x64xf32>
      %681 = arith.mulf %680, %679 : vector<32x64xf32>
      %682 = arith.addf %658, %681 : vector<32x64xf32>
      %683 = vector.extract_strided_slice %318 {offsets = [0, 60], sizes = [32, 1], strides = [1, 1]} : vector<32x64xf32> to vector<32x1xf32>
      %c60_365 = arith.constant 60 : index
      %c0_366 = arith.constant 0 : index
      %c0_367 = arith.constant 0 : index
      %684 = vector.load %arg14[%c60_365, %c0_366, %c0_367] : memref<64x32x64xf32, #tpu.memory_space<vmem>>, vector<1x32x64xf32>
      %685 = vector.shape_cast %684 : vector<1x32x64xf32> to vector<32x64xf32>
      %686 = vector.broadcast %683 : vector<32x1xf32> to vector<32x64xf32>
      %687 = arith.mulf %686, %685 : vector<32x64xf32>
      %688 = arith.addf %664, %687 : vector<32x64xf32>
      %689 = vector.extract_strided_slice %318 {offsets = [0, 61], sizes = [32, 1], strides = [1, 1]} : vector<32x64xf32> to vector<32x1xf32>
      %c61_368 = arith.constant 61 : index
      %c0_369 = arith.constant 0 : index
      %c0_370 = arith.constant 0 : index
      %690 = vector.load %arg14[%c61_368, %c0_369, %c0_370] : memref<64x32x64xf32, #tpu.memory_space<vmem>>, vector<1x32x64xf32>
      %691 = vector.shape_cast %690 : vector<1x32x64xf32> to vector<32x64xf32>
      %692 = vector.broadcast %689 : vector<32x1xf32> to vector<32x64xf32>
      %693 = arith.mulf %692, %691 : vector<32x64xf32>
      %694 = arith.addf %670, %693 : vector<32x64xf32>
      %695 = vector.extract_strided_slice %318 {offsets = [0, 62], sizes = [32, 1], strides = [1, 1]} : vector<32x64xf32> to vector<32x1xf32>
      %c62_371 = arith.constant 62 : index
      %c0_372 = arith.constant 0 : index
      %c0_373 = arith.constant 0 : index
      %696 = vector.load %arg14[%c62_371, %c0_372, %c0_373] : memref<64x32x64xf32, #tpu.memory_space<vmem>>, vector<1x32x64xf32>
      %697 = vector.shape_cast %696 : vector<1x32x64xf32> to vector<32x64xf32>
      %698 = vector.broadcast %695 : vector<32x1xf32> to vector<32x64xf32>
      %699 = arith.mulf %698, %697 : vector<32x64xf32>
      %700 = arith.addf %676, %699 : vector<32x64xf32>
      %701 = vector.extract_strided_slice %318 {offsets = [0, 63], sizes = [32, 1], strides = [1, 1]} : vector<32x64xf32> to vector<32x1xf32>
      %c63_374 = arith.constant 63 : index
      %c0_375 = arith.constant 0 : index
      %c0_376 = arith.constant 0 : index
      %702 = vector.load %arg14[%c63_374, %c0_375, %c0_376] : memref<64x32x64xf32, #tpu.memory_space<vmem>>, vector<1x32x64xf32>
      %703 = vector.shape_cast %702 : vector<1x32x64xf32> to vector<32x64xf32>
      %704 = vector.broadcast %701 : vector<32x1xf32> to vector<32x64xf32>
      %705 = arith.mulf %704, %703 : vector<32x64xf32>
      %706 = arith.addf %682, %705 : vector<32x64xf32>
      %707 = arith.addf %688, %694 : vector<32x64xf32>
      %708 = arith.addf %700, %706 : vector<32x64xf32>
      %709 = arith.addf %707, %708 : vector<32x64xf32>
      %c0_377 = arith.constant 0 : index
      %c0_378 = arith.constant 0 : index
      %710 = vector.load %arg3[%c0_377, %c0_378] : memref<16x32xbf16, #tpu.memory_space<vmem>>, vector<16x32xbf16>
      %711 = arith.truncf %709 : vector<32x64xf32> to vector<32x64xbf16>
      %cst_379 = arith.constant dense<0.000000e+00> : vector<16x64xf32>
      %712 = tpu.matmul %710, %711, %cst_379 {dimension_numbers = #tpu.dot_dimension_numbers<[1], [0], [0], [1], [0, 0, 1, 1], [], []>} : vector<16x32xbf16>, vector<32x64xbf16>, vector<16x64xf32> -> vector<16x64xf32>
      %c0_380 = arith.constant 0 : index
      %c0_381 = arith.constant 0 : index
      %713 = vector.load %arg10[%c0_380, %c0_381] : memref<1x64xf32, #tpu.memory_space<vmem>>, vector<1x64xf32>
      %714 = vector.broadcast %713 : vector<1x64xf32> to vector<16x64xf32>
      %715 = arith.addf %712, %714 : vector<16x64xf32>
      %cst_382 = arith.constant 0.000000e+00 : f32
      %716 = vector.broadcast %cst_382 : f32 to vector<16x64xf32>
      %717 = arith.maximumf %715, %716 : vector<16x64xf32>
      %718 = tpu.concatenate %717, %arg16 in 1 : vector<16x64xf32>, vector<16x64xf32> -> vector<16x128xf32>
      %719 = arith.truncf %718 : vector<16x128xf32> to vector<16x128xbf16>
      %c0_383 = arith.constant 0 : index
      %c0_384 = arith.constant 0 : index
      %720 = vector.load %arg11[%c0_383, %c0_384] : memref<128x256xbf16, #tpu.memory_space<vmem>>, vector<128x256xbf16>
      %cst_385 = arith.constant dense<0.000000e+00> : vector<16x256xf32>
      %721 = tpu.matmul %719, %720, %cst_385 {dimension_numbers = #tpu.dot_dimension_numbers<[1], [0], [0], [1], [0, 0, 1, 1], [], []>} : vector<16x128xbf16>, vector<128x256xbf16>, vector<16x256xf32> -> vector<16x256xf32>
      %c0_386 = arith.constant 0 : index
      %c0_387 = arith.constant 0 : index
      %722 = vector.load %arg12[%c0_386, %c0_387] : memref<1x256xf32, #tpu.memory_space<vmem>>, vector<1x256xf32>
      %723 = vector.broadcast %722 : vector<1x256xf32> to vector<16x256xf32>
      %724 = arith.addf %721, %723 : vector<16x256xf32>
      %725 = vector.extract_strided_slice %724 {offsets = [0, 0], sizes = [16, 128], strides = [1, 1]} : vector<16x256xf32> to vector<16x128xf32>
      %726 = arith.negf %725 : vector<16x128xf32>
      %727 = math.exp %726 : vector<16x128xf32>
      %cst_388 = arith.constant 1.000000e+00 : f32
      %728 = vector.broadcast %cst_388 : f32 to vector<16x128xf32>
      %729 = arith.addf %728, %727 : vector<16x128xf32>
      %730 = arith.divf %728, %729 : vector<16x128xf32>
      %731 = vector.extract_strided_slice %730 {offsets = [0, 0], sizes = [16, 64], strides = [1, 1]} : vector<16x128xf32> to vector<16x64xf32>
      %732 = vector.extract_strided_slice %730 {offsets = [0, 64], sizes = [16, 64], strides = [1, 1]} : vector<16x128xf32> to vector<16x64xf32>
      %733 = vector.extract_strided_slice %724 {offsets = [0, 128], sizes = [16, 64], strides = [1, 1]} : vector<16x256xf32> to vector<16x64xf32>
      %734 = vector.extract_strided_slice %724 {offsets = [0, 192], sizes = [16, 64], strides = [1, 1]} : vector<16x256xf32> to vector<16x64xf32>
      %735 = arith.mulf %731, %734 : vector<16x64xf32>
      %736 = arith.addf %733, %735 : vector<16x64xf32>
      %737 = math.tanh %736 : vector<16x64xf32>
      %cst_389 = arith.constant 1.000000e+00 : f32
      %738 = vector.broadcast %cst_389 : f32 to vector<16x64xf32>
      %739 = arith.subf %738, %732 : vector<16x64xf32>
      %740 = arith.mulf %739, %737 : vector<16x64xf32>
      %741 = arith.mulf %732, %arg16 : vector<16x64xf32>
      %742 = arith.addf %740, %741 : vector<16x64xf32>
      scf.yield %742 : vector<16x64xf32>
    }
    %c0_176 = arith.constant 0 : index
    %c0_177 = arith.constant 0 : index
    %315 = vector.load %arg13[%c0_176, %c0_177] : memref<16x64xf32, #tpu.memory_space<vmem>>, vector<16x64xf32>
    tpu.vector_store %arg13[%c0_176, %c0_177], %314 {strides = array<i32>} : memref<16x64xf32, #tpu.memory_space<vmem>>, vector<16x64xf32>,
    return
  }
}

</mosaic_0001>

<bundles_post_ra>
// kernel: tpu_custom_call.1
= control target key start
LH: loop header
LB: loop body
LE: loop exit
PB: predicated region body
PF: predicated region fallthrough
CT: control target
= control target key end

     0   :  { %18 = vsyncpa [#allocation4], 0  ;;  %s9991_s0 = inlined_call_operand.hbm [shape: bf16[16,32], index: 0, kind: input, shape index: {}]   ;;  %s9992_s1 = inlined_call_operand.hbm [shape: bf16[32,32], index: 1, kind: input, shape index: {}]   ;;  %s9993_s2 = inlined_call_operand.vmem [shape: bf16[32,16], index: 2, kind: input, shape index: {}]   ;;  %s9994_s3 = inlined_call_operand.hbm [shape: bf16[16,32], index: 3, kind: input, shape index: {}]   ;;  %s9995_s4 = inlined_call_operand.hbm [shape: bf16[32,64], index: 4, kind: input, shape index: {}]   ;;  %s9996_s5 = inlined_call_operand.hbm [shape: f32[1,64], index: 5, kind: input, shape index: {}]   ;;  %s9997_s6 = inlined_call_operand.hbm [shape: bf16[32,128], index: 6, kind: input, shape index: {}]   ;;  %s9998_s7 = inlined_call_operand.hbm [shape: f32[1,128], index: 7, kind: input, shape index: {}]   ;;  %s9999_s8 = inlined_call_operand.hbm [shape: bf16[128,4096], index: 8, kind: input, shape index: {}]   ;;  %s10000_s9 = inlined_call_operand.vmem [shape: f32[1,4096], index: 9, kind: input, shape index: {}]   ;;  %s10001_s10 = inlined_call_operand.hbm [shape: f32[1,64], index: 10, kind: input, shape index: {}]   ;;  %s10002_s11 = inlined_call_operand.hbm [shape: bf16[128,256], index: 11, kind: input, shape index: {}]   ;;  %s10003_s12 = inlined_call_operand.vmem [shape: f32[1,256], index: 12, kind: input, shape index: {}]   ;;  %s10004_s13 = inlined_call_operand.hbm [shape: f32[16,64], index: 13, kind: output, shape index: {}]  }
   0x1   :  { %19 = vsyncpa [#allocation7], 0 }
   0x2   :  { %20 = vsyncpa [#allocation10], 0 }
   0x3   :  { %21 = vsyncpa [#allocation13], 0 }
   0x4   :  { %22 = vsyncpa [#allocation16], 0 }
   0x5   :  { %23 = vsyncpa [#allocation19], 0 }
   0x6   :  { %24 = vsyncpa [#allocation5], 0  ;;  %s42_s27 = sshll.u32 %s9992_s1, 4  ;;  %s7563_s28 = smov [#allocation6]   ;;  %s43_s27 = int_to_ptr.hbm [resolvable:$true] %s42_s27 }
   0x7   :  { %s44_s29 = sshll.u32 %s7563_s28, 4  ;;  %s70_s15 = sshll.u32 %s9995_s4, 4  ;;  %s45_s29 = int_to_ptr.vmem [resolvable:$true] %s44_s29  ;;  %s71_s15 = int_to_ptr.hbm [resolvable:$true] %s70_s15 }
   0x8   :  { %s7564_s16 = smov 64   ;;  %s7565_s17 = smov 4  }
   0x9   :  { %50 = dma.hbm_to_vmem [thread:$0]  %s43_s27, 256, %s45_s29, [#allocation7], %s7564_s16, %s7564_s16, %s7565_s17  }
   0xa   :  { %s7566_s18 = smov [#allocation9]   ;;  %s94_s1 = sshll.u32 %s9997_s6, 4  ;;  %s95_s1 = int_to_ptr.hbm [resolvable:$true] %s94_s1 }
   0xb   :  { %s72_s19 = sshll.u32 %s7566_s18, 4  ;;  %s118_s23 = sshll.u32 %s9999_s8, 4  ;;  %s73_s19 = int_to_ptr.vmem [resolvable:$true] %s72_s19  ;;  %s119_s23 = int_to_ptr.hbm [resolvable:$true] %s118_s23 }
   0xc   :  { %78 = dma.hbm_to_vmem [thread:$0]  %s71_s15, 256, %s73_s19, [#allocation10], %s7564_s16, %s7564_s16, %s7565_s17  }
   0xd   :  { %s7567_s24 = smov [#allocation12]   ;;  %s7568_s26 = smov [#allocation15]  }
   0xe   :  { %s96_s25 = sshll.u32 %s7567_s24, 4  ;;  %s120_s6 = sshll.u32 %s7568_s26, 4  ;;  %s97_s25 = int_to_ptr.vmem [resolvable:$true] %s96_s25  ;;  %s121_s6 = int_to_ptr.vmem [resolvable:$true] %s120_s6 }
   0xf   :  { %102 = dma.hbm_to_vmem [thread:$0]  %s95_s1, 256, %s97_s25, [#allocation13], %s7564_s16, %s7564_s16, %s7565_s17  }
  0x10   :  { %s7569_s27 = smov 2048   ;;  %s7570_s28 = smov 128  }
  0x11   :  { %126 = dma.hbm_to_vmem [thread:$0]  %s119_s23, 32768, %s121_s6, [#allocation16], %s7569_s27, %s7569_s27, %s7570_s28  }
  0x12   :  { %s29_s14 = sshll.u32 %s9991_s0, 4  ;;  %s7571_s8 = smov [#allocation3]   ;;  %s30_s14 = int_to_ptr.hbm [resolvable:$true] %s29_s14 }
  0x13   :  { %s31_s15 = sshll.u32 %s7571_s8, 4  ;;  %s57_s20 = sshll.u32 %s9994_s3, 4  ;;  %s32_s15 = int_to_ptr.vmem [resolvable:$true] %s31_s15  ;;  %s58_s20 = int_to_ptr.hbm [resolvable:$true] %s57_s20 }
  0x14   :  { %37 = dma.hbm_to_vmem [thread:$0]  %s30_s14, 128, %s32_s15, [#allocation4], %s7564_s16, %s7564_s16, %s7565_s17  }
  0x15   :  { %s7572_s21 = smov [#allocation8]   ;;  %s84_s23 = sshll.u32 %s9996_s5, 4  ;;  %s85_s23 = int_to_ptr.hbm [resolvable:$true] %s84_s23 }
  0x16   :  { %s59_s1 = sshll.u32 %s7572_s21, 4  ;;  %s108_s3 = sshll.u32 %s9998_s7, 4  ;;  %s60_s1 = int_to_ptr.vmem [resolvable:$true] %s59_s1  ;;  %s109_s3 = int_to_ptr.hbm [resolvable:$true] %s108_s3 }
  0x17   :  { %65 = dma.hbm_to_vmem [thread:$0]  %s58_s20, 128, %s60_s1, [#allocation7], %s7564_s16, %s7564_s16, %s7565_s17  }
  0x18   :  { %s7573_s25 = smov [#allocation11]   ;;  %s7574_s6 = smov [#allocation14]  }
  0x19   :  { %s86_s26 = sshll.u32 %s7573_s25, 4  ;;  %s110_s27 = sshll.u32 %s7574_s6, 4  ;;  %s87_s26 = int_to_ptr.vmem [resolvable:$true] %s86_s26  ;;  %s111_s27 = int_to_ptr.vmem [resolvable:$true] %s110_s27 }
  0x1a   :  { %89 = dma.hbm_to_vmem [thread:$0]  %s85_s23, 16, %s87_s26, [#allocation10]  }
  0x1b   :  { %s134_s5 = sshll.u32 %s10001_s10, 4  ;;  %s144_s8 = sshll.u32 %s10002_s11, 4  ;;  %s135_s5 = int_to_ptr.hbm [resolvable:$true] %s134_s5  ;;  %s145_s8 = int_to_ptr.hbm [resolvable:$true] %s144_s8 }
  0x1c   :  { %113 = dma.hbm_to_vmem [thread:$0]  %s109_s3, 16, %s111_s27, [#allocation13]  }
  0x1d   :  { %s7575_s15 = smov [#allocation17]   ;;  %s7576_s18 = smov [#allocation18]  }
  0x1e   :  { %s136_s7 = sshll.u32 %s7575_s15, 4  ;;  %s146_s19 = sshll.u32 %s7576_s18, 4  ;;  %s137_s7 = int_to_ptr.vmem [resolvable:$true] %s136_s7  ;;  %s147_s19 = int_to_ptr.vmem [resolvable:$true] %s146_s19 }
  0x1f   :  { %139 = dma.hbm_to_vmem [thread:$0]  %s135_s5, 16, %s137_s7, [#allocation16]  }
  0x20   :  { %s7577_s20 = smov 8  }
  0x21   :  { %152 = dma.hbm_to_vmem [thread:$0]  %s145_s8, 2048, %s147_s19, [#allocation19], %s7570_s28, %s7570_s28, %s7577_s20  }
  0x22   :  { %7537 = dma.done.wait [#allocation4], 128  }
  0x23   :  { %7538 = vsyncadd [#allocation4], 4294967168 }
  0x24   :  { %7539 = dma.done.wait [#allocation7], 384  }
  0x25   :  { %7540 = vsyncadd [#allocation7], 4294966912 }
  0x26   :  { %7541 = dma.done.wait [#allocation10], 272  }
  0x27   :  { %7542 = vsyncadd [#allocation10], 4294967024 }
  0x28   :  { %7543 = dma.done.wait [#allocation13], 272  }
  0x29   :  { %7544 = vsyncadd [#allocation13], 4294967024 }
  0x2a   :  { %7545 = dma.done.wait [#allocation16], 32784  }
  0x2b   :  { %7546 = vsyncadd [#allocation16], 4294934512 }
  0x2c   :  { %7547 = dma.done.wait [#allocation19], 2048  }
  0x2d   :  { %7548 = vsyncadd [#allocation19], 4294965248  ;;  %v6649_v0 = vld [vmem:[#allocation12 + $0x8] sm:$0xff]  ;;  %v6648_v1 = vld [vmem:[#allocation12] sm:$0xff]  ;;  %vm223_vm0 = vcmask 261120   ;;  %vm586_vm1 = vcmask 523264  }
  0x2e   :  { %v6645_v2 = vld [vmem:[#allocation9 + $0x8] sm:$0xff]  ;;  %v6644_v3 = vld [vmem:[#allocation9] sm:$0xff]  ;;  %289 = vmatpush.bf16.msra.mxu1 %v6649_v0  ;;  %v6679_v4 = vld [vmem:[#allocation15 + $0x70c] sm:$0xf] }
  0x2f   :  { %v5662_v5 = vld [vmem:[#allocation15 + $0x788] sm:$0xf0]  ;;  %v5652_v6 = vld [vmem:[#allocation15 + $0x700] sm:$0xf]  ;;  %v6646_v7 = vld [vmem:[#allocation6] sm:$0xff]  ;;  %233 = vmatpush.bf16.msra.mxu0 %v6645_v2 }
  0x30   :  { %v5665_v8 = vor.u32 %v6679_v4, %v5662_v5  ;;  %v6680_v9 = vld [vmem:[#allocation15 + $0x77c] sm:$0xf0]  ;;  %v6678_v10 = vld [vmem:[#allocation15 + $0x704] sm:$0xf]  ;;  %v5660_v14 = vld [vmem:[#allocation15 + $0x708] sm:$0xf] }
  0x31   :  { %v5654_v11 = vld [vmem:[#allocation15 + $0x780] sm:$0xf0]  ;;  %v5653_v12 = vor.u32 %v6680_v9, %v5652_v6  ;;  %v6681_v15 = vld [vmem:[#allocation15 + $0x784] sm:$0xf0]  ;;  %v6675_v16 = vld [vmem:[#allocation15 + $0x60c] sm:$0xf] }
  0x32   :  { %v5657_v13 = vor.u32 %v6678_v10, %v5654_v11  ;;  %v5661_v17 = vor.u32 %v6681_v15, %v5660_v14  ;;  %v5646_v18 = vld [vmem:[#allocation15 + $0x688] sm:$0xf0]  ;;  %v5636_v19 = vld [vmem:[#allocation15 + $0x600] sm:$0xf]  ;;  %290 = vmatpush.bf16.msra.mxu1 %v6648_v1  ;;  %v6674_v22 = vld [vmem:[#allocation15 + $0x604] sm:$0xf] }
  0x33   :  { %v6676_v20 = vld [vmem:[#allocation15 + $0x67c] sm:$0xf0]  ;;  %510 = vmatpush.bf16.msra.mxu2 %v5653_v12  ;;  %v5638_v23 = vld [vmem:[#allocation15 + $0x680] sm:$0xf0]  ;;  %v5644_v24 = vld [vmem:[#allocation15 + $0x608] sm:$0xf]  ;;  %234 = vmatpush.bf16.msra.mxu0 %v6644_v3  ;;  %v5649_v25 = vor.u32 %v6675_v16, %v5646_v18 }
  0x34   :  { %v5637_v21 = vor.u32 %v6676_v20, %v5636_v19  ;;  %v6677_v26 = vld [vmem:[#allocation15 + $0x684] sm:$0xf0]  ;;  %v6643_v27 = vld [vmem:[#allocation3] sm:$0xff]  ;;  %v6671_v28 = vld [vmem:[#allocation15 + $0x50c] sm:$0xf]  ;;  %529 = vmatpush.bf16.msra.mxu3 %v5657_v13  ;;  %v5641_v29 = vor.u32 %v6674_v22, %v5638_v23 }
  0x35   :  { %v5645_v30 = vor.u32 %v6677_v26, %v5644_v24  ;;  %v5630_v31 = vld [vmem:[#allocation15 + $0x588] sm:$0xf0]  ;;  %v5620_v32 = vld [vmem:[#allocation15 + $0x500] sm:$0xf]  ;;  %5536 = vmatmul.msk.bf16.vlgmr.msra.gmra.mxu1 %vm223_vm0, %v6646_v7  ;;  %v6670_v34 = vld [vmem:[#allocation15 + $0x504] sm:$0xf] }
  0x36   :  { %567 = vmatpush.bf16.msrb.mxu1 %v5665_v8  ;;  %v6672_v33 = vld [vmem:[#allocation15 + $0x57c] sm:$0xf0]  ;;  %v5622_v35 = vld [vmem:[#allocation15 + $0x580] sm:$0xf0]  ;;  %v5628_v36 = vld [vmem:[#allocation15 + $0x508] sm:$0xf]  ;;  %5519 = vmatmul.msk.bf16.vlgmr.msra.gmra.mxu0 %vm223_vm0, %v6643_v27  ;;  %v5633_v39 = vor.u32 %v6671_v28, %v5630_v31 }
  0x37   :  { %548 = vmatpush.bf16.msrb.mxu0 %v5661_v17  ;;  %511 = vmatpush.bf16.msra.mxu2 %v5637_v21  ;;  %v5621_v37 = vor.u32 %v6672_v33, %v5620_v32  ;;  %v6673_v38 = vld [vmem:[#allocation15 + $0x584] sm:$0xf0]  ;;  %v6667_v40 = vld [vmem:[#allocation15 + $0x40c] sm:$0xf]  ;;  %v5604_v41 = vld [vmem:[#allocation15 + $0x400] sm:$0xf]  ;;  %v5625_v43 = vor.u32 %v6670_v34, %v5622_v35 }
  0x38   :  { %v6668_v42 = vld [vmem:[#allocation15 + $0x47c] sm:$0xf0]  ;;  %530 = vmatpush.bf16.msra.mxu3 %v5641_v29  ;;  %v5629_v44 = vor.u32 %v6673_v38, %v5628_v36  ;;  %v5614_v45 = vld [vmem:[#allocation15 + $0x488] sm:$0xf0]  ;;  %v6666_v46 = vld [vmem:[#allocation15 + $0x404] sm:$0xf] }
  0x39   :  { %v5606_v47 = vld [vmem:[#allocation15 + $0x480] sm:$0xf0]  ;;  %v5612_v48 = vld [vmem:[#allocation15 + $0x408] sm:$0xf]  ;;  %v5605_v50 = vor.u32 %v6668_v42, %v5604_v41  ;;  %v5617_v51 = vor.u32 %v6667_v40, %v5614_v45  ;;  %v6663_v54 = vld [vmem:[#allocation15 + $0x30c] sm:$0xf] }
  0x3a   :  { %568 = vmatpush.bf16.msrb.mxu1 %v5649_v25  ;;  %v6669_v49 = vld [vmem:[#allocation15 + $0x484] sm:$0xf0]  ;;  %v5609_v52 = vor.u32 %v6666_v46, %v5606_v47  ;;  %v5598_v55 = vld [vmem:[#allocation15 + $0x388] sm:$0xf0]  ;;  %v5588_v58 = vld [vmem:[#allocation15 + $0x300] sm:$0xf] }
  0x3b   :  { %549 = vmatpush.bf16.msrb.mxu0 %v5645_v30  ;;  %512 = vmatpush.bf16.msra.mxu2 %v5621_v37  ;;  %v5613_v53 = vor.u32 %v6669_v49, %v5612_v48  ;;  %v5601_v56 = vor.u32 %v6663_v54, %v5598_v55  ;;  %v6647_v57 = vld [vmem:[#allocation6 + $0x8] sm:$0xff]  ;;  %v6664_v59 = vld [vmem:[#allocation15 + $0x37c] sm:$0xf0]  ;;  %v6662_v60 = vld [vmem:[#allocation15 + $0x304] sm:$0xf] }
  0x3c   :  { %531 = vmatpush.bf16.msra.mxu3 %v5625_v43  ;;  %v5589_v61 = vor.u32 %v6664_v59, %v5588_v58  ;;  %v5590_v62 = vld [vmem:[#allocation15 + $0x380] sm:$0xf0]  ;;  %v5596_v63 = vld [vmem:[#allocation15 + $0x308] sm:$0xf]  ;;  %v6659_v3 = vld [vmem:[#allocation15 + $0x20c] sm:$0xf] }
  0x3d   :  { %v6665_v0 = vld [vmem:[#allocation15 + $0x384] sm:$0xf0]  ;;  %v5593_v1 = vor.u32 %v6662_v60, %v5590_v62  ;;  %v5582_v4 = vld [vmem:[#allocation15 + $0x288] sm:$0xf0]  ;;  %v5572_v5 = vld [vmem:[#allocation15 + $0x200] sm:$0xf] }
  0x3e   :  { %569 = vmatpush.bf16.msrb.mxu1 %v5633_v39  ;;  %v5597_v2 = vor.u32 %v6665_v0, %v5596_v63  ;;  %v5585_v6 = vor.u32 %v6659_v3, %v5582_v4  ;;  %v6660_v7 = vld [vmem:[#allocation15 + $0x27c] sm:$0xf0]  ;;  %v6658_v8 = vld [vmem:[#allocation15 + $0x204] sm:$0xf]  ;;  %v5580_v12 = vld [vmem:[#allocation15 + $0x208] sm:$0xf] }
  0x3f   :  { %550 = vmatpush.bf16.msrb.mxu0 %v5629_v44  ;;  %513 = vmatpush.bf16.msra.mxu2 %v5605_v50  ;;  %v5574_v9 = vld [vmem:[#allocation15 + $0x280] sm:$0xf0]  ;;  %v5573_v10 = vor.u32 %v6660_v7, %v5572_v5  ;;  %v6661_v13 = vld [vmem:[#allocation15 + $0x284] sm:$0xf0]  ;;  %v6655_v14 = vld [vmem:[#allocation15 + $0x10c] sm:$0xf] }
  0x40   :  { %532 = vmatpush.bf16.msra.mxu3 %v5609_v52  ;;  %v5577_v11 = vor.u32 %v6658_v8, %v5574_v9  ;;  %v5581_v15 = vor.u32 %v6661_v13, %v5580_v12  ;;  %v5566_v16 = vld [vmem:[#allocation15 + $0x188] sm:$0xf0]  ;;  %v5556_v18 = vld [vmem:[#allocation15 + $0x100] sm:$0xf]  ;;  %v6654_v20 = vld [vmem:[#allocation15 + $0x104] sm:$0xf] }
  0x41   :  { %v5569_v17 = vor.u32 %v6655_v14, %v5566_v16  ;;  %v6656_v19 = vld [vmem:[#allocation15 + $0x17c] sm:$0xf0]  ;;  %v5558_v22 = vld [vmem:[#allocation15 + $0x180] sm:$0xf0]  ;;  %v5564_v23 = vld [vmem:[#allocation15 + $0x108] sm:$0xf] }
  0x42   :  { %570 = vmatpush.bf16.msrb.mxu1 %v5617_v51  ;;  %v5557_v21 = vor.u32 %v6656_v19, %v5556_v18  ;;  %v6657_v24 = vld [vmem:[#allocation15 + $0x184] sm:$0xf0]  ;;  %v5561_v25 = vor.u32 %v6654_v20, %v5558_v22  ;;  %v6651_v27 = vld [vmem:[#allocation15 + $0xc] sm:$0xf]  ;;  %v5540_v29 = vld [vmem:[#allocation15] sm:$0xf] }
  0x43   :  { %551 = vmatpush.bf16.msrb.mxu0 %v5613_v53  ;;  %514 = vmatpush.bf16.msra.mxu2 %v5589_v61  ;;  %v5565_v26 = vor.u32 %v6657_v24, %v5564_v23  ;;  %v5550_v28 = vld [vmem:[#allocation15 + $0x88] sm:$0xf0]  ;;  %v6652_v31 = vld [vmem:[#allocation15 + $0x7c] sm:$0xf0]  ;;  %v6650_v32 = vld [vmem:[#allocation15 + $0x4] sm:$0xf] }
  0x44   :  { %533 = vmatpush.bf16.msra.mxu3 %v5593_v1  ;;  %v5553_v30 = vor.u32 %v6651_v27, %v5550_v28  ;;  %v5542_v33 = vld [vmem:[#allocation15 + $0x80] sm:$0xf0]  ;;  %v5541_v34 = vor.u32 %v6652_v31, %v5540_v29  ;;  %v5548_v36 = vld [vmem:[#allocation15 + $0x8] sm:$0xf]  ;;  %v5780_v39 = vld [vmem:[#allocation15 + $0x710] sm:$0xf] }
  0x45   :  { %5537 = vmatmul.msk.bf16.gmra.mxu1 %vm223_vm0, %v6647_v57  ;;  %v5545_v35 = vor.u32 %v6650_v32, %v5542_v33  ;;  %v6653_v37 = vld [vmem:[#allocation15 + $0x84] sm:$0xf0]  ;;  %v6712_v40 = vld [vmem:[#allocation15 + $0x78c] sm:$0xf0]  ;;  %v6710_v41 = vld [vmem:[#allocation15 + $0x714] sm:$0xf] }
  0x46   :  { %571 = vmatpush.bf16.msrb.mxu1 %v5601_v56  ;;  %v5549_v38 = vor.u32 %v6653_v37, %v5548_v36  ;;  %v5781_v42 = vor.u32 %v6712_v40, %v5780_v39  ;;  %v5782_v43 = vld [vmem:[#allocation15 + $0x790] sm:$0xf0]  ;;  %v5788_v44 = vld [vmem:[#allocation15 + $0x718] sm:$0xf]  ;;  %v6711_v48 = vld [vmem:[#allocation15 + $0x71c] sm:$0xf] }
  0x47   :  { %552 = vmatpush.bf16.msrb.mxu0 %v5597_v2  ;;  %515 = vmatpush.bf16.msra.mxu2 %v5573_v10  ;;  %v6713_v45 = vld [vmem:[#allocation15 + $0x794] sm:$0xf0]  ;;  %v5785_v46 = vor.u32 %v6710_v41, %v5782_v43  ;;  %v5790_v49 = vld [vmem:[#allocation15 + $0x798] sm:$0xf0]  ;;  %v5764_v51 = vld [vmem:[#allocation15 + $0x610] sm:$0xf] }
  0x48   :  { %534 = vmatpush.bf16.msra.mxu3 %v5577_v11  ;;  %v5789_v47 = vor.u32 %v6713_v45, %v5788_v44  ;;  %v5793_v50 = vor.u32 %v6711_v48, %v5790_v49  ;;  %v6708_v52 = vld [vmem:[#allocation15 + $0x68c] sm:$0xf0]  ;;  %v6706_v53 = vld [vmem:[#allocation15 + $0x614] sm:$0xf]  ;;  %v5772_v56 = vld [vmem:[#allocation15 + $0x618] sm:$0xf] }
  0x49   :  { %v5765_v54 = vor.u32 %v6708_v52, %v5764_v51  ;;  %v5766_v55 = vld [vmem:[#allocation15 + $0x690] sm:$0xf0]  ;;  %v6709_v57 = vld [vmem:[#allocation15 + $0x694] sm:$0xf0]  ;;  %v6707_v60 = vld [vmem:[#allocation15 + $0x61c] sm:$0xf] }
  0x4a   :  { %572 = vmatpush.bf16.msrb.mxu1 %v5585_v6  ;;  %v5769_v58 = vor.u32 %v6706_v53, %v5766_v55  ;;  %v5773_v59 = vor.u32 %v6709_v57, %v5772_v56  ;;  %v5774_v61 = vld [vmem:[#allocation15 + $0x698] sm:$0xf0]  ;;  %v5748_v63 = vld [vmem:[#allocation15 + $0x510] sm:$0xf]  ;;  %v6702_v1 = vld [vmem:[#allocation15 + $0x514] sm:$0xf] }
  0x4b   :  { %553 = vmatpush.bf16.msrb.mxu0 %v5581_v15  ;;  %516 = vmatpush.bf16.msra.mxu2 %v5557_v21  ;;  %v5777_v62 = vor.u32 %v6707_v60, %v5774_v61  ;;  %v6704_v0 = vld [vmem:[#allocation15 + $0x58c] sm:$0xf0]  ;;  %v5750_v3 = vld [vmem:[#allocation15 + $0x590] sm:$0xf0]  ;;  %v5756_v4 = vld [vmem:[#allocation15 + $0x518] sm:$0xf] }
  0x4c   :  { %535 = vmatpush.bf16.msra.mxu3 %v5561_v25  ;;  %v5749_v2 = vor.u32 %v6704_v0, %v5748_v63  ;;  %v6705_v5 = vld [vmem:[#allocation15 + $0x594] sm:$0xf0]  ;;  %v5753_v6 = vor.u32 %v6702_v1, %v5750_v3  ;;  %v6703_v8 = vld [vmem:[#allocation15 + $0x51c] sm:$0xf]  ;;  %v5732_v11 = vld [vmem:[#allocation15 + $0x410] sm:$0xf] }
  0x4d   :  { %v5757_v7 = vor.u32 %v6705_v5, %v5756_v4  ;;  %v5758_v9 = vld [vmem:[#allocation15 + $0x598] sm:$0xf0]  ;;  %v6700_v12 = vld [vmem:[#allocation15 + $0x48c] sm:$0xf0]  ;;  %v6698_v13 = vld [vmem:[#allocation15 + $0x414] sm:$0xf] }
  0x4e   :  { %573 = vmatpush.bf16.msrb.mxu1 %v5569_v17  ;;  %v5761_v10 = vor.u32 %v6703_v8, %v5758_v9  ;;  %v5733_v14 = vor.u32 %v6700_v12, %v5732_v11  ;;  %v5734_v15 = vld [vmem:[#allocation15 + $0x490] sm:$0xf0]  ;;  %v5740_v16 = vld [vmem:[#allocation15 + $0x418] sm:$0xf]  ;;  %v6699_v20 = vld [vmem:[#allocation15 + $0x41c] sm:$0xf] }
  0x4f   :  { %554 = vmatpush.bf16.msrb.mxu0 %v5565_v26  ;;  %517 = vmatpush.bf16.msra.mxu2 %v5541_v34  ;;  %v6701_v17 = vld [vmem:[#allocation15 + $0x494] sm:$0xf0]  ;;  %v5737_v18 = vor.u32 %v6698_v13, %v5734_v15  ;;  %v5742_v21 = vld [vmem:[#allocation15 + $0x498] sm:$0xf0]  ;;  %v5716_v23 = vld [vmem:[#allocation15 + $0x310] sm:$0xf] }
  0x50   :  { %536 = vmatpush.bf16.msra.mxu3 %v5545_v35  ;;  %v5741_v19 = vor.u32 %v6701_v17, %v5740_v16  ;;  %v5745_v22 = vor.u32 %v6699_v20, %v5742_v21  ;;  %v6696_v24 = vld [vmem:[#allocation15 + $0x38c] sm:$0xf0]  ;;  %v6694_v25 = vld [vmem:[#allocation15 + $0x314] sm:$0xf]  ;;  %v5724_v28 = vld [vmem:[#allocation15 + $0x318] sm:$0xf] }
  0x51   :  { %v5717_v26 = vor.u32 %v6696_v24, %v5716_v23  ;;  %v5718_v27 = vld [vmem:[#allocation15 + $0x390] sm:$0xf0]  ;;  %v6697_v29 = vld [vmem:[#allocation15 + $0x394] sm:$0xf0]  ;;  %v6695_v33 = vld [vmem:[#allocation15 + $0x31c] sm:$0xf] }
  0x52   :  { %574 = vmatpush.bf16.msrb.mxu1 %v5553_v30  ;;  %v5721_v31 = vor.u32 %v6694_v25, %v5718_v27  ;;  %v5725_v32 = vor.u32 %v6697_v29, %v5724_v28  ;;  %v5726_v34 = vld [vmem:[#allocation15 + $0x398] sm:$0xf0]  ;;  %v5700_v35 = vld [vmem:[#allocation15 + $0x210] sm:$0xf]  ;;  %v5702_v39 = vld [vmem:[#allocation15 + $0x290] sm:$0xf0] }
  0x53   :  { %555 = vmatpush.bf16.msrb.mxu0 %v5549_v38  ;;  %892 = vmatpush.bf16.msrb.mxu2 %v5781_v42  ;;  %v5729_v36 = vor.u32 %v6695_v33, %v5726_v34  ;;  %v6692_v37 = vld [vmem:[#allocation15 + $0x28c] sm:$0xf0]  ;;  %v6690_v38 = vld [vmem:[#allocation15 + $0x214] sm:$0xf]  ;;  %v5708_v42 = vld [vmem:[#allocation15 + $0x218] sm:$0xf] }
  0x54   :  { %911 = vmatpush.bf16.msrb.mxu3 %v5785_v46  ;;  %v5701_v40 = vor.u32 %v6692_v37, %v5700_v35  ;;  %v5705_v41 = vor.u32 %v6690_v38, %v5702_v39  ;;  %v6693_v43 = vld [vmem:[#allocation15 + $0x294] sm:$0xf0]  ;;  %v6691_v44 = vld [vmem:[#allocation15 + $0x21c] sm:$0xf]  ;;  %v5684_v48 = vld [vmem:[#allocation15 + $0x110] sm:$0xf] }
  0x55   :  { %v7766_v45 = vld [vmem:[#allocation14] ss:$0 sm:$0xff]  ;;  %v5709_v46 = vor.u32 %v6693_v43, %v5708_v42  ;;  %v6686_v51 = vld [vmem:[#allocation15 + $0x114] sm:$0xf]  ;;  %v6689_v55 = vld [vmem:[#allocation15 + $0x194] sm:$0xf0] }
  0x56   :  { %949 = vmatpush.bf16.msra.mxu1 %v5793_v50  ;;  %v6688_v50 = vld [vmem:[#allocation15 + $0x18c] sm:$0xf0]  ;;  %v5686_v52 = vld [vmem:[#allocation15 + $0x190] sm:$0xf0]  ;;  %v6687_v56 = vld [vmem:[#allocation15 + $0x11c] sm:$0xf] }
  0x57   :  { %930 = vmatpush.bf16.msra.mxu0 %v5789_v47  ;;  %893 = vmatpush.bf16.msrb.mxu2 %v5765_v54  ;;  %v5710_v47 = vld [vmem:[#allocation15 + $0x298] sm:$0xf0]  ;;  %v5685_v53 = vor.u32 %v6688_v50, %v5684_v48  ;;  %v5692_v54 = vld [vmem:[#allocation15 + $0x118] sm:$0xf]  ;;  %v5689_v57 = vor.u32 %v6686_v51, %v5686_v52  ;;  %v5668_v60 = vld [vmem:[#allocation15 + $0x10] sm:$0xf] }
  0x58   :  { %912 = vmatpush.bf16.msrb.mxu3 %v5769_v58  ;;  %v5713_v49 = vor.u32 %v6691_v44, %v5710_v47  ;;  %v5693_v58 = vor.u32 %v6689_v55, %v5692_v54  ;;  %v6684_v61 = vld [vmem:[#allocation15 + $0x8c] sm:$0xf0]  ;;  %v6682_v0 = vld [vmem:[#allocation15 + $0x14] sm:$0xf]  ;;  %v6685_v4 = vld [vmem:[#allocation15 + $0x94] sm:$0xf0] }
  0x59   :  { %v5670_v1 = vld [vmem:[#allocation15 + $0x90] sm:$0xf0]  ;;  %v6683_v9 = vld [vmem:[#allocation15 + $0x1c] sm:$0xf]  ;;  %v5908_v15 = vld [vmem:[#allocation15 + $0x720] sm:$0xf] }
  0x5a   :  { %950 = vmatpush.bf16.msra.mxu1 %v5777_v62  ;;  %v6744_v16 = vld [vmem:[#allocation15 + $0x79c] sm:$0xf0]  ;;  %v6742_v17 = vld [vmem:[#allocation15 + $0x724] sm:$0xf]  ;;  %v5916_v20 = vld [vmem:[#allocation15 + $0x728] sm:$0xf] }
  0x5b   :  { %931 = vmatpush.bf16.msra.mxu0 %v5773_v59  ;;  %894 = vmatpush.bf16.msrb.mxu2 %v5749_v2  ;;  %v5694_v59 = vld [vmem:[#allocation15 + $0x198] sm:$0xf0]  ;;  %v5676_v2 = vld [vmem:[#allocation15 + $0x18] sm:$0xf]  ;;  %v6745_v21 = vld [vmem:[#allocation15 + $0x7a4] sm:$0xf0] }
  0x5c   :  { %913 = vmatpush.bf16.msrb.mxu3 %v5753_v6  ;;  %v5697_v63 = vor.u32 %v6687_v56, %v5694_v59  ;;  %v5669_v6 = vor.u32 %v6684_v61, %v5668_v60  ;;  %v5677_v8 = vor.u32 %v6685_v4, %v5676_v2  ;;  %v5917_v24 = vor.u32 %v6745_v21, %v5916_v20  ;;  %v6743_v25 = vld [vmem:[#allocation15 + $0x72c] sm:$0xf]  ;;  %v5892_v27 = vld [vmem:[#allocation15 + $0x620] sm:$0xf]  ;;  %v5900_v34 = vld [vmem:[#allocation15 + $0x628] sm:$0xf] }
  0x5d   :  { %v6740_v29 = vld [vmem:[#allocation15 + $0x69c] sm:$0xf0]  ;;  %v6741_v35 = vld [vmem:[#allocation15 + $0x6a4] sm:$0xf0]  ;;  %v5902_v38 = vld [vmem:[#allocation15 + $0x6a8] sm:$0xf0] }
  0x5e   :  { %951 = vmatpush.bf16.msra.mxu1 %v5761_v10  ;;  %v5678_v10 = vld [vmem:[#allocation15 + $0x98] sm:$0xf0]  ;;  %v5901_v37 = vor.u32 %v6741_v35, %v5900_v34  ;;  %v5876_v39 = vld [vmem:[#allocation15 + $0x520] sm:$0xf]  ;;  %v6734_v42 = vld [vmem:[#allocation15 + $0x524] sm:$0xf] }
  0x5f   :  { %932 = vmatpush.bf16.msra.mxu0 %v5757_v7  ;;  %895 = vmatpush.bf16.msrb.mxu2 %v5733_v14  ;;  %v5673_v7 = vor.u32 %v6682_v0, %v5670_v1  ;;  %v5681_v14 = vor.u32 %v6683_v9, %v5678_v10  ;;  %v5878_v43 = vld [vmem:[#allocation15 + $0x5a0] sm:$0xf0]  ;;  %v6737_v47 = vld [vmem:[#allocation15 + $0x5a4] sm:$0xf0]  ;;  %v6735_v48 = vld [vmem:[#allocation15 + $0x52c] sm:$0xf] }
  0x60   :  { %914 = vmatpush.bf16.msrb.mxu3 %v5737_v18  ;;  %v5909_v18 = vor.u32 %v6744_v16, %v5908_v15  ;;  %v5886_v51 = vld [vmem:[#allocation15 + $0x5a8] sm:$0xf0]  ;;  %v5860_v52 = vld [vmem:[#allocation15 + $0x420] sm:$0xf]  ;;  %v6730_v56 = vld [vmem:[#allocation15 + $0x424] sm:$0xf] }
  0x61   :  { %v5889_v55 = vor.u32 %v6735_v48, %v5886_v51  ;;  %v6733_v60 = vld [vmem:[#allocation15 + $0x4a4] sm:$0xf0]  ;;  %v6731_v1 = vld [vmem:[#allocation15 + $0x42c] sm:$0xf]  ;;  %v5846_v10 = vld [vmem:[#allocation15 + $0x3a0] sm:$0xf0] }
  0x62   :  { %952 = vmatpush.bf16.msra.mxu1 %v5745_v22  ;;  %v5870_v2 = vld [vmem:[#allocation15 + $0x4a8] sm:$0xf0]  ;;  %v6724_v20 = vld [vmem:[#allocation15 + $0x29c] sm:$0xf0]  ;;  %v6722_v21 = vld [vmem:[#allocation15 + $0x224] sm:$0xf] }
  0x63   :  { %933 = vmatpush.bf16.msra.mxu0 %v5741_v19  ;;  %896 = vmatpush.bf16.msrb.mxu2 %v5717_v26  ;;  %v5910_v19 = vld [vmem:[#allocation15 + $0x7a0] sm:$0xf0]  ;;  %v5918_v26 = vld [vmem:[#allocation15 + $0x7a8] sm:$0xf0]  ;;  %v5820_v34 = vld [vmem:[#allocation15 + $0x128] sm:$0xf] }
  0x64   :  { %915 = vmatpush.bf16.msrb.mxu3 %v5721_v31  ;;  %v5913_v23 = vor.u32 %v6742_v17, %v5910_v19  ;;  %v5921_v28 = vor.u32 %v6743_v25, %v5918_v26  ;;  %v5894_v31 = vld [vmem:[#allocation15 + $0x6a0] sm:$0xf0]  ;;  %v6727_v16 = vld [vmem:[#allocation15 + $0x32c] sm:$0xf]  ;;  %v5836_v25 = vld [vmem:[#allocation15 + $0x228] sm:$0xf] }
  0x65   :  { %v5854_v17 = vld [vmem:[#allocation15 + $0x3a8] sm:$0xf0]  ;;  %v6725_v26 = vld [vmem:[#allocation15 + $0x2a4] sm:$0xf0] }
  0x66   :  { %953 = vmatpush.bf16.msra.mxu1 %v5729_v36  ;;  %v6739_v36 = vld [vmem:[#allocation15 + $0x62c] sm:$0xf]  ;;  %v5857_v19 = vor.u32 %v6727_v16, %v5854_v17  ;;  %v6717_v48 = vld [vmem:[#allocation15 + $0xa4] sm:$0xf0]  ;;  %v6004_v16 = vld [vmem:[#allocation15 + $0x530] sm:$0xf] }
  0x67   :  { %934 = vmatpush.bf16.msra.mxu0 %v5725_v32  ;;  %897 = vmatpush.bf16.msrb.mxu2 %v5701_v40  ;;  %v5893_v32 = vor.u32 %v6740_v29, %v5892_v27  ;;  %v5905_v40 = vor.u32 %v6739_v36, %v5902_v38  ;;  %v6723_v27 = vld [vmem:[#allocation15 + $0x22c] sm:$0xf]  ;;  %v6768_v17 = vld [vmem:[#allocation15 + $0x5ac] sm:$0xf0] }
  0x68   :  { %916 = vmatpush.bf16.msrb.mxu3 %v5705_v41  ;;  %v6736_v41 = vld [vmem:[#allocation15 + $0x59c] sm:$0xf0]  ;;  %v5838_v29 = vld [vmem:[#allocation15 + $0x2a8] sm:$0xf0] }
  0x69   :  { %v5877_v44 = vor.u32 %v6736_v41, %v5876_v39  ;;  %v5841_v35 = vor.u32 %v6723_v27, %v5838_v29  ;;  %v6719_v38 = vld [vmem:[#allocation15 + $0x12c] sm:$0xf]  ;;  %v6764_v29 = vld [vmem:[#allocation15 + $0x4ac] sm:$0xf0] }
  0x6a   :  { %954 = vmatpush.bf16.msra.mxu1 %v5713_v49  ;;  %v5881_v49 = vor.u32 %v6734_v42, %v5878_v43  ;;  %v5822_v39 = vld [vmem:[#allocation15 + $0x1a8] sm:$0xf0]  ;;  %v5796_v42 = vld [vmem:[#allocation15 + $0x20] sm:$0xf] }
  0x6b   :  { %935 = vmatpush.bf16.msra.mxu0 %v5709_v46  ;;  %898 = vmatpush.bf16.msrb.mxu2 %v5685_v53  ;;  %v5884_v46 = vld [vmem:[#allocation15 + $0x528] sm:$0xf]  ;;  %v6732_v53 = vld [vmem:[#allocation15 + $0x49c] sm:$0xf0] }
  0x6c   :  { %917 = vmatpush.bf16.msrb.mxu3 %v5689_v57  ;;  %v5885_v50 = vor.u32 %v6737_v47, %v5884_v46  ;;  %v5862_v57 = vld [vmem:[#allocation15 + $0x4a0] sm:$0xf0]  ;;  %v6716_v43 = vld [vmem:[#allocation15 + $0x9c] sm:$0xf0]  ;;  %v5804_v47 = vld [vmem:[#allocation15 + $0x28] sm:$0xf] }
  0x6d   :  { %v5798_v46 = vld [vmem:[#allocation15 + $0xa0] sm:$0xf0] }
  0x6e   :  { %955 = vmatpush.bf16.msra.mxu1 %v5697_v63  ;;  %v5865_v63 = vor.u32 %v6730_v56, %v5862_v57  ;;  %v6036_v56 = vld [vmem:[#allocation15 + $0x730] sm:$0xf] }
  0x6f   :  { %936 = vmatpush.bf16.msra.mxu0 %v5693_v58  ;;  %899 = vmatpush.bf16.msrb.mxu2 %v5669_v6  ;;  %v5868_v58 = vld [vmem:[#allocation15 + $0x428] sm:$0xf]  ;;  %v5873_v6 = vor.u32 %v6731_v1, %v5870_v2  ;;  %v6776_v57 = vld [vmem:[#allocation15 + $0x7ac] sm:$0xf0]  ;;  %v6775_v1 = vld [vmem:[#allocation15 + $0x73c] sm:$0xf] }
  0x70   :  { %918 = vmatpush.bf16.msrb.mxu3 %v5673_v7  ;;  %v5869_v0 = vor.u32 %v6733_v60, %v5868_v58  ;;  %v5844_v7 = vld [vmem:[#allocation15 + $0x320] sm:$0xf]  ;;  %v6774_v58 = vld [vmem:[#allocation15 + $0x734] sm:$0xf]  ;;  %v6046_v2 = vld [vmem:[#allocation15 + $0x7b8] sm:$0xf0] }
  0x71   :  { %v6038_v60 = vld [vmem:[#allocation15 + $0x7b0] sm:$0xf0] }
  0x72   :  { %956 = vmatpush.bf16.msra.mxu1 %v5681_v14 }
  0x73   :  { %937 = vmatpush.bf16.msra.mxu0 %v5677_v8  ;;  %v6728_v8 = vld [vmem:[#allocation15 + $0x39c] sm:$0xf0] }
  0x74   :  { %v5845_v9 = vor.u32 %v6728_v8, %v5844_v7  ;;  %v6770_v7 = vld [vmem:[#allocation15 + $0x634] sm:$0xf] }
  0x75   :  { %v6022_v8 = vld [vmem:[#allocation15 + $0x6b0] sm:$0xf0] }
  0xb2   :  { %v292_v30 = vpop.f32.mrf.mxu1 }
  0xb3   :  { %v293_v62 = vadd.f32 %v7766_v45, %v292_v30  ;;  %v6738_v30 = vld [vmem:[#allocation15 + $0x624] sm:$0xf] }
  0xb4   :  { %v5897_v33 = vor.u32 %v6738_v30, %v5894_v31  ;;  %v5812_v30 = vld [vmem:[#allocation15 + $0x120] sm:$0xf] }
  0xb5   :  { %v302_v11 = vmax.f32 %v293_v62, 0.0  ;;  %v5861_v62 = vor.u32 %v6732_v53, %v5860_v52  ;;  %v6720_v31 = vld [vmem:[#allocation15 + $0x19c] sm:$0xf0]  ;;  %v5805_v52 = vor.u32 %v6717_v48, %v5804_v47  ;;  %v6715_v53 = vld [vmem:[#allocation15 + $0x2c] sm:$0xf] }
  0xb6   :  { %v5813_v36 = vor.u32 %v6720_v31, %v5812_v30  ;;  %v6762_v30 = vld [vmem:[#allocation15 + $0x434] sm:$0xf]  ;;  %v5980_v47 = vld [vmem:[#allocation15 + $0x338] sm:$0xf] }
  0xb7   :  { %v6761_v48 = vld [vmem:[#allocation15 + $0x3b4] sm:$0xf0] }
  0xba   :  { %v294_v3 = vpop.f32.mrf.mxu1 }
  0xbb   :  { %v295_v5 = vadd.f32 %v7766_v45, %v294_v3 }
  0xbd   :  { %v303_v12 = vmax.f32 %v295_v5, 0.0 }
  0xbf   :  { %v7770_v13 = vpack.c.bf16 %v303_v12, %v302_v11  ;;  %v5852_v11 = vld [vmem:[#allocation15 + $0x328] sm:$0xf] }
  0xc0   :  { %v6729_v12 = vld [vmem:[#allocation15 + $0x3a4] sm:$0xf0] }
  0xc1   :  { %518 = vmatmul.bf16.vlgmr.msra.gmra.mxu2 %v7770_v13  ;;  %537 = vmatmul.bf16.vlgmr.msra.gmra.mxu3 %v7770_v13  ;;  %v5853_v15 = vor.u32 %v6729_v12, %v5852_v11  ;;  %v6773_v11 = vld [vmem:[#allocation15 + $0x6b4] sm:$0xf0]  ;;  %v6771_v12 = vld [vmem:[#allocation15 + $0x63c] sm:$0xf] }
  0xc2   :  { %556 = vmatmul.bf16.vlgmr.msrb.gmra.mxu0 %v7770_v13  ;;  %575 = vmatmul.bf16.vlgmr.msrb.gmra.mxu1 %v7770_v13  ;;  %v297_v22 = vpop.f32.mrf.mxu1 }
  0xc3   :  { %1274 = vmatpush.bf16.msra.mxu2 %v5909_v18  ;;  %1293 = vmatpush.bf16.msra.mxu3 %v5913_v23  ;;  %v298_v54 = vadd.f32 %v7766_v45, %v297_v22  ;;  %v5828_v18 = vld [vmem:[#allocation15 + $0x220] sm:$0xf]  ;;  %v5830_v22 = vld [vmem:[#allocation15 + $0x2a0] sm:$0xf0] }
  0xc4   :  { %1312 = vmatpush.bf16.msrb.mxu0 %v5917_v24  ;;  %1331 = vmatpush.bf16.msrb.mxu1 %v5921_v28  ;;  %v5829_v23 = vor.u32 %v6724_v20, %v5828_v18  ;;  %v5833_v24 = vor.u32 %v6722_v21, %v5830_v22  ;;  %v5837_v28 = vor.u32 %v6725_v26, %v5836_v25  ;;  %v6006_v20 = vld [vmem:[#allocation15 + $0x5b0] sm:$0xf0]  ;;  %v6012_v21 = vld [vmem:[#allocation15 + $0x538] sm:$0xf]  ;;  %v6014_v25 = vld [vmem:[#allocation15 + $0x5b8] sm:$0xf0] }
  0xc5   :  { %v304_v3 = vmax.f32 %v298_v54, 0.0  ;;  %v5806_v54 = vld [vmem:[#allocation15 + $0xa8] sm:$0xf0]  ;;  %v6005_v22 = vor.u32 %v6768_v17, %v6004_v16  ;;  %v6746_v16 = vld [vmem:[#allocation15 + $0x34] sm:$0xf] }
  0xc6   :  { %v5926_v17 = vld [vmem:[#allocation15 + $0xb0] sm:$0xf0] }
  0xc7   :  { %1275 = vmatpush.bf16.msra.mxu2 %v5893_v32  ;;  %1294 = vmatpush.bf16.msra.mxu3 %v5897_v33  ;;  %v6718_v32 = vld [vmem:[#allocation15 + $0x124] sm:$0xf] }
  0xc8   :  { %1313 = vmatpush.bf16.msrb.mxu0 %v5901_v37  ;;  %1332 = vmatpush.bf16.msrb.mxu1 %v5905_v40  ;;  %v5814_v33 = vld [vmem:[#allocation15 + $0x1a0] sm:$0xf0]  ;;  %v6721_v37 = vld [vmem:[#allocation15 + $0x1a4] sm:$0xf0] }
  0xc9   :  { %v5817_v40 = vor.u32 %v6718_v32, %v5814_v33  ;;  %v5821_v41 = vor.u32 %v6721_v37, %v5820_v34  ;;  %v5990_v32 = vld [vmem:[#allocation15 + $0x4b0] sm:$0xf0]  ;;  %v5996_v33 = vld [vmem:[#allocation15 + $0x438] sm:$0xf] }
  0xca   :  { %v299_v59 = vpop.f32.mrf.mxu1  ;;  %v6765_v34 = vld [vmem:[#allocation15 + $0x4b4] sm:$0xf0] }
  0xcb   :  { %v300_v61 = vadd.f32 %v7766_v45, %v299_v59  ;;  %1276 = vmatpush.bf16.msra.mxu2 %v5877_v44  ;;  %1295 = vmatpush.bf16.msra.mxu3 %v5881_v49  ;;  %v6726_v45 = vld [vmem:[#allocation15 + $0x324] sm:$0xf]  ;;  %v5825_v49 = vor.u32 %v6719_v38, %v5822_v39  ;;  %v6037_v59 = vor.u32 %v6776_v57, %v6036_v56  ;;  %v6763_v38 = vld [vmem:[#allocation15 + $0x43c] sm:$0xf]  ;;  %v6754_v56 = vld [vmem:[#allocation15 + $0x234] sm:$0xf] }
  0xcc   :  { %1314 = vmatpush.bf16.msrb.mxu0 %v5885_v50  ;;  %1333 = vmatpush.bf16.msrb.mxu1 %v5889_v55  ;;  %v5849_v14 = vor.u32 %v6726_v45, %v5846_v10  ;;  %v6714_v44 = vld [vmem:[#allocation15 + $0x24] sm:$0xf]  ;;  %v5797_v50 = vor.u32 %v6716_v43, %v5796_v42  ;;  %v5809_v55 = vor.u32 %v6715_v53, %v5806_v54  ;;  %v6028_v10 = vld [vmem:[#allocation15 + $0x638] sm:$0xf]  ;;  %v5998_v39 = vld [vmem:[#allocation15 + $0x4b8] sm:$0xf0] }
  0xcd   :  { %v305_v4 = vmax.f32 %v300_v61, 0.0  ;;  %v5801_v51 = vor.u32 %v6714_v44, %v5798_v46  ;;  %v6044_v61 = vld [vmem:[#allocation15 + $0x738] sm:$0xf]  ;;  %v5997_v37 = vor.u32 %v6765_v34, %v5996_v33  ;;  %v6760_v42 = vld [vmem:[#allocation15 + $0x3ac] sm:$0xf0] }
  0xce   :  { %v6758_v43 = vld [vmem:[#allocation15 + $0x334] sm:$0xf]  ;;  %v5956_v53 = vld [vmem:[#allocation15 + $0x230] sm:$0xf]  ;;  %v6809_v33 = vld [vmem:[#allocation15 + $0x7c4] sm:$0xf0] }
  0xcf   :  { %v7778_v5 = vpack.c.bf16 %v305_v4, %v304_v3  ;;  %1277 = vmatpush.bf16.msra.mxu2 %v5861_v62  ;;  %1296 = vmatpush.bf16.msra.mxu3 %v5865_v63  ;;  %v6777_v62 = vld [vmem:[#allocation15 + $0x7b4] sm:$0xf0]  ;;  %v6041_v63 = vor.u32 %v6774_v58, %v6038_v60  ;;  %v6020_v3 = vld [vmem:[#allocation15 + $0x630] sm:$0xf]  ;;  %v6049_v4 = vor.u32 %v6775_v1, %v6046_v2  ;;  %v5974_v46 = vld [vmem:[#allocation15 + $0x3b0] sm:$0xf0] }
  0xd0   :  { %1315 = vmatpush.bf16.msrb.mxu0 %v5869_v0  ;;  %1334 = vmatpush.bf16.msrb.mxu1 %v5873_v6  ;;  %v6045_v0 = vor.u32 %v6777_v62, %v6044_v61  ;;  %v6772_v6 = vld [vmem:[#allocation15 + $0x6ac] sm:$0xf0]  ;;  %v5958_v57 = vld [vmem:[#allocation15 + $0x2b0] sm:$0xf0]  ;;  %v5964_v60 = vld [vmem:[#allocation15 + $0x238] sm:$0xf] }
  0xd1   :  { %523 = vmatmul.bf16.gmra.mxu2 %v7778_v5  ;;  %542 = vmatmul.bf16.gmra.mxu3 %v7778_v5  ;;  %v6021_v45 = vor.u32 %v6772_v6, %v6020_v3  ;;  %v6757_v61 = vld [vmem:[#allocation15 + $0x2b4] sm:$0xf0]  ;;  %v6755_v62 = vld [vmem:[#allocation15 + $0x23c] sm:$0xf]  ;;  %v5940_v1 = vld [vmem:[#allocation15 + $0x130] sm:$0xf] }
  0xd2   :  { %561 = vmatmul.bf16.gmra.mxu0 %v7778_v5  ;;  %580 = vmatmul.bf16.gmra.mxu1 %v7778_v5  ;;  %v6752_v2 = vld [vmem:[#allocation15 + $0x1ac] sm:$0xf0]  ;;  %v6750_v3 = vld [vmem:[#allocation15 + $0x134] sm:$0xf]  ;;  %v5948_v6 = vld [vmem:[#allocation15 + $0x138] sm:$0xf] }
  0xd3   :  { %1278 = vmatpush.bf16.msra.mxu2 %v5845_v9  ;;  %1297 = vmatpush.bf16.msra.mxu3 %v5849_v14  ;;  %v6025_v9 = vor.u32 %v6770_v7, %v6022_v8  ;;  %v6029_v14 = vor.u32 %v6773_v11, %v6028_v10  ;;  %v5941_v8 = vor.u32 %v6752_v2, %v5940_v1  ;;  %v5950_v10 = vld [vmem:[#allocation15 + $0x1b8] sm:$0xf0]  ;;  %v6799_v1 = vld [vmem:[#allocation15 + $0x54c] sm:$0xf] }
  0xd4   :  { %1316 = vmatpush.bf16.msrb.mxu0 %v5853_v15  ;;  %1335 = vmatpush.bf16.msrb.mxu1 %v5857_v19  ;;  %v6030_v15 = vld [vmem:[#allocation15 + $0x6b8] sm:$0xf0]  ;;  %v6766_v19 = vld [vmem:[#allocation15 + $0x534] sm:$0xf]  ;;  %v6142_v2 = vld [vmem:[#allocation15 + $0x5c8] sm:$0xf0] }
  0xd5   :  { %v6033_v18 = vor.u32 %v6771_v12, %v6030_v15  ;;  %v6009_v26 = vor.u32 %v6766_v19, %v6006_v20  ;;  %v6748_v15 = vld [vmem:[#allocation15 + $0xac] sm:$0xf0]  ;;  %v6749_v19 = vld [vmem:[#allocation15 + $0xb4] sm:$0xf0] }
  0xd7   :  { %1279 = vmatpush.bf16.msra.mxu2 %v5829_v23  ;;  %1298 = vmatpush.bf16.msra.mxu3 %v5833_v24  ;;  %v6769_v23 = vld [vmem:[#allocation15 + $0x5b4] sm:$0xf0]  ;;  %v6767_v24 = vld [vmem:[#allocation15 + $0x53c] sm:$0xf] }
  0xd8   :  { %1317 = vmatpush.bf16.msrb.mxu0 %v5837_v28  ;;  %1336 = vmatpush.bf16.msrb.mxu1 %v5841_v35  ;;  %v6013_v27 = vor.u32 %v6769_v23, %v6012_v21  ;;  %v5988_v28 = vld [vmem:[#allocation15 + $0x430] sm:$0xf]  ;;  %v6017_v31 = vor.u32 %v6767_v24, %v6014_v25  ;;  %v6747_v24 = vld [vmem:[#allocation15 + $0x3c] sm:$0xf] }
  0xd9   :  { %v5989_v35 = vor.u32 %v6764_v29, %v5988_v28  ;;  %v5934_v25 = vld [vmem:[#allocation15 + $0xb8] sm:$0xf0]  ;;  %v6808_v28 = vld [vmem:[#allocation15 + $0x7bc] sm:$0xf0]  ;;  %v6806_v29 = vld [vmem:[#allocation15 + $0x744] sm:$0xf] }
  0xdb   :  { %1280 = vmatpush.bf16.msra.mxu2 %v5813_v36  ;;  %1299 = vmatpush.bf16.msra.mxu3 %v5817_v40  ;;  %v5993_v36 = vor.u32 %v6762_v30, %v5990_v32  ;;  %v6001_v40 = vor.u32 %v6763_v38, %v5998_v39  ;;  %v6172_v32 = vld [vmem:[#allocation15 + $0x748] sm:$0xf]  ;;  %v7031_v38 = vld [vmem:[#allocation11] ss:$0 sm:$0xff]  ;;  %v236_v39 = vpop.f32.mrf.mxu0 }
  0xdc   :  { %1318 = vmatpush.bf16.msrb.mxu0 %v5821_v41  ;;  %1337 = vmatpush.bf16.msrb.mxu1 %v5825_v49  ;;  %v5972_v41 = vld [vmem:[#allocation15 + $0x330] sm:$0xf]  ;;  %v5977_v49 = vor.u32 %v6758_v43, %v5974_v46  ;;  %v6802_v43 = vld [vmem:[#allocation15 + $0x644] sm:$0xf] }
  0xdd   :  { %v5973_v44 = vor.u32 %v6760_v42, %v5972_v41  ;;  %v6148_v41 = vld [vmem:[#allocation15 + $0x640] sm:$0xf] }
  0xde   :  { %v6804_v42 = vld [vmem:[#allocation15 + $0x6bc] sm:$0xf0] }
  0xdf   :  { %1281 = vmatpush.bf16.msra.mxu2 %v5797_v50  ;;  %1300 = vmatpush.bf16.msra.mxu3 %v5801_v51  ;;  %v5981_v50 = vor.u32 %v6761_v48, %v5980_v47  ;;  %v6759_v51 = vld [vmem:[#allocation15 + $0x33c] sm:$0xf]  ;;  %v6149_v46 = vor.u32 %v6804_v42, %v6148_v41  ;;  %v6150_v47 = vld [vmem:[#allocation15 + $0x6c0] sm:$0xf0]  ;;  %v6156_v48 = vld [vmem:[#allocation15 + $0x648] sm:$0xf] }
  0xe0   :  { %1319 = vmatpush.bf16.msrb.mxu0 %v5805_v52  ;;  %1338 = vmatpush.bf16.msrb.mxu1 %v5809_v55  ;;  %v5982_v52 = vld [vmem:[#allocation15 + $0x3b8] sm:$0xf0]  ;;  %v6756_v55 = vld [vmem:[#allocation15 + $0x2ac] sm:$0xf0]  ;;  %v6094_v42 = vld [vmem:[#allocation15 + $0x2c8] sm:$0xf0] }
  0xe1   :  { %900 = vmatmul.bf16.vlgmr.msrb.gmra.mxu2 %v7770_v13  ;;  %919 = vmatmul.bf16.vlgmr.msrb.gmra.mxu3 %v7770_v13  ;;  %v5985_v54 = vor.u32 %v6759_v51, %v5982_v52  ;;  %v5957_v58 = vor.u32 %v6756_v55, %v5956_v53  ;;  %v6803_v52 = vld [vmem:[#allocation15 + $0x64c] sm:$0xf] }
  0xe2   :  { %938 = vmatmul.bf16.vlgmr.msra.gmra.mxu0 %v7770_v13  ;;  %957 = vmatmul.bf16.vlgmr.msra.gmra.mxu1 %v7770_v13  ;;  %v6158_v53 = vld [vmem:[#allocation15 + $0x6c8] sm:$0xf0] }
  0xe3   :  { %1656 = vmatpush.bf16.msrb.mxu2 %v6037_v59  ;;  %1675 = vmatpush.bf16.msrb.mxu3 %v6041_v63  ;;  %v5961_v59 = vor.u32 %v6754_v56, %v5958_v57  ;;  %v5965_v63 = vor.u32 %v6757_v61, %v5964_v60  ;;  %v6161_v56 = vor.u32 %v6803_v52, %v6158_v53  ;;  %v6800_v57 = vld [vmem:[#allocation15 + $0x5bc] sm:$0xf0]  ;;  %v6134_v60 = vld [vmem:[#allocation15 + $0x5c0] sm:$0xf0]  ;;  %v6140_v61 = vld [vmem:[#allocation15 + $0x548] sm:$0xf] }
  0xe4   :  { %1694 = vmatpush.bf16.msra.mxu0 %v6045_v0  ;;  %1713 = vmatpush.bf16.msra.mxu1 %v6049_v4  ;;  %v5966_v0 = vld [vmem:[#allocation15 + $0x2b8] sm:$0xf0]  ;;  %v5942_v4 = vld [vmem:[#allocation15 + $0x1b0] sm:$0xf0]  ;;  %v6785_v52 = vld [vmem:[#allocation15 + $0x1c4] sm:$0xf0] }
  0xe5   :  { %v5969_v7 = vor.u32 %v6755_v62, %v5966_v0  ;;  %v5945_v11 = vor.u32 %v6750_v3, %v5942_v4  ;;  %v6801_v62 = vld [vmem:[#allocation15 + $0x5c4] sm:$0xf0]  ;;  %v6116_v3 = vld [vmem:[#allocation15 + $0x440] sm:$0xf]  ;;  %v6145_v4 = vor.u32 %v6799_v1, %v6142_v2 }
  0xe6   :  { %v6141_v0 = vor.u32 %v6801_v62, %v6140_v61  ;;  %v6778_v61 = vld [vmem:[#allocation15 + $0x44] sm:$0xf]  ;;  %v6781_v2 = vld [vmem:[#allocation15 + $0xc4] sm:$0xf0] }
  0xe7   :  { %1657 = vmatpush.bf16.msrb.mxu2 %v6021_v45  ;;  %1676 = vmatpush.bf16.msrb.mxu3 %v6025_v9  ;;  %v6753_v45 = vld [vmem:[#allocation15 + $0x1b4] sm:$0xf0]  ;;  %v6751_v9 = vld [vmem:[#allocation15 + $0x13c] sm:$0xf] }
  0xe8   :  { %1695 = vmatpush.bf16.msra.mxu0 %v6029_v14  ;;  %1714 = vmatpush.bf16.msra.mxu1 %v6033_v18  ;;  %v5949_v12 = vor.u32 %v6753_v45, %v5948_v6  ;;  %v5924_v14 = vld [vmem:[#allocation15 + $0x30] sm:$0xf]  ;;  %v5932_v18 = vld [vmem:[#allocation15 + $0x38] sm:$0xf]  ;;  %v5953_v20 = vor.u32 %v6751_v9, %v5950_v10  ;;  %v6796_v6 = vld [vmem:[#allocation15 + $0x4bc] sm:$0xf0]  ;;  %v238_v45 = vpop.f32.mrf.mxu0 }
  0xe9   :  { %v5925_v21 = vor.u32 %v6748_v15, %v5924_v14  ;;  %v5933_v23 = vor.u32 %v6749_v19, %v5932_v18  ;;  %v6124_v9 = vld [vmem:[#allocation15 + $0x448] sm:$0xf] }
  0xea   :  { %v6797_v10 = vld [vmem:[#allocation15 + $0x4c4] sm:$0xf0] }
  0xeb   :  { %1658 = vmatpush.bf16.msrb.mxu2 %v6005_v22  ;;  %1677 = vmatpush.bf16.msrb.mxu3 %v6009_v26  ;;  %v5929_v22 = vor.u32 %v6746_v16, %v5926_v17  ;;  %v5937_v26 = vor.u32 %v6747_v24, %v5934_v25  ;;  %v6125_v15 = vor.u32 %v6797_v10, %v6124_v9  ;;  %v6795_v16 = vld [vmem:[#allocation15 + $0x44c] sm:$0xf]  ;;  %v6102_v24 = vld [vmem:[#allocation15 + $0x3c0] sm:$0xf0]  ;;  %v6108_v25 = vld [vmem:[#allocation15 + $0x348] sm:$0xf] }
  0xec   :  { %1696 = vmatpush.bf16.msra.mxu0 %v6013_v27  ;;  %1715 = vmatpush.bf16.msra.mxu1 %v6017_v31  ;;  %v6164_v27 = vld [vmem:[#allocation15 + $0x740] sm:$0xf]  ;;  %v6166_v31 = vld [vmem:[#allocation15 + $0x7c0] sm:$0xf0]  ;;  %v6126_v17 = vld [vmem:[#allocation15 + $0x4c8] sm:$0xf0] }
  0xed   :  { %v6165_v30 = vor.u32 %v6808_v28, %v6164_v27  ;;  %v6169_v34 = vor.u32 %v6806_v29, %v6166_v31  ;;  %v6129_v19 = vor.u32 %v6795_v16, %v6126_v17  ;;  %v6791_v29 = vld [vmem:[#allocation15 + $0x34c] sm:$0xf]  ;;  %v6084_v31 = vld [vmem:[#allocation15 + $0x240] sm:$0xf]  ;;  %v6838_v9 = vld [vmem:[#allocation15 + $0x754] sm:$0xf] }
  0xef   :  { %1659 = vmatpush.bf16.msrb.mxu2 %v5989_v35  ;;  %1678 = vmatpush.bf16.msrb.mxu3 %v5993_v36  ;;  %v6173_v35 = vor.u32 %v6809_v33, %v6172_v32  ;;  %v6807_v36 = vld [vmem:[#allocation15 + $0x74c] sm:$0xf]  ;;  %v6788_v33 = vld [vmem:[#allocation15 + $0x2bc] sm:$0xf0] }
  0xf0   :  { %1697 = vmatpush.bf16.msra.mxu0 %v5997_v37  ;;  %1716 = vmatpush.bf16.msra.mxu1 %v6001_v40  ;;  %v6174_v37 = vld [vmem:[#allocation15 + $0x7c8] sm:$0xf0] }
  0xf1   :  { %905 = vmatmul.bf16.gmra.mxu2 %v7778_v5  ;;  %924 = vmatmul.bf16.gmra.mxu3 %v7778_v5  ;;  %v6177_v40 = vor.u32 %v6807_v36, %v6174_v37  ;;  %v6085_v36 = vor.u32 %v6788_v33, %v6084_v31  ;;  %v6286_v31 = vld [vmem:[#allocation15 + $0x6d8] sm:$0xf0] }
  0xf2   :  { %943 = vmatmul.bf16.gmra.mxu0 %v7778_v5  ;;  %962 = vmatmul.bf16.gmra.mxu1 %v7778_v5 }
  0xf3   :  { %1660 = vmatpush.bf16.msrb.mxu2 %v5973_v44  ;;  %1679 = vmatpush.bf16.msrb.mxu3 %v5977_v49  ;;  %v7796_v44 = vadd.f32 %v7031_v38, %v236_v39  ;;  %v6805_v49 = vld [vmem:[#allocation15 + $0x6c4] sm:$0xf0] }
  0xf4   :  { %1698 = vmatpush.bf16.msra.mxu0 %v5981_v50  ;;  %1717 = vmatpush.bf16.msra.mxu1 %v5985_v54  ;;  %v6153_v50 = vor.u32 %v6802_v43, %v6150_v47  ;;  %v6157_v51 = vor.u32 %v6805_v49, %v6156_v48  ;;  %v6132_v54 = vld [vmem:[#allocation15 + $0x540] sm:$0xf]  ;;  %v6789_v39 = vld [vmem:[#allocation15 + $0x2c4] sm:$0xf0]  ;;  %v6782_v47 = vld [vmem:[#allocation15 + $0x144] sm:$0xf] }
  0xf5   :  { %v241_v55 = vmax.f32 %v7796_v44, 0.0   ;;  %v6068_v43 = vld [vmem:[#allocation15 + $0x140] sm:$0xf]  ;;  %v6070_v48 = vld [vmem:[#allocation15 + $0x1c0] sm:$0xf0] }
  0xf6   :  { %v6076_v49 = vld [vmem:[#allocation15 + $0x148] sm:$0xf]  ;;  %v6073_v53 = vor.u32 %v6782_v47, %v6070_v48  ;;  %v6244_v48 = vld [vmem:[#allocation15 + $0x450] sm:$0xf] }
  0xf7   :  { %1661 = vmatpush.bf16.msrb.mxu2 %v5957_v58  ;;  %1680 = vmatpush.bf16.msrb.mxu3 %v5961_v59  ;;  %v6798_v58 = vld [vmem:[#allocation15 + $0x544] sm:$0xf]  ;;  %v6133_v59 = vor.u32 %v6800_v57, %v6132_v54  ;;  %v6077_v54 = vor.u32 %v6785_v52, %v6076_v49  ;;  %v6078_v57 = vld [vmem:[#allocation15 + $0x1c8] sm:$0xf0]  ;;  %v6828_v49 = vld [vmem:[#allocation15 + $0x4cc] sm:$0xf0] }
  0xf8   :  { %1699 = vmatpush.bf16.msra.mxu0 %v5965_v63  ;;  %1718 = vmatpush.bf16.msra.mxu1 %v5969_v7  ;;  %v6137_v63 = vor.u32 %v6798_v58, %v6134_v60  ;;  %v6794_v7 = vld [vmem:[#allocation15 + $0x444] sm:$0xf]  ;;  %v6780_v60 = vld [vmem:[#allocation15 + $0xbc] sm:$0xf0]  ;;  %v6246_v52 = vld [vmem:[#allocation15 + $0x4d0] sm:$0xf0] }
  0xfb   :  { %1662 = vmatpush.bf16.msrb.mxu2 %v5941_v8  ;;  %1681 = vmatpush.bf16.msrb.mxu3 %v5945_v11  ;;  %v6118_v8 = vld [vmem:[#allocation15 + $0x4c0] sm:$0xf0]  ;;  %v7799_v11 = vadd.f32 %v7031_v38, %v238_v45  ;;  %v6092_v38 = vld [vmem:[#allocation15 + $0x248] sm:$0xf]  ;;  %v6840_v45 = vld [vmem:[#allocation15 + $0x7cc] sm:$0xf0] }
  0xfc   :  { %1700 = vmatpush.bf16.msra.mxu0 %v5949_v12  ;;  %1719 = vmatpush.bf16.msra.mxu1 %v5953_v20  ;;  %v6117_v12 = vor.u32 %v6796_v6, %v6116_v3  ;;  %v6121_v14 = vor.u32 %v6794_v7, %v6118_v8  ;;  %v6100_v20 = vld [vmem:[#allocation15 + $0x340] sm:$0xf]  ;;  %v6093_v41 = vor.u32 %v6789_v39, %v6092_v38  ;;  %v6779_v3 = vld [vmem:[#allocation15 + $0x4c] sm:$0xf]  ;;  %v6292_v8 = vld [vmem:[#allocation15 + $0x750] sm:$0xf] }
  0xfd   :  { %v242_v18 = vmax.f32 %v7799_v11, 0.0   ;;  %v6293_v10 = vor.u32 %v6840_v45, %v6292_v8  ;;  %v6262_v38 = vld [vmem:[#allocation15 + $0x5d0] sm:$0xf0]  ;;  %v6268_v39 = vld [vmem:[#allocation15 + $0x558] sm:$0xf] }
  0xfe   :  { %v6238_v8 = vld [vmem:[#allocation15 + $0x3d8] sm:$0xf0] }
  0xff   :  { %1663 = vmatpush.bf16.msrb.mxu2 %v5925_v21  ;;  %1682 = vmatpush.bf16.msrb.mxu3 %v5929_v22  ;;  %v6792_v21 = vld [vmem:[#allocation15 + $0x3bc] sm:$0xf0]  ;;  %v6790_v22 = vld [vmem:[#allocation15 + $0x344] sm:$0xf] }
 0x100   :  { %1701 = vmatpush.bf16.msra.mxu0 %v5933_v23  ;;  %1720 = vmatpush.bf16.msra.mxu1 %v5937_v26  ;;  %v6101_v23 = vor.u32 %v6792_v21, %v6100_v20  ;;  %v6793_v26 = vld [vmem:[#allocation15 + $0x3c4] sm:$0xf0]  ;;  %v6105_v27 = vor.u32 %v6790_v22, %v6102_v24  ;;  %v6302_v20 = vld [vmem:[#allocation15 + $0x7d8] sm:$0xf0]  ;;  %v6276_v22 = vld [vmem:[#allocation15 + $0x650] sm:$0xf] }
 0x101   :  { %1282 = vmatmul.bf16.vlgmr.msra.gmra.mxu2 %v7770_v13  ;;  %1301 = vmatmul.bf16.vlgmr.msra.gmra.mxu3 %v7770_v13  ;;  %v6109_v28 = vor.u32 %v6793_v26, %v6108_v25  ;;  %v6834_v25 = vld [vmem:[#allocation15 + $0x654] sm:$0xf] }
 0x102   :  { %1320 = vmatmul.bf16.vlgmr.msrb.gmra.mxu0 %v7770_v13  ;;  %1339 = vmatmul.bf16.vlgmr.msrb.gmra.mxu1 %v7770_v13  ;;  %v6278_v26 = vld [vmem:[#allocation15 + $0x6d0] sm:$0xf0] }
 0x103   :  { %2038 = vmatpush.bf16.msra.mxu2 %v6165_v30  ;;  %2057 = vmatpush.bf16.msra.mxu3 %v6169_v34  ;;  %v6110_v30 = vld [vmem:[#allocation15 + $0x3c8] sm:$0xf0]  ;;  %v6786_v34 = vld [vmem:[#allocation15 + $0x244] sm:$0xf] }
 0x104   :  { %2076 = vmatpush.bf16.msrb.mxu0 %v6173_v35  ;;  %2095 = vmatpush.bf16.msrb.mxu1 %v6177_v40  ;;  %v6113_v32 = vor.u32 %v6791_v29, %v6110_v30  ;;  %v6086_v35 = vld [vmem:[#allocation15 + $0x2c0] sm:$0xf0]  ;;  %v6787_v40 = vld [vmem:[#allocation15 + $0x24c] sm:$0xf]  ;;  %v6837_v29 = vld [vmem:[#allocation15 + $0x6d4] sm:$0xf0] }
 0x105   :  { %v6089_v37 = vor.u32 %v6786_v34, %v6086_v35  ;;  %v6835_v30 = vld [vmem:[#allocation15 + $0x65c] sm:$0xf]  ;;  %v6260_v34 = vld [vmem:[#allocation15 + $0x550] sm:$0xf] }
 0x106   :  { %v6289_v33 = vor.u32 %v6835_v30, %v6286_v31  ;;  %v6832_v35 = vld [vmem:[#allocation15 + $0x5cc] sm:$0xf0]  ;;  %v6204_v30 = vld [vmem:[#allocation15 + $0x158] sm:$0xf] }
 0x107   :  { %2039 = vmatpush.bf16.msra.mxu2 %v6149_v46  ;;  %2058 = vmatpush.bf16.msra.mxu3 %v6153_v50  ;;  %v6784_v46 = vld [vmem:[#allocation15 + $0x1bc] sm:$0xf0]  ;;  %v6097_v50 = vor.u32 %v6787_v40, %v6094_v42  ;;  %v6833_v40 = vld [vmem:[#allocation15 + $0x5d4] sm:$0xf0] }
 0x108   :  { %2077 = vmatpush.bf16.msrb.mxu0 %v6157_v51  ;;  %2096 = vmatpush.bf16.msrb.mxu1 %v6161_v56  ;;  %v6069_v51 = vor.u32 %v6784_v46, %v6068_v43  ;;  %v6783_v56 = vld [vmem:[#allocation15 + $0x14c] sm:$0xf]  ;;  %v6269_v42 = vor.u32 %v6833_v40, %v6268_v39  ;;  %v6831_v43 = vld [vmem:[#allocation15 + $0x55c] sm:$0xf]  ;;  %v6817_v31 = vld [vmem:[#allocation15 + $0x1d4] sm:$0xf0] }
 0x109   :  { %v6081_v58 = vor.u32 %v6783_v56, %v6078_v57  ;;  %v6270_v46 = vld [vmem:[#allocation15 + $0x5d8] sm:$0xf0]  ;;  %v6180_v39 = vld [vmem:[#allocation15 + $0x50] sm:$0xf] }
 0x10a   :  { %v6273_v47 = vor.u32 %v6831_v43, %v6270_v46  ;;  %v6812_v40 = vld [vmem:[#allocation15 + $0xcc] sm:$0xf0]  ;;  %v6182_v46 = vld [vmem:[#allocation15 + $0xd0] sm:$0xf0] }
 0x10b   :  { %2040 = vmatpush.bf16.msra.mxu2 %v6133_v59  ;;  %2059 = vmatpush.bf16.msra.mxu3 %v6137_v63  ;;  %v6052_v59 = vld [vmem:[#allocation15 + $0x40] sm:$0xf]  ;;  %v6054_v63 = vld [vmem:[#allocation15 + $0xc0] sm:$0xf0] }
 0x10c   :  { %2078 = vmatpush.bf16.msrb.mxu0 %v6141_v0  ;;  %2097 = vmatpush.bf16.msrb.mxu1 %v6145_v4  ;;  %v6053_v62 = vor.u32 %v6780_v60, %v6052_v59  ;;  %v6060_v0 = vld [vmem:[#allocation15 + $0x48] sm:$0xf]  ;;  %v6057_v1 = vor.u32 %v6778_v61, %v6054_v63  ;;  %v6062_v4 = vld [vmem:[#allocation15 + $0xc8] sm:$0xf0]  ;;  %v6254_v59 = vld [vmem:[#allocation15 + $0x4d8] sm:$0xf0] }
 0x10d   :  { %v6061_v6 = vor.u32 %v6781_v2, %v6060_v0  ;;  %v6065_v7 = vor.u32 %v6779_v3, %v6062_v4  ;;  %v6228_v61 = vld [vmem:[#allocation15 + $0x350] sm:$0xf]  ;;  %v6822_v63 = vld [vmem:[#allocation15 + $0x354] sm:$0xf]  ;;  %v6236_v2 = vld [vmem:[#allocation15 + $0x358] sm:$0xf] }
 0x10e   :  { %v6825_v3 = vld [vmem:[#allocation15 + $0x3d4] sm:$0xf0] }
 0x10f   :  { %2041 = vmatpush.bf16.msra.mxu2 %v6117_v12  ;;  %2060 = vmatpush.bf16.msra.mxu3 %v6121_v14  ;;  %v6294_v12 = vld [vmem:[#allocation15 + $0x7d0] sm:$0xf0]  ;;  %v6300_v14 = vld [vmem:[#allocation15 + $0x758] sm:$0xf] }
 0x110   :  { %2079 = vmatpush.bf16.msrb.mxu0 %v6125_v15  ;;  %2098 = vmatpush.bf16.msrb.mxu1 %v6129_v19  ;;  %v6841_v15 = vld [vmem:[#allocation15 + $0x7d4] sm:$0xf0]  ;;  %v6297_v16 = vor.u32 %v6838_v9, %v6294_v12  ;;  %v6839_v19 = vld [vmem:[#allocation15 + $0x75c] sm:$0xf]  ;;  %v6212_v9 = vld [vmem:[#allocation15 + $0x250] sm:$0xf] }
 0x111   :  { %1287 = vmatmul.bf16.gmra.mxu2 %v7778_v5  ;;  %1306 = vmatmul.bf16.gmra.mxu3 %v7778_v5  ;;  %v6301_v17 = vor.u32 %v6841_v15, %v6300_v14  ;;  %v6305_v21 = vor.u32 %v6839_v19, %v6302_v20  ;;  %v6818_v12 = vld [vmem:[#allocation15 + $0x254] sm:$0xf] }
 0x112   :  { %1325 = vmatmul.bf16.gmra.mxu0 %v7778_v5  ;;  %1344 = vmatmul.bf16.gmra.mxu1 %v7778_v5  ;;  %v6214_v15 = vld [vmem:[#allocation15 + $0x2d0] sm:$0xf0] }
 0x113   :  { %2042 = vmatpush.bf16.msra.mxu2 %v6101_v23  ;;  %2061 = vmatpush.bf16.msra.mxu3 %v6105_v27  ;;  %v6836_v23 = vld [vmem:[#allocation15 + $0x6cc] sm:$0xf0]  ;;  %v6284_v27 = vld [vmem:[#allocation15 + $0x658] sm:$0xf]  ;;  %v6217_v19 = vor.u32 %v6818_v12, %v6214_v15  ;;  %v6868_v15 = vld [vmem:[#allocation15 + $0x6dc] sm:$0xf0] }
 0x114   :  { %2080 = vmatpush.bf16.msrb.mxu0 %v6109_v28  ;;  %2099 = vmatpush.bf16.msrb.mxu1 %v6113_v32  ;;  %v6277_v24 = vor.u32 %v6836_v23, %v6276_v22  ;;  %v6281_v28 = vor.u32 %v6834_v25, %v6278_v26  ;;  %v6285_v32 = vor.u32 %v6837_v29, %v6284_v27  ;;  %v6222_v22 = vld [vmem:[#allocation15 + $0x2d8] sm:$0xf0]  ;;  %v6196_v25 = vld [vmem:[#allocation15 + $0x150] sm:$0xf]  ;;  %v6814_v27 = vld [vmem:[#allocation15 + $0x154] sm:$0xf] }
 0x115   :  { %v340_v23 = vld [vmem:[%s10000_s9] sm:$0xf]  ;;  %v6816_v26 = vld [vmem:[#allocation15 + $0x1cc] sm:$0xf0]  ;;  %v6198_v29 = vld [vmem:[#allocation15 + $0x1d0] sm:$0xf0] }
 0x117   :  { %2043 = vmatpush.bf16.msra.mxu2 %v6085_v36  ;;  %2062 = vmatpush.bf16.msra.mxu3 %v6089_v37  ;;  %v6830_v36 = vld [vmem:[#allocation15 + $0x554] sm:$0xf]  ;;  %v6261_v37 = vor.u32 %v6832_v35, %v6260_v34  ;;  %v6201_v34 = vor.u32 %v6814_v27, %v6198_v29  ;;  %v6205_v35 = vor.u32 %v6817_v31, %v6204_v30  ;;  %v6414_v29 = vld [vmem:[#allocation15 + $0x6e8] sm:$0xf0]  ;;  %v6388_v31 = vld [vmem:[#allocation15 + $0x560] sm:$0xf] }
 0x118   :  { %2081 = vmatpush.bf16.msrb.mxu0 %v6093_v41  ;;  %2100 = vmatpush.bf16.msrb.mxu1 %v6097_v50  ;;  %v6265_v41 = vor.u32 %v6830_v36, %v6262_v38  ;;  %v6826_v50 = vld [vmem:[#allocation15 + $0x454] sm:$0xf]  ;;  %v6815_v36 = vld [vmem:[#allocation15 + $0x15c] sm:$0xf] }
 0x119   :  { %v6249_v56 = vor.u32 %v6826_v50, %v6246_v52 }
 0x11b   :  { %2044 = vmatpush.bf16.msra.mxu2 %v6069_v51  ;;  %2063 = vmatpush.bf16.msra.mxu3 %v6073_v53  ;;  %v6245_v51 = vor.u32 %v6828_v49, %v6244_v48  ;;  %v6252_v53 = vld [vmem:[#allocation15 + $0x458] sm:$0xf] }
 0x11c   :  { %2082 = vmatpush.bf16.msrb.mxu0 %v6077_v54  ;;  %2101 = vmatpush.bf16.msrb.mxu1 %v6081_v58  ;;  %v6829_v54 = vld [vmem:[#allocation15 + $0x4d4] sm:$0xf0]  ;;  %v6827_v58 = vld [vmem:[#allocation15 + $0x45c] sm:$0xf] }
 0x11d   :  { %v6253_v57 = vor.u32 %v6829_v54, %v6252_v53  ;;  %v6257_v60 = vor.u32 %v6827_v58, %v6254_v59  ;;  %v6813_v48 = vld [vmem:[#allocation15 + $0xd4] sm:$0xf0]  ;;  %v6811_v53 = vld [vmem:[#allocation15 + $0x5c] sm:$0xf] }
 0x11e   :  { %v6190_v54 = vld [vmem:[#allocation15 + $0xd8] sm:$0xf0] }
 0x11f   :  { %2045 = vmatpush.bf16.msra.mxu2 %v6053_v62  ;;  %2064 = vmatpush.bf16.msra.mxu3 %v6057_v1  ;;  %v6824_v62 = vld [vmem:[#allocation15 + $0x3cc] sm:$0xf0]  ;;  %v6230_v1 = vld [vmem:[#allocation15 + $0x3d0] sm:$0xf0]  ;;  %v6193_v59 = vor.u32 %v6811_v53, %v6190_v54 }
 0x120   :  { %2083 = vmatpush.bf16.msrb.mxu0 %v6061_v6  ;;  %2102 = vmatpush.bf16.msrb.mxu1 %v6065_v7  ;;  %v6229_v0 = vor.u32 %v6824_v62, %v6228_v61  ;;  %v6233_v4 = vor.u32 %v6822_v63, %v6230_v1  ;;  %v6237_v6 = vor.u32 %v6825_v3, %v6236_v2  ;;  %v6823_v7 = vld [vmem:[#allocation15 + $0x35c] sm:$0xf]  ;;  %v6872_v61 = vld [vmem:[#allocation15 + $0x7dc] sm:$0xf0]  ;;  %v6870_v63 = vld [vmem:[#allocation15 + $0x764] sm:$0xf] }
 0x121   :  { %1664 = vmatmul.bf16.vlgmr.msrb.gmra.mxu2 %v7770_v13  ;;  %1683 = vmatmul.bf16.vlgmr.msrb.gmra.mxu3 %v7770_v13  ;;  %v6241_v45 = vor.u32 %v6823_v7, %v6238_v8  ;;  %v6871_v7 = vld [vmem:[#allocation15 + $0x76c] sm:$0xf] }
 0x122   :  { %1702 = vmatmul.bf16.vlgmr.msra.gmra.mxu0 %v7770_v13  ;;  %1721 = vmatmul.bf16.vlgmr.msra.gmra.mxu1 %v7770_v13 }
 0x123   :  { %2420 = vmatpush.bf16.msrb.mxu2 %v6293_v10  ;;  %2439 = vmatpush.bf16.msrb.mxu3 %v6297_v16  ;;  %v6820_v10 = vld [vmem:[#allocation15 + $0x2cc] sm:$0xf0]  ;;  %v6220_v16 = vld [vmem:[#allocation15 + $0x258] sm:$0xf] }
 0x124   :  { %2458 = vmatpush.bf16.msra.mxu0 %v6301_v17  ;;  %2477 = vmatpush.bf16.msra.mxu1 %v6305_v21  ;;  %v6213_v14 = vor.u32 %v6820_v10, %v6212_v9  ;;  %v6821_v17 = vld [vmem:[#allocation15 + $0x2d4] sm:$0xf0]  ;;  %v6819_v21 = vld [vmem:[#allocation15 + $0x25c] sm:$0xf]  ;;  %v6430_v10 = vld [vmem:[#allocation15 + $0x7e8] sm:$0xf0] }
 0x125   :  { %v6221_v20 = vor.u32 %v6821_v17, %v6220_v16  ;;  %v6433_v12 = vor.u32 %v6871_v7, %v6430_v10  ;;  %v6856_v7 = vld [vmem:[#allocation15 + $0x3dc] sm:$0xf0] }
 0x127   :  { %2421 = vmatpush.bf16.msrb.mxu2 %v6277_v24  ;;  %2440 = vmatpush.bf16.msrb.mxu3 %v6281_v28  ;;  %v6225_v24 = vor.u32 %v6819_v21, %v6222_v22  ;;  %v6197_v28 = vor.u32 %v6816_v26, %v6196_v25  ;;  %v6406_v21 = vld [vmem:[#allocation15 + $0x6e0] sm:$0xf0]  ;;  %v6412_v25 = vld [vmem:[#allocation15 + $0x668] sm:$0xf] }
 0x128   :  { %2459 = vmatpush.bf16.msra.mxu0 %v6285_v32  ;;  %2478 = vmatpush.bf16.msra.mxu1 %v6289_v33  ;;  %v7817_v32 = vperm.slane %v340_v23, 2  ;;  %v7819_v33 = vperm.slane %v340_v23, 3  ;;  %v6869_v26 = vld [vmem:[#allocation15 + $0x6e4] sm:$0xf0] }
 0x129   :  { %v6413_v27 = vor.u32 %v6869_v26, %v6412_v25  ;;  %v6852_v25 = vld [vmem:[#allocation15 + $0x2dc] sm:$0xf0]  ;;  %v6850_v26 = vld [vmem:[#allocation15 + $0x264] sm:$0xf] }
 0x12b   :  { %2422 = vmatpush.bf16.msrb.mxu2 %v6261_v37  ;;  %2441 = vmatpush.bf16.msrb.mxu3 %v6265_v41  ;;  %v6206_v37 = vld [vmem:[#allocation15 + $0x1d8] sm:$0xf0]  ;;  %v6810_v41 = vld [vmem:[#allocation15 + $0x54] sm:$0xf] }
 0x12c   :  { %2460 = vmatpush.bf16.msra.mxu0 %v6269_v42  ;;  %2479 = vmatpush.bf16.msra.mxu1 %v6273_v47  ;;  %v6209_v38 = vor.u32 %v6815_v36, %v6206_v37  ;;  %v6188_v47 = vld [vmem:[#allocation15 + $0x58] sm:$0xf]  ;;  %v6185_v52 = vor.u32 %v6810_v41, %v6182_v46  ;;  %v6862_v36 = vld [vmem:[#allocation15 + $0x564] sm:$0xf]  ;;  %v6396_v41 = vld [vmem:[#allocation15 + $0x568] sm:$0xf] }
 0x12d   :  { %v6189_v58 = vor.u32 %v6813_v48, %v6188_v47  ;;  %v6390_v37 = vld [vmem:[#allocation15 + $0x5e0] sm:$0xf0]  ;;  %v6863_v48 = vld [vmem:[#allocation15 + $0x56c] sm:$0xf] }
 0x12f   :  { %2423 = vmatpush.bf16.msrb.mxu2 %v6245_v51  ;;  %2442 = vmatpush.bf16.msrb.mxu3 %v6249_v56  ;;  %v6181_v51 = vor.u32 %v6812_v40, %v6180_v39  ;;  %v7825_v56 = vperm.slane %v340_v23, 0  ;;  %v6393_v40 = vor.u32 %v6862_v36, %v6390_v37  ;;  %v6853_v36 = vld [vmem:[#allocation15 + $0x2e4] sm:$0xf0]  ;;  %v722_v37 = vld [vmem:[%s10000_s9 + $0x4] sm:$0xf] }
 0x130   :  { %2461 = vmatpush.bf16.msra.mxu0 %v6253_v57  ;;  %2480 = vmatpush.bf16.msra.mxu1 %v6257_v60  ;;  %v7827_v57 = vperm.slane %v340_v23, 1  ;;  %v6420_v60 = vld [vmem:[#allocation15 + $0x760] sm:$0xf] }
 0x131   :  { %1669 = vmatmul.bf16.gmra.mxu2 %v7778_v5  ;;  %1688 = vmatmul.bf16.gmra.mxu3 %v7778_v5  ;;  %v6421_v62 = vor.u32 %v6872_v61, %v6420_v60 }
 0x132   :  { %1707 = vmatmul.bf16.gmra.mxu0 %v7778_v5  ;;  %1726 = vmatmul.bf16.gmra.mxu1 %v7778_v5 }
 0x133   :  { %2424 = vmatpush.bf16.msrb.mxu2 %v6229_v0  ;;  %2443 = vmatpush.bf16.msrb.mxu3 %v6233_v4  ;;  %v6422_v0 = vld [vmem:[#allocation15 + $0x7e0] sm:$0xf0]  ;;  %v6428_v4 = vld [vmem:[#allocation15 + $0x768] sm:$0xf] }
 0x134   :  { %2462 = vmatpush.bf16.msra.mxu0 %v6237_v6  ;;  %2481 = vmatpush.bf16.msra.mxu1 %v6241_v45  ;;  %v6425_v3 = vor.u32 %v6870_v63, %v6422_v0  ;;  %v6873_v6 = vld [vmem:[#allocation15 + $0x7e4] sm:$0xf0] }
 0x135   :  { %v6429_v9 = vor.u32 %v6873_v6, %v6428_v4  ;;  %v6861_v63 = vld [vmem:[#allocation15 + $0x4e4] sm:$0xf0]  ;;  %v6356_v6 = vld [vmem:[#allocation15 + $0x360] sm:$0xf] }
 0x137   :  { %2425 = vmatpush.bf16.msrb.mxu2 %v6213_v14  ;;  %2444 = vmatpush.bf16.msrb.mxu3 %v6217_v19  ;;  %v6404_v14 = vld [vmem:[#allocation15 + $0x660] sm:$0xf] }
 0x138   :  { %2463 = vmatpush.bf16.msra.mxu0 %v6221_v20  ;;  %2482 = vmatpush.bf16.msra.mxu1 %v6225_v24  ;;  %v6405_v19 = vor.u32 %v6868_v15, %v6404_v14  ;;  %v6866_v20 = vld [vmem:[#allocation15 + $0x664] sm:$0xf]  ;;  %v6357_v14 = vor.u32 %v6856_v7, %v6356_v6  ;;  %v6364_v15 = vld [vmem:[#allocation15 + $0x368] sm:$0xf]  ;;  %v6844_v6 = vld [vmem:[#allocation15 + $0xdc] sm:$0xf0] }
 0x139   :  { %v6409_v24 = vor.u32 %v6866_v20, %v6406_v21  ;;  %v6855_v21 = vld [vmem:[#allocation15 + $0x36c] sm:$0xf]  ;;  %v6842_v7 = vld [vmem:[#allocation15 + $0x64] sm:$0xf] }
 0x13b   :  { %2426 = vmatpush.bf16.msrb.mxu2 %v6197_v28  ;;  %2445 = vmatpush.bf16.msrb.mxu3 %v6201_v34  ;;  %v6867_v28 = vld [vmem:[#allocation15 + $0x66c] sm:$0xf]  ;;  %v6864_v34 = vld [vmem:[#allocation15 + $0x5dc] sm:$0xf0] }
 0x13c   :  { %2464 = vmatpush.bf16.msra.mxu0 %v6205_v35  ;;  %2483 = vmatpush.bf16.msra.mxu1 %v6209_v38  ;;  %v6417_v30 = vor.u32 %v6867_v28, %v6414_v29  ;;  %v6389_v35 = vor.u32 %v6864_v34, %v6388_v31  ;;  %v6342_v29 = vld [vmem:[#allocation15 + $0x2e0] sm:$0xf0] }
 0x13f   :  { %v557_v42 = vpop.f32.mrf.mxu0  ;;  %v576_v43 = vpop.f32.mrf.mxu1  ;;  %2427 = vmatpush.bf16.msrb.mxu2 %v6181_v51  ;;  %2446 = vmatpush.bf16.msrb.mxu3 %v6185_v52  ;;  %v6860_v51 = vld [vmem:[#allocation15 + $0x4dc] sm:$0xf0]  ;;  %v6858_v52 = vld [vmem:[#allocation15 + $0x464] sm:$0xf] }
 0x140   :  { %v558_v49 = vadd.f32 %v557_v42, %v7817_v32  ;;  %v577_v50 = vadd.f32 %v576_v43, %v7819_v33  ;;  %2465 = vmatpush.bf16.msra.mxu0 %v6189_v58  ;;  %2484 = vmatpush.bf16.msra.mxu1 %v6193_v59  ;;  %v6865_v42 = vld [vmem:[#allocation15 + $0x5e4] sm:$0xf0]  ;;  %v6374_v58 = vld [vmem:[#allocation15 + $0x4e0] sm:$0xf0] }
 0x141   :  { %2046 = vmatmul.bf16.vlgmr.msra.gmra.mxu2 %v7770_v13  ;;  %2065 = vmatmul.bf16.vlgmr.msra.gmra.mxu3 %v7770_v13  ;;  %v6397_v47 = vor.u32 %v6865_v42, %v6396_v41  ;;  %v6380_v59 = vld [vmem:[#allocation15 + $0x468] sm:$0xf]  ;;  %v6350_v41 = vld [vmem:[#allocation15 + $0x2e8] sm:$0xf0] }
 0x142   :  { %639 = vst.msk [vmem:[#allocation2 + $0x80] sm:$0xff] %vm586_vm1, %v558_v49  ;;  %2103 = vmatmul.bf16.vlgmr.msrb.gmra.mxu1 %v7770_v13  ;;  %673 = vrot.lane.b32.xlu0 %v577_v50, %s7564_s16  ;;  %v6381_v4 = vor.u32 %v6861_v63, %v6380_v59 }
 0x143   :  { %665 = vst.msk [vmem:[#allocation2 + $0xc0] sm:$0xff] %vm586_vm1, %v577_v50  ;;  %2084 = vmatmul.bf16.vlgmr.msrb.gmra.mxu0 %v7770_v13  ;;  %647 = vrot.lane.b32.xlu2 %v558_v49, %s7564_s16  ;;  %v6398_v49 = vld [vmem:[#allocation15 + $0x5e8] sm:$0xf0]  ;;  %v6372_v50 = vld [vmem:[#allocation15 + $0x460] sm:$0xf] }
 0x144   :  { %v519_v1 = vpop.f32.mrf.mxu2  ;;  %v538_v2 = vpop.f32.mrf.mxu3  ;;  %2802 = vmatpush.bf16.msra.mxu2 %v6421_v62  ;;  %2821 = vmatpush.bf16.msra.mxu3 %v6425_v3  ;;  %v6401_v62 = vor.u32 %v6863_v48, %v6398_v49  ;;  %v6373_v0 = vor.u32 %v6860_v51, %v6372_v50  ;;  %v6382_v3 = vld [vmem:[#allocation15 + $0x4e8] sm:$0xf0]  ;;  %v6848_v51 = vld [vmem:[#allocation15 + $0x1dc] sm:$0xf0] }
 0x145   :  { %v520_v8 = vadd.f32 %v519_v1, %v7825_v56  ;;  %v539_v45 = vadd.f32 %v538_v2, %v7827_v57  ;;  %2840 = vmatpush.bf16.msrb.mxu0 %v6429_v9  ;;  %2859 = vmatpush.bf16.msrb.mxu1 %v6433_v12  ;;  %v6377_v1 = vor.u32 %v6858_v52, %v6374_v58  ;;  %v6859_v2 = vld [vmem:[#allocation15 + $0x46c] sm:$0xf]  ;;  %v6846_v52 = vld [vmem:[#allocation15 + $0x164] sm:$0xf]  ;;  %v6849_v58 = vld [vmem:[#allocation15 + $0x1e4] sm:$0xf0] }
 0x146   :  { %v6385_v12 = vor.u32 %v6859_v2, %v6382_v3  ;;  %v6308_v2 = vld [vmem:[#allocation15 + $0x60] sm:$0xf] }
 0x147   :  { %587 = vst.msk [vmem:[#allocation2] sm:$0xff] %vm586_vm1, %v520_v8  ;;  %v559_v16 = vpop.f32.mrf.mxu0  ;;  %v578_v17 = vpop.f32.mrf.mxu1 }
 0x148   :  { %613 = vst.msk [vmem:[#allocation2 + $0x40] sm:$0xff] %vm586_vm1, %v539_v45  ;;  %v579_v22 = vadd.f32 %v578_v17, %v7819_v33  ;;  %v560_v23 = vadd.f32 %v559_v16, %v7817_v32  ;;  %2803 = vmatpush.bf16.msra.mxu2 %v6405_v19  ;;  %2822 = vmatpush.bf16.msra.mxu3 %v6409_v24  ;;  %v6857_v16 = vld [vmem:[#allocation15 + $0x3e4] sm:$0xf0]  ;;  %v6340_v24 = vld [vmem:[#allocation15 + $0x260] sm:$0xf] }
 0x149   :  { %2841 = vmatpush.bf16.msrb.mxu0 %v6413_v27  ;;  %2860 = vmatpush.bf16.msrb.mxu1 %v6417_v30  ;;  %v6348_v30 = vld [vmem:[#allocation15 + $0x268] sm:$0xf] }
 0x14a   :  { %675 = vrot.lane.b32.xlu1 %v579_v22, %s7564_s16  ;;  %666 = vst.msk [vmem:[#allocation2 + $0xc8] sm:$0xff] %vm586_vm1, %v579_v22  ;;  %595 = vrot.lane.b32.xlu0 %v520_v8, %s7564_s16  ;;  %v6854_v8 = vld [vmem:[#allocation15 + $0x364] sm:$0xf]  ;;  %v6366_v22 = vld [vmem:[#allocation15 + $0x3e8] sm:$0xf0] }
 0x14b   :  { %621 = vrot.lane.b32.xlu2 %v539_v45, %s7564_s16  ;;  %640 = vst.msk [vmem:[#allocation2 + $0x88] sm:$0xff] %vm586_vm1, %v560_v23  ;;  %v6358_v45 = vld [vmem:[#allocation15 + $0x3e0] sm:$0xf0] }
 0x14c   :  { %v521_v38 = vpop.f32.mrf.mxu2  ;;  %v540_v39 = vpop.f32.mrf.mxu3  ;;  %2804 = vmatpush.bf16.msra.mxu2 %v6389_v35  ;;  %2823 = vmatpush.bf16.msra.mxu3 %v6393_v40  ;;  %v6361_v20 = vor.u32 %v6854_v8, %v6358_v45  ;;  %v6369_v35 = vor.u32 %v6855_v21, %v6366_v22  ;;  %v6851_v40 = vld [vmem:[#allocation15 + $0x26c] sm:$0xf]  ;;  %v6310_v8 = vld [vmem:[#allocation15 + $0xe0] sm:$0xf0]  ;;  %v6548_v21 = vld [vmem:[#allocation15 + $0x770] sm:$0xf] }
 0x14d   :  { %v541_v43 = vadd.f32 %v540_v39, %v7827_v57  ;;  %v7848_v46 = vadd.f32 %v521_v38, %v7825_v56  ;;  %2842 = vmatpush.bf16.msrb.mxu0 %v6397_v47  ;;  %2861 = vmatpush.bf16.msrb.mxu1 %v6401_v62  ;;  %v6341_v38 = vor.u32 %v6852_v25, %v6340_v24  ;;  %v7894_v47 = vperm.slane %v722_v37, 3  ;;  %v6847_v62 = vld [vmem:[#allocation15 + $0x16c] sm:$0xf]  ;;  %v6904_v22 = vld [vmem:[#allocation15 + $0x7ec] sm:$0xf0] }
 0x14e   :  { %v6345_v39 = vor.u32 %v6850_v26, %v6342_v29  ;;  %v6353_v48 = vor.u32 %v6851_v40, %v6350_v41  ;;  %v6902_v25 = vld [vmem:[#allocation15 + $0x774] sm:$0xf]  ;;  %v6905_v29 = vld [vmem:[#allocation15 + $0x7f4] sm:$0xf0]  ;;  %v6532_v41 = vld [vmem:[#allocation15 + $0x670] sm:$0xf] }
 0x14f   :  { %v562_v53 = vpop.f32.mrf.mxu0  ;;  %v581_v54 = vpop.f32.mrf.mxu1  ;;  %614 = vst.msk [vmem:[#allocation2 + $0x48] sm:$0xff] %vm586_vm1, %v541_v43  ;;  %v6550_v26 = vld [vmem:[#allocation15 + $0x7f0] sm:$0xf0] }
 0x150   :  { %v563_v60 = vadd.f32 %v562_v53, %v7817_v32  ;;  %v7853_v61 = vadd.f32 %v581_v54, %v7819_v33  ;;  %588 = vst.msk [vmem:[#allocation2 + $0x8] sm:$0xff] %vm586_vm1, %v7848_v46  ;;  %2805 = vmatpush.bf16.msra.mxu2 %v6373_v0  ;;  %2824 = vmatpush.bf16.msra.mxu3 %v6377_v1  ;;  %v6326_v53 = vld [vmem:[#allocation15 + $0x1e0] sm:$0xf0]  ;;  %v6332_v54 = vld [vmem:[#allocation15 + $0x168] sm:$0xf]  ;;  %v7909_v0 = vperm.slane %v722_v37, 1 }
 0x151   :  { %2051 = vmatmul.bf16.gmra.mxu2 %v7778_v5  ;;  %2070 = vmatmul.bf16.gmra.mxu3 %v7778_v5  ;;  %v6329_v3 = vor.u32 %v6846_v52, %v6326_v53  ;;  %v6553_v40 = vor.u32 %v6902_v25, %v6550_v26 }
 0x152   :  { %641 = vst.msk [vmem:[#allocation2 + $0x90] sm:$0xff] %vm586_vm1, %v563_v60  ;;  %2108 = vmatmul.bf16.gmra.mxu1 %v7778_v5  ;;  %651 = vrot.lane.b32.xlu1 %v563_v60, %s7564_s16 }
 0x153   :  { %667 = vst.msk [vmem:[#allocation2 + $0xd0] sm:$0xff] %vm586_vm1, %v7853_v61  ;;  %2089 = vmatmul.bf16.gmra.mxu0 %v7778_v5  ;;  %649 = vrot.lane.b32.xlu0 %v560_v23, %s7564_s16  ;;  %v6365_v23 = vor.u32 %v6857_v16, %v6364_v15 }
 0x154   :  { %623 = vrot.lane.b32.xlu2 %v541_v43, %s7564_s16  ;;  %v524_v9 = vpop.f32.mrf.mxu2  ;;  %v543_v10 = vpop.f32.mrf.mxu3  ;;  %2843 = vmatpush.bf16.msrb.mxu0 %v6381_v4  ;;  %v7892_v43 = vperm.slane %v722_v37, 2  ;;  %v6333_v4 = vor.u32 %v6849_v58, %v6332_v54  ;;  %v6901_v58 = vld [vmem:[#allocation15 + $0x6f4] sm:$0xf0] }
 0x155   :  { %v525_v17 = vadd.f32 %v524_v9, %v7825_v56  ;;  %v7869_v19 = vadd.f32 %v543_v10, %v7827_v57  ;;  %2862 = vmatpush.bf16.msrb.mxu1 %v6385_v12  ;;  %2806 = vmatpush.bf16.msra.mxu2 %v6357_v14  ;;  %v6316_v9 = vld [vmem:[#allocation15 + $0x68] sm:$0xf]  ;;  %v6843_v12 = vld [vmem:[#allocation15 + $0x6c] sm:$0xf] }
 0x156   :  { %2825 = vmatpush.bf16.msra.mxu3 %v6361_v20  ;;  %v6845_v10 = vld [vmem:[#allocation15 + $0xe4] sm:$0xf0]  ;;  %v6318_v14 = vld [vmem:[#allocation15 + $0xe8] sm:$0xf0]  ;;  %v6313_v20 = vor.u32 %v6842_v7, %v6310_v8 }
 0x157   :  { %589 = vst.msk [vmem:[#allocation2 + $0x10] sm:$0xff] %vm586_vm1, %v525_v17  ;;  %v564_v27 = vpop.f32.mrf.mxu0  ;;  %v583_v28 = vpop.f32.mrf.mxu1 }
 0x158   :  { %615 = vst.msk [vmem:[#allocation2 + $0x50] sm:$0xff] %vm586_vm1, %v7869_v19  ;;  %v7875_v31 = vadd.f32 %v564_v27, %v7817_v32  ;;  %v7878_v34 = vadd.f32 %v583_v28, %v7819_v33  ;;  %2844 = vmatpush.bf16.msrb.mxu0 %v6365_v23  ;;  %v6349_v32 = vor.u32 %v6853_v36, %v6348_v30  ;;  %v6556_v27 = vld [vmem:[#allocation15 + $0x778] sm:$0xf]  ;;  %v6903_v30 = vld [vmem:[#allocation15 + $0x77c] sm:$0xf] }
 0x159   :  { %2863 = vmatpush.bf16.msrb.mxu1 %v6369_v35  ;;  %2807 = vmatpush.bf16.msra.mxu2 %v6341_v38  ;;  %v6321_v28 = vor.u32 %v6843_v12, %v6318_v14  ;;  %v6897_v12 = vld [vmem:[#allocation15 + $0x5f4] sm:$0xf0]  ;;  %v6895_v14 = vld [vmem:[#allocation15 + $0x57c] sm:$0xf] }
 0x15a   :  { %599 = vrot.lane.b32.xlu1 %v525_v17, %s7564_s16  ;;  %642 = vst.msk [vmem:[#allocation2 + $0x98] sm:$0xff] %vm586_vm1, %v7875_v31  ;;  %2826 = vmatpush.bf16.msra.mxu3 %v6345_v39  ;;  %v6309_v17 = vor.u32 %v6844_v6, %v6308_v2 }
 0x15b   :  { %597 = vrot.lane.b32.xlu0 %v7848_v46, %s7564_s16  ;;  %668 = vst.msk [vmem:[#allocation2 + $0xd8] sm:$0xff] %vm586_vm1, %v7878_v34  ;;  %v6324_v46 = vld [vmem:[#allocation15 + $0x160] sm:$0xf] }
 0x15c   :  { %677 = vrot.lane.b32.xlu2 %v7853_v61, %s7564_s16  ;;  %v526_v33 = vpop.f32.mrf.mxu2  ;;  %v545_v42 = vpop.f32.mrf.mxu3  ;;  %2845 = vmatpush.bf16.msrb.mxu0 %v6349_v32  ;;  %v7901_v61 = vperm.slane %v722_v37, 0  ;;  %v6325_v1 = vor.u32 %v6848_v51, %v6324_v46  ;;  %v6549_v37 = vor.u32 %v6904_v22, %v6548_v21  ;;  %v6900_v32 = vld [vmem:[#allocation15 + $0x6ec] sm:$0xf0]  ;;  %v6890_v21 = vld [vmem:[#allocation15 + $0x474] sm:$0xf] }
 0x15d   :  { %v527_v49 = vadd.f32 %v526_v33, %v7825_v56  ;;  %v7898_v50 = vadd.f32 %v545_v42, %v7827_v57  ;;  %v6334_v56 = vld [vmem:[#allocation15 + $0x1e8] sm:$0xf0]  ;;  %2864 = vmatpush.bf16.msrb.mxu1 %v6353_v48  ;;  %v6557_v33 = vor.u32 %v6905_v29, %v6556_v27  ;;  %v6898_v48 = vld [vmem:[#allocation15 + $0x674] sm:$0xf]  ;;  %v6533_v46 = vor.u32 %v6900_v32, %v6532_v41  ;;  %v6893_v29 = vld [vmem:[#allocation15 + $0x4f4] sm:$0xf0] }
 0x15e   :  { %v6337_v45 = vor.u32 %v6847_v62, %v6334_v56  ;;  %2808 = vmatpush.bf16.msra.mxu2 %v6325_v1  ;;  %2827 = vmatpush.bf16.msra.mxu3 %v6329_v3  ;;  %v6516_v62 = vld [vmem:[#allocation15 + $0x570] sm:$0xf]  ;;  %v6894_v3 = vld [vmem:[#allocation15 + $0x574] sm:$0xf] }
 0x15f   :  { %v939_v59 = vpop.f32.mrf.mxu0  ;;  %v958_v60 = vpop.f32.mrf.mxu1  ;;  %590 = vst.msk [vmem:[#allocation2 + $0x18] sm:$0xff] %vm586_vm1, %v527_v49  ;;  %v6896_v56 = vld [vmem:[#allocation15 + $0x5ec] sm:$0xf0]  ;;  %v6502_v22 = vld [vmem:[#allocation15 + $0x4f0] sm:$0xf0] }
 0x160   :  { %v7904_v57 = vadd.f32 %v939_v59, %v7892_v43  ;;  %v7907_v63 = vadd.f32 %v958_v60, %v7894_v47  ;;  %616 = vst.msk [vmem:[#allocation2 + $0x58] sm:$0xff] %vm586_vm1, %v7898_v50  ;;  %2846 = vmatpush.bf16.msrb.mxu0 %v6333_v4  ;;  %v6899_v59 = vld [vmem:[#allocation15 + $0x67c] sm:$0xf]  ;;  %v6518_v4 = vld [vmem:[#allocation15 + $0x5f0] sm:$0xf0] }
 0x161   :  { %2428 = vmatmul.bf16.vlgmr.msrb.gmra.mxu2 %v7770_v13  ;;  %2447 = vmatmul.bf16.vlgmr.msrb.gmra.mxu3 %v7770_v13  ;;  %v6542_v60 = vld [vmem:[#allocation15 + $0x6f8] sm:$0xf0]  ;;  %v6886_v41 = vld [vmem:[#allocation15 + $0x374] sm:$0xf] }
 0x162   :  { %1021 = vst.msk [vmem:[#allocation2 + $0x180] sm:$0xff] %vm586_vm1, %v7904_v57  ;;  %2485 = vmatmul.bf16.vlgmr.msra.gmra.mxu1 %v7770_v13  ;;  %601 = vrot.lane.b32.xlu1 %v527_v49, %s7564_s16  ;;  %v6534_v49 = vld [vmem:[#allocation15 + $0x6f0] sm:$0xf0] }
 0x163   :  { %1047 = vst.msk [vmem:[#allocation2 + $0x1c0] sm:$0xff] %vm586_vm1, %v7907_v63  ;;  %2466 = vmatmul.bf16.vlgmr.msra.gmra.mxu0 %v7770_v13  ;;  %625 = vrot.lane.b32.xlu0 %v7869_v19, %s7564_s16  ;;  %v6317_v19 = vor.u32 %v6845_v10, %v6316_v9  ;;  %v6537_v53 = vor.u32 %v6898_v48, %v6534_v49  ;;  %v6486_v32 = vld [vmem:[#allocation15 + $0x3f0] sm:$0xf0]  ;;  %v1104_v49 = vld [vmem:[%s10000_s9 + $0x8] sm:$0xf] }
 0x164   :  { %653 = vrot.lane.b32.xlu2 %v7875_v31, %s7564_s16  ;;  %v901_v15 = vpop.f32.mrf.mxu2  ;;  %v920_v16 = vpop.f32.mrf.mxu3  ;;  %2865 = vmatpush.bf16.msrb.mxu1 %v6337_v45  ;;  %v6558_v31 = vld [vmem:[#allocation15 + $0x7f8] sm:$0xf0]  ;;  %v6524_v45 = vld [vmem:[#allocation15 + $0x578] sm:$0xf]  ;;  %v6545_v9 = vor.u32 %v6899_v59, %v6542_v60  ;;  %v6517_v10 = vor.u32 %v6896_v56, %v6516_v62  ;;  %v8009_v59 = vperm.slane %v1104_v49, 3 }
 0x165   :  { %v7927_v23 = vadd.f32 %v901_v15, %v7901_v61  ;;  %v921_v24 = vadd.f32 %v920_v16, %v7909_v0  ;;  %2809 = vmatpush.bf16.msra.mxu2 %v6309_v17  ;;  %2828 = vmatpush.bf16.msra.mxu3 %v6313_v20  ;;  %v6561_v42 = vor.u32 %v6903_v30, %v6558_v31  ;;  %v6526_v15 = vld [vmem:[#allocation15 + $0x5f8] sm:$0xf0]  ;;  %v6500_v17 = vld [vmem:[#allocation15 + $0x470] sm:$0xf] }
 0x166   :  { %2847 = vmatpush.bf16.msrb.mxu0 %v6317_v19  ;;  %v6521_v16 = vor.u32 %v6894_v3, %v6518_v4  ;;  %v6892_v20 = vld [vmem:[#allocation15 + $0x4ec] sm:$0xf0]  ;;  %v6529_v25 = vor.u32 %v6895_v14, %v6526_v15  ;;  %v6891_v30 = vld [vmem:[#allocation15 + $0x47c] sm:$0xf]  ;;  %v6505_v31 = vor.u32 %v6890_v21, %v6502_v22  ;;  %v6470_v3 = vld [vmem:[#allocation15 + $0x2f0] sm:$0xf0] }
 0x167   :  { %969 = vst.msk [vmem:[#allocation2 + $0x100] sm:$0xff] %vm586_vm1, %v7927_v23  ;;  %v941_v35 = vpop.f32.mrf.mxu0  ;;  %v960_v36 = vpop.f32.mrf.mxu1  ;;  %v6494_v62 = vld [vmem:[#allocation15 + $0x3f8] sm:$0xf0]  ;;  %v6468_v56 = vld [vmem:[#allocation15 + $0x270] sm:$0xf] }
 0x168   :  { %995 = vst.msk [vmem:[#allocation2 + $0x140] sm:$0xff] %vm586_vm1, %v921_v24  ;;  %v7934_v38 = vadd.f32 %v960_v36, %v7894_v47  ;;  %v7937_v39 = vadd.f32 %v941_v35, %v7892_v43  ;;  %2866 = vmatpush.bf16.msrb.mxu1 %v6321_v28  ;;  %v6501_v28 = vor.u32 %v6892_v20, %v6500_v17  ;;  %v6510_v35 = vld [vmem:[#allocation15 + $0x4f8] sm:$0xf0]  ;;  %v6484_v36 = vld [vmem:[#allocation15 + $0x370] sm:$0xf] }
 0x169   :  { %3184 = vmatpush.bf16.msrb.mxu2 %v6549_v37  ;;  %3203 = vmatpush.bf16.msrb.mxu3 %v6553_v40  ;;  %v6888_v37 = vld [vmem:[#allocation15 + $0x3ec] sm:$0xf0]  ;;  %v6883_v15 = vld [vmem:[#allocation15 + $0x27c] sm:$0xf] }
 0x16a   :  { %627 = vrot.lane.b32.xlu1 %v7898_v50, %s7564_s16  ;;  %1048 = vst.msk [vmem:[#allocation2 + $0x1c8] sm:$0xff] %vm586_vm1, %v7934_v38  ;;  %3222 = vmatpush.bf16.msra.mxu0 %v6557_v33  ;;  %v6478_v20 = vld [vmem:[#allocation15 + $0x2f8] sm:$0xf0]  ;;  %v6452_v21 = vld [vmem:[#allocation15 + $0x170] sm:$0xf] }
 0x16b   :  { %679 = vrot.lane.b32.xlu0 %v7878_v34, %s7564_s16  ;;  %1022 = vst.msk [vmem:[#allocation2 + $0x188] sm:$0xff] %vm586_vm1, %v7937_v39  ;;  %v6540_v34 = vld [vmem:[#allocation15 + $0x678] sm:$0xf]  ;;  %v6880_v22 = vld [vmem:[#allocation15 + $0x1ec] sm:$0xf0] }
 0x16c   :  { %1003 = vrot.lane.b32.xlu2 %v921_v24, %s7564_s16  ;;  %v903_v51 = vpop.f32.mrf.mxu2  ;;  %v922_v52 = vpop.f32.mrf.mxu3  ;;  %3241 = vmatpush.bf16.msra.mxu1 %v6561_v42  ;;  %v6541_v8 = vor.u32 %v6901_v58, %v6540_v34  ;;  %v8007_v58 = vperm.slane %v1104_v49, 2 }
 0x16d   :  { %v7949_v50 = vadd.f32 %v922_v52, %v7909_v0  ;;  %v7952_v54 = vadd.f32 %v903_v51, %v7901_v61  ;;  %3185 = vmatpush.bf16.msrb.mxu2 %v6533_v46  ;;  %3204 = vmatpush.bf16.msrb.mxu3 %v6537_v53  ;;  %v6513_v46 = vor.u32 %v6891_v30, %v6510_v35  ;;  %v6492_v52 = vld [vmem:[#allocation15 + $0x378] sm:$0xf] }
 0x16e   :  { %3223 = vmatpush.bf16.msra.mxu0 %v6541_v8  ;;  %v6485_v51 = vor.u32 %v6888_v37, %v6484_v36  ;;  %v6889_v53 = vld [vmem:[#allocation15 + $0x3f4] sm:$0xf0]  ;;  %v6453_v30 = vor.u32 %v6880_v22, %v6452_v21  ;;  %v6462_v37 = vld [vmem:[#allocation15 + $0x1f8] sm:$0xf0] }
 0x16f   :  { %v944_v1 = vpop.f32.mrf.mxu0  ;;  %v963_v2 = vpop.f32.mrf.mxu1  ;;  %996 = vst.msk [vmem:[#allocation2 + $0x148] sm:$0xff] %vm586_vm1, %v7949_v50 }
 0x170   :  { %v7957_v6 = vadd.f32 %v944_v1, %v7892_v43  ;;  %v7960_v7 = vadd.f32 %v963_v2, %v7894_v47  ;;  %970 = vst.msk [vmem:[#allocation2 + $0x108] sm:$0xff] %vm586_vm1, %v7952_v54  ;;  %3242 = vmatpush.bf16.msra.mxu1 %v6545_v9  ;;  %v6882_v2 = vld [vmem:[#allocation15 + $0x274] sm:$0xf]  ;;  %v6885_v9 = vld [vmem:[#allocation15 + $0x2f4] sm:$0xf0] }
 0x171   :  { %2433 = vmatmul.bf16.gmra.mxu2 %v7778_v5  ;;  %2452 = vmatmul.bf16.gmra.mxu3 %v7778_v5  ;;  %v6473_v17 = vor.u32 %v6882_v2, %v6470_v3 }
 0x172   :  { %1023 = vst.msk [vmem:[#allocation2 + $0x190] sm:$0xff] %vm586_vm1, %v7957_v6  ;;  %2490 = vmatmul.bf16.gmra.mxu1 %v7778_v5  ;;  %1055 = vrot.lane.b32.xlu1 %v7907_v63, %s7564_s16  ;;  %v6525_v63 = vor.u32 %v6897_v12, %v6524_v45  ;;  %v8017_v45 = vperm.slane %v1104_v49, 0 }
 0x173   :  { %1049 = vst.msk [vmem:[#allocation2 + $0x1d0] sm:$0xff] %vm586_vm1, %v7960_v7  ;;  %2471 = vmatmul.bf16.gmra.mxu0 %v7778_v5  ;;  %1029 = vrot.lane.b32.xlu0 %v7904_v57, %s7564_s16  ;;  %v6508_v57 = vld [vmem:[#allocation15 + $0x478] sm:$0xf] }
 0x174   :  { %1057 = vrot.lane.b32.xlu2 %v7934_v38, %s7564_s16  ;;  %v906_v24 = vpop.f32.mrf.mxu2  ;;  %v925_v19 = vpop.f32.mrf.mxu3  ;;  %3186 = vmatpush.bf16.msrb.mxu2 %v6517_v10  ;;  %v6509_v33 = vor.u32 %v6893_v29, %v6508_v57 }
 0x175   :  { %v7979_v26 = vadd.f32 %v906_v24, %v7901_v61  ;;  %v7982_v27 = vadd.f32 %v925_v19, %v7909_v0  ;;  %3205 = vmatpush.bf16.msrb.mxu3 %v6521_v16  ;;  %3224 = vmatpush.bf16.msra.mxu0 %v6525_v63  ;;  %v6878_v19 = vld [vmem:[#allocation15 + $0x174] sm:$0xf] }
 0x176   :  { %3243 = vmatpush.bf16.msra.mxu1 %v6529_v25  ;;  %v6454_v63 = vld [vmem:[#allocation15 + $0x1f0] sm:$0xf0]  ;;  %v6460_v25 = vld [vmem:[#allocation15 + $0x178] sm:$0xf] }
 0x177   :  { %971 = vst.msk [vmem:[#allocation2 + $0x110] sm:$0xff] %vm586_vm1, %v7979_v26  ;;  %v946_v38 = vpop.f32.mrf.mxu0  ;;  %v965_v40 = vpop.f32.mrf.mxu1  ;;  %v6457_v36 = vor.u32 %v6878_v19, %v6454_v63 }
 0x178   :  { %997 = vst.msk [vmem:[#allocation2 + $0x150] sm:$0xff] %vm586_vm1, %v7982_v27  ;;  %v7989_v42 = vadd.f32 %v965_v40, %v7894_v47  ;;  %v7992_v48 = vadd.f32 %v946_v38, %v7892_v43  ;;  %3187 = vmatpush.bf16.msrb.mxu2 %v6501_v28  ;;  %v6489_v47 = vor.u32 %v6886_v41, %v6486_v32  ;;  %v6881_v28 = vld [vmem:[#allocation15 + $0x1f4] sm:$0xf0]  ;;  %v6436_v38 = vld [vmem:[#allocation15 + $0x70] sm:$0xf] }
 0x179   :  { %3206 = vmatpush.bf16.msrb.mxu3 %v6505_v31  ;;  %3225 = vmatpush.bf16.msra.mxu0 %v6509_v33  ;;  %v6461_v40 = vor.u32 %v6881_v28, %v6460_v25  ;;  %v6874_v41 = vld [vmem:[#allocation15 + $0x74] sm:$0xf] }
 0x17a   :  { %977 = vrot.lane.b32.xlu1 %v7927_v23, %s7564_s16  ;;  %1050 = vst.msk [vmem:[#allocation2 + $0x1d8] sm:$0xff] %vm586_vm1, %v7989_v42  ;;  %v6493_v23 = vor.u32 %v6889_v53, %v6492_v52  ;;  %3244 = vmatpush.bf16.msra.mxu1 %v6513_v46  ;;  %v6438_v32 = vld [vmem:[#allocation15 + $0xf0] sm:$0xf0]  ;;  %v6444_v46 = vld [vmem:[#allocation15 + $0x78] sm:$0xf] }
 0x17b   :  { %1005 = vrot.lane.b32.xlu0 %v7949_v50, %s7564_s16  ;;  %1024 = vst.msk [vmem:[#allocation2 + $0x198] sm:$0xff] %vm586_vm1, %v7992_v48  ;;  %v6887_v50 = vld [vmem:[#allocation15 + $0x37c] sm:$0xf] }
 0x17c   :  { %979 = vrot.lane.b32.xlu2 %v7952_v54, %s7564_s16  ;;  %v908_v43 = vpop.f32.mrf.mxu2  ;;  %v927_v34 = vpop.f32.mrf.mxu3  ;;  %3188 = vmatpush.bf16.msrb.mxu2 %v6485_v51  ;;  %v6884_v54 = vld [vmem:[#allocation15 + $0x2ec] sm:$0xf0]  ;;  %v6497_v14 = vor.u32 %v6887_v50, %v6494_v62  ;;  %v6877_v51 = vld [vmem:[#allocation15 + $0xf4] sm:$0xf0]  ;;  %v6446_v50 = vld [vmem:[#allocation15 + $0xf8] sm:$0xf0] }
 0x17d   :  { %v8012_v60 = vadd.f32 %v927_v34, %v7909_v0  ;;  %v8015_v1 = vadd.f32 %v908_v43, %v7901_v61  ;;  %3207 = vmatpush.bf16.msrb.mxu3 %v6489_v47  ;;  %v6476_v0 = vld [vmem:[#allocation15 + $0x278] sm:$0xf]  ;;  %v8027_v61 = vperm.slane %v1104_v49, 1  ;;  %3226 = vmatpush.bf16.msra.mxu0 %v6493_v23  ;;  %v6469_v16 = vor.u32 %v6884_v54, %v6468_v56  ;;  %v6875_v23 = vld [vmem:[#allocation15 + $0x7c] sm:$0xf] }
 0x17e   :  { %v6477_v24 = vor.u32 %v6885_v9, %v6476_v0  ;;  %3245 = vmatpush.bf16.msra.mxu1 %v6497_v14  ;;  %v6441_v34 = vor.u32 %v6874_v41, %v6438_v32  ;;  %v6445_v62 = vor.u32 %v6877_v51, %v6444_v46  ;;  %v6449_v2 = vor.u32 %v6875_v23, %v6446_v50 }
 0x17f   :  { %v1321_v4 = vpop.f32.mrf.mxu0  ;;  %v1340_v8 = vpop.f32.mrf.mxu1  ;;  %998 = vst.msk [vmem:[#allocation2 + $0x158] sm:$0xff] %vm586_vm1, %v8012_v60 }
 0x180   :  { %v8022_v10 = vadd.f32 %v1321_v4, %v8007_v58  ;;  %v8025_v12 = vadd.f32 %v1340_v8, %v8009_v59  ;;  %972 = vst.msk [vmem:[#allocation2 + $0x118] sm:$0xff] %vm586_vm1, %v8015_v1  ;;  %3189 = vmatpush.bf16.msrb.mxu2 %v6469_v16 }
 0x181   :  { %2810 = vmatmul.bf16.vlgmr.msra.gmra.mxu2 %v7770_v13  ;;  %2829 = vmatmul.bf16.vlgmr.msra.gmra.mxu3 %v7770_v13 }
 0x182   :  { %1403 = vst.msk [vmem:[#allocation2 + $0x280] sm:$0xff] %vm586_vm1, %v8022_v10  ;;  %2867 = vmatmul.bf16.vlgmr.msrb.gmra.mxu1 %v7770_v13  ;;  %1031 = vrot.lane.b32.xlu1 %v7937_v39, %s7564_s16  ;;  %v6481_v39 = vor.u32 %v6883_v15, %v6478_v20 }
 0x183   :  { %1429 = vst.msk [vmem:[#allocation2 + $0x2c0] sm:$0xff] %vm586_vm1, %v8025_v12  ;;  %2848 = vmatmul.bf16.vlgmr.msrb.gmra.mxu0 %v7770_v13  ;;  %1059 = vrot.lane.b32.xlu0 %v7960_v7, %s7564_s16  ;;  %v6879_v7 = vld [vmem:[#allocation15 + $0x17c] sm:$0xf] }
 0x184   :  { %1033 = vrot.lane.b32.xlu2 %v7957_v6, %s7564_s16  ;;  %v1283_v57 = vpop.f32.mrf.mxu2  ;;  %v1302_v29 = vpop.f32.mrf.mxu3  ;;  %3208 = vmatpush.bf16.msrb.mxu3 %v6473_v17  ;;  %v6876_v6 = vld [vmem:[#allocation15 + $0xec] sm:$0xf0]  ;;  %v6465_v47 = vor.u32 %v6879_v7, %v6462_v37 }
 0x185   :  { %v8046_v31 = vadd.f32 %v1283_v57, %v8017_v45  ;;  %v8049_v35 = vadd.f32 %v1302_v29, %v8027_v61  ;;  %3227 = vmatpush.bf16.msra.mxu0 %v6477_v24  ;;  %3246 = vmatpush.bf16.msra.mxu1 %v6481_v39  ;;  %v6437_v43 = vor.u32 %v6876_v6, %v6436_v38 }
 0x186   :  { %3190 = vmatpush.bf16.msrb.mxu2 %v6453_v30 }
 0x187   :  { %1351 = vst.msk [vmem:[#allocation2 + $0x200] sm:$0xff] %vm586_vm1, %v8046_v31  ;;  %v1323_v33 = vpop.f32.mrf.mxu0  ;;  %v1342_v49 = vpop.f32.mrf.mxu1 }
 0x188   :  { %1377 = vst.msk [vmem:[#allocation2 + $0x240] sm:$0xff] %vm586_vm1, %v8049_v35  ;;  %v8056_v52 = vadd.f32 %v1323_v33, %v8007_v58  ;;  %v8059_v53 = vadd.f32 %v1342_v49, %v8009_v59  ;;  %3209 = vmatpush.bf16.msrb.mxu3 %v6457_v36 }
 0x189   :  { %3228 = vmatpush.bf16.msra.mxu0 %v6461_v40  ;;  %3247 = vmatpush.bf16.msra.mxu1 %v6465_v47 }
 0x18a   :  { %1404 = vst.msk [vmem:[#allocation2 + $0x288] sm:$0xff] %vm586_vm1, %v8056_v52  ;;  %1007 = vrot.lane.b32.xlu1 %v7982_v27, %s7564_s16  ;;  %3191 = vmatpush.bf16.msrb.mxu2 %v6437_v43 }
 0x18b   :  { %1430 = vst.msk [vmem:[#allocation2 + $0x2c8] sm:$0xff] %vm586_vm1, %v8059_v53  ;;  %981 = vrot.lane.b32.xlu0 %v7979_v26, %s7564_s16 }
 0x18c   :  { %1009 = vrot.lane.b32.xlu2 %v8012_v60, %s7564_s16  ;;  %v1285_v56 = vpop.f32.mrf.mxu2  ;;  %v1304_v54 = vpop.f32.mrf.mxu3  ;;  %3210 = vmatpush.bf16.msrb.mxu3 %v6441_v34 }
 0x18d   :  { %v8072_v3 = vadd.f32 %v1285_v56, %v8017_v45  ;;  %v8075_v27 = vadd.f32 %v1304_v54, %v8027_v61  ;;  %3229 = vmatpush.bf16.msra.mxu0 %v6445_v62  ;;  %3248 = vmatpush.bf16.msra.mxu1 %v6449_v2  ;;  %v1868_v62 = vld [vmem:[%s10000_s9 + $0x10] sm:$0xf] }
 0x18e   :  { %v8254_v2 = vperm.slane %v1868_v62, 3 }
 0x18f   :  { %1352 = vst.msk [vmem:[#allocation2 + $0x208] sm:$0xff] %vm586_vm1, %v8072_v3  ;;  %v1326_v26 = vpop.f32.mrf.mxu0  ;;  %v1345_v4 = vpop.f32.mrf.mxu1 }
 0x190   :  { %1378 = vst.msk [vmem:[#allocation2 + $0x248] sm:$0xff] %vm586_vm1, %v8075_v27  ;;  %v8082_v60 = vadd.f32 %v1326_v26, %v8007_v58  ;;  %v8085_v8 = vadd.f32 %v1345_v4, %v8009_v59  ;;  %v8257_v26 = vperm.slane %v1868_v62, 2 }
 0x191   :  { %2815 = vmatmul.bf16.gmra.mxu2 %v7778_v5  ;;  %2834 = vmatmul.bf16.gmra.mxu3 %v7778_v5 }
 0x192   :  { %1405 = vst.msk [vmem:[#allocation2 + $0x290] sm:$0xff] %vm586_vm1, %v8082_v60  ;;  %2872 = vmatmul.bf16.gmra.mxu1 %v7778_v5  ;;  %1061 = vrot.lane.b32.xlu1 %v7989_v42, %s7564_s16 }
 0x193   :  { %1431 = vst.msk [vmem:[#allocation2 + $0x2d0] sm:$0xff] %vm586_vm1, %v8085_v8  ;;  %2853 = vmatmul.bf16.gmra.mxu0 %v7778_v5  ;;  %1035 = vrot.lane.b32.xlu0 %v7992_v48, %s7564_s16 }
 0x194   :  { %1437 = vrot.lane.b32.xlu2 %v8025_v12, %s7564_s16  ;;  %v1288_v0 = vpop.f32.mrf.mxu2  ;;  %v1307_v9 = vpop.f32.mrf.mxu3  ;;  %v1486_v12 = vld [vmem:[%s10000_s9 + $0xc] sm:$0xf] }
 0x195   :  { %v8102_v14 = vadd.f32 %v1288_v0, %v8017_v45  ;;  %v1308_v15 = vadd.f32 %v1307_v9, %v8027_v61  ;;  %v8127_v20 = vperm.slane %v1486_v12, 2  ;;  %v8129_v21 = vperm.slane %v1486_v12, 3 }
 0x197   :  { %1353 = vst.msk [vmem:[#allocation2 + $0x210] sm:$0xff] %vm586_vm1, %v8102_v14  ;;  %v1328_v42 = vpop.f32.mrf.mxu0  ;;  %v1347_v16 = vpop.f32.mrf.mxu1 }
 0x198   :  { %1379 = vst.msk [vmem:[#allocation2 + $0x250] sm:$0xff] %vm586_vm1, %v1308_v15  ;;  %v8109_v17 = vadd.f32 %v1328_v42, %v8007_v58  ;;  %v8112_v48 = vadd.f32 %v1347_v16, %v8009_v59  ;;  %v8281_v42 = vperm.slane %v1868_v62, 0  ;;  %v8287_v16 = vperm.slane %v1868_v62, 1 }
 0x19a   :  { %1406 = vst.msk [vmem:[#allocation2 + $0x298] sm:$0xff] %vm586_vm1, %v8109_v17  ;;  %983 = vrot.lane.b32.xlu1 %v8015_v1, %s7564_s16 }
 0x19b   :  { %1432 = vst.msk [vmem:[#allocation2 + $0x2d8] sm:$0xff] %vm586_vm1, %v8112_v48  ;;  %1385 = vrot.lane.b32.xlu0 %v8049_v35, %s7564_s16 }
 0x19c   :  { %1359 = vrot.lane.b32.xlu2 %v8046_v31, %s7564_s16  ;;  %v1290_v58 = vpop.f32.mrf.mxu2  ;;  %v1309_v59 = vpop.f32.mrf.mxu3 }
 0x19d   :  { %v648_v22 = vpop.permute.xlu2 %647  ;;  %v8132_v24 = vadd.f32 %v1290_v58, %v8017_v45  ;;  %v8135_v1 = vadd.f32 %v1309_v59, %v8027_v61  ;;  %v8150_v45 = vperm.slane %v1486_v12, 0  ;;  %v8152_v61 = vperm.slane %v1486_v12, 1 }
 0x19e   :  { %660 = vst.msk [vmem:[#allocation2 + $0xa0] sm:$0xff] %vm586_vm1, %v648_v22 }
 0x19f   :  { %1354 = vst.msk [vmem:[#allocation2 + $0x218] sm:$0xff] %vm586_vm1, %v8132_v24  ;;  %v1703_v19 = vpop.f32.mrf.mxu0  ;;  %v1722_v63 = vpop.f32.mrf.mxu1 }
 0x1a0   :  { %1380 = vst.msk [vmem:[#allocation2 + $0x258] sm:$0xff] %vm586_vm1, %v8135_v1  ;;  %v8143_v25 = vadd.f32 %v1703_v19, %v8127_v20  ;;  %v8146_v28 = vadd.f32 %v1722_v63, %v8129_v21 }
 0x1a1   :  { %3192 = vmatmul.bf16.vlgmr.msrb.gmra.mxu2 %v7770_v13  ;;  %3211 = vmatmul.bf16.vlgmr.msrb.gmra.mxu3 %v7770_v13 }
 0x1a2   :  { %1785 = vst.msk [vmem:[#allocation2 + $0x380] sm:$0xff] %vm586_vm1, %v8143_v25  ;;  %3249 = vmatmul.bf16.vlgmr.msra.gmra.mxu1 %v7770_v13  ;;  %1411 = vrot.lane.b32.xlu1 %v8022_v10, %s7564_s16 }
 0x1a3   :  { %1811 = vst.msk [vmem:[#allocation2 + $0x3c0] sm:$0xff] %vm586_vm1, %v8146_v28  ;;  %3230 = vmatmul.bf16.vlgmr.msra.gmra.mxu0 %v7770_v13  ;;  %1439 = vrot.lane.b32.xlu0 %v8059_v53, %s7564_s16 }
 0x1a4   :  { %1413 = vrot.lane.b32.xlu2 %v8056_v52, %s7564_s16  ;;  %v1665_v57 = vpop.f32.mrf.mxu2  ;;  %v1684_v29 = vpop.f32.mrf.mxu3 }
 0x1a5   :  { %v622_v39 = vpop.permute.xlu2 %621  ;;  %v8167_v30 = vadd.f32 %v1665_v57, %v8150_v45  ;;  %v8170_v31 = vadd.f32 %v1684_v29, %v8152_v61 }
 0x1a6   :  { %634 = vst.msk [vmem:[#allocation2 + $0x60] sm:$0xff] %vm586_vm1, %v622_v39 }
 0x1a7   :  { %1733 = vst.msk [vmem:[#allocation2 + $0x300] sm:$0xff] %vm586_vm1, %v8167_v30  ;;  %v1705_v13 = vpop.f32.mrf.mxu0  ;;  %v1724_v10 = vpop.f32.mrf.mxu1 }
 0x1a8   :  { %1759 = vst.msk [vmem:[#allocation2 + $0x340] sm:$0xff] %vm586_vm1, %v8170_v31  ;;  %v8178_v35 = vadd.f32 %v1705_v13, %v8127_v20  ;;  %v8181_v36 = vadd.f32 %v1724_v10, %v8129_v21 }
 0x1aa   :  { %1786 = vst.msk [vmem:[#allocation2 + $0x388] sm:$0xff] %vm586_vm1, %v8178_v35  ;;  %1387 = vrot.lane.b32.xlu1 %v8075_v27, %s7564_s16 }
 0x1ab   :  { %1812 = vst.msk [vmem:[#allocation2 + $0x3c8] sm:$0xff] %vm586_vm1, %v8181_v36  ;;  %1361 = vrot.lane.b32.xlu0 %v8072_v3, %s7564_s16 }
 0x1ac   :  { %1389 = vrot.lane.b32.xlu2 %v1308_v15, %s7564_s16  ;;  %v1667_v7 = vpop.f32.mrf.mxu2  ;;  %v1686_v37 = vpop.f32.mrf.mxu3 }
 0x1ad   :  { %v8193_v38 = vadd.f32 %v1667_v7, %v8150_v45  ;;  %v8196_v40 = vadd.f32 %v1686_v37, %v8152_v61 }
 0x1ae   :  { %v624_v6 = vpop.permute.xlu2 %623 }
 0x1af   :  { %635 = vst.msk [vmem:[#allocation2 + $0x68] sm:$0xff] %vm586_vm1, %v624_v6  ;;  %v1708_v41 = vpop.f32.mrf.mxu0  ;;  %v1727_v32 = vpop.f32.mrf.mxu1 }
 0x1b0   :  { %1734 = vst.msk [vmem:[#allocation2 + $0x308] sm:$0xff] %vm586_vm1, %v8193_v38  ;;  %v8202_v33 = vadd.f32 %v1708_v41, %v8127_v20  ;;  %v8205_v49 = vadd.f32 %v1727_v32, %v8129_v21 }
 0x1b1   :  { %1760 = vst.msk [vmem:[#allocation2 + $0x348] sm:$0xff] %vm586_vm1, %v8196_v40  ;;  %3197 = vmatmul.bf16.gmra.mxu2 %v7778_v5  ;;  %3216 = vmatmul.bf16.gmra.mxu3 %v7778_v5 }
 0x1b2   :  { %1787 = vst.msk [vmem:[#allocation2 + $0x390] sm:$0xff] %vm586_vm1, %v8202_v33  ;;  %3254 = vmatmul.bf16.gmra.mxu1 %v7778_v5  ;;  %1441 = vrot.lane.b32.xlu1 %v8085_v8, %s7564_s16 }
 0x1b3   :  { %1813 = vst.msk [vmem:[#allocation2 + $0x3d0] sm:$0xff] %vm586_vm1, %v8205_v49  ;;  %3235 = vmatmul.bf16.gmra.mxu0 %v7778_v5  ;;  %1415 = vrot.lane.b32.xlu0 %v8082_v60, %s7564_s16 }
 0x1b4   :  { %1443 = vrot.lane.b32.xlu2 %v8112_v48, %s7564_s16  ;;  %v674_v46 = vpop.permute.xlu0 %673  ;;  %v1670_v51 = vpop.f32.mrf.mxu2 }
 0x1b5   :  { %686 = vst.msk [vmem:[#allocation2 + $0xe0] sm:$0xff] %vm586_vm1, %v674_v46  ;;  %v8225_v52 = vadd.f32 %v1670_v51, %v8150_v45  ;;  %v1689_v53 = vpop.f32.mrf.mxu3  ;;  %v2250_v51 = vld [vmem:[%s10000_s9 + $0x14] sm:$0xf] }
 0x1b6   :  { %v678_v47 = vpop.permute.xlu2 %677  ;;  %v8228_v43 = vadd.f32 %v1689_v53, %v8152_v61  ;;  %v8384_v62 = vperm.slane %v2250_v51, 2 }
 0x1b7   :  { %688 = vst.msk [vmem:[#allocation2 + $0xf0] sm:$0xff] %vm586_vm1, %v678_v47  ;;  %v1710_v5 = vpop.f32.mrf.mxu0  ;;  %v1729_v34 = vpop.f32.mrf.mxu1  ;;  %v8381_v47 = vperm.slane %v2250_v51, 3 }
 0x1b8   :  { %1735 = vst.msk [vmem:[#allocation2 + $0x310] sm:$0xff] %vm586_vm1, %v8225_v52  ;;  %v8234_v23 = vadd.f32 %v1710_v5, %v8127_v20  ;;  %v8237_v50 = vadd.f32 %v1729_v34, %v8129_v21 }
 0x1b9   :  { %1761 = vst.msk [vmem:[#allocation2 + $0x350] sm:$0xff] %vm586_vm1, %v8228_v43 }
 0x1ba   :  { %1788 = vst.msk [vmem:[#allocation2 + $0x398] sm:$0xff] %vm586_vm1, %v8234_v23  ;;  %1363 = vrot.lane.b32.xlu1 %v8102_v14, %s7564_s16 }
 0x1bb   :  { %1814 = vst.msk [vmem:[#allocation2 + $0x3d8] sm:$0xff] %vm586_vm1, %v8237_v50  ;;  %1391 = vrot.lane.b32.xlu0 %v8135_v1, %s7564_s16 }
 0x1bc   :  { %1365 = vrot.lane.b32.xlu2 %v8132_v24, %s7564_s16  ;;  %v676_v56 = vpop.permute.xlu1 %675  ;;  %v596_v54 = vpop.permute.xlu0 %595 }
 0x1bd   :  { %687 = vst.msk [vmem:[#allocation2 + $0xe8] sm:$0xff] %vm586_vm1, %v676_v56  ;;  %v1672_v3 = vpop.f32.mrf.mxu2  ;;  %v1691_v27 = vpop.f32.mrf.mxu3 }
 0x1be   :  { %608 = vst.msk [vmem:[#allocation2 + $0x20] sm:$0xff] %vm586_vm1, %v596_v54  ;;  %v654_v4 = vpop.permute.xlu2 %653  ;;  %v8261_v60 = vadd.f32 %v1672_v3, %v8150_v45  ;;  %v8264_v8 = vadd.f32 %v1691_v27, %v8152_v61 }
 0x1bf   :  { %663 = vst.msk [vmem:[#allocation2 + $0xb8] sm:$0xff] %vm586_vm1, %v654_v4  ;;  %v2104_v0 = vpop.f32.mrf.mxu1  ;;  %v8414_v4 = vperm.slane %v2250_v51, 1 }
 0x1c0   :  { %1736 = vst.msk [vmem:[#allocation2 + $0x318] sm:$0xff] %vm586_vm1, %v8261_v60  ;;  %v2085_v9 = vpop.f32.mrf.mxu0  ;;  %v8270_v14 = vadd.f32 %v2104_v0, %v8254_v2 }
 0x1c1   :  { %1762 = vst.msk [vmem:[#allocation2 + $0x358] sm:$0xff] %vm586_vm1, %v8264_v8  ;;  %v8275_v15 = vadd.f32 %v2085_v9, %v8257_v26 }
 0x1c2   :  { %2193 = vst.msk [vmem:[#allocation2 + $0x4c0] sm:$0xff] %vm586_vm1, %v8270_v14  ;;  %1417 = vrot.lane.b32.xlu1 %v8109_v17, %s7564_s16 }
 0x1c3   :  { %2167 = vst.msk [vmem:[#allocation2 + $0x480] sm:$0xff] %vm586_vm1, %v8275_v15  ;;  %1819 = vrot.lane.b32.xlu0 %v8146_v28, %s7564_s16 }
 0x1c4   :  { %1793 = vrot.lane.b32.xlu2 %v8143_v25, %s7564_s16  ;;  %v652_v48 = vpop.permute.xlu1 %651 }
 0x1c5   :  { %662 = vst.msk [vmem:[#allocation2 + $0xb0] sm:$0xff] %vm586_vm1, %v652_v48  ;;  %v650_v12 = vpop.permute.xlu0 %649  ;;  %v2047_v58 = vpop.f32.mrf.mxu2 }
 0x1c6   :  { %661 = vst.msk [vmem:[#allocation2 + $0xa8] sm:$0xff] %vm586_vm1, %v650_v12  ;;  %v1004_v17 = vpop.permute.xlu2 %1003  ;;  %v8294_v59 = vadd.f32 %v2047_v58, %v8281_v42  ;;  %v2066_v20 = vpop.f32.mrf.mxu3 }
 0x1c7   :  { %1016 = vst.msk [vmem:[#allocation2 + $0x160] sm:$0xff] %vm586_vm1, %v1004_v17  ;;  %v8298_v21 = vadd.f32 %v2066_v20, %v8287_v16  ;;  %v2106_v22 = vpop.f32.mrf.mxu1 }
 0x1c8   :  { %2115 = vst.msk [vmem:[#allocation2 + $0x400] sm:$0xff] %vm586_vm1, %v8294_v59  ;;  %v2087_v24 = vpop.f32.mrf.mxu0  ;;  %v8303_v1 = vadd.f32 %v2106_v22, %v8254_v2 }
 0x1c9   :  { %2141 = vst.msk [vmem:[#allocation2 + $0x440] sm:$0xff] %vm586_vm1, %v8298_v21  ;;  %v8308_v19 = vadd.f32 %v2087_v24, %v8257_v26 }
 0x1ca   :  { %2194 = vst.msk [vmem:[#allocation2 + $0x4c8] sm:$0xff] %vm586_vm1, %v8303_v1  ;;  %1767 = vrot.lane.b32.xlu1 %v8170_v31, %s7564_s16 }
 0x1cb   :  { %2168 = vst.msk [vmem:[#allocation2 + $0x488] sm:$0xff] %vm586_vm1, %v8308_v19  ;;  %1741 = vrot.lane.b32.xlu0 %v8167_v30, %s7564_s16 }
 0x1cc   :  { %1769 = vrot.lane.b32.xlu2 %v8196_v40, %s7564_s16  ;;  %v600_v63 = vpop.permute.xlu1 %599 }
 0x1cd   :  { %610 = vst.msk [vmem:[#allocation2 + $0x30] sm:$0xff] %vm586_vm1, %v600_v63  ;;  %v598_v25 = vpop.permute.xlu0 %597  ;;  %v2049_v28 = vpop.f32.mrf.mxu2 }
 0x1ce   :  { %609 = vst.msk [vmem:[#allocation2 + $0x28] sm:$0xff] %vm586_vm1, %v598_v25  ;;  %v1058_v45 = vpop.permute.xlu2 %1057  ;;  %v8323_v61 = vadd.f32 %v2049_v28, %v8281_v42  ;;  %v2068_v57 = vpop.f32.mrf.mxu3 }
 0x1cf   :  { %1069 = vst.msk [vmem:[#allocation2 + $0x1e8] sm:$0xff] %vm586_vm1, %v1058_v45  ;;  %v8327_v29 = vadd.f32 %v2068_v57, %v8287_v16  ;;  %v2109_v39 = vpop.f32.mrf.mxu1 }
 0x1d0   :  { %2116 = vst.msk [vmem:[#allocation2 + $0x408] sm:$0xff] %vm586_vm1, %v8323_v61  ;;  %v2090_v30 = vpop.f32.mrf.mxu0  ;;  %v8332_v31 = vadd.f32 %v2109_v39, %v8254_v2 }
 0x1d1   :  { %2142 = vst.msk [vmem:[#allocation2 + $0x448] sm:$0xff] %vm586_vm1, %v8327_v29  ;;  %v8337_v13 = vadd.f32 %v2090_v30, %v8257_v26 }
 0x1d2   :  { %2195 = vst.msk [vmem:[#allocation2 + $0x4d0] sm:$0xff] %vm586_vm1, %v8332_v31  ;;  %1821 = vrot.lane.b32.xlu1 %v8181_v36, %s7564_s16 }
 0x1d3   :  { %2169 = vst.msk [vmem:[#allocation2 + $0x490] sm:$0xff] %vm586_vm1, %v8337_v13  ;;  %1795 = vrot.lane.b32.xlu0 %v8178_v35, %s7564_s16 }
 0x1d4   :  { %1823 = vrot.lane.b32.xlu2 %v8205_v49, %s7564_s16  ;;  %v602_v10 = vpop.permute.xlu1 %601 }
 0x1d5   :  { %611 = vst.msk [vmem:[#allocation2 + $0x38] sm:$0xff] %vm586_vm1, %v602_v10  ;;  %v626_v7 = vpop.permute.xlu0 %625  ;;  %v2052_v37 = vpop.f32.mrf.mxu2 }
 0x1d6   :  { %636 = vst.msk [vmem:[#allocation2 + $0x70] sm:$0xff] %vm586_vm1, %v626_v7  ;;  %v980_v40 = vpop.permute.xlu2 %979  ;;  %v8352_v6 = vadd.f32 %v2052_v37, %v8281_v42  ;;  %v2071_v36 = vpop.f32.mrf.mxu3 }
 0x1d7   :  { %991 = vst.msk [vmem:[#allocation2 + $0x128] sm:$0xff] %vm586_vm1, %v980_v40  ;;  %v8356_v41 = vadd.f32 %v2071_v36, %v8287_v16  ;;  %v2111_v35 = vpop.f32.mrf.mxu1 }
 0x1d8   :  { %2117 = vst.msk [vmem:[#allocation2 + $0x410] sm:$0xff] %vm586_vm1, %v8352_v6  ;;  %v2092_v32 = vpop.f32.mrf.mxu0  ;;  %v8361_v49 = vadd.f32 %v2111_v35, %v8254_v2 }
 0x1d9   :  { %2143 = vst.msk [vmem:[#allocation2 + $0x450] sm:$0xff] %vm586_vm1, %v8356_v41  ;;  %v8366_v46 = vadd.f32 %v2092_v32, %v8257_v26  ;;  %v8408_v26 = vperm.slane %v2250_v51, 0  ;;  %v2632_v32 = vld [vmem:[%s10000_s9 + $0x18] sm:$0xf] }
 0x1da   :  { %2196 = vst.msk [vmem:[#allocation2 + $0x4d8] sm:$0xff] %vm586_vm1, %v8361_v49  ;;  %1743 = vrot.lane.b32.xlu1 %v8193_v38, %s7564_s16 }
 0x1db   :  { %2170 = vst.msk [vmem:[#allocation2 + $0x498] sm:$0xff] %vm586_vm1, %v8366_v46  ;;  %1771 = vrot.lane.b32.xlu0 %v8228_v43, %s7564_s16 }
 0x1dc   :  { %1745 = vrot.lane.b32.xlu2 %v8225_v52, %s7564_s16  ;;  %v628_v53 = vpop.permute.xlu1 %627 }
 0x1dd   :  { %637 = vst.msk [vmem:[#allocation2 + $0x78] sm:$0xff] %vm586_vm1, %v628_v53  ;;  %v680_v5 = vpop.permute.xlu0 %679  ;;  %v2054_v34 = vpop.f32.mrf.mxu2  ;;  %v8508_v53 = vperm.slane %v2632_v32, 3 }
 0x1de   :  { %689 = vst.msk [vmem:[#allocation2 + $0xf8] sm:$0xff] %vm586_vm1, %v680_v5  ;;  %v1034_v38 = vpop.permute.xlu2 %1033  ;;  %v8388_v56 = vadd.f32 %v2054_v34, %v8281_v42  ;;  %v2073_v54 = vpop.f32.mrf.mxu3  ;;  %v8511_v34 = vperm.slane %v2632_v32, 2 }
 0x1df   :  { %1044 = vst.msk [vmem:[#allocation2 + $0x1b0] sm:$0xff] %vm586_vm1, %v1034_v38  ;;  %v8392_v52 = vadd.f32 %v2073_v54, %v8287_v16  ;;  %v2486_v43 = vpop.f32.mrf.mxu1 }
 0x1e0   :  { %2118 = vst.msk [vmem:[#allocation2 + $0x418] sm:$0xff] %vm586_vm1, %v8388_v56  ;;  %v2467_v2 = vpop.f32.mrf.mxu0  ;;  %v8397_v3 = vadd.f32 %v2486_v43, %v8381_v47 }
 0x1e1   :  { %2144 = vst.msk [vmem:[#allocation2 + $0x458] sm:$0xff] %vm586_vm1, %v8392_v52  ;;  %v8402_v27 = vadd.f32 %v2467_v2, %v8384_v62 }
 0x1e2   :  { %2575 = vst.msk [vmem:[#allocation2 + $0x5c0] sm:$0xff] %vm586_vm1, %v8397_v3  ;;  %1797 = vrot.lane.b32.xlu1 %v8202_v33, %s7564_s16 }
 0x1e3   :  { %2549 = vst.msk [vmem:[#allocation2 + $0x580] sm:$0xff] %vm586_vm1, %v8402_v27  ;;  %1825 = vrot.lane.b32.xlu0 %v8237_v50, %s7564_s16 }
 0x1e4   :  { %1799 = vrot.lane.b32.xlu2 %v8234_v23, %s7564_s16  ;;  %v1056_v0 = vpop.permute.xlu1 %1055 }
 0x1e5   :  { %1068 = vst.msk [vmem:[#allocation2 + $0x1e0] sm:$0xff] %vm586_vm1, %v1056_v0  ;;  %v1030_v9 = vpop.permute.xlu0 %1029  ;;  %v2429_v42 = vpop.f32.mrf.mxu2 }
 0x1e6   :  { %1042 = vst.msk [vmem:[#allocation2 + $0x1a0] sm:$0xff] %vm586_vm1, %v1030_v9  ;;  %v1010_v33 = vpop.permute.xlu2 %1009  ;;  %v8421_v16 = vadd.f32 %v2429_v42, %v8408_v26  ;;  %v2448_v48 = vpop.f32.mrf.mxu3 }
 0x1e7   :  { %1019 = vst.msk [vmem:[#allocation2 + $0x178] sm:$0xff] %vm586_vm1, %v1010_v33  ;;  %v8425_v50 = vadd.f32 %v2448_v48, %v8414_v4  ;;  %v2488_v12 = vpop.f32.mrf.mxu1 }
 0x1e8   :  { %2497 = vst.msk [vmem:[#allocation2 + $0x500] sm:$0xff] %vm586_vm1, %v8421_v16  ;;  %v2469_v23 = vpop.f32.mrf.mxu0  ;;  %v8430_v58 = vadd.f32 %v2488_v12, %v8381_v47 }
 0x1e9   :  { %2523 = vst.msk [vmem:[#allocation2 + $0x540] sm:$0xff] %vm586_vm1, %v8425_v50  ;;  %v8435_v17 = vadd.f32 %v2469_v23, %v8384_v62 }
 0x1ea   :  { %2576 = vst.msk [vmem:[#allocation2 + $0x5c8] sm:$0xff] %vm586_vm1, %v8430_v58  ;;  %1773 = vrot.lane.b32.xlu1 %v8264_v8, %s7564_s16 }
 0x1eb   :  { %2550 = vst.msk [vmem:[#allocation2 + $0x588] sm:$0xff] %vm586_vm1, %v8435_v17  ;;  %1747 = vrot.lane.b32.xlu0 %v8261_v60, %s7564_s16 }
 0x1ec   :  { %2149 = vrot.lane.b32.xlu2 %v8298_v21, %s7564_s16  ;;  %v978_v20 = vpop.permute.xlu1 %977 }
 0x1ed   :  { %990 = vst.msk [vmem:[#allocation2 + $0x120] sm:$0xff] %vm586_vm1, %v978_v20  ;;  %v1006_v22 = vpop.permute.xlu0 %1005  ;;  %v2431_v24 = vpop.f32.mrf.mxu2 }
 0x1ee   :  { %1017 = vst.msk [vmem:[#allocation2 + $0x168] sm:$0xff] %vm586_vm1, %v1006_v22  ;;  %v1438_v63 = vpop.permute.xlu2 %1437  ;;  %v8450_v25 = vadd.f32 %v2431_v24, %v8408_v26  ;;  %v2450_v8 = vpop.f32.mrf.mxu3 }
 0x1ef   :  { %1450 = vst.msk [vmem:[#allocation2 + $0x2e0] sm:$0xff] %vm586_vm1, %v1438_v63  ;;  %v8454_v28 = vadd.f32 %v2450_v8, %v8414_v4  ;;  %v2491_v60 = vpop.f32.mrf.mxu1 }
 0x1f0   :  { %2498 = vst.msk [vmem:[#allocation2 + $0x508] sm:$0xff] %vm586_vm1, %v8450_v25  ;;  %v2472_v21 = vpop.f32.mrf.mxu0  ;;  %v8459_v45 = vadd.f32 %v2491_v60, %v8381_v47 }
 0x1f1   :  { %2524 = vst.msk [vmem:[#allocation2 + $0x548] sm:$0xff] %vm586_vm1, %v8454_v28  ;;  %v8464_v57 = vadd.f32 %v2472_v21, %v8384_v62 }
 0x1f2   :  { %2577 = vst.msk [vmem:[#allocation2 + $0x5d0] sm:$0xff] %vm586_vm1, %v8459_v45  ;;  %2201 = vrot.lane.b32.xlu1 %v8270_v14, %s7564_s16 }
 0x1f3   :  { %2551 = vst.msk [vmem:[#allocation2 + $0x590] sm:$0xff] %vm586_vm1, %v8464_v57  ;;  %2175 = vrot.lane.b32.xlu0 %v8275_v15, %s7564_s16 }
 0x1f4   :  { %2203 = vrot.lane.b32.xlu2 %v8303_v1, %s7564_s16  ;;  %v1032_v39 = vpop.permute.xlu1 %1031 }
 0x1f5   :  { %1043 = vst.msk [vmem:[#allocation2 + $0x1a8] sm:$0xff] %vm586_vm1, %v1032_v39  ;;  %v1060_v30 = vpop.permute.xlu0 %1059  ;;  %v2434_v10 = vpop.f32.mrf.mxu2 }
 0x1f6   :  { %1070 = vst.msk [vmem:[#allocation2 + $0x1f0] sm:$0xff] %vm586_vm1, %v1060_v30  ;;  %v1360_v7 = vpop.permute.xlu2 %1359  ;;  %v8479_v37 = vadd.f32 %v2434_v10, %v8408_v26  ;;  %v2453_v14 = vpop.f32.mrf.mxu3 }
 0x1f7   :  { %1372 = vst.msk [vmem:[#allocation2 + $0x220] sm:$0xff] %vm586_vm1, %v1360_v7  ;;  %v8483_v40 = vadd.f32 %v2453_v14, %v8414_v4  ;;  %v2493_v15 = vpop.f32.mrf.mxu1 }
 0x1f8   :  { %2499 = vst.msk [vmem:[#allocation2 + $0x510] sm:$0xff] %vm586_vm1, %v8479_v37  ;;  %v2474_v1 = vpop.f32.mrf.mxu0  ;;  %v8488_v36 = vadd.f32 %v2493_v15, %v8381_v47 }
 0x1f9   :  { %2525 = vst.msk [vmem:[#allocation2 + $0x550] sm:$0xff] %vm586_vm1, %v8483_v40  ;;  %v8493_v35 = vadd.f32 %v2474_v1, %v8384_v62 }
 0x1fa   :  { %2578 = vst.msk [vmem:[#allocation2 + $0x5d8] sm:$0xff] %vm586_vm1, %v8488_v36  ;;  %2123 = vrot.lane.b32.xlu1 %v8294_v59, %s7564_s16 }
 0x1fb   :  { %2552 = vst.msk [vmem:[#allocation2 + $0x598] sm:$0xff] %vm586_vm1, %v8493_v35  ;;  %2151 = vrot.lane.b32.xlu0 %v8327_v29, %s7564_s16 }
 0x1fc   :  { %2125 = vrot.lane.b32.xlu2 %v8323_v61, %s7564_s16  ;;  %v1008_v51 = vpop.permute.xlu1 %1007 }
 0x1fd   :  { %1018 = vst.msk [vmem:[#allocation2 + $0x170] sm:$0xff] %vm586_vm1, %v1008_v51  ;;  %v982_v47 = vpop.permute.xlu0 %981  ;;  %v2436_v5 = vpop.f32.mrf.mxu2 }
 0x1fe   :  { %992 = vst.msk [vmem:[#allocation2 + $0x130] sm:$0xff] %vm586_vm1, %v982_v47  ;;  %v1414_v59 = vpop.permute.xlu2 %1413  ;;  %v8515_v62 = vadd.f32 %v2436_v5, %v8408_v26  ;;  %v2455_v38 = vpop.f32.mrf.mxu3  ;;  %v8535_v26 = vperm.slane %v2632_v32, 0  ;;  %v3014_v5 = vld [vmem:[%s10000_s9 + $0x1c] sm:$0xf]  ;;  %s8918_s9 = smov 0  }
 0x1ff   :  { %1425 = vst.msk [vmem:[#allocation2 + $0x2a8] sm:$0xff] %vm586_vm1, %v1414_v59  ;;  %v8519_v61 = vadd.f32 %v2455_v38, %v8414_v4  ;;  %v2868_v29 = vpop.f32.mrf.mxu1  ;;  %v8541_v4 = vperm.slane %v2632_v32, 1 }
 0x200   :  { %2500 = vst.msk [vmem:[#allocation2 + $0x518] sm:$0xff] %vm586_vm1, %v8515_v62  ;;  %v2849_v54 = vpop.f32.mrf.mxu0  ;;  %v8524_v43 = vadd.f32 %v2868_v29, %v8508_v53  ;;  %v8638_v29 = vperm.slane %v3014_v5, 2 }
 0x201   :  { %2526 = vst.msk [vmem:[#allocation2 + $0x558] sm:$0xff] %vm586_vm1, %v8519_v61  ;;  %v8529_v2 = vadd.f32 %v2849_v54, %v8511_v34 }
 0x202   :  { %2957 = vst.msk [vmem:[#allocation2 + $0x6c0] sm:$0xff] %vm586_vm1, %v8524_v43  ;;  %2177 = vrot.lane.b32.xlu1 %v8308_v19, %s7564_s16 }
 0x203   :  { %2931 = vst.msk [vmem:[#allocation2 + $0x680] sm:$0xff] %vm586_vm1, %v8529_v2  ;;  %2205 = vrot.lane.b32.xlu0 %v8332_v31, %s7564_s16 }
 0x204   :  { %2179 = vrot.lane.b32.xlu2 %v8337_v13, %s7564_s16  ;;  %v1062_v0 = vpop.permute.xlu1 %1061 }
 0x205   :  { %1071 = vst.msk [vmem:[#allocation2 + $0x1f8] sm:$0xff] %vm586_vm1, %v1062_v0  ;;  %v1036_v9 = vpop.permute.xlu0 %1035  ;;  %v2811_v42 = vpop.f32.mrf.mxu2 }
 0x206   :  { %1045 = vst.msk [vmem:[#allocation2 + $0x1b8] sm:$0xff] %vm586_vm1, %v1036_v9  ;;  %v1390_v19 = vpop.permute.xlu2 %1389  ;;  %v8548_v33 = vadd.f32 %v2811_v42, %v8535_v26  ;;  %v2830_v48 = vpop.f32.mrf.mxu3 }
 0x207   :  { %1400 = vst.msk [vmem:[#allocation2 + $0x270] sm:$0xff] %vm586_vm1, %v1390_v19  ;;  %v8552_v31 = vadd.f32 %v2830_v48, %v8541_v4  ;;  %v2870_v12 = vpop.f32.mrf.mxu1  ;;  %v8668_v19 = vperm.slane %v3014_v5, 1 }
 0x208   :  { %2879 = vst.msk [vmem:[#allocation2 + $0x600] sm:$0xff] %vm586_vm1, %v8548_v33  ;;  %v2851_v13 = vpop.f32.mrf.mxu0  ;;  %v8557_v23 = vadd.f32 %v2870_v12, %v8508_v53 }
 0x209   :  { %2905 = vst.msk [vmem:[#allocation2 + $0x640] sm:$0xff] %vm586_vm1, %v8552_v31  ;;  %v8562_v20 = vadd.f32 %v2851_v13, %v8511_v34 }
 0x20a   :  { %2958 = vst.msk [vmem:[#allocation2 + $0x6c8] sm:$0xff] %vm586_vm1, %v8557_v23  ;;  %2153 = vrot.lane.b32.xlu1 %v8356_v41, %s7564_s16 }
 0x20b   :  { %2932 = vst.msk [vmem:[#allocation2 + $0x688] sm:$0xff] %vm586_vm1, %v8562_v20  ;;  %2127 = vrot.lane.b32.xlu0 %v8352_v6, %s7564_s16 }
 0x20c   :  { %2155 = vrot.lane.b32.xlu2 %v8392_v52, %s7564_s16  ;;  %v984_v22 = vpop.permute.xlu1 %983 }
 0x20d   :  { %993 = vst.msk [vmem:[#allocation2 + $0x138] sm:$0xff] %vm586_vm1, %v984_v22  ;;  %v1386_v24 = vpop.permute.xlu0 %1385  ;;  %v2813_v63 = vpop.f32.mrf.mxu2 }
 0x20e   :  { %1398 = vst.msk [vmem:[#allocation2 + $0x260] sm:$0xff] %vm586_vm1, %v1386_v24  ;;  %v1444_v8 = vpop.permute.xlu2 %1443  ;;  %v8577_v60 = vadd.f32 %v2813_v63, %v8535_v26  ;;  %v2832_v41 = vpop.f32.mrf.mxu3 }
 0x20f   :  { %1453 = vst.msk [vmem:[#allocation2 + $0x2f8] sm:$0xff] %vm586_vm1, %v1444_v8  ;;  %v8581_v21 = vadd.f32 %v2832_v41, %v8541_v4  ;;  %v2873_v6 = vpop.f32.mrf.mxu1 }
 0x210   :  { %2880 = vst.msk [vmem:[#allocation2 + $0x608] sm:$0xff] %vm586_vm1, %v8577_v60  ;;  %v2854_v52 = vpop.f32.mrf.mxu0  ;;  %v8586_v39 = vadd.f32 %v2873_v6, %v8508_v53 }
 0x211   :  { %2906 = vst.msk [vmem:[#allocation2 + $0x648] sm:$0xff] %vm586_vm1, %v8581_v21  ;;  %v8591_v30 = vadd.f32 %v2854_v52, %v8511_v34 }
 0x212   :  { %2959 = vst.msk [vmem:[#allocation2 + $0x6d0] sm:$0xff] %vm586_vm1, %v8586_v39  ;;  %2207 = vrot.lane.b32.xlu1 %v8361_v49, %s7564_s16 }
 0x213   :  { %2933 = vst.msk [vmem:[#allocation2 + $0x690] sm:$0xff] %vm586_vm1, %v8591_v30  ;;  %2181 = vrot.lane.b32.xlu0 %v8366_v46, %s7564_s16 }
 0x214   :  { %2583 = vrot.lane.b32.xlu2 %v8397_v3, %s7564_s16  ;;  %v1412_v10 = vpop.permute.xlu1 %1411 }
 0x215   :  { %1424 = vst.msk [vmem:[#allocation2 + $0x2a0] sm:$0xff] %vm586_vm1, %v1412_v10  ;;  %v1440_v7 = vpop.permute.xlu0 %1439  ;;  %v2816_v14 = vpop.f32.mrf.mxu2 }
 0x216   :  { %1451 = vst.msk [vmem:[#allocation2 + $0x2e8] sm:$0xff] %vm586_vm1, %v1440_v7  ;;  %v1366_v15 = vpop.permute.xlu2 %1365  ;;  %v8606_v1 = vadd.f32 %v2816_v14, %v8535_v26  ;;  %v2835_v49 = vpop.f32.mrf.mxu3 }
 0x217   :  { %1375 = vst.msk [vmem:[#allocation2 + $0x238] sm:$0xff] %vm586_vm1, %v1366_v15  ;;  %v8610_v32 = vadd.f32 %v2835_v49, %v8541_v4  ;;  %v2875_v46 = vpop.f32.mrf.mxu1 }
 0x218   :  { %2881 = vst.msk [vmem:[#allocation2 + $0x610] sm:$0xff] %vm586_vm1, %v8606_v1  ;;  %v2856_v3 = vpop.f32.mrf.mxu0  ;;  %v8615_v51 = vadd.f32 %v2875_v46, %v8508_v53 }
 0x219   :  { %2907 = vst.msk [vmem:[#allocation2 + $0x650] sm:$0xff] %vm586_vm1, %v8610_v32  ;;  %v8620_v47 = vadd.f32 %v2856_v3, %v8511_v34  ;;  %v8635_v34 = vperm.slane %v3014_v5, 3 }
 0x21a   :  { %2960 = vst.msk [vmem:[#allocation2 + $0x6d8] sm:$0xff] %vm586_vm1, %v8615_v51  ;;  %2129 = vrot.lane.b32.xlu1 %v8388_v56, %s7564_s16 }
 0x21b   :  { %2934 = vst.msk [vmem:[#allocation2 + $0x698] sm:$0xff] %vm586_vm1, %v8620_v47  ;;  %2531 = vrot.lane.b32.xlu0 %v8425_v50, %s7564_s16 }
 0x21c   :  { %2505 = vrot.lane.b32.xlu2 %v8421_v16, %s7564_s16  ;;  %v1388_v53 = vpop.permute.xlu1 %1387 }
 0x21d   :  { %1399 = vst.msk [vmem:[#allocation2 + $0x268] sm:$0xff] %vm586_vm1, %v1388_v53  ;;  %v1362_v59 = vpop.permute.xlu0 %1361  ;;  %v2818_v38 = vpop.f32.mrf.mxu2 }
 0x21e   :  { %1373 = vst.msk [vmem:[#allocation2 + $0x228] sm:$0xff] %vm586_vm1, %v1362_v59  ;;  %v1794_v56 = vpop.permute.xlu2 %1793  ;;  %v8642_v54 = vadd.f32 %v2818_v38, %v8535_v26  ;;  %v2837_v0 = vpop.f32.mrf.mxu3 }
 0x21f   :  { %1806 = vst.msk [vmem:[#allocation2 + $0x3a0] sm:$0xff] %vm586_vm1, %v1794_v56  ;;  %v8646_v16 = vadd.f32 %v2837_v0, %v8541_v4  ;;  %v3250_v50 = vpop.f32.mrf.mxu1  ;;  %v8662_v4 = vperm.slane %v3014_v5, 0 }
 0x220   :  { %2882 = vst.msk [vmem:[#allocation2 + $0x618] sm:$0xff] %vm586_vm1, %v8642_v54  ;;  %v3231_v9 = vpop.f32.mrf.mxu0  ;;  %v8651_v42 = vadd.f32 %v3250_v50, %v8635_v34 }
 0x221   :  { %2908 = vst.msk [vmem:[#allocation2 + $0x658] sm:$0xff] %vm586_vm1, %v8646_v16  ;;  %v8656_v26 = vadd.f32 %v3231_v9, %v8638_v29 }
 0x222   :  { %3339 = vst.msk [vmem:[#allocation2 + $0x7c0] sm:$0xff] %vm586_vm1, %v8651_v42  ;;  %2557 = vrot.lane.b32.xlu1 %v8402_v27, %s7564_s16 }
 0x223   :  { %3313 = vst.msk [vmem:[#allocation2 + $0x780] sm:$0xff] %vm586_vm1, %v8656_v26  ;;  %2585 = vrot.lane.b32.xlu0 %v8430_v58, %s7564_s16 }
 0x224   :  { %2559 = vrot.lane.b32.xlu2 %v8435_v17, %s7564_s16  ;;  %v1442_v48 = vpop.permute.xlu1 %1441 }
 0x225   :  { %1452 = vst.msk [vmem:[#allocation2 + $0x2f0] sm:$0xff] %vm586_vm1, %v1442_v48  ;;  %v1416_v12 = vpop.permute.xlu0 %1415  ;;  %v3193_v13 = vpop.f32.mrf.mxu2 }
 0x226   :  { %1426 = vst.msk [vmem:[#allocation2 + $0x2b0] sm:$0xff] %vm586_vm1, %v1416_v12  ;;  %v1770_v27 = vpop.permute.xlu2 %1769  ;;  %v8675_v22 = vadd.f32 %v3193_v13, %v8662_v4  ;;  %v3212_v24 = vpop.f32.mrf.mxu3 }
 0x227   :  { %1781 = vst.msk [vmem:[#allocation2 + $0x368] sm:$0xff] %vm586_vm1, %v1770_v27  ;;  %v8679_v58 = vadd.f32 %v3212_v24, %v8668_v19  ;;  %v3252_v63 = vpop.f32.mrf.mxu1 }
 0x228   :  { %3261 = vst.msk [vmem:[#allocation2 + $0x700] sm:$0xff] %vm586_vm1, %v8675_v22  ;;  %v3233_v17 = vpop.f32.mrf.mxu0  ;;  %v8684_v8 = vadd.f32 %v3252_v63, %v8635_v34 }
 0x229   :  { %3287 = vst.msk [vmem:[#allocation2 + $0x740] sm:$0xff] %vm586_vm1, %v8679_v58  ;;  %v8689_v41 = vadd.f32 %v3233_v17, %v8638_v29 }
 0x22a   :  { %3340 = vst.msk [vmem:[#allocation2 + $0x7c8] sm:$0xff] %vm586_vm1, %v8684_v8  ;;  %2533 = vrot.lane.b32.xlu1 %v8454_v28, %s7564_s16 }
 0x22b   :  { %3314 = vst.msk [vmem:[#allocation2 + $0x788] sm:$0xff] %vm586_vm1, %v8689_v41  ;;  %2507 = vrot.lane.b32.xlu0 %v8450_v25, %s7564_s16 }
 0x22c   :  { %2535 = vrot.lane.b32.xlu2 %v8483_v40, %s7564_s16  ;;  %v1364_v6 = vpop.permute.xlu1 %1363 }
 0x22d   :  { %1374 = vst.msk [vmem:[#allocation2 + $0x230] sm:$0xff] %vm586_vm1, %v1364_v6  ;;  %v1392_v52 = vpop.permute.xlu0 %1391  ;;  %v3195_v10 = vpop.f32.mrf.mxu2 }
 0x22e   :  { %1401 = vst.msk [vmem:[#allocation2 + $0x278] sm:$0xff] %vm586_vm1, %v1392_v52  ;;  %v1824_v7 = vpop.permute.xlu2 %1823  ;;  %v8704_v14 = vadd.f32 %v3195_v10, %v8662_v4  ;;  %v3214_v28 = vpop.f32.mrf.mxu3 }
 0x22f   :  { %1834 = vst.msk [vmem:[#allocation2 + $0x3f0] sm:$0xff] %vm586_vm1, %v1824_v7  ;;  %v8708_v15 = vadd.f32 %v3214_v28, %v8668_v19  ;;  %v3255_v25 = vpop.f32.mrf.mxu1 }
 0x230   :  { %3262 = vst.msk [vmem:[#allocation2 + $0x708] sm:$0xff] %vm586_vm1, %v8704_v14  ;;  %v3236_v40 = vpop.f32.mrf.mxu0  ;;  %v8713_v49 = vadd.f32 %v3255_v25, %v8635_v34 }
 0x231   :  { %3288 = vst.msk [vmem:[#allocation2 + $0x748] sm:$0xff] %vm586_vm1, %v8708_v15  ;;  %v8718_v46 = vadd.f32 %v3236_v40, %v8638_v29 }
 0x232   :  { %3341 = vst.msk [vmem:[#allocation2 + $0x7d0] sm:$0xff] %vm586_vm1, %v8713_v49  ;;  %2587 = vrot.lane.b32.xlu1 %v8459_v45, %s7564_s16 }
 0x233   :  { %3315 = vst.msk [vmem:[#allocation2 + $0x790] sm:$0xff] %vm586_vm1, %v8718_v46  ;;  %2561 = vrot.lane.b32.xlu0 %v8464_v57, %s7564_s16 }
 0x234   :  { %2589 = vrot.lane.b32.xlu2 %v8488_v36, %s7564_s16  ;;  %v1418_v3 = vpop.permute.xlu1 %1417 }
 0x235   :  { %1427 = vst.msk [vmem:[#allocation2 + $0x2b8] sm:$0xff] %vm586_vm1, %v1418_v3  ;;  %v1820_v5 = vpop.permute.xlu0 %1819  ;;  %v3198_v53 = vpop.f32.mrf.mxu2 }
 0x236   :  { %1832 = vst.msk [vmem:[#allocation2 + $0x3e0] sm:$0xff] %vm586_vm1, %v1820_v5  ;;  %v1746_v59 = vpop.permute.xlu2 %1745  ;;  %v8733_v38 = vadd.f32 %v3198_v53, %v8662_v4  ;;  %v3217_v45 = vpop.f32.mrf.mxu3 }
 0x237   :  { %1756 = vst.msk [vmem:[#allocation2 + $0x330] sm:$0xff] %vm586_vm1, %v1746_v59  ;;  %v8737_v56 = vadd.f32 %v3217_v45, %v8668_v19  ;;  %v3257_v57 = vpop.f32.mrf.mxu1 }
 0x238   :  { %3263 = vst.msk [vmem:[#allocation2 + $0x710] sm:$0xff] %vm586_vm1, %v8733_v38  ;;  %v3238_v36 = vpop.f32.mrf.mxu0  ;;  %v8742_v0 = vadd.f32 %v3257_v57, %v8635_v34 }
 0x239   :  { %3289 = vst.msk [vmem:[#allocation2 + $0x750] sm:$0xff] %vm586_vm1, %v8737_v56  ;;  %v8747_v50 = vadd.f32 %v3238_v36, %v8638_v29 }
 0x23a   :  { %3342 = vst.msk [vmem:[#allocation2 + $0x7d8] sm:$0xff] %vm586_vm1, %v8742_v0  ;;  %2509 = vrot.lane.b32.xlu1 %v8479_v37, %s7564_s16 }
 0x23b   :  { %3316 = vst.msk [vmem:[#allocation2 + $0x798] sm:$0xff] %vm586_vm1, %v8747_v50  ;;  %2537 = vrot.lane.b32.xlu0 %v8519_v61, %s7564_s16 }
 0x23c   :  { %2511 = vrot.lane.b32.xlu2 %v8515_v62, %s7564_s16  ;;  %v1768_v34 = vpop.permute.xlu1 %1767 }
 0x23d   :  { %1780 = vst.msk [vmem:[#allocation2 + $0x360] sm:$0xff] %vm586_vm1, %v1768_v34  ;;  %v1742_v29 = vpop.permute.xlu0 %1741  ;;  %v3200_v9 = vpop.f32.mrf.mxu2 }
 0x23e   :  { %1754 = vst.msk [vmem:[#allocation2 + $0x320] sm:$0xff] %vm586_vm1, %v1742_v29  ;;  %v1800_v48 = vpop.permute.xlu2 %1799  ;;  %v8762_v12 = vadd.f32 %v3200_v9, %v8662_v4  ;;  %v3219_v37 = vpop.f32.mrf.mxu3 }
 0x23f   :  { %1809 = vst.msk [vmem:[#allocation2 + $0x3b8] sm:$0xff] %vm586_vm1, %v1800_v48  ;;  %v8766_v13 = vadd.f32 %v3219_v37, %v8668_v19 }
 0x240   :  { %3264 = vst.msk [vmem:[#allocation2 + $0x718] sm:$0xff] %vm586_vm1, %v8762_v12 }
 0x241   :  { %3290 = vst.msk [vmem:[#allocation2 + $0x758] sm:$0xff] %vm586_vm1, %v8766_v13 }
 0x242   :  { %2563 = vrot.lane.b32.xlu1 %v8493_v35, %s7564_s16 }
 0x243   :  { %2965 = vrot.lane.b32.xlu0 %v8524_v43, %s7564_s16 }
 0x244   :  { %2939 = vrot.lane.b32.xlu2 %v8529_v2, %s7564_s16  ;;  %v1822_v62 = vpop.permute.xlu1 %1821 }
 0x245   :  { %1833 = vst.msk [vmem:[#allocation2 + $0x3e8] sm:$0xff] %vm586_vm1, %v1822_v62  ;;  %v1796_v61 = vpop.permute.xlu0 %1795 }
 0x246   :  { %1807 = vst.msk [vmem:[#allocation2 + $0x3a8] sm:$0xff] %vm586_vm1, %v1796_v61  ;;  %v2150_v4 = vpop.permute.xlu2 %2149 }
 0x247   :  { %2162 = vst.msk [vmem:[#allocation2 + $0x460] sm:$0xff] %vm586_vm1, %v2150_v4 }
 0x24a   :  { %2913 = vrot.lane.b32.xlu1 %v8552_v31, %s7564_s16 }
 0x24b   :  { %2887 = vrot.lane.b32.xlu0 %v8548_v33, %s7564_s16 }
 0x24c   :  { %2915 = vrot.lane.b32.xlu2 %v8581_v21, %s7564_s16  ;;  %v1744_v35 = vpop.permute.xlu1 %1743 }
 0x24d   :  { %1755 = vst.msk [vmem:[#allocation2 + $0x328] sm:$0xff] %vm586_vm1, %v1744_v35  ;;  %v1772_v43 = vpop.permute.xlu0 %1771 }
 0x24e   :  { %1782 = vst.msk [vmem:[#allocation2 + $0x370] sm:$0xff] %vm586_vm1, %v1772_v43  ;;  %v2204_v2 = vpop.permute.xlu2 %2203 }
 0x24f   :  { %2215 = vst.msk [vmem:[#allocation2 + $0x4e8] sm:$0xff] %vm586_vm1, %v2204_v2 }
 0x252   :  { %2967 = vrot.lane.b32.xlu1 %v8557_v23, %s7564_s16 }
 0x253   :  { %2941 = vrot.lane.b32.xlu0 %v8562_v20, %s7564_s16 }
 0x254   :  { %2969 = vrot.lane.b32.xlu2 %v8586_v39, %s7564_s16  ;;  %v1798_v33 = vpop.permute.xlu1 %1797 }
 0x255   :  { %1808 = vst.msk [vmem:[#allocation2 + $0x3b0] sm:$0xff] %vm586_vm1, %v1798_v33  ;;  %v1826_v31 = vpop.permute.xlu0 %1825 }
 0x256   :  { %1835 = vst.msk [vmem:[#allocation2 + $0x3f8] sm:$0xff] %vm586_vm1, %v1826_v31  ;;  %v2126_v21 = vpop.permute.xlu2 %2125 }
 0x257   :  { %2137 = vst.msk [vmem:[#allocation2 + $0x428] sm:$0xff] %vm586_vm1, %v2126_v21 }
 0x25a   :  { %2889 = vrot.lane.b32.xlu1 %v8577_v60, %s7564_s16 }
 0x25b   :  { %2917 = vrot.lane.b32.xlu0 %v8610_v32, %s7564_s16 }
 0x25c   :  { %2891 = vrot.lane.b32.xlu2 %v8606_v1, %s7564_s16  ;;  %v1774_v23 = vpop.permute.xlu1 %1773 }
 0x25d   :  { %1783 = vst.msk [vmem:[#allocation2 + $0x378] sm:$0xff] %vm586_vm1, %v1774_v23  ;;  %v1748_v20 = vpop.permute.xlu0 %1747 }
 0x25e   :  { %1757 = vst.msk [vmem:[#allocation2 + $0x338] sm:$0xff] %vm586_vm1, %v1748_v20  ;;  %v2180_v39 = vpop.permute.xlu2 %2179 }
 0x25f   :  { %2190 = vst.msk [vmem:[#allocation2 + $0x4b0] sm:$0xff] %vm586_vm1, %v2180_v39 }
 0x262   :  { %2943 = vrot.lane.b32.xlu1 %v8591_v30, %s7564_s16 }
 0x263   :  { %2971 = vrot.lane.b32.xlu0 %v8615_v51, %s7564_s16 }
 0x264   :  { %2945 = vrot.lane.b32.xlu2 %v8620_v47, %s7564_s16  ;;  %v2202_v60 = vpop.permute.xlu1 %2201 }
 0x265   :  { %2214 = vst.msk [vmem:[#allocation2 + $0x4e0] sm:$0xff] %vm586_vm1, %v2202_v60  ;;  %v2176_v1 = vpop.permute.xlu0 %2175 }
 0x266   :  { %2188 = vst.msk [vmem:[#allocation2 + $0x4a0] sm:$0xff] %vm586_vm1, %v2176_v1  ;;  %v2156_v32 = vpop.permute.xlu2 %2155 }
 0x267   :  { %2165 = vst.msk [vmem:[#allocation2 + $0x478] sm:$0xff] %vm586_vm1, %v2156_v32 }
 0x26a   :  { %2919 = vrot.lane.b32.xlu1 %v8646_v16, %s7564_s16 }
 0x26b   :  { %2893 = vrot.lane.b32.xlu0 %v8642_v54, %s7564_s16 }
 0x26c   :  { %3295 = vrot.lane.b32.xlu2 %v8679_v58, %s7564_s16  ;;  %v2124_v30 = vpop.permute.xlu1 %2123 }
 0x26d   :  { %2136 = vst.msk [vmem:[#allocation2 + $0x420] sm:$0xff] %vm586_vm1, %v2124_v30  ;;  %v2152_v51 = vpop.permute.xlu0 %2151 }
 0x26e   :  { %2163 = vst.msk [vmem:[#allocation2 + $0x468] sm:$0xff] %vm586_vm1, %v2152_v51  ;;  %v2584_v47 = vpop.permute.xlu2 %2583 }
 0x26f   :  { %2596 = vst.msk [vmem:[#allocation2 + $0x5e0] sm:$0xff] %vm586_vm1, %v2584_v47 }
 0x272   :  { %3347 = vrot.lane.b32.xlu1 %v8651_v42, %s7564_s16 }
 0x273   :  { %3321 = vrot.lane.b32.xlu0 %v8656_v26, %s7564_s16 }
 0x274   :  { %3271 = vrot.lane.b32.xlu2 %v8704_v14, %s7564_s16  ;;  %v2178_v54 = vpop.permute.xlu1 %2177 }
 0x275   :  { %2189 = vst.msk [vmem:[#allocation2 + $0x4a8] sm:$0xff] %vm586_vm1, %v2178_v54  ;;  %v2206_v16 = vpop.permute.xlu0 %2205 }
 0x276   :  { %2216 = vst.msk [vmem:[#allocation2 + $0x4f0] sm:$0xff] %vm586_vm1, %v2206_v16  ;;  %v2506_v19 = vpop.permute.xlu2 %2505 }
 0x277   :  { %2518 = vst.msk [vmem:[#allocation2 + $0x520] sm:$0xff] %vm586_vm1, %v2506_v19 }
 0x27a   :  { %3269 = vrot.lane.b32.xlu1 %v8675_v22, %s7564_s16 }
 0x27b   :  { %3297 = vrot.lane.b32.xlu0 %v8708_v15, %s7564_s16 }
 0x27c   :  { %3325 = vrot.lane.b32.xlu2 %v8718_v46, %s7564_s16  ;;  %v2154_v42 = vpop.permute.xlu1 %2153 }
 0x27d   :  { %2164 = vst.msk [vmem:[#allocation2 + $0x470] sm:$0xff] %vm586_vm1, %v2154_v42  ;;  %v2128_v26 = vpop.permute.xlu0 %2127 }
 0x27e   :  { %2138 = vst.msk [vmem:[#allocation2 + $0x430] sm:$0xff] %vm586_vm1, %v2128_v26  ;;  %v2560_v27 = vpop.permute.xlu2 %2559 }
 0x27f   :  { %2571 = vst.msk [vmem:[#allocation2 + $0x5a8] sm:$0xff] %vm586_vm1, %v2560_v27 }
 0x282   :  { %3323 = vrot.lane.b32.xlu1 %v8689_v41, %s7564_s16 }
 0x283   :  { %3273 = vrot.lane.b32.xlu0 %v8733_v38, %s7564_s16 }
 0x284   :  { %3301 = vrot.lane.b32.xlu2 %v8766_v13, %s7564_s16  ;;  %v2208_v22 = vpop.permute.xlu1 %2207 }
 0x285   :  { %2217 = vst.msk [vmem:[#allocation2 + $0x4f8] sm:$0xff] %vm586_vm1, %v2208_v22  ;;  %v2182_v24 = vpop.permute.xlu0 %2181 }
 0x286   :  { %2191 = vst.msk [vmem:[#allocation2 + $0x4b8] sm:$0xff] %vm586_vm1, %v2182_v24  ;;  %v2536_v58 = vpop.permute.xlu2 %2535 }
 0x287   :  { %2546 = vst.msk [vmem:[#allocation2 + $0x570] sm:$0xff] %vm586_vm1, %v2536_v58 }
 0x28a   :  { %3299 = vrot.lane.b32.xlu1 %v8737_v56, %s7564_s16 }
 0x28b   :  { %3327 = vrot.lane.b32.xlu0 %v8747_v50, %s7564_s16 }
 0x28c   :  { %3349 = vrot.lane.b32.xlu2 %v8684_v8, %s7564_s16  ;;  %v2130_v63 = vpop.permute.xlu1 %2129 }
 0x28d   :  { %2139 = vst.msk [vmem:[#allocation2 + $0x438] sm:$0xff] %vm586_vm1, %v2130_v63  ;;  %v2532_v17 = vpop.permute.xlu0 %2531 }
 0x28e   :  { %2544 = vst.msk [vmem:[#allocation2 + $0x560] sm:$0xff] %vm586_vm1, %v2532_v17  ;;  %v2590_v41 = vpop.permute.xlu2 %2589 }
 0x28f   :  { %2599 = vst.msk [vmem:[#allocation2 + $0x5f8] sm:$0xff] %vm586_vm1, %v2590_v41 }
 0x292   :  { %3275 = vrot.lane.b32.xlu1 %v8762_v12, %s7564_s16 }
 0x293   :  { %3351 = vrot.lane.b32.xlu0 %v8713_v49, %s7564_s16 }
 0x294   :  { %v2558_v6 = vpop.permute.xlu1 %2557 }
 0x295   :  { %2570 = vst.msk [vmem:[#allocation2 + $0x5a0] sm:$0xff] %vm586_vm1, %v2558_v6  ;;  %v2586_v52 = vpop.permute.xlu0 %2585 }
 0x296   :  { %2597 = vst.msk [vmem:[#allocation2 + $0x5e8] sm:$0xff] %vm586_vm1, %v2586_v52  ;;  %v2512_v8 = vpop.permute.xlu2 %2511 }
 0x297   :  { %2521 = vst.msk [vmem:[#allocation2 + $0x538] sm:$0xff] %vm586_vm1, %v2512_v8 }
 0x29a   :  { %3353 = vrot.lane.b32.xlu1 %v8742_v0, %s7564_s16 }
 0x29c   :  { %v2534_v10 = vpop.permute.xlu1 %2533 }
 0x29d   :  { %2545 = vst.msk [vmem:[#allocation2 + $0x568] sm:$0xff] %vm586_vm1, %v2534_v10  ;;  %v2508_v7 = vpop.permute.xlu0 %2507 }
 0x29e   :  { %2519 = vst.msk [vmem:[#allocation2 + $0x528] sm:$0xff] %vm586_vm1, %v2508_v7  ;;  %v2940_v14 = vpop.permute.xlu2 %2939 }
 0x29f   :  { %2952 = vst.msk [vmem:[#allocation2 + $0x6a0] sm:$0xff] %vm586_vm1, %v2940_v14 }
 0x2a4   :  { %v2588_v28 = vpop.permute.xlu1 %2587 }
 0x2a5   :  { %2598 = vst.msk [vmem:[#allocation2 + $0x5f0] sm:$0xff] %vm586_vm1, %v2588_v28  ;;  %v2562_v15 = vpop.permute.xlu0 %2561 }
 0x2a6   :  { %2572 = vst.msk [vmem:[#allocation2 + $0x5b0] sm:$0xff] %vm586_vm1, %v2562_v15  ;;  %v2916_v25 = vpop.permute.xlu2 %2915 }
 0x2a7   :  { %2927 = vst.msk [vmem:[#allocation2 + $0x668] sm:$0xff] %vm586_vm1, %v2916_v25 }
 0x2ac   :  { %v2510_v40 = vpop.permute.xlu1 %2509 }
 0x2ad   :  { %2520 = vst.msk [vmem:[#allocation2 + $0x530] sm:$0xff] %vm586_vm1, %v2510_v40  ;;  %v2538_v49 = vpop.permute.xlu0 %2537 }
 0x2ae   :  { %2547 = vst.msk [vmem:[#allocation2 + $0x578] sm:$0xff] %vm586_vm1, %v2538_v49  ;;  %v2970_v46 = vpop.permute.xlu2 %2969 }
 0x2af   :  { %2980 = vst.msk [vmem:[#allocation2 + $0x6f0] sm:$0xff] %vm586_vm1, %v2970_v46 }
 0x2b4   :  { %v2564_v3 = vpop.permute.xlu1 %2563 }
 0x2b5   :  { %2573 = vst.msk [vmem:[#allocation2 + $0x5b8] sm:$0xff] %vm586_vm1, %v2564_v3  ;;  %v2966_v5 = vpop.permute.xlu0 %2965 }
 0x2b6   :  { %2978 = vst.msk [vmem:[#allocation2 + $0x6e0] sm:$0xff] %vm586_vm1, %v2966_v5  ;;  %v2892_v53 = vpop.permute.xlu2 %2891 }
 0x2b7   :  { %2902 = vst.msk [vmem:[#allocation2 + $0x630] sm:$0xff] %vm586_vm1, %v2892_v53 }
 0x2bc   :  { %v2914_v59 = vpop.permute.xlu1 %2913 }
 0x2bd   :  { %2926 = vst.msk [vmem:[#allocation2 + $0x660] sm:$0xff] %vm586_vm1, %v2914_v59  ;;  %v2888_v38 = vpop.permute.xlu0 %2887 }
 0x2be   :  { %2900 = vst.msk [vmem:[#allocation2 + $0x620] sm:$0xff] %vm586_vm1, %v2888_v38  ;;  %v2946_v45 = vpop.permute.xlu2 %2945 }
 0x2bf   :  { %2955 = vst.msk [vmem:[#allocation2 + $0x6b8] sm:$0xff] %vm586_vm1, %v2946_v45 }
 0x2c4   :  { %v2968_v56 = vpop.permute.xlu1 %2967 }
 0x2c5   :  { %2979 = vst.msk [vmem:[#allocation2 + $0x6e8] sm:$0xff] %vm586_vm1, %v2968_v56  ;;  %v2942_v57 = vpop.permute.xlu0 %2941 }
 0x2c6   :  { %2953 = vst.msk [vmem:[#allocation2 + $0x6a8] sm:$0xff] %vm586_vm1, %v2942_v57  ;;  %v3296_v36 = vpop.permute.xlu2 %3295 }
 0x2c7   :  { %3308 = vst.msk [vmem:[#allocation2 + $0x760] sm:$0xff] %vm586_vm1, %v3296_v36 }
 0x2cc   :  { %v2890_v0 = vpop.permute.xlu1 %2889 }
 0x2cd   :  { %2901 = vst.msk [vmem:[#allocation2 + $0x628] sm:$0xff] %vm586_vm1, %v2890_v0  ;;  %v2918_v50 = vpop.permute.xlu0 %2917 }
 0x2ce   :  { %2928 = vst.msk [vmem:[#allocation2 + $0x670] sm:$0xff] %vm586_vm1, %v2918_v50  ;;  %v3272_v34 = vpop.permute.xlu2 %3271 }
 0x2cf   :  { %3283 = vst.msk [vmem:[#allocation2 + $0x728] sm:$0xff] %vm586_vm1, %v3272_v34 }
 0x2d4   :  { %v2944_v29 = vpop.permute.xlu1 %2943 }
 0x2d5   :  { %2954 = vst.msk [vmem:[#allocation2 + $0x6b0] sm:$0xff] %vm586_vm1, %v2944_v29  ;;  %v2972_v9 = vpop.permute.xlu0 %2971 }
 0x2d6   :  { %2981 = vst.msk [vmem:[#allocation2 + $0x6f8] sm:$0xff] %vm586_vm1, %v2972_v9  ;;  %v3326_v48 = vpop.permute.xlu2 %3325 }
 0x2d7   :  { %3336 = vst.msk [vmem:[#allocation2 + $0x7b0] sm:$0xff] %vm586_vm1, %v3326_v48 }
 0x2dc   :  { %v2920_v12 = vpop.permute.xlu1 %2919 }
 0x2dd   :  { %2929 = vst.msk [vmem:[#allocation2 + $0x678] sm:$0xff] %vm586_vm1, %v2920_v12  ;;  %v2894_v37 = vpop.permute.xlu0 %2893 }
 0x2de   :  { %2903 = vst.msk [vmem:[#allocation2 + $0x638] sm:$0xff] %vm586_vm1, %v2894_v37  ;;  %v3302_v13 = vpop.permute.xlu2 %3301 }
 0x2df   :  { %3311 = vst.msk [vmem:[#allocation2 + $0x778] sm:$0xff] %vm586_vm1, %v3302_v13 }
 0x2e4   :  { %v3348_v62 = vpop.permute.xlu1 %3347 }
 0x2e5   :  { %3360 = vst.msk [vmem:[#allocation2 + $0x7e0] sm:$0xff] %vm586_vm1, %v3348_v62  ;;  %v3322_v61 = vpop.permute.xlu0 %3321 }
 0x2e6   :  { %3334 = vst.msk [vmem:[#allocation2 + $0x7a0] sm:$0xff] %vm586_vm1, %v3322_v61  ;;  %v3350_v4 = vpop.permute.xlu2 %3349 }
 0x2e7   :  { %3361 = vst.msk [vmem:[#allocation2 + $0x7e8] sm:$0xff] %vm586_vm1, %v3350_v4 }
 0x2ec   :  { %v3270_v35 = vpop.permute.xlu1 %3269 }
 0x2ed   :  { %3282 = vst.msk [vmem:[#allocation2 + $0x720] sm:$0xff] %vm586_vm1, %v3270_v35  ;;  %v3298_v43 = vpop.permute.xlu0 %3297 }
 0x2ee   :  { %3309 = vst.msk [vmem:[#allocation2 + $0x768] sm:$0xff] %vm586_vm1, %v3298_v43 }
 0x2f4   :  { %v3324_v2 = vpop.permute.xlu1 %3323 }
 0x2f5   :  { %3335 = vst.msk [vmem:[#allocation2 + $0x7a8] sm:$0xff] %vm586_vm1, %v3324_v2  ;;  %v3274_v33 = vpop.permute.xlu0 %3273 }
 0x2f6   :  { %3284 = vst.msk [vmem:[#allocation2 + $0x730] sm:$0xff] %vm586_vm1, %v3274_v33 }
 0x2fc   :  { %v3300_v31 = vpop.permute.xlu1 %3299 }
 0x2fd   :  { %3310 = vst.msk [vmem:[#allocation2 + $0x770] sm:$0xff] %vm586_vm1, %v3300_v31  ;;  %v3328_v21 = vpop.permute.xlu0 %3327 }
 0x2fe   :  { %3337 = vst.msk [vmem:[#allocation2 + $0x7b8] sm:$0xff] %vm586_vm1, %v3328_v21 }
 0x304   :  { %v3276_v23 = vpop.permute.xlu1 %3275 }
 0x305   :  { %3285 = vst.msk [vmem:[#allocation2 + $0x738] sm:$0xff] %vm586_vm1, %v3276_v23  ;;  %v3352_v20 = vpop.permute.xlu0 %3351 }
 0x306   :  { %3362 = vst.msk [vmem:[#allocation2 + $0x7f0] sm:$0xff] %vm586_vm1, %v3352_v20 }
 0x30c   :  { %v3354_v39 = vpop.permute.xlu1 %3353 }
 0x30d   :  { %3363 = vst.msk [vmem:[#allocation2 + $0x7f8] sm:$0xff] %vm586_vm1, %v3354_v39 }
 0x30e LB: > { %10071 = vst [vmem:[#allocation28_spill] sm:$0xff] %v7553_v18  ;;  %v7578_v11 = vmov 3   ;;  %v3376_v44 = vpack.c.bf16 %v7553_v18, %v7557_v55  ;;  %v7579_v60 = vmov 1   ;;  %v7580_v1 = vmov 0   ;;  %v6906_v32 = vld [vmem:[%s9993_s2] sm:$0xff]  ;;  %v6907_v30 = vld [vmem:[%s9993_s2 + $0x8] sm:$0xff]  ;;  %s7561_s9 = sphi %s8918_s9, %s3369_s9   ;;  %v7557_v55 = vphi %v241_v55, %v10192_v55   ;;  %v7553_v18 = vphi %v242_v18, %v10191_v18  }
 0x30f   : > { %10072 = vst [vmem:[#allocation29_spill] sm:$0xff] %v7557_v55  ;;  %7035 = vset.pattern.permute.xlu1 %v7578_v11  ;;  %7033 = vset.pattern.permute.xlu2 %v7579_v60  ;;  %vm3387_vm2 = vcmask 130048   ;;  %v7581_v47 = vmov 6   ;;  %v7582_v54 = vmov 2   ;;  %v7583_v16 = vmov 4   ;;  %s7642_s8 = smov 64  }
 0x310   : > { %7032 = vset.pattern.permute.xlu0 %v7580_v1  ;;  %3401 = vmatpush.bf16.msra.mxu0 %v3376_v44  ;;  %v7584_v19 = vmov 8   ;;  %v7585_v42 = vmov 5   ;;  %v7586_v26 = vmov 9   ;;  %v7587_v27 = vmov 11   ;;  %s3369_s9 = sadd.s32 1, %s7561_s9  }
 0x311   : > { %v7588_v22 = vmov 7   ;;  %v7589_v58 = vmov 10   ;;  %v7590_v63 = vmov 12   ;;  %v7591_v10 = vmov 14   ;;  %p3366_p0 = scmp.ge.s32.totalorder %s3369_s9, 6  }
 0x312   : > { %v7592_v28 = vmov 15   ;;  %v7593_v40 = vmov 16   ;;  %v7594_v3 = vmov 17   ;;  %v7595_v59 = vmov 19   ;;  %s5478_s10 = sshll.u32 (%p3366_p0), %s10004_s13, 4  ;;  %s7643_s11 = smov (%p3366_p0), [#allocation20]   ;;  %s5479_s10 = int_to_ptr.hbm [resolvable:$true] %s5478_s10 }
 0x313   : > { %6570 = vmatmul.msk.bf16.vlgmr.msra.gmra.mxu0 %vm3387_vm2, %v6906_v32  ;;  %v7596_v56 = vmov 20   ;;  %v10027_v50 = vmov 21   ;;  %v10025_v48 = vmov 22   ;;  %v7599_v62 = vmov 13   ;;  %s5476_s21 = sshll.u32 (%p3366_p0), %s7643_s11, 4  ;;  %s5477_s21 = int_to_ptr.vmem [resolvable:$true] %s5476_s21 }
 0x314   : > { %v10021_v61 = vmov 24   ;;  %v10019_v2 = vmov 25   ;;  %v10017_v23 = vmov 26   ;;  %v10013_v44 = vmov 27  }
 0x315   : > { %v10035_v55 = vmov 39  }
 0x323   : > { %6571 = vmatmul.msk.bf16.gmra.mxu0 %vm3387_vm2, %v6907_v30  ;;  %v10011_v30 = vmov 29  }
 0x390   : > { %v8940_v51 = vpop.f32.mrf.mxu0 }
 0x391   : > { %3506 = vperm.xlu1 %7035, %v8940_v51   ;;  %3450 = vperm.xlu2 %7033, %v8940_v51  }
 0x392   : > { %3419 = vperm.xlu0 %7032, %v8940_v51  }
 0x398   : > { %v8959_v24 = vpop.f32.mrf.mxu0 }
 0x399   : > { %7038 = vset.pattern.permute.xlu1 %v7581_v47  ;;  %7034 = vset.pattern.permute.xlu2 %v7582_v54 }
 0x39a   : > { %7036 = vset.pattern.permute.xlu0 %v7583_v16  ;;  %3590 = vperm.xlu1 %7038, %v8940_v51  }
 0x39b   : > { %3478 = vperm.xlu2 %7034, %v8940_v51   ;;  %3534 = vperm.xlu0 %7036, %v8940_v51  }
 0x3a0   : > { %v8978_v17 = vpop.f32.mrf.mxu0 }
 0x3a2   : > { %7040 = vset.pattern.permute.xlu1 %v7584_v19 }
 0x3a3   : > { %7037 = vset.pattern.permute.xlu2 %v7585_v42  ;;  %7041 = vset.pattern.permute.xlu0 %v7586_v26 }
 0x3a4   : > { %3646 = vperm.xlu1 %7040, %v8940_v51   ;;  %3562 = vperm.xlu2 %7037, %v8940_v51  }
 0x3a5   : > { %3674 = vperm.xlu0 %7041, %v8940_v51  }
 0x3a8   : > { %v8997_v41 = vpop.f32.mrf.mxu0 }
 0x3ac   : > { %7043 = vset.pattern.permute.xlu1 %v7587_v27  ;;  %7039 = vset.pattern.permute.xlu2 %v7588_v22 }
 0x3ad   : > { %7045 = vset.pattern.permute.xlu0 %v7580_v1  ;;  %3730 = vperm.xlu1 %7043, %v8940_v51  }
 0x3ae   : > { %3618 = vperm.xlu2 %7039, %v8940_v51   ;;  %3424 = vperm.xlu0 %7045, %v8959_v24  }
 0x3b5   : > { %7047 = vset.pattern.permute.xlu1 %v7582_v54 }
 0x3b6   : > { %7042 = vset.pattern.permute.xlu2 %v7589_v58  ;;  %7050 = vset.pattern.permute.xlu0 %v7585_v42 }
 0x3b7   : > { %3702 = vperm.xlu2 %7042, %v8940_v51   ;;  %3482 = vperm.xlu1 %7047, %v8959_v24  }
 0x3b8   : > { %3566 = vperm.xlu0 %7050, %v8959_v24  }
 0x3bf   : > { %7044 = vset.pattern.permute.xlu2 %v7590_v63  ;;  %7049 = vset.pattern.permute.xlu1 %v7583_v16 }
 0x3c0   : > { %7055 = vset.pattern.permute.xlu0 %v7589_v58  ;;  %3758 = vperm.xlu2 %7044, %v8940_v51  }
 0x3c1   : > { %3538 = vperm.xlu1 %7049, %v8959_v24   ;;  %3706 = vperm.xlu0 %7055, %v8959_v24  }
 0x3c8   : > { %7046 = vset.pattern.permute.xlu2 %v7579_v60 }
 0x3c9   : > { %7052 = vset.pattern.permute.xlu1 %v7588_v22  ;;  %7059 = vset.pattern.permute.xlu0 %v7579_v60 }
 0x3ca   : > { %3622 = vperm.xlu1 %7052, %v8959_v24   ;;  %3454 = vperm.xlu2 %7046, %v8959_v24  }
 0x3cb   : > { %3458 = vperm.xlu0 %7059, %v8978_v17  }
 0x3d2   : > { %7054 = vset.pattern.permute.xlu1 %v7586_v26  ;;  %7048 = vset.pattern.permute.xlu2 %v7578_v11 }
 0x3d3   : > { %7064 = vset.pattern.permute.xlu0 %v7581_v47  ;;  %3678 = vperm.xlu1 %7054, %v8959_v24  }
 0x3d4   : > { %3510 = vperm.xlu2 %7048, %v8959_v24   ;;  %3598 = vperm.xlu0 %7064, %v8978_v17  }
 0x3db   : > { %7057 = vset.pattern.permute.xlu1 %v7590_v63 }
 0x3dc   : > { %7051 = vset.pattern.permute.xlu2 %v7581_v47  ;;  %7069 = vset.pattern.permute.xlu0 %v7587_v27 }
 0x3dd   : > { %3762 = vperm.xlu1 %7057, %v8959_v24   ;;  %3594 = vperm.xlu2 %7051, %v8959_v24  }
 0x3de   : > { %3738 = vperm.xlu0 %7069, %v8978_v17  }
 0x3e5   : > { %7058 = vset.pattern.permute.xlu1 %v7580_v1  ;;  %7053 = vset.pattern.permute.xlu2 %v7584_v19 }
 0x3e6   : > { %7073 = vset.pattern.permute.xlu0 %v7582_v54  ;;  %3650 = vperm.xlu2 %7053, %v8959_v24  }
 0x3e7   : > { %3429 = vperm.xlu1 %7058, %v8978_v17   ;;  %3490 = vperm.xlu0 %7073, %v8997_v41  }
 0x3eb   : > { %v9005_v6 = vpop.permute.xlu2 %3450 }
 0x3ec   : > { %10073 = vst [vmem:[#allocation30_spill] sm:$0xff] %v9005_v6 }
 0x3ee   : > { %7056 = vset.pattern.permute.xlu2 %v7587_v27 }
 0x3ef   : > { %7061 = vset.pattern.permute.xlu1 %v7578_v11  ;;  %7078 = vset.pattern.permute.xlu0 %v7588_v22 }
 0x3f0   : > { %3734 = vperm.xlu2 %7056, %v8959_v24   ;;  %3514 = vperm.xlu1 %7061, %v8978_v17  }
 0x3f1   : > { %3630 = vperm.xlu0 %7078, %v8997_v41  }
 0x3f5   : > { %v9013_v52 = vpop.permute.xlu2 %3478 }
 0x3f8   : > { %7060 = vset.pattern.permute.xlu2 %v7582_v54  ;;  %7063 = vset.pattern.permute.xlu1 %v7585_v42 }
 0x3f9   : > { %7083 = vset.pattern.permute.xlu0 %v7590_v63  ;;  %3486 = vperm.xlu2 %7060, %v8978_v17  }
 0x3fa   : > { %3570 = vperm.xlu1 %7063, %v8978_v17   ;;  %3770 = vperm.xlu0 %7083, %v8997_v41  }
 0x3fe   : > { %v9021_v8 = vpop.permute.xlu2 %3562 }
 0x3ff   : > { %10074 = vst [vmem:[#allocation31_spill] sm:$0xff] %v9021_v8  ;;  %v3783_v8 = vld [vmem:[#allocation2 + $0x1b0] sm:$0xff] }
 0x401   : > { %7062 = vset.pattern.permute.xlu2 %v7583_v16 }
 0x402   : > { %7066 = vset.pattern.permute.xlu1 %v7584_v19  ;;  %7086 = vset.pattern.permute.xlu0 %v7591_v10 }
 0x403   : > { %3542 = vperm.xlu2 %7062, %v8978_v17   ;;  %3654 = vperm.xlu1 %7066, %v8978_v17   ;;  %v9028_v7 = vpop.permute.xlu1 %3506 }
 0x404   : > { %3814 = vperm.xlu0 %7086, %v8940_v51   ;;  %v9077_v57 = vpop.permute.xlu0 %3419 }
 0x405   : > { %10079 = vst [vmem:[#allocation36_spill] sm:$0xff] %v9077_v57  ;;  %v3559_v57 = vld [vmem:[#allocation2 + $0xb0] sm:$0xff] }
 0x408   : > { %v9031_v14 = vpop.permute.xlu2 %3618 }
 0x40b   : > { %7065 = vset.pattern.permute.xlu2 %v7588_v22  ;;  %7068 = vset.pattern.permute.xlu1 %v7589_v58  ;;  %v10005_v22 = vmov 31  }
 0x40c   : > { %7090 = vset.pattern.permute.xlu0 %v7592_v28  ;;  %3626 = vperm.xlu2 %7065, %v8978_v17   ;;  %v9037_v15 = vpop.permute.xlu1 %3590 }
 0x40d   : > { %3710 = vperm.xlu1 %7068, %v8978_v17   ;;  %3846 = vperm.xlu0 %7090, %v8959_v24   ;;  %v9092_v29 = vpop.permute.xlu0 %3534 }
 0x40e   : > { %10082 = vst [vmem:[#allocation39_spill] sm:$0xff] %v9092_v29 }
 0x411   : > { %v9041_v25 = vpop.permute.xlu2 %3702 }
 0x414   : > { %7067 = vset.pattern.permute.xlu2 %v7586_v26 }
 0x415   : > { %7071 = vset.pattern.permute.xlu1 %v7580_v1  ;;  %7094 = vset.pattern.permute.xlu0 %v7593_v40 }
 0x416   : > { %3682 = vperm.xlu2 %7067, %v8978_v17   ;;  %3878 = vperm.xlu0 %7094, %v8978_v17   ;;  %v9048_v49 = vpop.permute.xlu1 %3646 }
 0x417   : > { %10075 = vst [vmem:[#allocation32_spill] sm:$0xff] %v9048_v49  ;;  %3434 = vperm.xlu1 %7071, %v8997_v41   ;;  %v9105_v37 = vpop.permute.xlu0 %3674  ;;  %v10041_v49 = vmov 42  }
 0x418   : > { %10085 = vst [vmem:[#allocation42_spill] sm:$0xff] %v9105_v37  ;;  %v3671_v37 = vld [vmem:[#allocation2 + $0x130] sm:$0xff] }
 0x41a   : > { %v9051_v46 = vpop.permute.xlu2 %3758 }
 0x41b   : > { %10076 = vst [vmem:[#allocation33_spill] sm:$0xff] %v9051_v46  ;;  %v10039_v46 = vmov 41  }
 0x41e   : > { %7070 = vset.pattern.permute.xlu2 %v7590_v63  ;;  %7097 = vset.pattern.permute.xlu0 %v7594_v3 }
 0x41f   : > { %7072 = vset.pattern.permute.xlu1 %v7579_v60  ;;  %3766 = vperm.xlu2 %7070, %v8978_v17   ;;  %v9057_v5 = vpop.permute.xlu1 %3730 }
 0x420   : > { %3910 = vperm.xlu0 %7097, %v8997_v41   ;;  %3462 = vperm.xlu1 %7072, %v8997_v41   ;;  %v9115_v35 = vpop.permute.xlu0 %3424 }
 0x421   : > { %10087 = vst [vmem:[#allocation44_spill] sm:$0xff] %v9115_v35 }
 0x424   : > { %v9061_v53 = vpop.permute.xlu2 %3454 }
 0x425   : > { %10077 = vst [vmem:[#allocation34_spill] sm:$0xff] %v9061_v53  ;;  %v10037_v53 = vmov 40  }
 0x427   : > { %7074 = vset.pattern.permute.xlu2 %v7578_v11 }
 0x428   : > { %7100 = vset.pattern.permute.xlu0 %v7595_v59  ;;  %7075 = vset.pattern.permute.xlu1 %v7583_v16 }
 0x429   : > { %3518 = vperm.xlu2 %7074, %v8997_v41   ;;  %3954 = vperm.xlu0 %7100, %v8940_v51   ;;  %v9068_v38 = vpop.permute.xlu1 %3482 }
 0x42a   : > { %10078 = vst [vmem:[#allocation35_spill] sm:$0xff] %v9068_v38  ;;  %3546 = vperm.xlu1 %7075, %v8997_v41   ;;  %v9125_v31 = vpop.permute.xlu0 %3566 }
 0x42b   : > { %10088 = vst [vmem:[#allocation45_spill] sm:$0xff] %v9125_v31  ;;  %v10093_v31 = vmov 22  }
 0x42e   : > { %v9071_v45 = vpop.permute.xlu2 %3510 }
 0x431   : > { %7076 = vset.pattern.permute.xlu2 %v7585_v42  ;;  %7104 = vset.pattern.permute.xlu0 %v7596_v56 }
 0x432   : > { %7077 = vset.pattern.permute.xlu1 %v7581_v47  ;;  %3574 = vperm.xlu2 %7076, %v8997_v41  }
 0x433   : > { %3986 = vperm.xlu0 %7104, %v8959_v24   ;;  %3602 = vperm.xlu1 %7077, %v8997_v41   ;;  %v9081_v36 = vpop.permute.xlu1 %3538  ;;  %v9137_v39 = vpop.permute.xlu0 %3706 }
 0x434   : > { %10080 = vst [vmem:[#allocation37_spill] sm:$0xff] %v9081_v36 }
 0x435   : > { %10089 = vst [vmem:[#allocation46_spill] sm:$0xff] %v9137_v39 }
 0x437   : > { %v9083_v0 = vpop.permute.xlu2 %3594 }
 0x438   : > { %10081 = vst [vmem:[#allocation38_spill] sm:$0xff] %v9083_v0 }
 0x43a   : > { %7079 = vset.pattern.permute.xlu2 %v7584_v19  ;;  %v10007_v19 = vmov 30  }
 0x43b   : > { %7108 = vset.pattern.permute.xlu0 %v10027_v50  ;;  %7080 = vset.pattern.permute.xlu1 %v7586_v26 }
 0x43c   : > { %3658 = vperm.xlu2 %7079, %v8997_v41   ;;  %4018 = vperm.xlu0 %7108, %v8978_v17   ;;  %v9090_v34 = vpop.permute.xlu1 %3622 }
 0x43d   : > { %3686 = vperm.xlu1 %7080, %v8997_v41   ;;  %v9148_v1 = vpop.permute.xlu0 %3458 }
 0x440   : > { %v9095_v9 = vpop.permute.xlu2 %3650 }
 0x441   : > { %10083 = vst [vmem:[#allocation40_spill] sm:$0xff] %v9095_v9 }
 0x444   : > { %7081 = vset.pattern.permute.xlu2 %v7589_v58  ;;  %7111 = vset.pattern.permute.xlu0 %v10025_v48  ;;  %v10033_v48 = vmov 37  }
 0x445   : > { %7082 = vset.pattern.permute.xlu1 %v7587_v27  ;;  %3714 = vperm.xlu2 %7081, %v8997_v41   ;;  %v9101_v12 = vpop.permute.xlu1 %3678 }
 0x446   : > { %10084 = vst [vmem:[#allocation41_spill] sm:$0xff] %v9101_v12  ;;  %4050 = vperm.xlu0 %7111, %v8997_v41   ;;  %3742 = vperm.xlu1 %7082, %v8997_v41   ;;  %v9159_v54 = vpop.permute.xlu0 %3598 }
 0x44a   : > { %v9107_v13 = vpop.permute.xlu2 %3734 }
 0x44d   : > { %7085 = vset.pattern.permute.xlu2 %v7599_v62 }
 0x44e   : > { %7114 = vset.pattern.permute.xlu0 %v10021_v61  ;;  %7084 = vset.pattern.permute.xlu1 %v7599_v62  ;;  %v7608_v62 = vmov 18  }
 0x44f   : > { %3790 = vperm.xlu2 %7085, %v8959_v24   ;;  %4094 = vperm.xlu0 %7114, %v8940_v51   ;;  %v9112_v4 = vpop.permute.xlu1 %3762 }
 0x450   : > { %10086 = vst [vmem:[#allocation43_spill] sm:$0xff] %v9112_v4  ;;  %3786 = vperm.xlu1 %7084, %v8940_v51   ;;  %v9171_v26 = vpop.permute.xlu0 %3738 }
 0x453   : > { %v9117_v43 = vpop.permute.xlu2 %3486 }
 0x457   : > { %3798 = vperm.xlu2 %7085, %v8997_v41   ;;  %7118 = vset.pattern.permute.xlu0 %v10019_v2  ;;  %v10029_v2 = vmov 36  }
 0x458   : > { %3794 = vperm.xlu1 %7084, %v8978_v17   ;;  %4126 = vperm.xlu0 %7118, %v8959_v24  }
 0x459   : > { %v9123_v33 = vpop.permute.xlu1 %3429  ;;  %v9182_v63 = vpop.permute.xlu0 %3490 }
 0x45d   : > { %v9127_v21 = vpop.permute.xlu2 %3542 }
 0x45f   : > { %7088 = vset.pattern.permute.xlu2 %v7591_v10 }
 0x460   : > { %7087 = vset.pattern.permute.xlu1 %v7591_v10  ;;  %3822 = vperm.xlu2 %7088, %v8978_v17  }
 0x461   : > { %7122 = vset.pattern.permute.xlu0 %v10017_v23  ;;  %3818 = vperm.xlu1 %7087, %v8959_v24  }
 0x462   : > { %4158 = vperm.xlu0 %7122, %v8978_v17   ;;  %v9135_v20 = vpop.permute.xlu1 %3514 }
 0x466   : > { %v9139_v11 = vpop.permute.xlu2 %3626 }
 0x468   : > { %7089 = vset.pattern.permute.xlu2 %v7592_v28 }
 0x469   : > { %3826 = vperm.xlu1 %7087, %v8997_v41   ;;  %3842 = vperm.xlu2 %7089, %v8940_v51  }
 0x46a   : > { %7125 = vset.pattern.permute.xlu0 %v10013_v44  ;;  %v10023_v44 = vmov 35  }
 0x46b   : > { %4190 = vperm.xlu0 %7125, %v8997_v41  }
 0x46c   : > { %v9146_v60 = vpop.permute.xlu1 %3570 }
 0x470   : > { %v9150_v32 = vpop.permute.xlu2 %3682 }
 0x471   : > { %7091 = vset.pattern.permute.xlu1 %v7592_v28  ;;  %3854 = vperm.xlu2 %7089, %v8997_v41   ;;  %v10009_v28 = vmov 32   ;;  %v3691_v4 = vmul.f32 %v9150_v32, %v3671_v37  ;;  %v10098_v37 = vmov 24  }
 0x472   : > { %3850 = vperm.xlu1 %7091, %v8978_v17  }
 0x473   : > { %7128 = vset.pattern.permute.xlu0 %v10011_v30 }
 0x474   : > { %4234 = vperm.xlu0 %7128, %v8940_v51  }
 0x475   : > { %v9157_v47 = vpop.permute.xlu1 %3654 }
 0x479   : > { %7093 = vset.pattern.permute.xlu2 %v7593_v40  ;;  %v9162_v16 = vpop.permute.xlu2 %3766 }
 0x47a   : > { %7092 = vset.pattern.permute.xlu1 %v7593_v40  ;;  %3874 = vperm.xlu2 %7093, %v8959_v24  }
 0x47b   : > { %3870 = vperm.xlu1 %7092, %v8940_v51  }
 0x47c   : > { %7132 = vset.pattern.permute.xlu0 %v10007_v19  ;;  %v10015_v19 = vmov 34  }
 0x47d   : > { %4266 = vperm.xlu0 %7132, %v8959_v24  }
 0x47f   : > { %v9169_v42 = vpop.permute.xlu1 %3710 }
 0x482   : > { %7095 = vset.pattern.permute.xlu2 %v7594_v3 }
 0x483   : > { %3882 = vperm.xlu1 %7092, %v8997_v41   ;;  %3898 = vperm.xlu2 %7095, %v8940_v51   ;;  %v9176_v27 = vpop.permute.xlu2 %3518 }
 0x485   : > { %7136 = vset.pattern.permute.xlu0 %v10005_v22  ;;  %v9194_v22 = vpop.permute.xlu0 %3630 }
 0x486   : > { %4298 = vperm.xlu0 %7136, %v8978_v17  }
 0x489   : > { %v9180_v58 = vpop.permute.xlu1 %3434 }
 0x48b   : > { %7096 = vset.pattern.permute.xlu1 %v7594_v3  ;;  %3906 = vperm.xlu2 %7095, %v8978_v17  }
 0x48c   : > { %3902 = vperm.xlu1 %7096, %v8959_v24   ;;  %v9187_v10 = vpop.permute.xlu2 %3574 }
 0x48e   : > { %7139 = vset.pattern.permute.xlu0 %v10009_v28 }
 0x48f   : > { %4330 = vperm.xlu0 %7139, %v8997_v41  }
 0x492   : > { %v9191_v40 = vpop.permute.xlu1 %3462 }
 0x493   : > { %7099 = vset.pattern.permute.xlu2 %v7608_v62 }
 0x494   : > { %7098 = vset.pattern.permute.xlu1 %v7608_v62  ;;  %3930 = vperm.xlu2 %7099, %v8959_v24   ;;  %v9205_v62 = vpop.permute.xlu0 %3770 }
 0x495   : > { %3926 = vperm.xlu1 %7098, %v8940_v51  }
 0x496   : > { %v9197_v3 = vpop.permute.xlu2 %3658 }
 0x497   : > { %7142 = vset.pattern.permute.xlu0 %v10015_v19 }
 0x498   : > { %4374 = vperm.xlu0 %7142, %v8940_v51  }
 0x49c   : > { %3938 = vperm.xlu2 %7099, %v8997_v41   ;;  %v9202_v28 = vpop.permute.xlu1 %3546  ;;  %v9217_v23 = vpop.permute.xlu0 %3814 }
 0x49d   : > { %3934 = vperm.xlu1 %7098, %v8978_v17  }
 0x49f   : > { %v9207_v30 = vpop.permute.xlu2 %3714 }
 0x4a0   : > { %7146 = vset.pattern.permute.xlu0 %v10023_v44 }
 0x4a1   : > { %4406 = vperm.xlu0 %7146, %v8959_v24  }
 0x4a4   : > { %7102 = vset.pattern.permute.xlu2 %v7595_v59  ;;  %v9231_v50 = vpop.permute.xlu0 %3846 }
 0x4a5   : > { %7101 = vset.pattern.permute.xlu1 %v7595_v59  ;;  %3962 = vperm.xlu2 %7102, %v8978_v17   ;;  %v9214_v19 = vpop.permute.xlu1 %3602 }
 0x4a6   : > { %3958 = vperm.xlu1 %7101, %v8959_v24  }
 0x4a9   : > { %7150 = vset.pattern.permute.xlu0 %v10029_v2  ;;  %v9220_v61 = vpop.permute.xlu2 %3790 }
 0x4aa   : > { %10090 = vst [vmem:[#allocation47_spill] sm:$0xff] %v9220_v61  ;;  %4438 = vperm.xlu0 %7150, %v8978_v17   ;;  %v10091_v61 = vmov 21  }
 0x4ad   : > { %7103 = vset.pattern.permute.xlu2 %v7596_v56 }
 0x4ae   : > { %3966 = vperm.xlu1 %7101, %v8997_v41   ;;  %3982 = vperm.xlu2 %7103, %v8940_v51  }
 0x4af   : > { %v9226_v59 = vpop.permute.xlu1 %3686 }
 0x4b1   : > { %v9228_v44 = vpop.permute.xlu2 %3798 }
 0x4b2   : > { %7153 = vset.pattern.permute.xlu0 %v10033_v48  ;;  %v9243_v48 = vpop.permute.xlu0 %3878 }
 0x4b3   : > { %4470 = vperm.xlu0 %7153, %v8997_v41  }
 0x4b6   : > { %7105 = vset.pattern.permute.xlu1 %v7596_v56  ;;  %3994 = vperm.xlu2 %7103, %v8997_v41  }
 0x4b7   : > { %3990 = vperm.xlu1 %7105, %v8978_v17  }
 0x4b8   : > { %v9237_v2 = vpop.permute.xlu1 %3742 }
 0x4ba   : > { %v9239_v18 = vpop.permute.xlu2 %3822 }
 0x4bb   : > { %7156 = vset.pattern.permute.xlu0 %v10035_v55  ;;  %v9255_v55 = vpop.permute.xlu0 %3910 }
 0x4bc   : > { %4514 = vperm.xlu0 %7156, %v8940_v51  }
 0x4be   : > { %7107 = vset.pattern.permute.xlu2 %v10091_v61 }
 0x4bf   : > { %7106 = vset.pattern.permute.xlu1 %v10091_v61  ;;  %4014 = vperm.xlu2 %7107, %v8959_v24  }
 0x4c0   : > { %4010 = vperm.xlu1 %7106, %v8940_v51  }
 0x4c2   : > { %v9249_v56 = vpop.permute.xlu1 %3786 }
 0x4c3   : > { %10092 = vst [vmem:[#allocation48_spill] sm:$0xff] %v9249_v56  ;;  %v9251_v12 = vpop.permute.xlu2 %3842 }
 0x4c4   : > { %7160 = vset.pattern.permute.xlu0 %v10037_v53  ;;  %v9266_v53 = vpop.permute.xlu0 %3954 }
 0x4c5   : > { %4546 = vperm.xlu0 %7160, %v8959_v24  }
 0x4c7   : > { %7109 = vset.pattern.permute.xlu2 %v10093_v31 }
 0x4c8   : > { %4022 = vperm.xlu1 %7106, %v8997_v41   ;;  %4038 = vperm.xlu2 %7109, %v8940_v51  }
 0x4ca   : > { %v3795_v61 = vpop.permute.xlu1 %3794 }
 0x4cb   : > { %v9260_v39 = vpop.permute.xlu2 %3854 }
 0x4cc   : > { %v9277_v29 = vpop.permute.xlu0 %3986 }
 0x4cd   : > { %7164 = vset.pattern.permute.xlu0 %v10039_v46  ;;  %v7617_v46 = vmov 23   ;;  %10096 = vst [vmem:[#allocation51_spill] sm:$0xff] %v9277_v29  ;;  %v3803_v29 = vmul.f32 %v3795_v61, %v3783_v8  ;;  %v3588_v8 = vld [vmem:[#allocation2 + $0xd8] sm:$0xff] }
 0x4ce   : > { %4578 = vperm.xlu0 %7164, %v8978_v17   ;;  %v3700_v61 = vld [vmem:[#allocation2 + $0x158] sm:$0xff] }
 0x4d0   : > { %7110 = vset.pattern.permute.xlu1 %v10093_v31  ;;  %4046 = vperm.xlu2 %7109, %v8978_v17   ;;  %v3447_v31 = vld [vmem:[#allocation2 + $0x30] sm:$0xff] }
 0x4d1   : > { %4042 = vperm.xlu1 %7110, %v8959_v24  }
 0x4d3   : > { %v9269_v38 = vpop.permute.xlu1 %3818 }
 0x4d4   : > { %10094 = vst [vmem:[#allocation49_spill] sm:$0xff] %v9269_v38  ;;  %v9271_v0 = vpop.permute.xlu2 %3874  ;;  %v3579_v38 = vmul.f32 %v9146_v60, %v3559_v57  ;;  %v3895_v57 = vld [vmem:[#allocation2 + $0x230] sm:$0xff] }
 0x4d5   : > { %10095 = vst [vmem:[#allocation50_spill] sm:$0xff] %v9271_v0  ;;  %v10043_v0 = vmov 44  }
 0x4d6   : > { %7167 = vset.pattern.permute.xlu0 %v10041_v49  ;;  %v3467_v49 = vmul.f32 %v9148_v1, %v3447_v31  ;;  %v4019_v1 = vpop.permute.xlu0 %4018 }
 0x4d7   : > { %4610 = vperm.xlu0 %7167, %v8997_v41  }
 0x4d8   : > { %7113 = vset.pattern.permute.xlu2 %v7617_v46 }
 0x4d9   : > { %7112 = vset.pattern.permute.xlu1 %v7617_v46  ;;  %4070 = vperm.xlu2 %7113, %v8959_v24   ;;  %v3583_v46 = vadd.f32 %v3579_v38, %v3467_v49  ;;  %v10047_v38 = vmov 45  }
 0x4da   : > { %4066 = vperm.xlu1 %7112, %v8940_v51  }
 0x4db   : > { %v3827_v56 = vpop.permute.xlu1 %3826  ;;  %v3695_v60 = vadd.f32 %v3691_v4, %v3583_v46  ;;  %v3812_v46 = vld [vmem:[#allocation2 + $0x1d8] sm:$0xff] }
 0x4dd   : > { %v9280_v6 = vpop.permute.xlu2 %3898  ;;  %v3807_v35 = vadd.f32 %v3803_v29, %v3695_v60  ;;  %v3476_v29 = vld [vmem:[#allocation2 + $0x58] sm:$0xff]  ;;  %v10045_v60 = vmov 47  }
 0x4de   : > { %10097 = vst [vmem:[#allocation52_spill] sm:$0xff] %v9280_v6  ;;  %v4007_v6 = vld [vmem:[#allocation2 + $0x2b0] sm:$0xff]  ;;  %v3496_v32 = vmul.f32 %v9182_v63, %v3476_v29 }
 0x4df   : > { %7170 = vset.pattern.permute.xlu0 %v10043_v0  ;;  %v4027_v0 = vmul.f32 %v4019_v1, %v4007_v6  ;;  %v3608_v6 = vmul.f32 %v9214_v19, %v3588_v8  ;;  %v3720_v1 = vmul.f32 %v9207_v30, %v3700_v61  ;;  %v3924_v19 = vld [vmem:[#allocation2 + $0x258] sm:$0xff]  ;;  %v4051_v8 = vpop.permute.xlu0 %4050 }
 0x4e0   : > { %4654 = vperm.xlu0 %7170, %v8940_v51  }
 0x4e1   : > { %4078 = vperm.xlu2 %7113, %v8997_v41  }
 0x4e2   : > { %4074 = vperm.xlu1 %7112, %v8978_v17  }
 0x4e4   : > { %v9288_v9 = vpop.permute.xlu1 %3850 }
 0x4e5   : > { %v3907_v31 = vpop.permute.xlu2 %3906 }
 0x4e6   : > { %v3915_v36 = vmul.f32 %v3907_v31, %v3895_v57  ;;  %v3612_v57 = vadd.f32 %v3608_v6, %v3496_v32  ;;  %v3832_v31 = vmul.f32 %v3827_v56, %v3812_v46  ;;  %v10055_v46 = vmov 46  }
 0x4e8   : > { %v3919_v49 = vadd.f32 %v3915_v36, %v3807_v35  ;;  %7174 = vset.pattern.permute.xlu0 %v10047_v38 }
 0x4e9   : > { %4690 = vperm.xlu0 %7174, %v8978_v17   ;;  %7116 = vset.pattern.permute.xlu2 %v10098_v37 }
 0x4ea   : > { %7115 = vset.pattern.permute.xlu1 %v10098_v37  ;;  %4102 = vperm.xlu2 %7116, %v8978_v17   ;;  %v9295_v4 = vadd.f32 %v4027_v0, %v3919_v49  ;;  %v10102_v0 = vmov 25   ;;  %v3724_v49 = vadd.f32 %v3720_v1, %v3612_v57  ;;  %v4036_v37 = vld [vmem:[#allocation2 + $0x2d8] sm:$0xff]  ;;  %v10105_v57 = vmov 26  }
 0x4eb   : > { %4098 = vperm.xlu1 %7115, %v8959_v24   ;;  %v10107_v1 = vmov 27  }
 0x4ec   : > { %10099 = vst [vmem:[#allocation53_spill] sm:$0xff] %v9295_v4  ;;  %v3836_v6 = vadd.f32 %v3832_v31, %v3724_v49  ;;  %v10051_v4 = vmov 50   ;;  %v10053_v49 = vmov 49  }
 0x4ed   : > { %v9299_v36 = vpop.permute.xlu1 %3870 }
 0x4ee   : > { %10100 = vst [vmem:[#allocation54_spill] sm:$0xff] %v9299_v36  ;;  %v9301_v35 = vpop.permute.xlu2 %3930  ;;  %v10059_v36 = vmov 53  }
 0x4ef   : > { %10101 = vst [vmem:[#allocation55_spill] sm:$0xff] %v9301_v35 }
 0x4f1   : > { %7179 = vset.pattern.permute.xlu0 %v10045_v60  ;;  %v4056_v60 = vmul.f32 %v4051_v8, %v4036_v37  ;;  %v9341_v37 = vpop.permute.xlu0 %4094 }
 0x4f2   : > { %4750 = vperm.xlu0 %7179, %v8997_v41   ;;  %7117 = vset.pattern.permute.xlu2 %v10102_v0  ;;  %10108 = vst [vmem:[#allocation59_spill] sm:$0xff] %v9341_v37 }
 0x4f3   : > { %4106 = vperm.xlu1 %7115, %v8997_v41   ;;  %4122 = vperm.xlu2 %7117, %v8940_v51  }
 0x4f5   : > { %v9310_v63 = vpop.permute.xlu1 %3882 }
 0x4f6   : > { %v3939_v29 = vpop.permute.xlu2 %3938 }
 0x4f7   : > { %v3944_v32 = vmul.f32 %v3939_v29, %v3924_v19 }
 0x4f9   : > { %v3948_v38 = vadd.f32 %v3944_v32, %v3836_v6  ;;  %v3587_v6 = vld [vmem:[#allocation2 + $0xd0] sm:$0xff] }
 0x4fa   : > { %7184 = vset.pattern.permute.xlu0 %v10051_v4  ;;  %v3475_v32 = vld [vmem:[#allocation2 + $0x50] sm:$0xff] }
 0x4fb   : > { %4830 = vperm.xlu0 %7184, %v8978_v17   ;;  %7119 = vset.pattern.permute.xlu1 %v10102_v0  ;;  %v9315_v30 = vadd.f32 %v4056_v60, %v3948_v38  ;;  %v10049_v0 = vmov 52   ;;  %v3699_v4 = vld [vmem:[#allocation2 + $0x150] sm:$0xff] }
 0x4fc   : > { %4134 = vperm.xlu2 %7117, %v8997_v41   ;;  %4130 = vperm.xlu1 %7119, %v8978_v17  }
 0x4fd   : > { %10103 = vst [vmem:[#allocation56_spill] sm:$0xff] %v9315_v30  ;;  %v3495_v30 = vmul.f32 %v9117_v43, %v3475_v32  ;;  %v10112_v32 = vmov 29  }
 0x4fe   : > { %v9319_v56 = vpop.permute.xlu1 %3902 }
 0x4ff   : > { %10104 = vst [vmem:[#allocation57_spill] sm:$0xff] %v9319_v56  ;;  %v9321_v61 = vpop.permute.xlu2 %3962 }
 0x503   : > { %7189 = vset.pattern.permute.xlu0 %v10055_v46  ;;  %v3607_v46 = vmul.f32 %v9159_v54, %v3587_v6  ;;  %v4035_v54 = vld [vmem:[#allocation2 + $0x2d0] sm:$0xff] }
 0x504   : > { %7121 = vset.pattern.permute.xlu2 %v10105_v57  ;;  %4710 = vperm.xlu0 %7189, %v8940_v51  }
 0x505   : > { %7120 = vset.pattern.permute.xlu1 %v10105_v57  ;;  %4154 = vperm.xlu2 %7121, %v8959_v24   ;;  %v7625_v57 = vmov 28   ;;  %v3611_v37 = vadd.f32 %v3607_v46, %v3495_v30 }
 0x506   : > { %4150 = vperm.xlu1 %7120, %v8940_v51  }
 0x507   : > { %v9329_v38 = vpop.permute.xlu1 %3926 }
 0x508   : > { %v9331_v60 = vpop.permute.xlu2 %3982 }
 0x509   : > { %10106 = vst [vmem:[#allocation58_spill] sm:$0xff] %v9331_v60 }
 0x50c   : > { %7194 = vset.pattern.permute.xlu0 %v10049_v0  ;;  %v10057_v0 = vmov 58  }
 0x50d   : > { %7123 = vset.pattern.permute.xlu2 %v10107_v1  ;;  %4890 = vperm.xlu0 %7194, %v8997_v41  }
 0x50e   : > { %4162 = vperm.xlu1 %7120, %v8997_v41   ;;  %4178 = vperm.xlu2 %7123, %v8940_v51  }
 0x50f   : > { %v3935_v31 = vpop.permute.xlu1 %3934 }
 0x510   : > { %v9338_v19 = vpop.permute.xlu2 %3994 }
 0x515   : > { %7203 = vset.pattern.permute.xlu0 %v10053_v49 }
 0x516   : > { %7124 = vset.pattern.permute.xlu1 %v10107_v1  ;;  %4186 = vperm.xlu2 %7123, %v8978_v17   ;;  %v9352_v1 = vpop.permute.xlu0 %4126 }
 0x517   : > { %4798 = vperm.xlu0 %7203, %v8959_v24   ;;  %4182 = vperm.xlu1 %7124, %v8959_v24   ;;  %10110 = vst [vmem:[#allocation61_spill] sm:$0xff] %v9352_v1 }
 0x518   : > { %v9347_v8 = vpop.permute.xlu1 %3958 }
 0x519   : > { %v9349_v29 = vpop.permute.xlu2 %4014 }
 0x51a   : > { %10109 = vst [vmem:[#allocation60_spill] sm:$0xff] %v9349_v29  ;;  %v3811_v29 = vld [vmem:[#allocation2 + $0x1d0] sm:$0xff] }
 0x51b   : > { %v3831_v1 = vmul.f32 %v9239_v18, %v3811_v29 }
 0x51e   : > { %7127 = vset.pattern.permute.xlu2 %v7625_v57 }
 0x51f   : > { %7212 = vset.pattern.permute.xlu0 %v10057_v0  ;;  %7126 = vset.pattern.permute.xlu1 %v7625_v57  ;;  %v3719_v0 = vmul.f32 %v9169_v42, %v3699_v4  ;;  %v3923_v57 = vld [vmem:[#allocation2 + $0x250] sm:$0xff]  ;;  %v4159_v4 = vpop.permute.xlu0 %4158 }
 0x520   : > { %4210 = vperm.xlu2 %7127, %v8959_v24   ;;  %5058 = vperm.xlu0 %7212, %v8997_v41   ;;  %v3967_v49 = vpop.permute.xlu1 %3966  ;;  %v3943_v35 = vmul.f32 %v3935_v31, %v3923_v57  ;;  %v4147_v42 = vld [vmem:[#allocation2 + $0x350] sm:$0xff]  ;;  %v3616_v57 = vld [vmem:[#allocation2 + $0xf8] sm:$0xff] }
 0x521   : > { %4206 = vperm.xlu1 %7126, %v8940_v51   ;;  %v3723_v60 = vadd.f32 %v3719_v0, %v3611_v37  ;;  %v4167_v0 = vmul.f32 %v4159_v4, %v4147_v42  ;;  %v3504_v37 = vld [vmem:[#allocation2 + $0x78] sm:$0xff]  ;;  %v3636_v42 = vmul.f32 %v9194_v22, %v3616_v57 }
 0x522   : > { %v9359_v56 = vpop.permute.xlu2 %4038 }
 0x523   : > { %v3835_v43 = vadd.f32 %v3831_v1, %v3723_v60  ;;  %v3728_v60 = vld [vmem:[#allocation2 + $0x178] sm:$0xff]  ;;  %v3524_v1 = vmul.f32 %v9176_v27, %v3504_v37 }
 0x524   : > { %v3748_v4 = vmul.f32 %v9237_v2, %v3728_v60  ;;  %v4064_v37 = vld [vmem:[#allocation2 + $0x2f8] sm:$0xff] }
 0x525   : > { %v3947_v46 = vadd.f32 %v3943_v35, %v3835_v43 }
 0x527   : > { %v4191_v22 = vpop.permute.xlu0 %4190 }
 0x528   : > { %4218 = vperm.xlu2 %7127, %v8997_v41   ;;  %7217 = vset.pattern.permute.xlu0 %v10059_v36  ;;  %v10061_v36 = vmov 55  }
 0x529   : > { %4214 = vperm.xlu1 %7126, %v8978_v17   ;;  %4906 = vperm.xlu0 %7217, %v8940_v51   ;;  %v9367_v6 = vpop.permute.xlu1 %3990 }
 0x52a   : > { %v4047_v30 = vpop.permute.xlu2 %4046 }
 0x52b   : > { %v4055_v18 = vmul.f32 %v4047_v30, %v4035_v54  ;;  %v3840_v54 = vld [vmem:[#allocation2 + $0x1f8] sm:$0xff] }
 0x52c   : > { %v3952_v30 = vld [vmem:[#allocation2 + $0x278] sm:$0xff]  ;;  %v3860_v27 = vmul.f32 %v9260_v39, %v3840_v54  ;;  %v10063_v54 = vmov 62  }
 0x52d   : > { %v4059_v31 = vadd.f32 %v4055_v18, %v3947_v46  ;;  %v3640_v46 = vadd.f32 %v3636_v42, %v3524_v1 }
 0x52f   : > { %v9369_v29 = vadd.f32 %v4167_v0, %v4059_v31  ;;  %v3752_v18 = vadd.f32 %v3748_v4, %v3640_v46  ;;  %v3972_v0 = vmul.f32 %v3967_v49, %v3952_v30  ;;  %v10114_v31 = vmov 30  }
 0x530   : > { %7130 = vset.pattern.permute.xlu2 %v10112_v32  ;;  %v10117_v30 = vmov 31  }
 0x531   : > { %10111 = vst [vmem:[#allocation62_spill] sm:$0xff] %v9369_v29  ;;  %7129 = vset.pattern.permute.xlu1 %v10112_v32  ;;  %4242 = vperm.xlu2 %7130, %v8978_v17   ;;  %v3864_v32 = vadd.f32 %v3860_v27, %v3752_v18  ;;  %v4176_v29 = vld [vmem:[#allocation2 + $0x378] sm:$0xff]  ;;  %v10119_v18 = vmov 32  }
 0x532   : > { %7218 = vset.pattern.permute.xlu0 %v10061_v36  ;;  %4238 = vperm.xlu1 %7129, %v8959_v24   ;;  %v9377_v35 = vpop.permute.xlu1 %4010  ;;  %v4196_v39 = vmul.f32 %v4191_v22, %v4176_v29  ;;  %v10067_v29 = vmov 56  }
 0x533   : > { %10113 = vst [vmem:[#allocation63_spill] sm:$0xff] %v9377_v35  ;;  %4970 = vperm.xlu0 %7218, %v8978_v17   ;;  %v9380_v43 = vpop.permute.xlu2 %4070  ;;  %v3976_v57 = vadd.f32 %v3972_v0, %v3864_v32  ;;  %v10065_v32 = vmov 59  }
 0x539   : > { %7131 = vset.pattern.permute.xlu2 %v10114_v31 }
 0x53a   : > { %4246 = vperm.xlu1 %7129, %v8997_v41   ;;  %4262 = vperm.xlu2 %7131, %v8940_v51   ;;  %v9388_v36 = vpop.permute.xlu1 %4022 }
 0x53b   : > { %4966 = vperm.xlu0 %7218, %v8959_v24   ;;  %v4079_v2 = vpop.permute.xlu2 %4078 }
 0x53c   : > { %v4084_v60 = vmul.f32 %v4079_v2, %v4064_v37  ;;  %v9418_v37 = vpop.permute.xlu0 %4234 }
 0x53d   : > { %10120 = vst [vmem:[#allocation67_spill] sm:$0xff] %v9418_v37 }
 0x53e   : > { %v4088_v1 = vadd.f32 %v4084_v60, %v3976_v57  ;;  %v3615_v57 = vld [vmem:[#allocation2 + $0xf0] sm:$0xff] }
 0x53f   : > { %v3503_v60 = vld [vmem:[#allocation2 + $0x70] sm:$0xff] }
 0x540   : > { %v9391_v49 = vadd.f32 %v4196_v39, %v4088_v1  ;;  %v3635_v39 = vmul.f32 %v9139_v11, %v3615_v57  ;;  %v7632_v1 = vmov 33   ;;  %v3951_v11 = vld [vmem:[#allocation2 + $0x270] sm:$0xff] }
 0x542   : > { %10115 = vst [vmem:[#allocation64_spill] sm:$0xff] %v9391_v49  ;;  %7133 = vset.pattern.permute.xlu1 %v10114_v31  ;;  %4274 = vperm.xlu2 %7131, %v8997_v41   ;;  %v3416_v49 = vld [vmem:[#allocation2 + $0x18] sm:$0xff] }
 0x543   : > { %7227 = vset.pattern.permute.xlu0 %v10063_v54  ;;  %4270 = vperm.xlu1 %7133, %v8978_v17   ;;  %v9397_v42 = vpop.permute.xlu1 %4042  ;;  %v3727_v54 = vld [vmem:[#allocation2 + $0x170] sm:$0xff] }
 0x544   : > { %10116 = vst [vmem:[#allocation65_spill] sm:$0xff] %v9397_v42  ;;  %5166 = vperm.xlu0 %7227, %v8978_v17   ;;  %v9400_v4 = vpop.permute.xlu2 %4102  ;;  %v10069_v42 = vmov 61  }
 0x54a   : > { %7135 = vset.pattern.permute.xlu2 %v10117_v30 }
 0x54b   : > { %7134 = vset.pattern.permute.xlu1 %v10117_v30  ;;  %4294 = vperm.xlu2 %7135, %v8959_v24   ;;  %v3523_v30 = vmul.f32 %v9135_v20, %v3503_v60  ;;  %v3747_v20 = vmul.f32 %v9171_v26, %v3727_v54 }
 0x54c   : > { %7228 = vset.pattern.permute.xlu0 %v10067_v29  ;;  %4290 = vperm.xlu1 %7134, %v8940_v51   ;;  %v9407_v46 = vpop.permute.xlu1 %4066  ;;  %v9432_v29 = vpop.permute.xlu0 %4266 }
 0x54d   : > { %4998 = vperm.xlu0 %7228, %v8978_v17   ;;  %v9410_v27 = vpop.permute.xlu2 %4122  ;;  %10123 = vst [vmem:[#allocation70_spill] sm:$0xff] %v9432_v29 }
 0x54e   : > { %10118 = vst [vmem:[#allocation66_spill] sm:$0xff] %v9410_v27  ;;  %v3971_v27 = vmul.f32 %v9321_v61, %v3951_v11  ;;  %v3440_v61 = vmul.f32 %v9180_v58, %v3416_v49  ;;  %v3644_v11 = vld [vmem:[#allocation2 + $0x118] sm:$0xff] }
 0x54f   : > { %v3980_v49 = vld [vmem:[#allocation2 + $0x298] sm:$0xff] }
 0x553   : > { %7137 = vset.pattern.permute.xlu2 %v10119_v18 }
 0x554   : > { %4302 = vperm.xlu1 %7134, %v8997_v41   ;;  %4318 = vperm.xlu2 %7137, %v8940_v51   ;;  %v4075_v0 = vpop.permute.xlu1 %4074  ;;  %v4299_v26 = vpop.permute.xlu0 %4298 }
 0x555   : > { %4994 = vperm.xlu0 %7228, %v8959_v24  }
 0x556   : > { %v9416_v31 = vpop.permute.xlu2 %4134 }
 0x55c   : > { %7138 = vset.pattern.permute.xlu1 %v10119_v18  ;;  %4326 = vperm.xlu2 %7137, %v8978_v17  }
 0x55d   : > { %7237 = vset.pattern.permute.xlu0 %v10065_v32  ;;  %4322 = vperm.xlu1 %7138, %v8959_v24   ;;  %v9424_v22 = vpop.permute.xlu1 %4098  ;;  %v3839_v32 = vld [vmem:[#allocation2 + $0x1f0] sm:$0xff] }
 0x55e   : > { %10121 = vst [vmem:[#allocation68_spill] sm:$0xff] %v9424_v22  ;;  %5074 = vperm.xlu0 %7237, %v8940_v51   ;;  %v3859_v60 = vmul.f32 %v9288_v9, %v3839_v32 }
 0x55f   : > { %v9427_v2 = vpop.permute.xlu2 %4154 }
 0x560   : > { %10122 = vst [vmem:[#allocation69_spill] sm:$0xff] %v9427_v2  ;;  %v3639_v2 = vadd.f32 %v3635_v39, %v3523_v30  ;;  %v4175_v30 = vld [vmem:[#allocation2 + $0x370] sm:$0xff] }
 0x562   : > { %v3751_v37 = vadd.f32 %v3747_v20, %v3639_v2 }
 0x564   : > { %7141 = vset.pattern.permute.xlu2 %v7632_v1  ;;  %v3863_v29 = vadd.f32 %v3859_v60, %v3751_v37  ;;  %v10125_v60 = vmov 34  }
 0x565   : > { %7140 = vset.pattern.permute.xlu1 %v7632_v1  ;;  %4350 = vperm.xlu2 %7141, %v8959_v24   ;;  %v4107_v18 = vpop.permute.xlu1 %4106  ;;  %v4063_v1 = vld [vmem:[#allocation2 + $0x2f0] sm:$0xff] }
 0x566   : > { %7242 = vset.pattern.permute.xlu0 %v10069_v42  ;;  %4346 = vperm.xlu1 %7140, %v8940_v51   ;;  %v4083_v35 = vmul.f32 %v4075_v0, %v4063_v1  ;;  %v3532_v42 = vld [vmem:[#allocation2 + $0x98] sm:$0xff]  ;;  %v3975_v22 = vadd.f32 %v3971_v27, %v3863_v29  ;;  %v3664_v29 = vmul.f32 %v9197_v3, %v3644_v11  ;;  %v4331_v11 = vpop.permute.xlu0 %4330 }
 0x567   : > { %5134 = vperm.xlu0 %7242, %v8959_v24   ;;  %v3552_v9 = vmul.f32 %v9202_v28, %v3532_v42  ;;  %v3756_v28 = vld [vmem:[#allocation2 + $0x198] sm:$0xff] }
 0x568   : > { %v9437_v57 = vpop.permute.xlu2 %4178  ;;  %v4087_v32 = vadd.f32 %v4083_v35, %v3975_v22  ;;  %v3868_v35 = vld [vmem:[#allocation2 + $0x218] sm:$0xff]  ;;  %v3776_v22 = vmul.f32 %v9205_v62, %v3756_v28 }
 0x569   : > { %10124 = vst [vmem:[#allocation71_spill] sm:$0xff] %v9437_v57  ;;  %v4287_v57 = vld [vmem:[#allocation2 + $0x3f0] sm:$0xff]  ;;  %v3556_v20 = vadd.f32 %v3552_v9, %v3440_v61  ;;  %v10126_v9 = vmov 35   ;;  %v4204_v61 = vld [vmem:[#allocation2 + $0x398] sm:$0xff] }
 0x56a   : > { %v4307_v0 = vmul.f32 %v4299_v26, %v4287_v57  ;;  %v3888_v57 = vmul.f32 %v9310_v63, %v3868_v35  ;;  %v4316_v62 = vld [vmem:[#allocation2 + $0x418] sm:$0xff] }
 0x56b   : > { %v3668_v58 = vadd.f32 %v3664_v29, %v3556_v20  ;;  %v3473_v29 = vld [vmem:[#allocation2 + $0x40] sm:$0xff]  ;;  %v4336_v28 = vmul.f32 %v4331_v11, %v4316_v62  ;;  %v10127_v62 = vmov 36  }
 0x56d   : > { %4358 = vperm.xlu2 %7141, %v8997_v41   ;;  %v3780_v26 = vadd.f32 %v3776_v22, %v3668_v58  ;;  %v3493_v58 = vmul.f32 %v9013_v52, %v3473_v29  ;;  %v3809_v22 = vld [vmem:[#allocation2 + $0x1c0] sm:$0xff] }
 0x56e   : > { %4354 = vperm.xlu1 %7140, %v8978_v17   ;;  %v9444_v39 = vpop.permute.xlu1 %4130 }
 0x56f   : > { %v3892_v3 = vadd.f32 %v3888_v57, %v3780_v26 }
 0x570   : > { %v4187_v54 = vpop.permute.xlu2 %4186 }
 0x571   : > { %v4195_v2 = vmul.f32 %v4187_v54, %v4175_v30  ;;  %v4092_v30 = vld [vmem:[#allocation2 + $0x318] sm:$0xff]  ;;  %v4000_v54 = vmul.f32 %v9338_v19, %v3980_v49 }
 0x573   : > { %v4199_v37 = vadd.f32 %v4195_v2, %v4087_v32  ;;  %v4112_v32 = vmul.f32 %v4107_v18, %v4092_v30  ;;  %v3697_v18 = vld [vmem:[#allocation2 + $0x140] sm:$0xff] }
 0x574   : > { %v3717_v30 = vmul.f32 %v9041_v25, %v3697_v18  ;;  %v3726_v18 = vld [vmem:[#allocation2 + $0x168] sm:$0xff] }
 0x575   : > { %7144 = vset.pattern.permute.xlu2 %v10125_v60  ;;  %v9449_v1 = vadd.f32 %v4307_v0, %v4199_v37  ;;  %v4004_v0 = vadd.f32 %v4000_v54, %v3892_v3  ;;  %v3585_v37 = vld [vmem:[#allocation2 + $0xc0] sm:$0xff] }
 0x576   : > { %7143 = vset.pattern.permute.xlu1 %v10125_v60  ;;  %4382 = vperm.xlu2 %7144, %v8978_v17   ;;  %v3605_v19 = vmul.f32 %v9037_v15, %v3585_v37  ;;  %v3921_v54 = vld [vmem:[#allocation2 + $0x240] sm:$0xff]  ;;  %v3829_v15 = vmul.f32 %v9217_v23, %v3809_v22 }
 0x577   : > { %4378 = vperm.xlu1 %7143, %v8959_v24   ;;  %v4116_v20 = vadd.f32 %v4112_v32, %v4004_v0  ;;  %v4033_v32 = vld [vmem:[#allocation2 + $0x2c0] sm:$0xff] }
 0x578   : > { %v4151_v42 = vpop.permute.xlu1 %4150  ;;  %v3609_v57 = vadd.f32 %v3605_v19, %v3493_v58  ;;  %v4053_v37 = vmul.f32 %v9359_v56, %v4033_v32  ;;  %v4257_v23 = vld [vmem:[#allocation2 + $0x3c0] sm:$0xff]  ;;  %v3614_v19 = vld [vmem:[#allocation2 + $0xe8] sm:$0xff]  ;;  %v3746_v32 = vmul.f32 %v9107_v13, %v3726_v18 }
 0x57a   : > { %v9455_v27 = vpop.permute.xlu2 %4210  ;;  %v3721_v52 = vadd.f32 %v3717_v30, %v3609_v57  ;;  %v3634_v57 = vmul.f32 %v9090_v34, %v3614_v19  ;;  %v10128_v30 = vmov 37   ;;  %v4062_v34 = vld [vmem:[#allocation2 + $0x2e8] sm:$0xff] }
 0x57c   : > { %v3833_v0 = vadd.f32 %v3829_v15, %v3721_v52  ;;  %v3950_v52 = vld [vmem:[#allocation2 + $0x268] sm:$0xff] }
 0x57e   : > { %7145 = vset.pattern.permute.xlu2 %v10126_v9 }
 0x57f   : > { %4386 = vperm.xlu1 %7143, %v8997_v41   ;;  %4402 = vperm.xlu2 %7145, %v8940_v51  }
 0x580   : > { %v9463_v2 = vpop.permute.xlu1 %4162 }
 0x582   : > { %v4219_v63 = vpop.permute.xlu2 %4218 }
 0x583   : > { %v4224_v60 = vmul.f32 %v4219_v63, %v4204_v61  ;;  %v4145_v61 = vld [vmem:[#allocation2 + $0x340] sm:$0xff] }
 0x584   : > { %v4165_v11 = vmul.f32 %v4151_v42, %v4145_v61  ;;  %v3838_v42 = vld [vmem:[#allocation2 + $0x1e8] sm:$0xff] }
 0x585   : > { %v4228_v35 = vadd.f32 %v4224_v60, %v4116_v20  ;;  %v4369_v60 = vld [vmem:[#allocation2 + $0x440] sm:$0xff] }
 0x587   : > { %7147 = vset.pattern.permute.xlu1 %v10126_v9  ;;  %4414 = vperm.xlu2 %7145, %v8997_v41   ;;  %v9469_v49 = vadd.f32 %v4336_v28, %v4228_v35  ;;  %v3941_v9 = vmul.f32 %v9329_v38, %v3921_v54  ;;  %v4375_v38 = vpop.permute.xlu0 %4374  ;;  %v3502_v35 = vld [vmem:[#allocation2 + $0x68] sm:$0xff] }
 0x588   : > { %4410 = vperm.xlu1 %7147, %v8978_v17   ;;  %v4389_v58 = vmul.f32 %v4375_v38, %v4369_v60  ;;  %v3522_v15 = vmul.f32 %v9071_v45, %v3502_v35  ;;  %v3531_v45 = vld [vmem:[#allocation2 + $0x90] sm:$0xff] }
 0x589   : > { %v4183_v26 = vpop.permute.xlu1 %4182  ;;  %v3945_v25 = vadd.f32 %v3941_v9, %v3833_v0  ;;  %v3858_v0 = vmul.f32 %v9231_v50, %v3838_v42  ;;  %v4286_v50 = vld [vmem:[#allocation2 + $0x3e8] sm:$0xff]  ;;  %v3415_v38 = vld [vmem:[#allocation2 + $0x10] sm:$0xff] }
 0x58a   : > { %v3638_v61 = vadd.f32 %v3634_v57, %v3522_v15 }
 0x58b   : > { %v9474_v3 = vpop.permute.xlu2 %4242  ;;  %v4057_v63 = vadd.f32 %v4053_v37, %v3945_v25  ;;  %v3970_v25 = vmul.f32 %v9347_v8, %v3950_v52  ;;  %v3551_v8 = vmul.f32 %v9127_v21, %v3531_v45  ;;  %v3867_v52 = vld [vmem:[#allocation2 + $0x210] sm:$0xff] }
 0x58d   : > { %v4169_v28 = vadd.f32 %v4165_v11, %v4057_v63  ;;  %v4174_v11 = vld [vmem:[#allocation2 + $0x368] sm:$0xff]  ;;  %v4082_v63 = vmul.f32 %v9380_v43, %v4062_v34 }
 0x58e   : > { %v4194_v60 = vmul.f32 %v4183_v26, %v4174_v11  ;;  %v3755_v26 = vld [vmem:[#allocation2 + $0x190] sm:$0xff] }
 0x58f   : > { %7149 = vset.pattern.permute.xlu2 %v10127_v62  ;;  %v4407_v35 = vpop.permute.xlu0 %4406 }
 0x590   : > { %7148 = vset.pattern.permute.xlu1 %v10127_v62  ;;  %4434 = vperm.xlu2 %7149, %v8959_v24   ;;  %v3750_v62 = vadd.f32 %v3746_v32, %v3638_v61  ;;  %v7634_v32 = vmov 38  }
 0x591   : > { %4430 = vperm.xlu1 %7148, %v8940_v51  }
 0x593   : > { %v9482_v20 = vpop.permute.xlu1 %4206 }
 0x594   : > { %v4263_v29 = vpop.permute.xlu2 %4262 }
 0x595   : > { %v4277_v56 = vmul.f32 %v4263_v29, %v4257_v23  ;;  %v3862_v23 = vadd.f32 %v3858_v0, %v3750_v62  ;;  %v3643_v29 = vld [vmem:[#allocation2 + $0x110] sm:$0xff]  ;;  %v3775_v0 = vmul.f32 %v9162_v16, %v3755_v26  ;;  %v3560_v16 = vld [vmem:[#allocation2 + $0xb8] sm:$0xff] }
 0x596   : > { %v3663_v57 = vmul.f32 %v9157_v47, %v3643_v29  ;;  %v3887_v47 = vmul.f32 %v9243_v48, %v3867_v52  ;;  %v4091_v62 = vld [vmem:[#allocation2 + $0x310] sm:$0xff] }
 0x597   : > { %v4281_v22 = vadd.f32 %v4277_v56, %v4169_v28  ;;  %v3974_v13 = vadd.f32 %v3970_v25, %v3862_v23  ;;  %v4398_v56 = vld [vmem:[#allocation2 + $0x468] sm:$0xff] }
 0x598   : > { %7151 = vset.pattern.permute.xlu2 %v10128_v30 }
 0x599   : > { %4442 = vperm.xlu1 %7148, %v8997_v41   ;;  %4458 = vperm.xlu2 %7151, %v8940_v51   ;;  %v9488_v54 = vadd.f32 %v4389_v58, %v4281_v22  ;;  %v4086_v19 = vadd.f32 %v4082_v63, %v3974_v13  ;;  %v3439_v22 = vmul.f32 %v9123_v33, %v3415_v38  ;;  %v3979_v33 = vld [vmem:[#allocation2 + $0x290] sm:$0xff]  ;;  %v3448_v13 = vld [vmem:[#allocation2 + $0x38] sm:$0xff] }
 0x59a   : > { %v3999_v23 = vmul.f32 %v9367_v6, %v3979_v33  ;;  %v4203_v63 = vld [vmem:[#allocation2 + $0x390] sm:$0xff]  ;;  %v3468_v48 = vmul.f32 %v9191_v40, %v3448_v13  ;;  %v3580_v6 = vmul.f32 %v9187_v10, %v3560_v16  ;;  %v3613_v16 = vld [vmem:[#allocation2 + $0xe0] sm:$0xff] }
 0x59b   : > { %v4215_v9 = vpop.permute.xlu1 %4214  ;;  %v4198_v18 = vadd.f32 %v4194_v60, %v4086_v19  ;;  %v3555_v15 = vadd.f32 %v3551_v8, %v3439_v22  ;;  %v4111_v60 = vmul.f32 %v9400_v4, %v4091_v62  ;;  %v4315_v19 = vld [vmem:[#allocation2 + $0x410] sm:$0xff]  ;;  %v4439_v4 = vpop.permute.xlu0 %4438 }
 0x59c   : > { %v9493_v37 = vpop.permute.xlu2 %4274  ;;  %v4223_v29 = vmul.f32 %v4215_v9, %v4203_v63  ;;  %v3584_v26 = vadd.f32 %v3580_v6, %v3468_v48  ;;  %v4456_v48 = vld [vmem:[#allocation2 + $0x4b8] sm:$0xff] }
 0x59d   : > { %v3667_v61 = vadd.f32 %v3663_v57, %v3555_v15  ;;  %v10129_v15 = vmov 39  }
 0x59f   : > { %v3779_v11 = vadd.f32 %v3775_v0, %v3667_v61  ;;  %v4120_v0 = vld [vmem:[#allocation2 + $0x338] sm:$0xff] }
 0x5a0   : > { %v4140_v63 = vmul.f32 %v9416_v31, %v4120_v0  ;;  %v10131_v0 = vld [vmem:[#allocation71_spill] sm:$0xff] }
 0x5a1   : > { %7152 = vset.pattern.permute.xlu1 %v10128_v30  ;;  %4466 = vperm.xlu2 %7151, %v8978_v17   ;;  %v4418_v30 = vmul.f32 %v4407_v35, %v4398_v56  ;;  %v3891_v45 = vadd.f32 %v3887_v47, %v3779_v11  ;;  %v4232_v11 = vld [vmem:[#allocation2 + $0x3b8] sm:$0xff] }
 0x5a2   : > { %4462 = vperm.xlu1 %7152, %v8959_v24  }
 0x5a3   : > { %v4003_v38 = vadd.f32 %v3999_v23, %v3891_v45  ;;  %v4471_v62 = vpop.permute.xlu0 %4470  ;;  %v10130_v45 = vmov 40  }
 0x5a4   : > { %v9500_v28 = vpop.permute.xlu1 %4238 }
 0x5a5   : > { %v4295_v43 = vpop.permute.xlu2 %4294  ;;  %v4115_v8 = vadd.f32 %v4111_v60, %v4003_v38 }
 0x5a6   : > { %v4306_v58 = vmul.f32 %v4295_v43, %v4286_v50  ;;  %v3672_v50 = vld [vmem:[#allocation2 + $0x138] sm:$0xff]  ;;  %v4427_v43 = vld [vmem:[#allocation2 + $0x490] sm:$0xff] }
 0x5a7   : > { %v3692_v35 = vmul.f32 %v9226_v59, %v3672_v50  ;;  %v4227_v22 = vadd.f32 %v4223_v29, %v4115_v8  ;;  %v4447_v9 = vmul.f32 %v4439_v4, %v4427_v43  ;;  %v3896_v59 = vld [vmem:[#allocation2 + $0x238] sm:$0xff]  ;;  %v3633_v8 = vmul.f32 %v9031_v14, %v3613_v16 }
 0x5a8   : > { %v4310_v42 = vadd.f32 %v4306_v58, %v4198_v18  ;;  %v3784_v58 = vld [vmem:[#allocation2 + $0x1b8] sm:$0xff]  ;;  %v3916_v47 = vmul.f32 %v9255_v55, %v3896_v59  ;;  %v3501_v55 = vld [vmem:[#allocation2 + $0x60] sm:$0xff]  ;;  %v4476_v4 = vmul.f32 %v4471_v62, %v4456_v48 }
 0x5a9   : > { %7155 = vset.pattern.permute.xlu2 %v7634_v32  ;;  %v3804_v40 = vmul.f32 %v9228_v44, %v3784_v58  ;;  %v4344_v50 = vld [vmem:[#allocation2 + $0x438] sm:$0xff]  ;;  %v4285_v59 = vld [vmem:[#allocation2 + $0x3e0] sm:$0xff] }
 0x5aa   : > { %7154 = vset.pattern.permute.xlu1 %v7634_v32  ;;  %4490 = vperm.xlu2 %7155, %v8959_v24   ;;  %v9506_v21 = vadd.f32 %v4418_v30, %v4310_v42  ;;  %v3696_v42 = vadd.f32 %v3692_v35, %v3584_v26  ;;  %v4008_v32 = vld [vmem:[#allocation2 + $0x2b8] sm:$0xff]  ;;  %v3837_v35 = vld [vmem:[#allocation2 + $0x1e0] sm:$0xff] }
 0x5ab   : > { %4486 = vperm.xlu1 %7154, %v8940_v51   ;;  %v4028_v44 = vmul.f32 %v9388_v36, %v4008_v32  ;;  %v3725_v36 = vld [vmem:[#allocation2 + $0x160] sm:$0xff]  ;;  %v4515_v58 = vpop.permute.xlu0 %4514  ;;  %v3530_v32 = vld [vmem:[#allocation2 + $0x88] sm:$0xff] }
 0x5ac   : > { %v4247_v34 = vpop.permute.xlu1 %4246  ;;  %v3808_v52 = vadd.f32 %v3804_v40, %v3696_v42  ;;  %v3745_v43 = vmul.f32 %v9057_v5, %v3725_v36  ;;  %v4173_v40 = vld [vmem:[#allocation2 + $0x360] sm:$0xff]  ;;  %v10135_v36 = vld [vmem:[#allocation40_spill] sm:$0xff] }
 0x5ad   : > { %v4252_v60 = vmul.f32 %v4247_v34, %v4232_v11  ;;  %v3521_v34 = vmul.f32 %v9028_v7, %v3501_v55  ;;  %v3414_v11 = vld [vmem:[#allocation2 + $0x8] sm:$0xff] }
 0x5ae   : > { %v9511_v25 = vpop.permute.xlu2 %4318  ;;  %v3920_v23 = vadd.f32 %v3916_v47, %v3808_v52  ;;  %v4193_v47 = vmul.f32 %v10131_v0, %v4173_v40  ;;  %v10139_v0 = vld [vmem:[#allocation31_spill] sm:$0xff] }
 0x5b0   : > { %v4032_v13 = vadd.f32 %v4028_v44, %v3920_v23  ;;  %v10132_v44 = vmov 41   ;;  %v3642_v23 = vld [vmem:[#allocation2 + $0x108] sm:$0xff] }
 0x5b1   : > { %v3662_v48 = vmul.f32 %v10135_v36, %v3642_v23 }
 0x5b2   : > { %4498 = vperm.xlu2 %7155, %v8997_v41   ;;  %v4144_v38 = vadd.f32 %v4140_v63, %v4032_v13  ;;  %v4397_v13 = vld [vmem:[#allocation2 + $0x460] sm:$0xff] }
 0x5b3   : > { %4494 = vperm.xlu1 %7154, %v8978_v17   ;;  %v9556_v62 = vpop.permute.xlu0 %4546 }
 0x5b4   : > { %v4256_v31 = vadd.f32 %v4252_v60, %v4144_v38  ;;  %v3754_v60 = vld [vmem:[#allocation2 + $0x188] sm:$0xff]  ;;  %v10134_v38 = vld [vmem:[#allocation44_spill] sm:$0xff] }
 0x5b5   : > { %v9518_v56 = vpop.permute.xlu1 %4270  ;;  %v3438_v55 = vmul.f32 %v10134_v38, %v3414_v11  ;;  %v4090_v11 = vld [vmem:[#allocation2 + $0x308] sm:$0xff]  ;;  %v10142_v38 = vld [vmem:[#allocation64_spill] sm:$0xff] }
 0x5b6   : > { %v4327_v18 = vpop.permute.xlu2 %4326 }
 0x5b7   : > { %v4335_v57 = vmul.f32 %v4327_v18, %v4315_v19 }
 0x5b9   : > { %v4339_v30 = vadd.f32 %v4335_v57, %v4227_v22  ;;  %v3637_v22 = vadd.f32 %v3633_v8, %v3521_v34  ;;  %v3857_v57 = vmul.f32 %v9251_v12, %v3837_v35 }
 0x5ba   : > { %7158 = vset.pattern.permute.xlu2 %v10129_v15 }
 0x5bb   : > { %7157 = vset.pattern.permute.xlu1 %v10129_v15  ;;  %4522 = vperm.xlu2 %7158, %v8978_v17   ;;  %v9526_v10 = vadd.f32 %v4447_v9, %v4339_v30  ;;  %v3749_v14 = vadd.f32 %v3745_v43, %v3637_v22  ;;  %v3949_v9 = vld [vmem:[#allocation2 + $0x260] sm:$0xff] }
 0x5bc   : > { %4518 = vperm.xlu1 %7157, %v8959_v24   ;;  %v4061_v30 = vld [vmem:[#allocation2 + $0x2e0] sm:$0xff]  ;;  %v3969_v15 = vmul.f32 %v9266_v53, %v3949_v9 }
 0x5bd   : > { %v3861_v5 = vadd.f32 %v3857_v57, %v3749_v14  ;;  %v4081_v12 = vmul.f32 %v9407_v46, %v4061_v30  ;;  %v10133_v53 = vld [vmem:[#allocation37_spill] sm:$0xff]  ;;  %v10137_v9 = vld [vmem:[#allocation50_spill] sm:$0xff] }
 0x5be   : > { %v4291_v61 = vpop.permute.xlu1 %4290  ;;  %v3550_v46 = vmul.f32 %v10133_v53, %v3530_v32  ;;  %v3557_v57 = vld [vmem:[#allocation2 + $0xa0] sm:$0xff] }
 0x5bf   : > { %v9529_v33 = vpop.permute.xlu2 %4350  ;;  %v3973_v52 = vadd.f32 %v3969_v15, %v3861_v5  ;;  %v10138_v5 = vmov 42   ;;  %v10140_v53 = vld [vmem:[#allocation30_spill] sm:$0xff] }
 0x5c0   : > { %v3554_v34 = vadd.f32 %v3550_v46, %v3438_v55 }
 0x5c1   : > { %v4085_v63 = vadd.f32 %v4081_v12, %v3973_v52  ;;  %v3445_v12 = vld [vmem:[#allocation2 + $0x20] sm:$0xff]  ;;  %v9574_v52 = vpop.permute.xlu0 %4578 }
 0x5c2   : > { %v3666_v14 = vadd.f32 %v3662_v48, %v3554_v34  ;;  %v3465_v46 = vmul.f32 %v10140_v53, %v3445_v12  ;;  %v10143_v48 = vld [vmem:[#allocation51_spill] sm:$0xff]  ;;  %v10145_v34 = vld [vmem:[#allocation48_spill] sm:$0xff] }
 0x5c3   : > { %7159 = vset.pattern.permute.xlu2 %v10130_v45  ;;  %v4197_v16 = vadd.f32 %v4193_v47, %v4085_v63  ;;  %v3577_v47 = vmul.f32 %v10139_v0, %v3557_v57  ;;  %v3781_v63 = vld [vmem:[#allocation2 + $0x1a0] sm:$0xff] }
 0x5c4   : > { %4526 = vperm.xlu1 %7157, %v8997_v41   ;;  %4542 = vperm.xlu2 %7159, %v8940_v51  }
 0x5c6   : > { %v9537_v29 = vpop.permute.xlu1 %4302 }
 0x5c7   : > { %v4359_v19 = vpop.permute.xlu2 %4358 }
 0x5c8   : > { %v4364_v6 = vmul.f32 %v4359_v19, %v4344_v50  ;;  %v4509_v19 = vld [vmem:[#allocation2 + $0x4e0] sm:$0xff] }
 0x5ca   : > { %v4368_v18 = vadd.f32 %v4364_v6, %v4256_v31  ;;  %v3866_v31 = vld [vmem:[#allocation2 + $0x208] sm:$0xff] }
 0x5cb   : > { %v3886_v30 = vmul.f32 %v10137_v9, %v3866_v31  ;;  %v10144_v31 = vld [vmem:[#allocation68_spill] sm:$0xff] }
 0x5cc   : > { %7161 = vset.pattern.permute.xlu1 %v10130_v45  ;;  %4554 = vperm.xlu2 %7159, %v8997_v41   ;;  %v9545_v26 = vadd.f32 %v4476_v4, %v4368_v18  ;;  %v4305_v45 = vmul.f32 %v4291_v61, %v4285_v59  ;;  %v10136_v61 = vld [vmem:[#allocation43_spill] sm:$0xff]  ;;  %v4288_v4 = vld [vmem:[#allocation2 + $0x3f8] sm:$0xff]  ;;  %v4529_v18 = vmul.f32 %v4515_v58, %v4509_v19  ;;  %v3669_v59 = vld [vmem:[#allocation2 + $0x120] sm:$0xff] }
 0x5cd   : > { %4550 = vperm.xlu1 %7161, %v8978_v17   ;;  %v3774_v43 = vmul.f32 %v10136_v61, %v3754_v60  ;;  %v4308_v40 = vmul.f32 %v9537_v29, %v4288_v4  ;;  %v4400_v58 = vld [vmem:[#allocation2 + $0x478] sm:$0xff]  ;;  %v3801_v61 = vmul.f32 %v10145_v34, %v3781_v63  ;;  %v3529_v63 = vld [vmem:[#allocation2 + $0x80] sm:$0xff] }
 0x5ce   : > { %v4309_v6 = vadd.f32 %v4305_v45, %v4197_v16  ;;  %v4202_v16 = vld [vmem:[#allocation2 + $0x388] sm:$0xff]  ;;  %v10146_v9 = vld [vmem:[#allocation52_spill] sm:$0xff] }
 0x5cf   : > { %v9548_v7 = vpop.permute.xlu1 %4322  ;;  %v3778_v32 = vadd.f32 %v3774_v43, %v3666_v14  ;;  %v4312_v55 = vadd.f32 %v4308_v40, %v10142_v38  ;;  %v4314_v43 = vld [vmem:[#allocation2 + $0x408] sm:$0xff]  ;;  %v4222_v57 = vmul.f32 %v9455_v27, %v4202_v16  ;;  %v4117_v40 = vld [vmem:[#allocation2 + $0x320] sm:$0xff] }
 0x5d0   : > { %v9550_v42 = vpop.permute.xlu2 %4382  ;;  %v3641_v16 = vld [vmem:[#allocation2 + $0x100] sm:$0xff]  ;;  %v3586_v38 = vld [vmem:[#allocation2 + $0xc8] sm:$0xff] }
 0x5d1   : > { %v3890_v29 = vadd.f32 %v3886_v30, %v3778_v32 }
 0x5d4   : > { %7163 = vset.pattern.permute.xlu2 %v10132_v44 }
 0x5d5   : > { %7162 = vset.pattern.permute.xlu1 %v10132_v44  ;;  %4574 = vperm.xlu2 %7163, %v8959_v24   ;;  %v3978_v44 = vld [vmem:[#allocation2 + $0x288] sm:$0xff] }
 0x5d6   : > { %4570 = vperm.xlu1 %7162, %v8940_v51   ;;  %v3998_v19 = vmul.f32 %v10143_v48, %v3978_v44  ;;  %v9594_v44 = vpop.permute.xlu0 %4610 }
 0x5d8   : > { %v9562_v50 = vpop.permute.xlu1 %4346 }
 0x5d9   : > { %v4403_v8 = vpop.permute.xlu2 %4402 }
 0x5da   : > { %v4417_v35 = vmul.f32 %v4403_v8, %v4397_v13  ;;  %v10141_v13 = vld [vmem:[#allocation42_spill] sm:$0xff] }
 0x5db   : > { %v3689_v60 = vmul.f32 %v10141_v13, %v3669_v59  ;;  %v3893_v8 = vld [vmem:[#allocation2 + $0x220] sm:$0xff]  ;;  %v4334_v59 = vmul.f32 %v9548_v7, %v4314_v43 }
 0x5dc   : > { %v4421_v22 = vadd.f32 %v4417_v35, %v4309_v6  ;;  %v4110_v6 = vmul.f32 %v10144_v31, %v4090_v11  ;;  %v3581_v35 = vadd.f32 %v3577_v47, %v3465_v46  ;;  %v3913_v30 = vmul.f32 %v10146_v9, %v3893_v8  ;;  %v4426_v47 = vld [vmem:[#allocation2 + $0x488] sm:$0xff]  ;;  %v3413_v13 = vld [vmem:[#allocation2] sm:$0xff] }
 0x5dd   : > { %7165 = vset.pattern.permute.xlu2 %v10138_v5  ;;  %v4341_v31 = vld [vmem:[#allocation2 + $0x420] sm:$0xff] }
 0x5de   : > { %4582 = vperm.xlu1 %7162, %v8997_v41   ;;  %4598 = vperm.xlu2 %7165, %v8940_v51   ;;  %v9572_v15 = vadd.f32 %v4529_v18, %v4421_v22  ;;  %v4005_v18 = vld [vmem:[#allocation2 + $0x2a0] sm:$0xff]  ;;  %v4002_v22 = vadd.f32 %v3998_v19, %v3890_v29  ;;  %v3693_v14 = vadd.f32 %v3689_v60, %v3581_v35  ;;  %v10150_v35 = vld [vmem:[#allocation36_spill] sm:$0xff] }
 0x5df   : > { %v4229_v19 = vld [vmem:[#allocation2 + $0x3a0] sm:$0xff]  ;;  %v3437_v34 = vmul.f32 %v10150_v35, %v3413_v13 }
 0x5e0   : > { %v9577_v23 = vpop.permute.xlu1 %4354  ;;  %v4114_v12 = vadd.f32 %v4110_v6, %v4002_v22  ;;  %v3805_v32 = vadd.f32 %v3801_v61, %v3693_v14  ;;  %v3474_v61 = vld [vmem:[#allocation2 + $0x48] sm:$0xff]  ;;  %v10151_v22 = vld [vmem:[#allocation32_spill] sm:$0xff]  ;;  %v10155_v13 = vld [vmem:[#allocation33_spill] sm:$0xff] }
 0x5e1   : > { %v4415_v45 = vpop.permute.xlu2 %4414  ;;  %v10152_v14 = vld [vmem:[#allocation38_spill] sm:$0xff]  ;;  %v10157_v35 = vld [vmem:[#allocation49_spill] sm:$0xff] }
 0x5e2   : > { %v4420_v36 = vmul.f32 %v4415_v45, %v4400_v58  ;;  %v10147_v58 = vld [vmem:[#allocation63_spill] sm:$0xff]  ;;  %v4226_v27 = vadd.f32 %v4222_v57, %v4114_v12  ;;  %v3917_v29 = vadd.f32 %v3913_v30, %v3805_v32  ;;  %v10148_v45 = vld [vmem:[#allocation66_spill] sm:$0xff]  ;;  %v3661_v57 = vmul.f32 %v10151_v22, %v3641_v16  ;;  %v9614_v16 = vpop.permute.xlu0 %4654 }
 0x5e3   : > { %v4025_v0 = vmul.f32 %v10147_v58, %v4005_v18  ;;  %v4137_v53 = vmul.f32 %v10148_v45, %v4117_v40  ;;  %v7635_v18 = vmov 43   ;;  %v3606_v9 = vmul.f32 %v10152_v14, %v3586_v38  ;;  %v3753_v40 = vld [vmem:[#allocation2 + $0x180] sm:$0xff]  ;;  %v10153_v12 = vld [vmem:[#allocation67_spill] sm:$0xff] }
 0x5e4   : > { %v9585_v4 = vadd.f32 %v4420_v36, %v4312_v55  ;;  %v4338_v60 = vadd.f32 %v4334_v59, %v4226_v27  ;;  %v10149_v36 = vld [vmem:[#allocation39_spill] sm:$0xff]  ;;  %v4361_v59 = vmul.f32 %v9562_v50, %v4341_v31  ;;  %v3865_v45 = vld [vmem:[#allocation2 + $0x200] sm:$0xff] }
 0x5e5   : > { %v4029_v55 = vadd.f32 %v4025_v0, %v3917_v29  ;;  %v3549_v48 = vmul.f32 %v10149_v36, %v3529_v63  ;;  %v10154_v58 = vld [vmem:[#allocation35_spill] sm:$0xff]  ;;  %v4453_v63 = vld [vmem:[#allocation2 + $0x4a0] sm:$0xff] }
 0x5e6   : > { %7166 = vset.pattern.permute.xlu1 %v10138_v5  ;;  %4606 = vperm.xlu2 %7165, %v8978_v17   ;;  %v4538_v5 = vld [vmem:[#allocation2 + $0x508] sm:$0xff]  ;;  %v3494_v0 = vmul.f32 %v10154_v58, %v3474_v61  ;;  %v4231_v50 = vld [vmem:[#allocation2 + $0x3b0] sm:$0xff]  ;;  %v3977_v36 = vld [vmem:[#allocation2 + $0x280] sm:$0xff] }
 0x5e7   : > { %4602 = vperm.xlu1 %7166, %v8959_v24   ;;  %v4558_v8 = vmul.f32 %v9556_v62, %v4538_v5  ;;  %v4141_v43 = vadd.f32 %v4137_v53, %v4029_v55  ;;  %v4249_v62 = vmul.f32 %v10153_v12, %v4229_v19  ;;  %v3553_v32 = vadd.f32 %v3549_v48, %v3437_v34  ;;  %v3698_v29 = vld [vmem:[#allocation2 + $0x148] sm:$0xff]  ;;  %v10161_v58 = vld [vmem:[#allocation53_spill] sm:$0xff] }
 0x5e8   : > { %v3810_v5 = vld [vmem:[#allocation2 + $0x1c8] sm:$0xff] }
 0x5e9   : > { %v9596_v11 = vpop.permute.xlu1 %4378  ;;  %v4253_v53 = vadd.f32 %v4249_v62, %v4141_v43  ;;  %v3922_v55 = vld [vmem:[#allocation2 + $0x248] sm:$0xff]  ;;  %v3830_v34 = vmul.f32 %v10157_v35, %v3810_v5  ;;  %v10162_v5 = vld [vmem:[#allocation65_spill] sm:$0xff] }
 0x5ea   : > { %v4435_v46 = vpop.permute.xlu2 %4434  ;;  %v10156_v31 = vld [vmem:[#allocation46_spill] sm:$0xff]  ;;  %v10159_v12 = vld [vmem:[#allocation55_spill] sm:$0xff] }
 0x5eb   : > { %v4446_v7 = vmul.f32 %v4435_v46, %v4426_v47  ;;  %v4119_v47 = vld [vmem:[#allocation2 + $0x330] sm:$0xff]  ;;  %v3665_v46 = vadd.f32 %v3661_v57, %v3553_v32  ;;  %v4365_v19 = vadd.f32 %v4361_v59, %v4253_v53  ;;  %v10158_v61 = vld [vmem:[#allocation54_spill] sm:$0xff]  ;;  %v4251_v57 = vmul.f32 %v9474_v3, %v4231_v50 }
 0x5ec   : > { %v4139_v48 = vmul.f32 %v9444_v39, %v4119_v47  ;;  %v3885_v43 = vmul.f32 %v10158_v61, %v3865_v45  ;;  %v4034_v22 = vld [vmem:[#allocation2 + $0x2c8] sm:$0xff]  ;;  %v3942_v62 = vmul.f32 %v10159_v12, %v3922_v55  ;;  %v4455_v53 = vld [vmem:[#allocation2 + $0x4b0] sm:$0xff]  ;;  %v10163_v55 = vld [vmem:[#allocation69_spill] sm:$0xff] }
 0x5ed   : > { %v4450_v6 = vadd.f32 %v4446_v7, %v4338_v60  ;;  %v3773_v60 = vmul.f32 %v10155_v13, %v3753_v40  ;;  %v3610_v7 = vadd.f32 %v3606_v9, %v3494_v0  ;;  %v10160_v32 = vld [vmem:[#allocation58_spill] sm:$0xff]  ;;  %v4054_v45 = vmul.f32 %v10162_v5, %v4034_v22  ;;  %v10164_v35 = vld [vmem:[#allocation59_spill] sm:$0xff] }
 0x5ee   : > { %7169 = vset.pattern.permute.xlu2 %v7635_v18  ;;  %v3997_v39 = vmul.f32 %v10160_v32, %v3977_v36  ;;  %v4146_v59 = vld [vmem:[#allocation2 + $0x348] sm:$0xff]  ;;  %v4143_v0 = vadd.f32 %v4139_v48, %v10161_v58  ;;  %v4313_v22 = vld [vmem:[#allocation2 + $0x400] sm:$0xff] }
 0x5ef   : > { %7168 = vset.pattern.permute.xlu1 %v7635_v18  ;;  %4630 = vperm.xlu2 %7169, %v8959_v24   ;;  %v9605_v30 = vadd.f32 %v4558_v8, %v4450_v6  ;;  %v3718_v6 = vmul.f32 %v10156_v31, %v3698_v29  ;;  %v4343_v18 = vld [vmem:[#allocation2 + $0x430] sm:$0xff]  ;;  %v3777_v9 = vadd.f32 %v3773_v60, %v3665_v46  ;;  %v4089_v46 = vld [vmem:[#allocation2 + $0x300] sm:$0xff] }
 0x5f0   : > { %4626 = vperm.xlu1 %7168, %v8940_v51   ;;  %v4363_v47 = vmul.f32 %v9577_v23, %v4343_v18  ;;  %v4255_v13 = vadd.f32 %v4251_v57, %v4143_v0  ;;  %v4166_v36 = vmul.f32 %v10163_v55, %v4146_v59  ;;  %v3558_v23 = vld [vmem:[#allocation2 + $0xa8] sm:$0xff]  ;;  %v4691_v18 = vpop.permute.xlu0 %4690  ;;  %v10165_v59 = vld [vmem:[#allocation45_spill] sm:$0xff]  ;;  %v4333_v5 = vmul.f32 %v9511_v25, %v4313_v22 }
 0x5f1   : > { %v9611_v27 = vpop.permute.xlu1 %4386  ;;  %v3722_v40 = vadd.f32 %v3718_v6, %v3610_v7  ;;  %v3889_v3 = vadd.f32 %v3885_v43, %v3777_v9  ;;  %v4679_v43 = vld [vmem:[#allocation2 + $0x5b0] sm:$0xff]  ;;  %v4258_v9 = vld [vmem:[#allocation2 + $0x3c8] sm:$0xff]  ;;  %v3578_v58 = vmul.f32 %v10165_v59, %v3558_v23 }
 0x5f2   : > { %v4367_v31 = vadd.f32 %v4363_v47, %v4255_v13  ;;  %v3670_v0 = vld [vmem:[#allocation2 + $0x128] sm:$0xff] }
 0x5f3   : > { %v4459_v38 = vpop.permute.xlu2 %4458  ;;  %v3834_v29 = vadd.f32 %v3830_v34, %v3722_v40  ;;  %v4001_v50 = vadd.f32 %v3997_v39, %v3889_v3  ;;  %v4109_v34 = vmul.f32 %v10164_v35, %v4089_v46  ;;  %v3446_v39 = vld [vmem:[#allocation2 + $0x28] sm:$0xff]  ;;  %v4699_v3 = vmul.f32 %v4691_v18, %v4679_v43  ;;  %v4425_v46 = vld [vmem:[#allocation2 + $0x480] sm:$0xff]  ;;  %v4260_v35 = vld [vmem:[#allocation2 + $0x3d8] sm:$0xff] }
 0x5f4   : > { %v4473_v8 = vmul.f32 %v4459_v38, %v4453_v63  ;;  %v4399_v63 = vld [vmem:[#allocation2 + $0x470] sm:$0xff]  ;;  %v10168_v13 = vld [vmem:[#allocation34_spill] sm:$0xff]  ;;  %v4280_v59 = vmul.f32 %v9493_v37, %v4260_v35 }
 0x5f5   : > { %v3946_v7 = vadd.f32 %v3942_v62, %v3834_v29  ;;  %v4567_v38 = vld [vmem:[#allocation2 + $0x530] sm:$0xff]  ;;  %v4370_v62 = vld [vmem:[#allocation2 + $0x448] sm:$0xff]  ;;  %v10166_v29 = vmov 44  }
 0x5f6   : > { %v9621_v14 = vadd.f32 %v4473_v8, %v4365_v19  ;;  %v4201_v19 = vld [vmem:[#allocation2 + $0x380] sm:$0xff]  ;;  %v4587_v40 = vmul.f32 %v9574_v52, %v4567_v38  ;;  %v3782_v52 = vld [vmem:[#allocation2 + $0x1a8] sm:$0xff]  ;;  %v4148_v38 = vld [vmem:[#allocation2 + $0x358] sm:$0xff] }
 0x5f7   : > { %4638 = vperm.xlu2 %7169, %v8997_v41   ;;  %v4058_v61 = vadd.f32 %v4054_v45, %v3946_v7  ;;  %v4221_v12 = vmul.f32 %v9482_v20, %v4201_v19  ;;  %v10167_v20 = vld [vmem:[#allocation70_spill] sm:$0xff]  ;;  %v10169_v7 = vld [vmem:[#allocation41_spill] sm:$0xff]  ;;  %v10170_v23 = vld [vmem:[#allocation47_spill] sm:$0xff]  ;;  %v4168_v43 = vmul.f32 %v9463_v2, %v4148_v38 }
 0x5f8   : > { %4634 = vperm.xlu1 %7168, %v8978_v17   ;;  %v4278_v45 = vmul.f32 %v10167_v20, %v4258_v9  ;;  %v4482_v25 = vld [vmem:[#allocation2 + $0x4c8] sm:$0xff] }
 0x5f9   : > { %v4170_v47 = vadd.f32 %v4166_v36, %v4058_v61 }
 0x5fa   : > { %v4411_v60 = vpop.permute.xlu1 %4410 }
 0x5fb   : > { %v4419_v48 = vmul.f32 %v4411_v60, %v4399_v63  ;;  %v4467_v8 = vpop.permute.xlu2 %4466  ;;  %v4113_v63 = vadd.f32 %v4109_v34, %v4001_v50  ;;  %v3466_v60 = vmul.f32 %v10168_v13, %v3446_v39  ;;  %v3690_v50 = vmul.f32 %v10169_v7, %v3670_v0  ;;  %v4230_v13 = vld [vmem:[#allocation2 + $0x3a8] sm:$0xff] }
 0x5fc   : > { %v4475_v6 = vmul.f32 %v4467_v8, %v4455_v53  ;;  %v4390_v53 = vmul.f32 %v9596_v11, %v4370_v62  ;;  %v4282_v19 = vadd.f32 %v4278_v45, %v4170_v47  ;;  %v10172_v47 = vmov 45  }
 0x5fd   : > { %v9633_v57 = vadd.f32 %v4419_v48, %v9449_v1  ;;  %v4225_v55 = vadd.f32 %v4221_v12, %v4113_v63  ;;  %v3582_v8 = vadd.f32 %v3578_v58, %v3466_v60  ;;  %v4372_v12 = vld [vmem:[#allocation2 + $0x458] sm:$0xff] }
 0x5fe   : > { %v4479_v32 = vadd.f32 %v4475_v6, %v4367_v31  ;;  %v3802_v31 = vmul.f32 %v10170_v23, %v3782_v52  ;;  %v3894_v6 = vld [vmem:[#allocation2 + $0x228] sm:$0xff]  ;;  %v4394_v18 = vadd.f32 %v4390_v53, %v4282_v19  ;;  %v10173_v63 = vld [vmem:[#allocation60_spill] sm:$0xff]  ;;  %v10175_v19 = vld [vmem:[#allocation61_spill] sm:$0xff]  ;;  %v4250_v23 = vmul.f32 %v9500_v28, %v4230_v13  ;;  %v9690_v13 = vpop.permute.xlu0 %4750 }
 0x5ff   : > { %7172 = vset.pattern.permute.xlu2 %v10166_v29  ;;  %v4337_v11 = vadd.f32 %v4333_v5, %v4225_v55  ;;  %v3694_v9 = vadd.f32 %v3690_v50, %v3582_v8  ;;  %v4392_v5 = vmul.f32 %v9611_v27, %v4372_v12  ;;  %v4484_v52 = vld [vmem:[#allocation2 + $0x4d8] sm:$0xff]  ;;  %v4118_v53 = vld [vmem:[#allocation2 + $0x328] sm:$0xff]  ;;  %v10177_v12 = vmov 47  }
 0x600   : > { %v4591_v1 = vadd.f32 %v4587_v40, %v4479_v32  ;;  %7171 = vset.pattern.permute.xlu1 %v10166_v29  ;;  %4662 = vperm.xlu2 %7172, %v8978_v17   ;;  %v4006_v40 = vld [vmem:[#allocation2 + $0x2a8] sm:$0xff]  ;;  %v10171_v32 = vld [vmem:[#allocation57_spill] sm:$0xff] }
 0x601   : > { %4658 = vperm.xlu1 %7171, %v8959_v24   ;;  %v3914_v39 = vmul.f32 %v10171_v32, %v3894_v6  ;;  %v3806_v0 = vadd.f32 %v3802_v31, %v3694_v9  ;;  %v4026_v29 = vmul.f32 %v10173_v63, %v4006_v40  ;;  %v4481_v32 = vld [vmem:[#allocation2 + $0x4c0] sm:$0xff] }
 0x602   : > { %v9647_v36 = vadd.f32 %v4699_v3, %v4591_v1  ;;  %v10174_v3 = vld [vmem:[#allocation56_spill] sm:$0xff]  ;;  %v4649_v63 = vld [vmem:[#allocation2 + $0x580] sm:$0xff] }
 0x603   : > { %v4431_v48 = vpop.permute.xlu1 %4430  ;;  %v4172_v2 = vadd.f32 %v4168_v43, %v10174_v3  ;;  %v4428_v1 = vld [vmem:[#allocation2 + $0x498] sm:$0xff]  ;;  %v3918_v20 = vadd.f32 %v3914_v39, %v3806_v0  ;;  %v4511_v43 = vld [vmem:[#allocation2 + $0x4f0] sm:$0xff]  ;;  %v4537_v39 = vld [vmem:[#allocation2 + $0x500] sm:$0xff] }
 0x604   : > { %v4445_v34 = vmul.f32 %v4431_v48, %v4425_v46  ;;  %v4491_v61 = vpop.permute.xlu2 %4490  ;;  %v4596_v46 = vld [vmem:[#allocation2 + $0x558] sm:$0xff]  ;;  %v4138_v48 = vmul.f32 %v10175_v19, %v4118_v53  ;;  %v4483_v53 = vld [vmem:[#allocation2 + $0x4d0] sm:$0xff]  ;;  %v4510_v19 = vld [vmem:[#allocation2 + $0x4e8] sm:$0xff] }
 0x605   : > { %v4502_v22 = vmul.f32 %v4491_v61, %v4482_v25  ;;  %v4284_v45 = vadd.f32 %v4280_v59, %v4172_v2  ;;  %v4030_v50 = vadd.f32 %v4026_v29, %v3918_v20  ;;  %v4342_v25 = vld [vmem:[#allocation2 + $0x428] sm:$0xff]  ;;  %v4616_v8 = vmul.f32 %v9594_v44, %v4596_v46  ;;  %v4259_v59 = vld [vmem:[#allocation2 + $0x3d0] sm:$0xff] }
 0x606   : > { %v9651_v62 = vadd.f32 %v4445_v34, %v4337_v11  ;;  %v4362_v35 = vmul.f32 %v9529_v33, %v4342_v25  ;;  %v10176_v11 = vmov 46   ;;  %v4371_v2 = vld [vmem:[#allocation2 + $0x450] sm:$0xff]  ;;  %v10179_v25 = vmov 49  }
 0x607   : > { %v9655_v58 = vadd.f32 %v4502_v22, %v4394_v18  ;;  %v4396_v38 = vadd.f32 %v4392_v5, %v4284_v45  ;;  %v4142_v6 = vadd.f32 %v4138_v48, %v4030_v50  ;;  %v4391_v45 = vmul.f32 %v9550_v42, %v4371_v2  ;;  %v4566_v48 = vld [vmem:[#allocation2 + $0x528] sm:$0xff] }
 0x608   : > { %7173 = vset.pattern.permute.xlu2 %v10172_v47 }
 0x609   : > { %4666 = vperm.xlu1 %7171, %v8997_v41   ;;  %4682 = vperm.xlu2 %7173, %v8940_v51   ;;  %v4254_v61 = vadd.f32 %v4250_v23, %v4142_v6 }
 0x60b   : > { %v4443_v37 = vpop.permute.xlu1 %4442  ;;  %v4366_v18 = vadd.f32 %v4362_v35, %v4254_v61  ;;  %v4512_v61 = vld [vmem:[#allocation2 + $0x4f8] sm:$0xff] }
 0x60c   : > { %v4448_v60 = vmul.f32 %v4443_v37, %v4428_v1  ;;  %v4499_v7 = vpop.permute.xlu2 %4498  ;;  %v7636_v37 = vmov 48  }
 0x60d   : > { %v4504_v55 = vmul.f32 %v4499_v7, %v4484_v52  ;;  %v4669_v52 = vmul.f32 %v9614_v16, %v4649_v63  ;;  %v4539_v63 = vld [vmem:[#allocation2 + $0x510] sm:$0xff] }
 0x60e   : > { %v4452_v27 = vadd.f32 %v4448_v60, %v9469_v49  ;;  %v4454_v49 = vld [vmem:[#allocation2 + $0x4a8] sm:$0xff] }
 0x60f   : > { %v4508_v31 = vadd.f32 %v4504_v55, %v4396_v38  ;;  %v10178_v60 = vld [vmem:[#allocation62_spill] sm:$0xff] }
 0x611   : > { %7175 = vset.pattern.permute.xlu1 %v10172_v47  ;;  %7176 = vset.pattern.permute.xlu2 %v10176_v11  ;;  %v9670_v34 = vadd.f32 %v4616_v8, %v4508_v31  ;;  %v9701_v8 = vpop.permute.xlu0 %4830 }
 0x612   : > { %4694 = vperm.xlu1 %7175, %v8997_v41   ;;  %4718 = vperm.xlu2 %7176, %v8978_v17  }
 0x614   : > { %v4463_v44 = vpop.permute.xlu1 %4462 }
 0x615   : > { %v4474_v28 = vmul.f32 %v4463_v44, %v4454_v49  ;;  %v4523_v22 = vpop.permute.xlu2 %4522  ;;  %v7637_v44 = vmov 51  }
 0x616   : > { %v4531_v9 = vmul.f32 %v4523_v22, %v4511_v43  ;;  %v10180_v43 = vmov 50  }
 0x617   : > { %v4478_v40 = vadd.f32 %v4474_v28, %v4366_v18  ;;  %v4593_v28 = vld [vmem:[#allocation2 + $0x540] sm:$0xff] }
 0x618   : > { %v9675_v33 = vadd.f32 %v4531_v9, %v9633_v57  ;;  %v4279_v57 = vmul.f32 %v9518_v56, %v4259_v59  ;;  %v4705_v9 = vld [vmem:[#allocation2 + $0x5c0] sm:$0xff] }
 0x61a   : > { %7177 = vset.pattern.permute.xlu1 %v10176_v11  ;;  %7178 = vset.pattern.permute.xlu2 %v10177_v12  ;;  %v4283_v56 = vadd.f32 %v4279_v57, %v10178_v60 }
 0x61b   : > { %4722 = vperm.xlu1 %7177, %v8997_v41   ;;  %4746 = vperm.xlu2 %7178, %v8978_v17  }
 0x61d   : > { %v4487_v0 = vpop.permute.xlu1 %4486 }
 0x61e   : > { %v4501_v29 = vmul.f32 %v4487_v0, %v4481_v32  ;;  %v4543_v3 = vpop.permute.xlu2 %4542  ;;  %v4711_v32 = vpop.permute.xlu0 %4710 }
 0x61f   : > { %v4557_v5 = vmul.f32 %v4543_v3, %v4537_v39  ;;  %v4725_v59 = vmul.f32 %v4711_v32, %v4705_v9  ;;  %v4595_v3 = vld [vmem:[#allocation2 + $0x550] sm:$0xff]  ;;  %v4677_v9 = vld [vmem:[#allocation2 + $0x5a0] sm:$0xff]  ;;  %v7638_v32 = vmov 54  }
 0x620   : > { %v4505_v1 = vadd.f32 %v4501_v29, %v9488_v54  ;;  %v4540_v54 = vld [vmem:[#allocation2 + $0x518] sm:$0xff] }
 0x621   : > { %v4561_v20 = vadd.f32 %v4557_v5, %v9651_v62  ;;  %v4395_v62 = vadd.f32 %v4391_v45, %v4283_v56  ;;  %v4622_v45 = vld [vmem:[#allocation2 + $0x568] sm:$0xff] }
 0x623   : > { %7180 = vset.pattern.permute.xlu1 %v7636_v37  ;;  %7181 = vset.pattern.permute.xlu2 %v7636_v37  ;;  %v9688_v46 = vadd.f32 %v4669_v52, %v4561_v20 }
 0x624   : > { %4774 = vperm.xlu1 %7180, %v8978_v17   ;;  %4778 = vperm.xlu2 %7181, %v8997_v41  }
 0x625   : > { %v4495_v16 = vpop.permute.xlu1 %4494 }
 0x626   : > { %v4503_v42 = vmul.f32 %v4495_v16, %v4483_v53  ;;  %v4555_v7 = vpop.permute.xlu2 %4554 }
 0x627   : > { %v4560_v50 = vmul.f32 %v4555_v7, %v4540_v54  ;;  %v4736_v7 = vld [vmem:[#allocation2 + $0x5f8] sm:$0xff] }
 0x628   : > { %v4507_v38 = vadd.f32 %v4503_v42, %v4395_v62  ;;  %v4624_v62 = vld [vmem:[#allocation2 + $0x578] sm:$0xff]  ;;  %v10181_v42 = vmov 52  }
 0x629   : > { %v9695_v55 = vadd.f32 %v4560_v50, %v4452_v27 }
 0x62c   : > { %7182 = vset.pattern.permute.xlu1 %v10179_v25  ;;  %7183 = vset.pattern.permute.xlu2 %v10179_v25 }
 0x62d   : > { %4802 = vperm.xlu1 %7182, %v8978_v17   ;;  %4806 = vperm.xlu2 %7183, %v8997_v41  }
 0x62e   : > { %v4519_v23 = vpop.permute.xlu1 %4518 }
 0x62f   : > { %v4530_v31 = vmul.f32 %v4519_v23, %v4510_v19  ;;  %v4575_v6 = vpop.permute.xlu2 %4574 }
 0x630   : > { %v4586_v35 = vmul.f32 %v4575_v6, %v4566_v48  ;;  %v4651_v6 = vld [vmem:[#allocation2 + $0x590] sm:$0xff] }
 0x631   : > { %v4534_v49 = vadd.f32 %v4530_v31, %v9506_v21 }
 0x632   : > { %v9704_v27 = vadd.f32 %v4586_v35, %v4478_v40  ;;  %v10182_v35 = vmov 53  }
 0x635   : > { %7185 = vset.pattern.permute.xlu1 %v10180_v43  ;;  %7186 = vset.pattern.permute.xlu2 %v7637_v44 }
 0x636   : > { %4834 = vperm.xlu1 %7185, %v8997_v41   ;;  %v4527_v18 = vpop.permute.xlu1 %4526  ;;  %4858 = vperm.xlu2 %7186, %v8978_v17  }
 0x637   : > { %v4532_v22 = vmul.f32 %v4527_v18, %v4512_v61 }
 0x638   : > { %v4599_v39 = vpop.permute.xlu2 %4598 }
 0x639   : > { %v4536_v21 = vadd.f32 %v4532_v22, %v9585_v4  ;;  %v4613_v40 = vmul.f32 %v4599_v39, %v4593_v28  ;;  %v4621_v22 = vld [vmem:[#allocation2 + $0x560] sm:$0xff] }
 0x63b   : > { %v4617_v0 = vadd.f32 %v4613_v40, %v4505_v1  ;;  %v4565_v1 = vld [vmem:[#allocation2 + $0x520] sm:$0xff] }
 0x63d   : > { %v9711_v29 = vadd.f32 %v4725_v59, %v4617_v0 }
 0x63e   : > { %7187 = vset.pattern.permute.xlu1 %v7637_v44  ;;  %7188 = vset.pattern.permute.xlu2 %v10172_v47 }
 0x63f   : > { %4862 = vperm.xlu1 %7187, %v8997_v41   ;;  %v4551_v2 = vpop.permute.xlu1 %4550  ;;  %4686 = vperm.xlu2 %7188, %v8959_v24  }
 0x640   : > { %v4559_v5 = vmul.f32 %v4551_v2, %v4539_v63  ;;  %v4607_v57 = vpop.permute.xlu2 %4606  ;;  %v4623_v63 = vld [vmem:[#allocation2 + $0x570] sm:$0xff] }
 0x641   : > { %v4615_v52 = vmul.f32 %v4607_v57, %v4595_v3  ;;  %v4707_v2 = vld [vmem:[#allocation2 + $0x5d0] sm:$0xff]  ;;  %v10183_v57 = vmov 55  }
 0x642   : > { %v4563_v4 = vadd.f32 %v4559_v5, %v9526_v10  ;;  %v4568_v10 = vld [vmem:[#allocation2 + $0x538] sm:$0xff] }
 0x643   : > { %v9718_v20 = vadd.f32 %v4615_v52, %v4507_v38  ;;  %v4819_v52 = vld [vmem:[#allocation2 + $0x650] sm:$0xff] }
 0x647   : > { %7190 = vset.pattern.permute.xlu1 %v10176_v11  ;;  %7191 = vset.pattern.permute.xlu2 %v10177_v12 }
 0x648   : > { %4714 = vperm.xlu1 %7190, %v8959_v24   ;;  %v4571_v47 = vpop.permute.xlu1 %4570  ;;  %4738 = vperm.xlu2 %7191, %v8940_v51  }
 0x649   : > { %v4585_v53 = vmul.f32 %v4571_v47, %v4565_v1  ;;  %v4631_v60 = vpop.permute.xlu2 %4630 }
 0x64a   : > { %v4642_v56 = vmul.f32 %v4631_v60, %v4622_v45  ;;  %v4839_v45 = vmul.f32 %v9701_v8, %v4819_v52  ;;  %v4678_v52 = vld [vmem:[#allocation2 + $0x5a8] sm:$0xff] }
 0x64b   : > { %v4589_v54 = vadd.f32 %v4585_v53, %v9621_v14  ;;  %v4756_v14 = vmul.f32 %v9690_v13, %v4736_v7  ;;  %v4650_v53 = vld [vmem:[#allocation2 + $0x588] sm:$0xff] }
 0x64c   : > { %v9725_v16 = vadd.f32 %v4642_v56, %v4534_v49 }
 0x650   : > { %7192 = vset.pattern.permute.xlu1 %v10177_v12  ;;  %v4583_v11 = vpop.permute.xlu1 %4582  ;;  %7193 = vset.pattern.permute.xlu2 %v10181_v42  ;;  %v4594_v12 = vld [vmem:[#allocation2 + $0x548] sm:$0xff] }
 0x651   : > { %v4588_v50 = vmul.f32 %v4583_v11, %v4568_v10  ;;  %4742 = vperm.xlu1 %7192, %v8959_v24   ;;  %4886 = vperm.xlu2 %7193, %v8978_v17   ;;  %v4639_v38 = vpop.permute.xlu2 %4638  ;;  %v4652_v11 = vld [vmem:[#allocation2 + $0x598] sm:$0xff] }
 0x652   : > { %v4644_v19 = vmul.f32 %v4639_v38, %v4624_v62  ;;  %v4764_v38 = vld [vmem:[#allocation2 + $0x618] sm:$0xff] }
 0x653   : > { %v9732_v48 = vadd.f32 %v4588_v50, %v9545_v26 }
 0x654   : > { %v4648_v23 = vadd.f32 %v4644_v19, %v4536_v21 }
 0x656   : > { %v9735_v31 = vadd.f32 %v4756_v14, %v4648_v23  ;;  %v4680_v14 = vld [vmem:[#allocation2 + $0x5b8] sm:$0xff] }
 0x659   : > { %7195 = vset.pattern.permute.xlu1 %v10182_v35  ;;  %v4603_v49 = vpop.permute.xlu1 %4602  ;;  %7196 = vset.pattern.permute.xlu2 %v10182_v35 }
 0x65a   : > { %v4614_v61 = vmul.f32 %v4603_v49, %v4594_v12  ;;  %4914 = vperm.xlu1 %7195, %v8978_v17   ;;  %4918 = vperm.xlu2 %7196, %v8997_v41   ;;  %v4663_v18 = vpop.permute.xlu2 %4662 }
 0x65b   : > { %v4671_v26 = vmul.f32 %v4663_v18, %v4651_v6  ;;  %v4792_v6 = vld [vmem:[#allocation2 + $0x638] sm:$0xff] }
 0x65c   : > { %v9742_v28 = vadd.f32 %v4614_v61, %v9655_v58  ;;  %v4708_v18 = vld [vmem:[#allocation2 + $0x5d8] sm:$0xff] }
 0x65d   : > { %v9744_v13 = vadd.f32 %v4671_v26, %v4563_v4 }
 0x662   : > { %7197 = vset.pattern.permute.xlu1 %v7638_v32  ;;  %v4627_v39 = vpop.permute.xlu1 %4626  ;;  %7198 = vset.pattern.permute.xlu2 %v7638_v32 }
 0x663   : > { %v4641_v21 = vmul.f32 %v4627_v39, %v4621_v22  ;;  %4942 = vperm.xlu1 %7197, %v8978_v17   ;;  %4946 = vperm.xlu2 %7198, %v8997_v41   ;;  %v4683_v40 = vpop.permute.xlu2 %4682  ;;  %v9785_v39 = vpop.permute.xlu0 %4890 }
 0x664   : > { %v4697_v59 = vmul.f32 %v4683_v40, %v4677_v9  ;;  %v4847_v9 = vld [vmem:[#allocation2 + $0x670] sm:$0xff]  ;;  %v7639_v40 = vmov 57  }
 0x665   : > { %v9751_v58 = vadd.f32 %v4641_v21, %v9572_v15  ;;  %v10184_v21 = vmov 56  }
 0x666   : > { %v9753_v0 = vadd.f32 %v4697_v59, %v4589_v54  ;;  %v4735_v54 = vld [vmem:[#allocation2 + $0x5f0] sm:$0xff] }
 0x66a   : > { %v4635_v3 = vpop.permute.xlu1 %4634 }
 0x66b   : > { %v4643_v5 = vmul.f32 %v4635_v3, %v4623_v63  ;;  %7199 = vset.pattern.permute.xlu1 %v10183_v57  ;;  %7200 = vset.pattern.permute.xlu2 %v7636_v37  ;;  %v4763_v3 = vld [vmem:[#allocation2 + $0x610] sm:$0xff] }
 0x66c   : > { %4974 = vperm.xlu1 %7199, %v8997_v41   ;;  %4766 = vperm.xlu2 %7200, %v8940_v51   ;;  %v4719_v4 = vpop.permute.xlu2 %4718 }
 0x66d   : > { %v4647_v1 = vadd.f32 %v4643_v5, %v9675_v33  ;;  %v4727_v15 = vmul.f32 %v4719_v4, %v4707_v2  ;;  %v10185_v4 = vmov 58  }
 0x66f   : > { %v4731_v47 = vadd.f32 %v4727_v15, %v9718_v20  ;;  %v4799_v15 = vpop.permute.xlu0 %4798 }
 0x671   : > { %v9762_v60 = vadd.f32 %v4839_v45, %v4731_v47 }
 0x673   : > { %v4659_v56 = vpop.permute.xlu1 %4658 }
 0x674   : > { %v4670_v10 = vmul.f32 %v4659_v56, %v4650_v53  ;;  %7201 = vset.pattern.permute.xlu1 %v7636_v37  ;;  %7202 = vset.pattern.permute.xlu2 %v10179_v25 }
 0x675   : > { %4770 = vperm.xlu1 %7201, %v8959_v24   ;;  %4794 = vperm.xlu2 %7202, %v8940_v51   ;;  %v4747_v33 = vpop.permute.xlu2 %4746 }
 0x676   : > { %v9769_v62 = vadd.f32 %v4670_v10, %v9605_v30  ;;  %v4755_v8 = vmul.f32 %v4747_v33, %v4735_v54  ;;  %v4791_v54 = vld [vmem:[#allocation2 + $0x630] sm:$0xff] }
 0x678   : > { %v4759_v20 = vadd.f32 %v4755_v8, %v4647_v1  ;;  %v4790_v1 = vld [vmem:[#allocation2 + $0x628] sm:$0xff] }
 0x679   : > { %v4810_v53 = vmul.f32 %v4799_v15, %v4790_v1  ;;  %v4761_v15 = vld [vmem:[#allocation2 + $0x600] sm:$0xff] }
 0x67b   : > { %v4667_v7 = vpop.permute.xlu1 %4666 }
 0x67c   : > { %v4672_v50 = vmul.f32 %v4667_v7, %v4652_v11  ;;  %v10186_v11 = vmov 59  }
 0x67d   : > { %7204 = vset.pattern.permute.xlu1 %v10180_v43  ;;  %7205 = vset.pattern.permute.xlu2 %v10180_v43 }
 0x67e   : > { %v4676_v37 = vadd.f32 %v4672_v50, %v9695_v55  ;;  %4822 = vperm.xlu1 %7204, %v8940_v51   ;;  %4826 = vperm.xlu2 %7205, %v8959_v24   ;;  %v4779_v25 = vpop.permute.xlu2 %4778 }
 0x67f   : > { %v4784_v19 = vmul.f32 %v4779_v25, %v4764_v38  ;;  %v4820_v38 = vld [vmem:[#allocation2 + $0x658] sm:$0xff] }
 0x681   : > { %v9776_v30 = vadd.f32 %v4784_v19, %v4676_v37  ;;  %v4875_v19 = vld [vmem:[#allocation2 + $0x690] sm:$0xff] }
 0x684   : > { %v4695_v23 = vpop.permute.xlu1 %4694 }
 0x685   : > { %v4700_v12 = vmul.f32 %v4695_v23, %v4680_v14 }
 0x686   : > { %7206 = vset.pattern.permute.xlu1 %v7637_v44  ;;  %7207 = vset.pattern.permute.xlu2 %v7637_v44 }
 0x687   : > { %v4704_v43 = vadd.f32 %v4700_v12, %v9732_v48  ;;  %4850 = vperm.xlu1 %7206, %v8940_v51   ;;  %4854 = vperm.xlu2 %7207, %v8959_v24   ;;  %v4807_v55 = vpop.permute.xlu2 %4806 }
 0x688   : > { %v4812_v49 = vmul.f32 %v4807_v55, %v4792_v6  ;;  %v4848_v6 = vld [vmem:[#allocation2 + $0x678] sm:$0xff] }
 0x689   : > { %v4904_v55 = vld [vmem:[#allocation2 + $0x6b8] sm:$0xff] }
 0x68a   : > { %v9783_v61 = vadd.f32 %v4812_v49, %v4704_v43 }
 0x68d   : > { %v4723_v26 = vpop.permute.xlu1 %4722 }
 0x68e   : > { %v4728_v22 = vmul.f32 %v4723_v26, %v4708_v18 }
 0x68f   : > { %7208 = vset.pattern.permute.xlu1 %v10184_v21  ;;  %7209 = vset.pattern.permute.xlu2 %v7639_v40 }
 0x690   : > { %v4732_v44 = vadd.f32 %v4728_v22, %v9670_v34  ;;  %5002 = vperm.xlu1 %7208, %v8997_v41   ;;  %5026 = vperm.xlu2 %7209, %v8978_v17   ;;  %v4859_v48 = vpop.permute.xlu2 %4858  ;;  %v4706_v22 = vld [vmem:[#allocation2 + $0x5c8] sm:$0xff] }
 0x691   : > { %v4867_v59 = vmul.f32 %v4859_v48, %v4847_v9  ;;  %v7640_v9 = vmov 63   ;;  %v4932_v48 = vld [vmem:[#allocation2 + $0x6d8] sm:$0xff] }
 0x692   : > { %7247 = vset.pattern.permute.xlu0 %v7640_v9 }
 0x693   : > { %v9792_v63 = vadd.f32 %v4867_v59, %v4759_v20  ;;  %v4733_v20 = vld [vmem:[#allocation2 + $0x5e0] sm:$0xff] }
 0x696   : > { %v4775_v2 = vpop.permute.xlu1 %4774 }
 0x697   : > { %v4783_v5 = vmul.f32 %v4775_v2, %v4763_v3  ;;  %v4734_v2 = vld [vmem:[#allocation2 + $0x5e8] sm:$0xff] }
 0x698   : > { %7210 = vset.pattern.permute.xlu1 %v7639_v40  ;;  %7211 = vset.pattern.permute.xlu2 %v10185_v4 }
 0x699   : > { %v4787_v34 = vadd.f32 %v4783_v5, %v9744_v13  ;;  %5030 = vperm.xlu1 %7210, %v8997_v41   ;;  %5054 = vperm.xlu2 %7211, %v8978_v17   ;;  %v4687_v45 = vpop.permute.xlu2 %4686  ;;  %v9836_v5 = vpop.permute.xlu0 %5058 }
 0x69a   : > { %v4698_v47 = vmul.f32 %v4687_v45, %v4678_v52 }
 0x69c   : > { %v4702_v56 = vadd.f32 %v4698_v47, %v9704_v27  ;;  %v4903_v47 = vld [vmem:[#allocation2 + $0x6b0] sm:$0xff] }
 0x69e   : > { %v9800_v10 = vadd.f32 %v4810_v53, %v4702_v56 }
 0x69f   : > { %v4803_v33 = vpop.permute.xlu1 %4802 }
 0x6a0   : > { %v4811_v8 = vmul.f32 %v4803_v33, %v4791_v54  ;;  %v4789_v33 = vld [vmem:[#allocation2 + $0x620] sm:$0xff] }
 0x6a1   : > { %7213 = vset.pattern.permute.xlu1 %v10186_v11  ;;  %7214 = vset.pattern.permute.xlu2 %v10186_v11  ;;  %v4907_v56 = vpop.permute.xlu0 %4906 }
 0x6a2   : > { %v9805_v13 = vadd.f32 %v4811_v8, %v9647_v36  ;;  %5082 = vperm.xlu1 %7213, %v8978_v17   ;;  %5086 = vperm.xlu2 %7214, %v8997_v41   ;;  %v4739_v7 = vpop.permute.xlu2 %4738  ;;  %v10187_v8 = vmov 61  }
 0x6a3   : > { %v4753_v50 = vmul.f32 %v4739_v7, %v4733_v20  ;;  %v4901_v20 = vld [vmem:[#allocation2 + $0x6a0] sm:$0xff] }
 0x6a5   : > { %v9810_v27 = vadd.f32 %v4753_v50, %v9751_v58 }
 0x6a8   : > { %v4835_v37 = vpop.permute.xlu1 %4834 }
 0x6a9   : > { %v4840_v25 = vmul.f32 %v4835_v37, %v4820_v38  ;;  %v4931_v37 = vld [vmem:[#allocation2 + $0x6d0] sm:$0xff] }
 0x6aa   : > { %7215 = vset.pattern.permute.xlu1 %v10181_v42  ;;  %7216 = vset.pattern.permute.xlu2 %v10181_v42 }
 0x6ab   : > { %v4844_v14 = vadd.f32 %v4840_v25, %v4732_v44  ;;  %4878 = vperm.xlu1 %7215, %v8940_v51   ;;  %4882 = vperm.xlu2 %7216, %v8959_v24   ;;  %v4887_v36 = vpop.permute.xlu2 %4886 }
 0x6ac   : > { %v4895_v23 = vmul.f32 %v4887_v36, %v4875_v19  ;;  %v4818_v36 = vld [vmem:[#allocation2 + $0x648] sm:$0xff] }
 0x6ae   : > { %v9816_v12 = vadd.f32 %v4895_v23, %v4787_v34  ;;  %v7641_v34 = vmov 60   ;;  %v9854_v23 = vpop.permute.xlu0 %4970 }
 0x6b1   : > { %v4863_v58 = vpop.permute.xlu1 %4862 }
 0x6b2   : > { %v4868_v43 = vmul.f32 %v4863_v58, %v4848_v6  ;;  %v10188_v6 = vmov 62  }
 0x6b3   : > { %7219 = vset.pattern.permute.xlu1 %v10182_v35  ;;  %7220 = vset.pattern.permute.xlu2 %v7638_v32 }
 0x6b4   : > { %v9821_v49 = vadd.f32 %v4868_v43, %v9735_v31  ;;  %4910 = vperm.xlu1 %7219, %v8959_v24   ;;  %4934 = vperm.xlu2 %7220, %v8940_v51   ;;  %v4919_v42 = vpop.permute.xlu2 %4918 }
 0x6b5   : > { %v4924_v18 = vmul.f32 %v4919_v42, %v4904_v55  ;;  %v4960_v55 = vld [vmem:[#allocation2 + $0x6f8] sm:$0xff] }
 0x6b7   : > { %v9826_v26 = vadd.f32 %v4924_v18, %v9783_v61 }
 0x6ba   : > { %v4715_v44 = vpop.permute.xlu1 %4714 }
 0x6bb   : > { %v4726_v35 = vmul.f32 %v4715_v44, %v4706_v22  ;;  %v4846_v22 = vld [vmem:[#allocation2 + $0x668] sm:$0xff] }
 0x6bc   : > { %7221 = vset.pattern.permute.xlu1 %v7638_v32  ;;  %7222 = vset.pattern.permute.xlu2 %v10183_v57  ;;  %v4958_v44 = vld [vmem:[#allocation2 + $0x6e8] sm:$0xff] }
 0x6bd   : > { %v4730_v31 = vadd.f32 %v4726_v35, %v9742_v28  ;;  %4938 = vperm.xlu1 %7221, %v8959_v24   ;;  %4962 = vperm.xlu2 %7222, %v8940_v51   ;;  %v4947_v59 = vpop.permute.xlu2 %4946  ;;  %v4967_v35 = vpop.permute.xlu0 %4966 }
 0x6be   : > { %v4952_v61 = vmul.f32 %v4947_v59, %v4932_v48 }
 0x6c0   : > { %v9834_v3 = vadd.f32 %v4952_v61, %v4844_v14  ;;  %v4762_v61 = vld [vmem:[#allocation2 + $0x608] sm:$0xff] }
 0x6c3   : > { %v4743_v52 = vpop.permute.xlu1 %4742 }
 0x6c4   : > { %v4754_v1 = vmul.f32 %v4743_v52, %v4734_v2 }
 0x6c5   : > { %7223 = vset.pattern.permute.xlu1 %v7641_v34  ;;  %7224 = vset.pattern.permute.xlu2 %v7641_v34 }
 0x6c6   : > { %v4758_v28 = vadd.f32 %v4754_v1, %v9725_v16  ;;  %5110 = vperm.xlu1 %7223, %v8978_v17   ;;  %5114 = vperm.xlu2 %7224, %v8997_v41   ;;  %v4767_v32 = vpop.permute.xlu2 %4766 }
 0x6c7   : > { %v4781_v57 = vmul.f32 %v4767_v32, %v4761_v15  ;;  %v5015_v15 = vld [vmem:[#allocation2 + $0x730] sm:$0xff] }
 0x6c9   : > { %v9844_v45 = vadd.f32 %v4781_v57, %v9688_v46  ;;  %v4921_v46 = vmul.f32 %v4907_v56, %v4901_v20  ;;  %v4988_v20 = vld [vmem:[#allocation2 + $0x718] sm:$0xff] }
 0x6cc   : > { %v4915_v53 = vpop.permute.xlu1 %4914 }
 0x6cd   : > { %v4923_v54 = vmul.f32 %v4915_v53, %v4903_v47 }
 0x6ce   : > { %7225 = vset.pattern.permute.xlu1 %v10187_v8  ;;  %7226 = vset.pattern.permute.xlu2 %v10187_v8 }
 0x6cf   : > { %v4927_v16 = vadd.f32 %v4923_v54, %v9805_v13  ;;  %5138 = vperm.xlu1 %7225, %v8978_v17   ;;  %5142 = vperm.xlu2 %7226, %v8997_v41   ;;  %v4795_v7 = vpop.permute.xlu2 %4794 }
 0x6d0   : > { %v4809_v50 = vmul.f32 %v4795_v7, %v4789_v33 }
 0x6d2   : > { %v4813_v38 = vadd.f32 %v4809_v50, %v9753_v0 }
 0x6d4   : > { %v9852_v25 = vadd.f32 %v4921_v46, %v4813_v38  ;;  %v4874_v38 = vld [vmem:[#allocation2 + $0x688] sm:$0xff] }
 0x6d5   : > { %v4943_v19 = vpop.permute.xlu1 %4942 }
 0x6d6   : > { %v4951_v14 = vmul.f32 %v4943_v19, %v4931_v37 }
 0x6d7   : > { %7229 = vset.pattern.permute.xlu1 %v10188_v6  ;;  %7230 = vset.pattern.permute.xlu2 %v7640_v9 }
 0x6d8   : > { %v9859_v13 = vadd.f32 %v4951_v14, %v9762_v60  ;;  %5170 = vperm.xlu1 %7229, %v8997_v41   ;;  %5194 = vperm.xlu2 %7230, %v8978_v17   ;;  %v4827_v0 = vpop.permute.xlu2 %4826 }
 0x6d9   : > { %v4838_v58 = vmul.f32 %v4827_v0, %v4818_v36  ;;  %v4957_v0 = vld [vmem:[#allocation2 + $0x6e0] sm:$0xff] }
 0x6db   : > { %v9863_v43 = vadd.f32 %v4838_v58, %v4730_v31  ;;  %v4978_v31 = vmul.f32 %v4967_v35, %v4958_v44  ;;  %v10190_v35 = vld [vmem:[#allocation28_spill] sm:$0xff] }
 0x6de   : > { %v4975_v42 = vpop.permute.xlu1 %4974 }
 0x6df   : > { %v4980_v18 = vmul.f32 %v4975_v42, %v4960_v55  ;;  %v10189_v55 = vld [vmem:[#allocation29_spill] sm:$0xff] }
 0x6e0   : > { %7231 = vset.pattern.permute.xlu1 %v7640_v9  ;;  %7232 = vset.pattern.permute.xlu2 %v10184_v21 }
 0x6e1   : > { %v9868_v60 = vadd.f32 %v4980_v18, %v9821_v49  ;;  %5198 = vperm.xlu1 %7231, %v8997_v41   ;;  %4990 = vperm.xlu2 %7232, %v8940_v51   ;;  %v4855_v17 = vpop.permute.xlu2 %4854  ;;  %v4873_v18 = vld [vmem:[#allocation2 + $0x680] sm:$0xff] }
 0x6e2   : > { %v4866_v48 = vmul.f32 %v4855_v17, %v4846_v22  ;;  %5255 = vrot.lane.b32.xlu0 %v10189_v55, %s7642_s8  ;;  %v5016_v17 = vld [vmem:[#allocation2 + $0x738] sm:$0xff] }
 0x6e4   : > { %v4870_v59 = vadd.f32 %v4866_v48, %v4758_v28  ;;  %v4817_v28 = vld [vmem:[#allocation2 + $0x640] sm:$0xff]  ;;  %v5100_v48 = vld [vmem:[#allocation2 + $0x798] sm:$0xff] }
 0x6e6   : > { %v9872_v2 = vadd.f32 %v4978_v31, %v4870_v59 }
 0x6e7   : > { %v4771_v52 = vpop.permute.xlu1 %4770 }
 0x6e8   : > { %v4782_v1 = vmul.f32 %v4771_v52, %v4762_v61  ;;  %v5128_v52 = vld [vmem:[#allocation2 + $0x7b8] sm:$0xff] }
 0x6e9   : > { %7233 = vset.pattern.permute.xlu1 %v7639_v40  ;;  %7234 = vset.pattern.permute.xlu2 %v7639_v40  ;;  %v4845_v40 = vld [vmem:[#allocation2 + $0x660] sm:$0xff] }
 0x6ea   : > { %v4786_v21 = vadd.f32 %v4782_v1, %v9769_v62  ;;  %5018 = vperm.xlu1 %7233, %v8940_v51   ;;  %5022 = vperm.xlu2 %7234, %v8959_v24   ;;  %v5027_v41 = vpop.permute.xlu2 %5026 }
 0x6eb   : > { %v5035_v49 = vmul.f32 %v5027_v41, %v5015_v15  ;;  %v5043_v41 = vld [vmem:[#allocation2 + $0x750] sm:$0xff] }
 0x6ed   : > { %v9879_v32 = vadd.f32 %v5035_v49, %v4927_v16 }
 0x6f0   : > { %v4823_v57 = vpop.permute.xlu1 %4822 }
 0x6f1   : > { %v4837_v47 = vmul.f32 %v4823_v57, %v4817_v28  ;;  %v4959_v57 = vld [vmem:[#allocation2 + $0x6f0] sm:$0xff] }
 0x6f2   : > { %7235 = vset.pattern.permute.xlu1 %v10185_v4  ;;  %7236 = vset.pattern.permute.xlu2 %v10185_v4  ;;  %v4876_v4 = vld [vmem:[#allocation2 + $0x698] sm:$0xff] }
 0x6f3   : > { %v4841_v53 = vadd.f32 %v4837_v47, %v9711_v29  ;;  %5046 = vperm.xlu1 %7235, %v8940_v51   ;;  %5050 = vperm.xlu2 %7236, %v8959_v24   ;;  %v9886_v62 = vpop.permute.xlu2 %5054  ;;  %v4896_v16 = vmul.f32 %v9785_v39, %v4876_v4  ;;  %v4929_v39 = vld [vmem:[#allocation2 + $0x6c0] sm:$0xff] }
 0x6f5   : > { %v4900_v50 = vadd.f32 %v4896_v16, %v9776_v30  ;;  %v5155_v16 = vld [vmem:[#allocation2 + $0x7d0] sm:$0xff] }
 0x6f9   : > { %v4851_v56 = vpop.permute.xlu1 %4850 }
 0x6fa   : > { %v4865_v54 = vmul.f32 %v4851_v56, %v4845_v40  ;;  %v5063_v40 = vmul.f32 %v9886_v62, %v5043_v41  ;;  %v4930_v56 = vld [vmem:[#allocation2 + $0x6c8] sm:$0xff] }
 0x6fb   : > { %7238 = vset.pattern.permute.xlu1 %v10186_v11  ;;  %7239 = vset.pattern.permute.xlu2 %v7641_v34 }
 0x6fc   : > { %v4869_v33 = vadd.f32 %v4865_v54, %v9810_v27  ;;  %5078 = vperm.xlu1 %7238, %v8959_v24   ;;  %5102 = vperm.xlu2 %7239, %v8940_v51   ;;  %v9893_v29 = vpop.permute.xlu2 %5086 }
 0x702   : > { %v5003_v7 = vpop.permute.xlu1 %5002 }
 0x703   : > { %v5008_v46 = vmul.f32 %v5003_v7, %v4988_v20 }
 0x704   : > { %7240 = vset.pattern.permute.xlu1 %v7641_v34  ;;  %7241 = vset.pattern.permute.xlu2 %v10187_v8 }
 0x705   : > { %v5012_v11 = vadd.f32 %v5008_v46, %v4900_v50  ;;  %5106 = vperm.xlu1 %7240, %v8959_v24   ;;  %5130 = vperm.xlu2 %7241, %v8940_v51   ;;  %v4883_v27 = vpop.permute.xlu2 %4882  ;;  %v5183_v50 = vld [vmem:[#allocation2 + $0x7f0] sm:$0xff]  ;;  %v5067_v46 = vadd.f32 %v5063_v40, %v9859_v13  ;;  %v4985_v40 = vld [vmem:[#allocation2 + $0x700] sm:$0xff] }
 0x706   : > { %v4894_v37 = vmul.f32 %v4883_v27, %v4874_v38 }
 0x708   : > { %v9901_v19 = vadd.f32 %v4894_v37, %v4786_v21 }
 0x70b   : > { %v5031_v14 = vpop.permute.xlu1 %5030 }
 0x70c   : > { %v5036_v31 = vmul.f32 %v5031_v14, %v5016_v17 }
 0x70d   : > { %7243 = vset.pattern.permute.xlu1 %v10188_v6  ;;  %7244 = vset.pattern.permute.xlu2 %v10188_v6 }
 0x70e   : > { %5158 = vperm.xlu1 %7243, %v8940_v51   ;;  %5162 = vperm.xlu2 %7244, %v8959_v24   ;;  %v4935_v30 = vpop.permute.xlu2 %4934  ;;  %v5040_v49 = vadd.f32 %v5036_v31, %v9826_v26 }
 0x70f   : > { %v4949_v34 = vmul.f32 %v4935_v30, %v4929_v39 }
 0x711   : > { %v9907_v8 = vadd.f32 %v4949_v34, %v4841_v53 }
 0x714   : > { %v5083_v36 = vpop.permute.xlu1 %5082 }
 0x716   : > { %7245 = vset.pattern.permute.xlu1 %v7640_v9  ;;  %7246 = vset.pattern.permute.xlu2 %v7640_v9 }
 0x717   : > { %5186 = vperm.xlu1 %7245, %v8940_v51   ;;  %5190 = vperm.xlu2 %7246, %v8959_v24   ;;  %v4963_v58 = vpop.permute.xlu2 %4962  ;;  %v4902_v24 = vld [vmem:[#allocation2 + $0x6a8] sm:$0xff] }
 0x718   : > { %v4977_v6 = vmul.f32 %v4963_v58, %v4957_v0  ;;  %v5099_v58 = vld [vmem:[#allocation2 + $0x790] sm:$0xff] }
 0x71a   : > { %v9915_v42 = vadd.f32 %v4977_v6, %v4869_v33  ;;  %v4979_v33 = vmul.f32 %v9854_v23, %v4959_v57  ;;  %v5127_v6 = vld [vmem:[#allocation2 + $0x7b0] sm:$0xff] }
 0x71c   : > { %v4983_v26 = vadd.f32 %v4979_v33, %v9792_v63 }
 0x71d   : > { %v4879_v22 = vpop.permute.xlu1 %4878 }
 0x71e   : > { %v4893_v44 = vmul.f32 %v4879_v22, %v4873_v18 }
 0x71f   : > { %5257 = vrot.lane.b32.xlu1 %v10190_v35, %s7642_s8 }
 0x720   : > { %v9920_v9 = vadd.f32 %v4893_v44, %v9844_v45  ;;  %v5115_v51 = vpop.permute.xlu2 %5114  ;;  %v5071_v45 = vld [vmem:[#allocation2 + $0x770] sm:$0xff] }
 0x721   : > { %v5120_v1 = vmul.f32 %v5115_v51, %v5100_v48  ;;  %v5091_v4 = vmul.f32 %v5083_v36, %v5071_v45  ;;  %v4987_v36 = vld [vmem:[#allocation2 + $0x710] sm:$0xff]  ;;  %v5072_v48 = vld [vmem:[#allocation2 + $0x778] sm:$0xff] }
 0x723   : > { %v5124_v47 = vadd.f32 %v5120_v1, %v5012_v11  ;;  %v5095_v62 = vadd.f32 %v5091_v4, %v4983_v26  ;;  %v5184_v1 = vld [vmem:[#allocation2 + $0x7f8] sm:$0xff]  ;;  %v5097_v4 = vld [vmem:[#allocation2 + $0x780] sm:$0xff] }
 0x726   : > { %v4911_v59 = vpop.permute.xlu1 %4910 }
 0x727   : > { %v4922_v61 = vmul.f32 %v4911_v59, %v4902_v24  ;;  %v5044_v59 = vld [vmem:[#allocation2 + $0x758] sm:$0xff] }
 0x729   : > { %v9923_v15 = vadd.f32 %v4922_v61, %v9800_v10  ;;  %v5143_v21 = vpop.permute.xlu2 %5142  ;;  %v5167_v10 = vpop.permute.xlu0 %5166  ;;  %v5156_v61 = vld [vmem:[#allocation2 + $0x7d8] sm:$0xff] }
 0x72a   : > { %v5148_v28 = vmul.f32 %v5143_v21, %v5128_v52  ;;  %v5175_v27 = vmul.f32 %v5167_v10, %v5155_v16  ;;  %v5092_v52 = vmul.f32 %v9893_v29, %v5072_v48  ;;  %v5064_v21 = vmul.f32 %v9836_v5, %v5044_v59  ;;  %v5125_v5 = vld [vmem:[#allocation2 + $0x7a0] sm:$0xff] }
 0x72c   : > { %v5152_v53 = vadd.f32 %v5148_v28, %v5040_v49  ;;  %v5179_v14 = vadd.f32 %v5175_v27, %v5067_v46  ;;  %v5068_v28 = vadd.f32 %v5064_v21, %v9834_v3  ;;  %v6923_v21 = vld [vmem:[#allocation18 + $0x74] sm:$0xf] }
 0x72e   : > { %v5212_v54 = vadd.f32 %v5152_v53, %v5124_v47 }
 0x72f   : > { %v4939_v20 = vpop.permute.xlu1 %4938 }
 0x730   : > { %v4950_v7 = vmul.f32 %v4939_v20, %v4930_v56  ;;  %v5013_v56 = vld [vmem:[#allocation2 + $0x720] sm:$0xff] }
 0x731   : > { %v4999_v0 = vpop.permute.xlu0 %4998 }
 0x732   : > { %v9931_v38 = vadd.f32 %v4950_v7, %v9863_v43  ;;  %v5195_v11 = vpop.permute.xlu2 %5194  ;;  %v5007_v55 = vmul.f32 %v4999_v0, %v4987_v36  ;;  %v5014_v0 = vld [vmem:[#allocation2 + $0x728] sm:$0xff] }
 0x733   : > { %v5203_v37 = vmul.f32 %v5195_v11, %v5183_v50 }
 0x734   : > { %v5011_v63 = vadd.f32 %v5007_v55, %v9816_v12  ;;  %v5096_v12 = vadd.f32 %v5092_v52, %v9868_v60  ;;  %v6635_v52 = vld [vmem:[#allocation18 + $0x70] sm:$0xf] }
 0x735   : > { %v5207_v39 = vadd.f32 %v5203_v37, %v5095_v62 }
 0x737   : > { %v5215_v23 = vadd.f32 %v5207_v39, %v5179_v14  ;;  %v5042_v39 = vld [vmem:[#allocation2 + $0x748] sm:$0xff] }
 0x738   : > { %v5111_v30 = vpop.permute.xlu1 %5110 }
 0x739   : > { %v5119_v13 = vmul.f32 %v5111_v30, %v5099_v58  ;;  %v4995_v26 = vpop.permute.xlu0 %4994  ;;  %v5154_v30 = vld [vmem:[#allocation2 + $0x7c8] sm:$0xff] }
 0x73a   : > { %v5182_v58 = vld [vmem:[#allocation2 + $0x7e8] sm:$0xff] }
 0x73b   : > { %v4991_v34 = vpop.permute.xlu2 %4990  ;;  %v5123_v22 = vadd.f32 %v5119_v13, %v5011_v63 }
 0x73c   : > { %v5005_v20 = vmul.f32 %v4991_v34, %v4985_v40 }
 0x73e   : > { %v5009_v60 = vadd.f32 %v5005_v20, %v9920_v9  ;;  %v6919_v20 = vld [vmem:[#allocation18 + $0x54] sm:$0xf] }
 0x741   : > { %v5139_v18 = vpop.permute.xlu1 %5138  ;;  %v9945_v14 = vpop.permute.xlu0 %5074 }
 0x742   : > { %v5147_v43 = vmul.f32 %v5139_v18, %v5127_v6 }
 0x744   : > { %v5151_v44 = vadd.f32 %v5147_v43, %v9879_v32  ;;  %v5023_v35 = vpop.permute.xlu2 %5022  ;;  %v4986_v43 = vld [vmem:[#allocation2 + $0x708] sm:$0xff] }
 0x745   : > { %v5034_v55 = vmul.f32 %v5023_v35, %v5014_v0  ;;  %v5006_v48 = vmul.f32 %v4995_v26, %v4986_v43  ;;  %v5041_v26 = vld [vmem:[#allocation2 + $0x740] sm:$0xff] }
 0x746   : > { %v5211_v51 = vadd.f32 %v5151_v44, %v5123_v22  ;;  %v6916_v43 = vld [vmem:[#allocation18 + $0x34] sm:$0xf0] }
 0x748   : > { %v5219_v17 = vadd.f32 %v5215_v23, %v5211_v51  ;;  %v5070_v23 = vld [vmem:[#allocation2 + $0x768] sm:$0xff] }
 0x749   : > { %v5126_v51 = vld [vmem:[#allocation2 + $0x7a8] sm:$0xff] }
 0x74a   : > { %v5171_v24 = vpop.permute.xlu1 %5170 }
 0x74b   : > { %v5176_v41 = vmul.f32 %v5171_v24, %v5156_v61  ;;  %v5098_v24 = vld [vmem:[#allocation2 + $0x788] sm:$0xff] }
 0x74d   : > { %v5051_v31 = vpop.permute.xlu2 %5050  ;;  %v5180_v57 = vadd.f32 %v5176_v41, %v5068_v28  ;;  %v6922_v28 = vld [vmem:[#allocation18 + $0x64] sm:$0xf0] }
 0x74e   : > { %v5062_v34 = vmul.f32 %v5051_v31, %v5042_v39  ;;  %v5038_v31 = vadd.f32 %v5034_v55, %v9923_v15 }
 0x750   : > { %v5066_v13 = vadd.f32 %v5062_v34, %v9931_v38  ;;  %v5010_v38 = vadd.f32 %v5006_v48, %v9901_v19  ;;  %v6597_v48 = vld [vmem:[#allocation18 + $0x28] sm:$0xf0] }
 0x753   : > { %v5199_v49 = vpop.permute.xlu1 %5198 }
 0x754   : > { %v5204_v32 = vmul.f32 %v5199_v49, %v5184_v1  ;;  %v6924_v1 = vld [vmem:[#allocation18 + $0x74] sm:$0xf0]  ;;  %v6637_v49 = vld [vmem:[#allocation18 + $0x78] sm:$0xf0] }
 0x756   : > { %v5208_v45 = vadd.f32 %v5204_v32, %v5096_v12  ;;  %v5103_v47 = vpop.permute.xlu2 %5102  ;;  %v6627_v12 = vld [vmem:[#allocation18 + $0x60] sm:$0xf]  ;;  %v6640_v32 = vor.u32 %v6923_v21, %v6637_v49  ;;  %v6581_v49 = vld [vmem:[#allocation18 + $0x8] sm:$0xf0] }
 0x757   : > { %v5117_v7 = vmul.f32 %v5103_v47, %v5097_v4  ;;  %v6628_v15 = vor.u32 %v6922_v28, %v6627_v12 }
 0x758   : > { %v5216_v53 = vadd.f32 %v5208_v45, %v5180_v57  ;;  %v6921_v57 = vld [vmem:[#allocation18 + $0x64] sm:$0xf]  ;;  %v6629_v45 = vld [vmem:[#allocation18 + $0x68] sm:$0xf0]  ;;  %5380 = vmatpush.bf16.msra.mxu3 %v6640_v32  ;;  %v7248_v32 = vld [vmem:[#allocation17] ss:$0 sm:$0xff] }
 0x759   : > { %v5121_v11 = vadd.f32 %v5117_v7, %v5009_v60  ;;  %v6632_v40 = vor.u32 %v6921_v57, %v6629_v45  ;;  %v6918_v7 = vld [vmem:[#allocation18 + $0x44] sm:$0xf0]  ;;  %v6917_v60 = vld [vmem:[#allocation18 + $0x44] sm:$0xf] }
 0x75a   : > { %v5220_v33 = vadd.f32 %v5216_v53, %v5212_v54 }
 0x75c   : > { %v5019_v29 = vpop.permute.xlu1 %5018  ;;  %v5224_v16 = vpack.c.bf16 %v5220_v33, %v5219_v17  ;;  %v5135_v17 = vpop.permute.xlu0 %5134  ;;  %v6920_v33 = vld [vmem:[#allocation18 + $0x54] sm:$0xf0]  ;;  %5381 = vmatpush.bf16.msra.mxu3 %v6632_v40 }
 0x75d   : > { %v5033_v10 = vmul.f32 %v5019_v29, %v5013_v56  ;;  %v5146_v35 = vmul.f32 %v5135_v17, %v5126_v51  ;;  %v6619_v56 = vld [vmem:[#allocation18 + $0x50] sm:$0xf]  ;;  %v6621_v29 = vld [vmem:[#allocation18 + $0x58] sm:$0xf0]  ;;  %v6913_v17 = vld [vmem:[#allocation18 + $0x24] sm:$0xf] }
 0x75e   : > { %5243 = vmatpush.bf16.msra.mxu1 %v5224_v16  ;;  %v6620_v16 = vor.u32 %v6920_v33, %v6619_v56 }
 0x75f   : > { %v5131_v50 = vpop.permute.xlu2 %5130  ;;  %v5037_v3 = vadd.f32 %v5033_v10, %v9852_v25  ;;  %v5150_v47 = vadd.f32 %v5146_v35, %v5038_v31  ;;  %v6624_v10 = vor.u32 %v6919_v20, %v6621_v29  ;;  %v6600_v31 = vor.u32 %v6913_v17, %v6597_v48  ;;  %v6579_v35 = vld [vmem:[#allocation18] sm:$0xf]  ;;  %v5280_v29 = vld [vmem:[%s10003_s12] sm:$0x3] }
 0x760   : > { %v5145_v46 = vmul.f32 %v5131_v50, %v5125_v5  ;;  %v6611_v5 = vld [vmem:[#allocation18 + $0x40] sm:$0xf] }
 0x761   : > { %5382 = vmatpush.bf16.msra.mxu3 %v6624_v10 }
 0x762   : > { %v5149_v27 = vadd.f32 %v5145_v46, %v5037_v3  ;;  %v6613_v3 = vld [vmem:[#allocation18 + $0x48] sm:$0xf0]  ;;  %v6612_v46 = vor.u32 %v6918_v7, %v6611_v5 }
 0x764   : > { %v9941_v62 = vadd.f32 %v5149_v27, %v5121_v11  ;;  %v6616_v11 = vor.u32 %v6917_v60, %v6613_v3  ;;  %v5069_v27 = vld [vmem:[#allocation2 + $0x760] sm:$0xff] }
 0x765   : > { %v9943_v54 = vpop.permute.xlu1 %5046 }
 0x766   : > { %v5061_v39 = vmul.f32 %v9943_v54, %v5041_v26  ;;  %5383 = vmatpush.bf16.msra.mxu3 %v6616_v11  ;;  %v6603_v54 = vld [vmem:[#allocation18 + $0x30] sm:$0xf] }
 0x768   : > { %v5163_v37 = vpop.permute.xlu2 %5162  ;;  %v5065_v0 = vadd.f32 %v5061_v39, %v9907_v8  ;;  %v6595_v8 = vld [vmem:[#allocation18 + $0x20] sm:$0xf] }
 0x769   : > { %v5174_v25 = vmul.f32 %v5163_v37, %v5154_v30  ;;  %v5153_v37 = vld [vmem:[#allocation2 + $0x7c0] sm:$0xff]  ;;  %v5089_v30 = vmul.f32 %v9945_v14, %v5069_v27  ;;  %v6915_v14 = vld [vmem:[#allocation18 + $0x34] sm:$0xf] }
 0x76b   : > { %v5178_v22 = vadd.f32 %v5174_v25, %v5066_v13 }
 0x76e   : > { %v5079_v36 = vpop.permute.xlu1 %5078 }
 0x76f   : > { %v5090_v9 = vmul.f32 %v5079_v36, %v5070_v23  ;;  %v5181_v23 = vld [vmem:[#allocation2 + $0x7e0] sm:$0xff] }
 0x771   : > { %v5191_v6 = vpop.permute.xlu2 %5190  ;;  %v5094_v18 = vadd.f32 %v5090_v9, %v9872_v2  ;;  %v6636_v2 = vor.u32 %v6924_v1, %v6635_v52  ;;  %v5093_v9 = vadd.f32 %v5089_v30, %v9915_v42  ;;  %v6914_v42 = vld [vmem:[#allocation18 + $0x24] sm:$0xf0]  ;;  %v6589_v1 = vld [vmem:[#allocation18 + $0x18] sm:$0xf0] }
 0x772   : > { %v5202_v63 = vmul.f32 %v5191_v6, %v5182_v58 }
 0x773   : > { %5366 = vmatpush.bf16.msra.mxu2 %v6636_v2 }
 0x774   : > { %v5206_v44 = vadd.f32 %v5202_v63, %v5094_v18  ;;  %v6908_v63 = vld [vmem:[#allocation8] sm:$0xff] }
 0x776   : > { %v5214_v59 = vadd.f32 %v5206_v44, %v5178_v22  ;;  %v6604_v22 = vor.u32 %v6916_v43, %v6603_v54  ;;  %v6605_v44 = vld [vmem:[#allocation18 + $0x38] sm:$0xf0] }
 0x777   : > { %v5107_v61 = vpop.permute.xlu1 %5106  ;;  %5367 = vmatpush.bf16.msra.mxu2 %v6628_v15  ;;  %v6608_v51 = vor.u32 %v6915_v14, %v6605_v44  ;;  %v9957_v15 = vpop.permute.xlu0 %5255 }
 0x778   : > { %v5118_v41 = vmul.f32 %v5107_v61, %v5098_v24  ;;  %v6596_v24 = vor.u32 %v6914_v42, %v6595_v8  ;;  %v6911_v61 = vld [vmem:[#allocation18 + $0x14] sm:$0xf] }
 0x779   : > { %5384 = vmatpush.bf16.msra.mxu3 %v6608_v51  ;;  %v6592_v21 = vor.u32 %v6911_v61, %v6589_v1 }
 0x77a   : > { %v5122_v53 = vadd.f32 %v5118_v41, %v5010_v38  ;;  %v6910_v38 = vld [vmem:[#allocation18 + $0x4] sm:$0xf0]  ;;  %v6909_v41 = vld [vmem:[#allocation18 + $0x4] sm:$0xf] }
 0x77b   : > { %5368 = vmatpush.bf16.msra.mxu2 %v6620_v16  ;;  %v6580_v2 = vor.u32 %v6910_v38, %v6579_v35  ;;  %v6584_v12 = vor.u32 %v6909_v41, %v6581_v49 }
 0x77c   : > { %v5210_v4 = vadd.f32 %v5150_v47, %v5122_v53 }
 0x77d   : > { %5385 = vmatpush.bf16.msra.mxu3 %v6600_v31 }
 0x77e   : > { %v5218_v19 = vadd.f32 %v5214_v59, %v5210_v4  ;;  %v6912_v59 = vld [vmem:[#allocation18 + $0x14] sm:$0xf0] }
 0x77f   : > { %5369 = vmatpush.bf16.msra.mxu2 %v6612_v46 }
 0x780   : > { %v5159_v50 = vpop.permute.xlu1 %5158 }
 0x781   : > { %v5173_v34 = vmul.f32 %v5159_v50, %v5153_v37  ;;  %5386 = vmatpush.bf16.msra.mxu3 %v6592_v21  ;;  %v5282_v50 = vperm.slane %v5280_v29, 0 }
 0x783   : > { %v5177_v25 = vadd.f32 %v5173_v34, %v5065_v0  ;;  %5370 = vmatpush.bf16.msra.mxu2 %v6604_v22 }
 0x785   : > { %5387 = vmatpush.bf16.msra.mxu3 %v6584_v12 }
 0x787   : > { %5371 = vmatpush.bf16.msra.mxu2 %v6596_v24 }
 0x789   : > { %v5187_v36 = vpop.permute.xlu1 %5186 }
 0x78a   : > { %v5201_v58 = vmul.f32 %v5187_v36, %v5181_v23 }
 0x78c   : > { %v5205_v6 = vadd.f32 %v5201_v58, %v5093_v9 }
 0x78e   : > { %v5213_v55 = vadd.f32 %v5205_v6, %v5177_v25 }
 0x790   : > { %v5217_v13 = vadd.f32 %v5213_v55, %v9941_v62  ;;  %v6587_v62 = vld [vmem:[#allocation18 + $0x10] sm:$0xf] }
 0x791   : > { %v6588_v52 = vor.u32 %v6912_v59, %v6587_v62  ;;  %v9959_v40 = vpop.permute.xlu1 %5257 }
 0x792   : > { %v5223_v18 = vpack.c.bf16 %v5218_v19, %v5217_v13  ;;  %v5283_v19 = vperm.slane %v5280_v29, 1 }
 0x793   : > { %5372 = vmatpush.bf16.msra.mxu2 %v6588_v52 }
 0x794   : > { %5244 = vmatpush.bf16.msra.mxu1 %v5223_v18 }
 0x797   : > { %6576 = vmatmul.msk.bf16.vlgmr.msra.gmra.mxu1 %vm223_vm0, %v6908_v63  ;;  %5373 = vmatpush.bf16.msra.mxu2 %v6580_v2 }
 0x814   : > { %v5246_v28 = vpop.f32.mrf.mxu1 }
 0x815   : > { %v5247_v57 = vadd.f32 %v7248_v32, %v5246_v28 }
 0x817   : > { %v5251_v47 = vmax.f32 %v5247_v57, 0.0 }
 0x819   : > { %v5261_v33 = vsel %vm586_vm1, %v5251_v47, %v9957_v15 }
 0x81c   : > { %v5248_v45 = vpop.f32.mrf.mxu1 }
 0x81d   : > { %v5249_v53 = vadd.f32 %v7248_v32, %v5248_v45 }
 0x81f   : > { %v5252_v56 = vmax.f32 %v5249_v53, 0.0 }
 0x821   : > { %v5262_v4 = vsel %vm586_vm1, %v5252_v56, %v9959_v40 }
 0x822   : > { %v5263_v20 = vpack.c.bf16 %v5262_v4, %v5261_v33 }
 0x824   : > { %5374 = vmatmul.bf16.vlgmr.msra.gmra.mxu2 %v5263_v20  ;;  %5388 = vmatmul.bf16.vlgmr.msra.gmra.mxu3 %v5263_v20 }
 0x8a7   : > { %v5389_v16 = vpop.f32.mrf.mxu3  ;;  %v5375_v60 = vpop.f32.mrf.mxu2 }
 0x8a8   : > { %v5390_v10 = vadd.f32 %v5389_v16, %v5283_v19  ;;  %v5376_v3 = vadd.f32 %v5375_v60, %v5282_v50 }
 0x8aa   : > { %5434 = vrot.lane.b32.xlu2 %v5390_v10, %s7642_s8  ;;  %v6641_v46 = vmul.f32 -1.442695, %v5376_v3 }
 0x8ac   : > { %7249 = vpow2.f32 %v6641_v46 }
 0x8af   : > { %v5391_v5 = vpop.f32.mrf.mxu3  ;;  %v5377_v37 = vpop.f32.mrf.mxu2 }
 0x8b0   : > { %v5392_v7 = vadd.f32 %v5391_v5, %v5283_v19  ;;  %v5378_v23 = vadd.f32 %v5377_v37, %v5282_v50 }
 0x8b2   : > { %5436 = vrot.lane.b32.xlu0 %v5392_v7, %s7642_s8  ;;  %v7250_v26 = vpop.eup %7249  ;;  %v6642_v34 = vmul.f32 -1.442695, %v5378_v23 }
 0x8b3   : > { %v5400_v11 = vadd.f32 1.0, %v7250_v26 }
 0x8b5   : > { %7251 = vrcp.f32 %v5400_v11  ;;  %v5413_v9 = vand.u32 2147483648, %v5400_v11  ;;  %vm5407_vm4 = vweird.f32 %v5400_v11  ;;  %v5411_v58 = vand.u32 2147483647, %v5400_v11 }
 0x8b6   : > { %7253 = vpow2.f32 %v6642_v34 }
 0x8b7   : > { %v5414_v55 = vor.u32 1.1754944e-38, %v5413_v9  ;;  %vm5412_vm6 = vcmp.eq.f32.partialorder %v5411_v58, 8.507059e+37 }
 0x8bb   : > { %v7252_v27 = vpop.eup %7251 }
 0x8bc   : > { %v5403_v39 = vmul.f32 %v7252_v27, %v5400_v11  ;;  %vm5408_vm3 = vweird.f32 %v7252_v27  ;;  %v7254_v25 = vpop.eup %7253 }
 0x8bd   : > { %vm5409_vm5 = vmor %vm5407_vm4, %vm5408_vm3  ;;  %v5401_v13 = vadd.f32 1.0, %v7254_v25 }
 0x8be   : > { %v5404_v30 = vsub.f32 1.0, %v5403_v39 }
 0x8bf   : > { %7255 = vrcp.f32 %v5401_v13  ;;  %v5428_v17 = vand.u32 2147483648, %v5401_v13  ;;  %vm5422_vm8 = vweird.f32 %v5401_v13  ;;  %v5426_v24 = vand.u32 2147483647, %v5401_v13 }
 0x8c0   : > { %v5405_v36 = vmul.f32 %v7252_v27, %v5404_v30 }
 0x8c1   : > { %v5429_v31 = vor.u32 1.1754944e-38, %v5428_v17  ;;  %vm5427_vm10 = vcmp.eq.f32.partialorder %v5426_v24, 8.507059e+37 }
 0x8c2   : > { %v5406_v0 = vadd.f32 %v7252_v27, %v5405_v36 }
 0x8c4   : > { %v5410_v6 = vsel %vm5409_vm5, %v7252_v27, %v5406_v0 }
 0x8c5   : > { %v5415_v63 = vsel %vm5412_vm6, %v5414_v55, %v5410_v6  ;;  %v7256_v14 = vpop.eup %7255 }
 0x8c6   : > { %v5418_v44 = vmul.f32 %v7256_v14, %v5401_v13  ;;  %vm5423_vm7 = vweird.f32 %v7256_v14  ;;  %v5446_v21 = vsub.f32 1.0, %v5415_v63  ;;  %v5458_v38 = vmul.f32 %v5415_v63, %v9957_v15 }
 0x8c7   : > { %vm5424_vm9 = vmor %vm5422_vm8, %vm5423_vm7 }
 0x8c8   : > { %v5419_v51 = vsub.f32 1.0, %v5418_v44 }
 0x8ca   : > { %v5420_v8 = vmul.f32 %v7256_v14, %v5419_v51 }
 0x8cc   : > { %v5421_v42 = vadd.f32 %v7256_v14, %v5420_v8 }
 0x8ce   : > { %v5425_v48 = vsel %vm5424_vm9, %v7256_v14, %v5421_v42 }
 0x8cf   : > { %v5430_v59 = vsel %vm5427_vm10, %v5429_v31, %v5425_v48 }
 0x8d0   : > { %v5447_v49 = vsub.f32 1.0, %v5430_v59  ;;  %v5459_v28 = vmul.f32 %v5430_v59, %v9959_v40 }
 0x904   : > { %v5435_v18 = vpop.permute.xlu2 %5434 }
 0x905   : > { %v5440_v54 = vmul.f32 %v5435_v18, %v5415_v63 }
 0x907   : > { %v5442_v43 = vadd.f32 %v5440_v54, %v5390_v10 }
 0x909   : > { %7257 = vtanh.f32 %v5442_v43 }
 0x90f   : > { %v7258_v22 = vpop.eup %7257 }
 0x910   : > { %5450 = vrot.lane.b32.xlu1 %v7258_v22, %s7642_s8 }
 0x924   : > { %v5437_v62 = vpop.permute.xlu0 %5436 }
 0x925   : > { %v5441_v61 = vmul.f32 %v5437_v62, %v5430_v59 }
 0x927   : > { %v5443_v52 = vadd.f32 %v5441_v61, %v5392_v7 }
 0x929   : > { %7259 = vtanh.f32 %v5443_v52 }
 0x92f   : > { %v7260_v1 = vpop.eup %7259 }
 0x930   : > { %5452 = vrot.lane.b32.xlu2 %v7260_v1, %s7642_s8 }
 0x982   : > { %v5451_v35 = vpop.permute.xlu1 %5450 }
 0x983   : > { %v5456_v41 = vmul.f32 %v5451_v35, %v5446_v21 }
 0x985   : > { %v5460_v2 = vadd.f32 %v5458_v38, %v5456_v41 }
 0x987   : > { %5464 = vrot.lane.b32.xlu0 %v5460_v2, %s7642_s8 }
 0x98a   : > { %v5453_v12 = vpop.permute.xlu2 %5452 }
 0x98b   : > { %v5457_v32 = vmul.f32 %v5453_v12, %v5447_v49 }
 0x98d   : > { %v5461_v57 = vadd.f32 %v5459_v28, %v5457_v32 }
 0x98f   : > { %5466 = vrot.lane.b32.xlu1 %v5461_v57, %s7642_s8 }
 0x9f9   : > { %v5465_v45 = vpop.permute.xlu0 %5464  }
 0x9fa   : > { %v10192_v55 = vmov %v5465_v45  ;;  %5470 = vst.msk [vmem:[#allocation20] sm:$0xff] (%p3366_p0), %vm586_vm1, %v5465_v45 }
 0x9fe   :  { %3368 = sbr.rel (!%p3366_p0) target bundleno = 782 (0x30e), region = 182 }
 0xa01   : > { %v5467_v47 = vpop.permute.xlu1 %5466  }
 0xa02   : > { %v10191_v18 = vmov %v5467_v47  ;;  %5471 = vst.msk [vmem:[#allocation20 + $0x8] sm:$0xff] (%p3366_p0), %vm586_vm1, %v5467_v47 }
 0xa03   :  { %5484 = dma.vmem_to_hbm [thread:$0]  %s5477_s21, 256, %s5479_s10, [#allocation5], %s7570_s28, %s7570_s28, %s7577_s20  }
 0xa04   :  { %7549 = dma.done.wait [#allocation5], 256  }
 0xa05   :  { %7550 = vsyncadd [#allocation5], 4294967040 }
 0xa06   :  { %5489 = vsyncpa [#allocation4], 1 }
 0xa07   :  { %5490 = vsyncpa [#allocation7], 1 }
 0xa08   :  { %5491 = vsyncpa [#allocation10], 1 }
 0xa09   :  { %5492 = vsyncpa [#allocation13], 1 }
 0xa0a   :  { %5493 = vsyncpa [#allocation16], 1 }
 0xa0b   :  { %5494 = vsyncpa [#allocation19], 1 }
 0xa0c   :  { %5495 = vsyncpa [#allocation5], 1 }

</bundles_post_ra>
